<compile_context>
chip_gen: v5e
topology: v5e:2x2
jax: 0.10.0
libtpu: 0.0.40
codegen_flags: <defaults>
</compile_context>

<pallas_src>
import functools

import jax
import jax.numpy as jnp
from jax.experimental import pallas as pl
from jax.experimental.pallas import tpu as pltpu

EPS = 1e-7        # HGCN Hyperboloid eps for float32
MIN_NORM = 1e-15
MAX_NORM = 1e6


def _arcosh(z):
    # (z-1)*(z+1) instead of z*z-1: no cancellation for z ~ 1 (self / near pairs)
    return jnp.log(z + jnp.sqrt((z - 1.0) * (z + 1.0)))


def _artanh(z):
    z = jnp.clip(z, -1.0 + 1e-7, 1.0 - 1e-7)
    return 0.5 * jnp.log((1.0 + z) / (1.0 - z))


def _cosh_sinh(t):
    """cosh/sinh from a single exp + EXACT reciprocal (approx recip is too noisy
    for sinh of small arguments, which sets expmap0's direction scaling)."""
    e = jnp.exp(t)
    einv = 1.0 / e
    return 0.5 * (e + einv), 0.5 * (e - einv)


def _round_up(x, m):
    return ((x + m - 1) // m) * m


def _pick_src_tile(n128):
    """Src-node tile: prefer multiples of 256 (v6e/v7x MXU), keep row padding
    <= 128, and keep >= 2 src tiles when possible (v7x megacore balance)."""
    cands = [c for c in (512, 256, 128)
             if c <= n128 and _round_up(n128, c) - n128 <= 128]
    two = [c for c in cands if _round_up(n128, c) // c >= 2]
    pool = two if two else cands
    return max(pool) if pool else 128


def _pick_tgt_tile(np_, ts):
    """Tgt-node tile: largest multiple of Ts dividing Np, capped at 1024 so the
    double-buffered kernel-2 footprint stays well inside v5e/v7x scoped VMEM.
    When Np <= 1024 this returns Np -> att_k/poin become VMEM-resident."""
    best = ts
    tk = ts
    cap = min(np_, 1024)
    while tk <= cap:
        if np_ % tk == 0:
            best = tk
        tk += ts
    return best


# ---------------------------------------------------------------------------
# Kernel 1: HypLinear on the hyperboloid, tiled over node rows.
#   mobius_matvec (logmap0 -> matmul -> expmap0) + proj + mobius_add(bias) + proj
# Also emits the packed bf16 Poincare midpoint operand poin = [lam-1 | lam*p].
# ---------------------------------------------------------------------------
def hyp_linear_kernel(x_ref, wt_ref, hb_ref, att_ref, poin_ref, *, c):
    K = 1.0 / c
    sqrtK = K ** 0.5

    x = x_ref[...]                                   # (T, Dinp) hyperboloid points
    wt = wt_ref[...]                                 # (Dinp, Dp) = padded weight.T
    hb = hb_ref[...]                                 # (1, Dp) hyperbolic bias point

    col_in = jax.lax.broadcasted_iota(jnp.int32, x.shape, 1)
    sp_in = (col_in > 0).astype(x.dtype)

    # --- logmap0(x) (tangent at origin, time coord == 0) ---
    y = x * sp_in
    y_norm = jnp.maximum(jnp.sqrt(jnp.sum(y * y, axis=-1, keepdims=True)), MIN_NORM)
    theta = jnp.maximum(x[:, 0:1] / sqrtK, 1.0 + EPS)
    u = sqrtK * _arcosh(theta) * y / y_norm          # (T, Dinp)

    # --- tangent-space matmul (MXU) ---
    mu = jnp.dot(u, wt, preferred_element_type=jnp.float32)   # (T, Dp)

    col = jax.lax.broadcasted_iota(jnp.int32, mu.shape, 1)
    sp = (col > 0).astype(mu.dtype)
    is0 = col == 0

    def proj(h):
        ysq = jnp.sum((h * sp) ** 2, axis=-1, keepdims=True)
        return jnp.where(is0, jnp.sqrt(jnp.maximum(K + ysq, EPS)), h)

    # --- expmap0(mu) + proj ---
    xv = mu * sp
    xv_norm = jnp.maximum(jnp.sqrt(jnp.sum(xv * xv, axis=-1, keepdims=True)), MIN_NORM)
    ch0, sh0 = _cosh_sinh(xv_norm / sqrtK)
    res = proj(jnp.where(is0, sqrtK * ch0, sqrtK * sh0 * xv / xv_norm))

    # --- mobius_add(res, hyp_bias) ---
    colb = jax.lax.broadcasted_iota(jnp.int32, hb.shape, 1)
    spb = (colb > 0).astype(hb.dtype)
    yb = hb * spb
    yb_norm = jnp.maximum(jnp.sqrt(jnp.sum(yb * yb, axis=-1, keepdims=True)), MIN_NORM)
    thb = jnp.maximum(hb[:, 0:1] / sqrtK, 1.0 + EPS)
    ub = sqrtK * _arcosh(thb) * yb / yb_norm          # logmap0(hyp_bias), (1, Dp)

    # ptransp0(res, ub)
    x0 = res[:, 0:1]
    yx = res * sp
    yx_norm = jnp.maximum(jnp.sqrt(jnp.sum(yx * yx, axis=-1, keepdims=True)), MIN_NORM)
    yn = yx / yx_norm
    vvec = jnp.where(is0, -yx_norm, (sqrtK - x0) * yn)
    alpha = jnp.sum(yn * ub, axis=-1, keepdims=True) / sqrtK
    r2 = ub - alpha * vvec                            # (T, Dp)
    # proj_tan(r2, res)
    ux = jnp.sum(yx * (r2 * sp), axis=-1, keepdims=True)
    v = jnp.where(is0, ux / jnp.maximum(x0, EPS), r2)

    # expmap(v, res) + proj
    mdot = jnp.sum(v * v, axis=-1, keepdims=True) - 2.0 * v[:, 0:1] ** 2
    normu = jnp.minimum(jnp.sqrt(jnp.maximum(mdot, EPS)), MAX_NORM)
    th2 = jnp.maximum(normu / sqrtK, MIN_NORM)
    ch2, sh2 = _cosh_sinh(th2)
    out = proj(ch2 * res + sh2 * v / th2)
    att_ref[...] = out

    # --- packed Poincare operand (bf16): col0 = lam-1, spatial cols = lam * p ---
    p = sqrtK * (out * sp) / (out[:, 0:1] + sqrtK)    # hyperboloid -> Poincare ball
    psq = jnp.sum(p * p, axis=-1, keepdims=True)
    lam = 2.0 / jnp.maximum(1.0 - c * psq, MIN_NORM)  # conformal factor
    poin_ref[...] = jnp.where(is0, lam - 1.0, lam * p).astype(poin_ref.dtype)


# ---------------------------------------------------------------------------
# Kernel 2: attention — pairwise hyperboloid sqdist, masked weights,
#           ONE fused MXU pass accumulating [den | num] of the weighted Mobius
#           gyromidpoint across target tiles, then map back + HypAct(relu).
# Grid = (src_tiles, tgt_tiles); all math stays in (tgt, src) layout (no
# transpose); tgt axis is an online (exact) f32 accumulation in VMEM scratch.
# ---------------------------------------------------------------------------
def attention_kernel(atts_ref, attk_ref, m_ref, poin_ref, o_ref,
                     acc_ref, attsm_ref, *, c):
    K = 1.0 / c
    sqrtK = K ** 0.5
    sqrtc = c ** 0.5
    kk = pl.program_id(1)

    @pl.when(kk == 0)
    def _():
        acc_ref[...] = jnp.zeros_like(acc_ref)
        # Minkowski-signed src rows, computed once per src tile (not per step)
        a = atts_ref[...]
        sgn = jnp.where(
            jax.lax.broadcasted_iota(jnp.int32, a.shape, 1) == 0, -1.0, 1.0
        ).astype(a.dtype)
        attsm_ref[...] = a * sgn

    att_k = attk_ref[...]                             # (Tk, Dp) target rows (f32)
    m32 = m_ref[...].astype(jnp.float32)              # (Tk, Ts): m32[t,s] = edges[t,s]

    # pairwise Minkowski dot  <att[t], att[s]>_M -> (Tk, Ts)   (f32 MXU)
    mdot = jax.lax.dot_general(att_k, attsm_ref[...], (((1,), (1,)), ((), ())),
                               preferred_element_type=jnp.float32)
    theta = jnp.maximum(-mdot / K, 1.0 + EPS)
    # w[t,s] = -edges[t,s] * min(K*arcosh^2, 50) where edges > 0.01 (fused chain)
    w = jnp.where(m32 > 0.01,
                  -m32 * jnp.minimum(K * _arcosh(theta) ** 2, 50.0),
                  0.0)

    # single fused matmul (bf16 operands, f32 accumulation), contraction over tgt:
    #   acc[s,0]  += sum_t w[t,s]*(lam[t]-1);  acc[s,1:] += sum_t w[t,s]*lam[t]*p[t]
    acc_ref[...] += jax.lax.dot_general(
        w.astype(jnp.bfloat16), poin_ref[...],
        (((0,), (0,)), ((), ())), preferred_element_type=jnp.float32)

    @pl.when(kk == pl.num_programs(1) - 1)
    def _():
        acc = acc_ref[...]
        col = jax.lax.broadcasted_iota(jnp.int32, acc.shape, 1)
        is0 = col == 0
        sp = (col > 0).astype(acc.dtype)

        den = acc[:, 0:1]
        den = jnp.where(jnp.abs(den) > MIN_NORM, den, MIN_NORM)   # isolated-node guard
        g = (acc * sp) / den
        gn = jnp.maximum(jnp.sqrt(jnp.sum(g * g, axis=-1, keepdims=True)), MIN_NORM)
        mid = jnp.tanh(0.5 * _artanh(sqrtc * gn)) * g / (sqrtc * gn)

        # Poincare ball -> hyperboloid
        msq = jnp.sum(mid * mid, axis=-1, keepdims=True)
        denom = jnp.maximum(K - msq, MIN_NORM)
        h = jnp.where(is0, sqrtK * (K + msq) / denom, 2.0 * K * mid / denom)

        # HypAct(relu): relu(logmap0(h)) -> proj_tan0 -> expmap0 -> proj
        hy = h * sp
        hy_norm = jnp.maximum(jnp.sqrt(jnp.sum(hy * hy, axis=-1, keepdims=True)), MIN_NORM)
        hth = jnp.maximum(h[:, 0:1] / sqrtK, 1.0 + EPS)
        xt = jnp.maximum(sqrtK * _arcosh(hth) * hy / hy_norm, 0.0)   # col 0 already 0
        xv = xt * sp
        xv_norm = jnp.maximum(jnp.sqrt(jnp.sum(xv * xv, axis=-1, keepdims=True)), MIN_NORM)
        ch, sh = _cosh_sinh(xv_norm / sqrtK)
        out = jnp.where(is0, sqrtK * ch, sqrtK * sh * xv / xv_norm)
        ysq = jnp.sum((out * sp) ** 2, axis=-1, keepdims=True)
        o_ref[...] = jnp.where(is0, jnp.sqrt(jnp.maximum(K + ysq, EPS)), out)


# ---------------------------------------------------------------------------
# Plain-JAX glue: padding, parameter setup (hyperbolic bias point), wrapper.
# ---------------------------------------------------------------------------
def _expmap0_proj(u, c):
    """Hyperboloid expmap0 + proj of a tangent vector (time coord ignored)."""
    K = 1.0 / c
    sqrtK = K ** 0.5
    x = u[:, 1:]
    x_norm = jnp.maximum(jnp.linalg.norm(x, axis=-1, keepdims=True), MIN_NORM)
    theta = x_norm / sqrtK
    ressp = sqrtK * jnp.sinh(theta) * x / x_norm
    ysq = jnp.sum(ressp * ressp, axis=-1, keepdims=True)
    res0 = jnp.sqrt(jnp.maximum(K + ysq, EPS))
    return jnp.concatenate([res0, ressp], axis=-1)


def shared_self_attention_v0(hyp_features, edges, weight, bias, curvature=1.0):
    hyp_features = jnp.asarray(hyp_features, jnp.float32)
    edges = jnp.asarray(edges, jnp.float32)
    weight = jnp.asarray(weight, jnp.float32)
    bias = jnp.asarray(bias, jnp.float32)

    N, Din = hyp_features.shape
    Dout = weight.shape[0]

    # lane-dense feature padding (zero spatial columns are inert end-to-end)
    Dinp = _round_up(Din, 128)
    Dp = _round_up(Dout, 128)

    # node tiling: src tile Ts (parallel axis), tgt tile Tk (accumulated axis)
    N128 = _round_up(N, 128)
    Ts = _pick_src_tile(N128)
    Np = _round_up(N128, Ts)
    Tk = _pick_tgt_tile(Np, Ts)
    nt_s = Np // Ts
    nt_k = Np // Tk

    x_p = jnp.zeros((Np, Dinp), jnp.float32).at[:N, :Din].set(hyp_features)
    # adjacency streamed in bf16 (only O(N^2) HBM stream); threshold applied
    # in-kernel on the upcast value
    edges_p = jnp.zeros((Np, Np), jnp.bfloat16).at[:N, :N].set(
        edges.astype(jnp.bfloat16))
    wt_p = jnp.zeros((Dinp, Dp), jnp.float32).at[:Din, :Dout].set(weight.T)
    bias_p = jnp.zeros((1, Dp), jnp.float32).at[0, :Dout].set(bias)
    hyp_bias = _expmap0_proj(bias_p, curvature)                    # (1, Dp)

    # ---- kernel 1: HypLinear, tiled over node rows ----
    att, poin = pl.pallas_call(
        functools.partial(hyp_linear_kernel, c=curvature),
        out_shape=(jax.ShapeDtypeStruct((Np, Dp), jnp.float32),
                   jax.ShapeDtypeStruct((Np, Dp), jnp.bfloat16)),
        grid_spec=pltpu.PrefetchScalarGridSpec(
            num_scalar_prefetch=0,
            grid=(nt_s,),
            in_specs=[pl.BlockSpec((Ts, Dinp), lambda i: (i, 0)),
                      pl.BlockSpec((Dinp, Dp), lambda i: (0, 0)),
                      pl.BlockSpec((1, Dp), lambda i: (0, 0))],
            out_specs=[pl.BlockSpec((Ts, Dp), lambda i: (i, 0)),
                       pl.BlockSpec((Ts, Dp), lambda i: (i, 0))]),
        compiler_params=pltpu.CompilerParams(
            dimension_semantics=("parallel",)),
    )(x_p, wt_p, hyp_bias)

    # ---- kernel 2: attention, tiled (src parallel, tgt accumulated) ----
    # When nt_k == 1 the att_k / poin block indices are constant, so they are
    # DMA'd once and stay VMEM-resident; the bf16 mask is the only re-streamed
    # O(N^2) operand.
    out_p = pl.pallas_call(
        functools.partial(attention_kernel, c=curvature),
        out_shape=jax.ShapeDtypeStruct((Np, Dp), jnp.float32),
        grid_spec=pltpu.PrefetchScalarGridSpec(
            num_scalar_prefetch=0,
            grid=(nt_s, nt_k),
            in_specs=[pl.BlockSpec((Ts, Dp), lambda s, k: (s, 0)),   # att (src rows)
                      pl.BlockSpec((Tk, Dp), lambda s, k: (k, 0)),   # att (tgt rows)
                      pl.BlockSpec((Tk, Ts), lambda s, k: (k, s)),   # edges[t,s], bf16
                      pl.BlockSpec((Tk, Dp), lambda s, k: (k, 0))],  # bf16 [lam-1|lam*p]
            out_specs=pl.BlockSpec((Ts, Dp), lambda s, k: (s, 0)),
            scratch_shapes=[pltpu.VMEM((Ts, Dp), jnp.float32),       # [den|num] acc
                            pltpu.VMEM((Ts, Dp), jnp.float32)]),     # signed src rows
        compiler_params=pltpu.CompilerParams(
            dimension_semantics=("parallel", "arbitrary"),
            vmem_limit_bytes=48 * 1024 * 1024),
    )(att, att, edges_p, poin)

    return out_p[:N, :Dout]


if __name__ == "__main__":
    N, Din, Dout = 8, 16, 16
    curvature = 1.0

    key = jax.random.PRNGKey(0)
    k1, k2, k3, k4, k5 = jax.random.split(key, 5)

    # hyperboloid input points (expmap0 of random tangent vectors)
    tangent = 0.5 * jax.random.normal(k1, (N, Din), jnp.float32)
    tangent = tangent.at[:, 0].set(0.0)
    hyp_features = _expmap0_proj(tangent, curvature)      # (N, Din)

    # dense weighted adjacency; a ring of edges guarantees >=1 incoming edge per node
    rand = jax.random.uniform(k2, (N, N), jnp.float32)
    keep = (jax.random.uniform(k3, (N, N)) > 0.5).astype(jnp.float32)
    edges = rand * keep
    edges = edges.at[(jnp.arange(N) + 1) % N, jnp.arange(N)].set(0.7)

    # HypLinear parameters (xavier_uniform weight, small bias) — deterministic
    limit = (6.0 / (Din + Dout)) ** 0.5
    weight = jax.random.uniform(k4, (Dout, Din), jnp.float32, -limit, limit)
    bias = 0.1 * jax.random.normal(k5, (Dout,), jnp.float32)

    out = shared_self_attention_v0(hyp_features, edges, weight, bias, curvature)
    out = jax.block_until_ready(out)

    assert out.shape == (N, Dout), out.shape
    assert not bool(jnp.any(jnp.isnan(out))), "NaN in output"
    print("KERNEL_OK")
</pallas_src>

<mosaic_0001>
module attributes {stable_mosaic.version = 11 : i64} {
  func.func @hyp_linear_kernel(%arg0: i32, %arg1: memref<128x128xf32, #tpu.memory_space<vmem>>, %arg2: memref<128x128xf32, #tpu.memory_space<vmem>>, %arg3: memref<1x128xf32, #tpu.memory_space<vmem>>, %arg4: memref<128x128xf32, #tpu.memory_space<vmem>>, %arg5: memref<128x128xbf16, #tpu.memory_space<vmem>>) attributes {dimension_semantics = [#tpu.dimension_semantics<parallel>], iteration_bounds = array<i64: 1>, scalar_prefetch = 0 : i64, scratch_operands = 0 : i64, tpu.core_type = #tpu.core_type<tc>, window_params = [{transform_indices = @transform_0, window_bounds = array<i64: 128, 128>}, {pipeline_mode = #tpu.pipeline_mode<synchronous>, transform_indices = @transform_1, window_bounds = array<i64: 128, 128>}, {pipeline_mode = #tpu.pipeline_mode<synchronous>, transform_indices = @transform_2, window_bounds = array<i64: 1, 128>}, {transform_indices = @transform_3, window_bounds = array<i64: 128, 128>}, {transform_indices = @transform_4, window_bounds = array<i64: 128, 128>}]} {
    %c0 = arith.constant 0 : index
    %c0_0 = arith.constant 0 : index
    %0 = vector.load %arg1[%c0, %c0_0] : memref<128x128xf32, #tpu.memory_space<vmem>>, vector<128x128xf32>
    %c0_1 = arith.constant 0 : index
    %c0_2 = arith.constant 0 : index
    %1 = vector.load %arg2[%c0_1, %c0_2] : memref<128x128xf32, #tpu.memory_space<vmem>>, vector<128x128xf32>
    %c0_3 = arith.constant 0 : index
    %c0_4 = arith.constant 0 : index
    %2 = vector.load %arg3[%c0_3, %c0_4] : memref<1x128xf32, #tpu.memory_space<vmem>>, vector<1x128xf32>
    %3 = tpu.iota {dimensions = array<i32: 1>} : vector<128x128xi32>
    %c0_i32 = arith.constant 0 : i32
    %4 = vector.broadcast %c0_i32 : i32 to vector<128x128xi32>
    %5 = arith.cmpi sgt, %3, %4 : vector<128x128xi32>
    %6 = arith.extui %5 : vector<128x128xi1> to vector<128x128xi32>
    %7 = arith.sitofp %6 : vector<128x128xi32> to vector<128x128xf32>
    %8 = arith.mulf %0, %7 : vector<128x128xf32>
    %9 = arith.mulf %8, %8 : vector<128x128xf32>
    %cst = arith.constant dense<0.000000e+00> : vector<128xf32>
    %10 = vector.multi_reduction <add>, %9, %cst [1] : vector<128x128xf32> to vector<128xf32>
    %11 = vector.shape_cast %10 : vector<128xf32> to vector<128x1xf32>
    %12 = math.sqrt %11 : vector<128x1xf32>
    %cst_5 = arith.constant 1.000000e-15 : f32
    %13 = vector.broadcast %cst_5 : f32 to vector<128x1xf32>
    %14 = arith.maximumf %12, %13 : vector<128x1xf32>
    %15 = vector.extract_strided_slice %0 {offsets = [0, 0], sizes = [128, 1], strides = [1, 1]} : vector<128x128xf32> to vector<128x1xf32>
    %cst_6 = arith.constant 1.000000e+00 : f32
    %16 = vector.broadcast %cst_6 : f32 to vector<128x1xf32>
    %17 = arith.divf %15, %16 : vector<128x1xf32>
    %cst_7 = arith.constant 1.00000012 : f32
    %18 = vector.broadcast %cst_7 : f32 to vector<128x1xf32>
    %19 = arith.maximumf %17, %18 : vector<128x1xf32>
    %cst_8 = arith.constant 1.000000e+00 : f32
    %20 = vector.broadcast %cst_8 : f32 to vector<128x1xf32>
    %21 = arith.subf %19, %20 : vector<128x1xf32>
    %cst_9 = arith.constant 1.000000e+00 : f32
    %22 = vector.broadcast %cst_9 : f32 to vector<128x1xf32>
    %23 = arith.addf %19, %22 : vector<128x1xf32>
    %24 = arith.mulf %21, %23 : vector<128x1xf32>
    %25 = math.sqrt %24 : vector<128x1xf32>
    %26 = arith.addf %19, %25 : vector<128x1xf32>
    %27 = math.log %26 : vector<128x1xf32>
    %cst_10 = arith.constant 1.000000e+00 : f32
    %28 = vector.broadcast %cst_10 : f32 to vector<128x1xf32>
    %29 = arith.mulf %28, %27 : vector<128x1xf32>
    %30 = vector.broadcast %29 : vector<128x1xf32> to vector<128x128xf32>
    %31 = arith.mulf %30, %8 : vector<128x128xf32>
    %32 = vector.broadcast %14 : vector<128x1xf32> to vector<128x128xf32>
    %33 = arith.divf %31, %32 : vector<128x128xf32>
    %cst_11 = arith.constant dense<0.000000e+00> : vector<128x128xf32>
    %34 = tpu.matmul %33, %1, %cst_11 {dimension_numbers = #tpu.dot_dimension_numbers<[1], [0], [0], [1], [0, 0, 1, 1], [], []>} : vector<128x128xf32>, vector<128x128xf32>, vector<128x128xf32> -> vector<128x128xf32>
    %35 = tpu.iota {dimensions = array<i32: 1>} : vector<128x128xi32>
    %c0_i32_12 = arith.constant 0 : i32
    %36 = vector.broadcast %c0_i32_12 : i32 to vector<128x128xi32>
    %37 = arith.cmpi sgt, %35, %36 : vector<128x128xi32>
    %38 = arith.extui %37 : vector<128x128xi1> to vector<128x128xi32>
    %39 = arith.sitofp %38 : vector<128x128xi32> to vector<128x128xf32>
    %c0_i32_13 = arith.constant 0 : i32
    %40 = vector.broadcast %c0_i32_13 : i32 to vector<128x128xi32>
    %41 = arith.cmpi eq, %35, %40 : vector<128x128xi32>
    %42 = arith.mulf %34, %39 : vector<128x128xf32>
    %43 = arith.mulf %42, %42 : vector<128x128xf32>
    %cst_14 = arith.constant dense<0.000000e+00> : vector<128xf32>
    %44 = vector.multi_reduction <add>, %43, %cst_14 [1] : vector<128x128xf32> to vector<128xf32>
    %45 = vector.shape_cast %44 : vector<128xf32> to vector<128x1xf32>
    %46 = math.sqrt %45 : vector<128x1xf32>
    %cst_15 = arith.constant 1.000000e-15 : f32
    %47 = vector.broadcast %cst_15 : f32 to vector<128x1xf32>
    %48 = arith.maximumf %46, %47 : vector<128x1xf32>
    %cst_16 = arith.constant 1.000000e+00 : f32
    %49 = vector.broadcast %cst_16 : f32 to vector<128x1xf32>
    %50 = arith.divf %48, %49 : vector<128x1xf32>
    %51 = math.exp %50 : vector<128x1xf32>
    %cst_17 = arith.constant 1.000000e+00 : f32
    %52 = vector.broadcast %cst_17 : f32 to vector<128x1xf32>
    %53 = arith.divf %52, %51 : vector<128x1xf32>
    %54 = arith.addf %51, %53 : vector<128x1xf32>
    %cst_18 = arith.constant 5.000000e-01 : f32
    %55 = vector.broadcast %cst_18 : f32 to vector<128x1xf32>
    %56 = arith.mulf %55, %54 : vector<128x1xf32>
    %57 = arith.subf %51, %53 : vector<128x1xf32>
    %cst_19 = arith.constant 5.000000e-01 : f32
    %58 = vector.broadcast %cst_19 : f32 to vector<128x1xf32>
    %59 = arith.mulf %58, %57 : vector<128x1xf32>
    %cst_20 = arith.constant 1.000000e+00 : f32
    %60 = vector.broadcast %cst_20 : f32 to vector<128x1xf32>
    %61 = arith.mulf %60, %56 : vector<128x1xf32>
    %cst_21 = arith.constant 1.000000e+00 : f32
    %62 = vector.broadcast %cst_21 : f32 to vector<128x1xf32>
    %63 = arith.mulf %62, %59 : vector<128x1xf32>
    %64 = vector.broadcast %63 : vector<128x1xf32> to vector<128x128xf32>
    %65 = arith.mulf %64, %42 : vector<128x128xf32>
    %66 = vector.broadcast %48 : vector<128x1xf32> to vector<128x128xf32>
    %67 = arith.divf %65, %66 : vector<128x128xf32>
    %68 = vector.shape_cast %61 : vector<128x1xf32> to vector<128x1xf32>
    %69 = vector.broadcast %68 : vector<128x1xf32> to vector<128x128xf32>
    %70 = arith.select %41, %69, %67 : vector<128x128xi1>, vector<128x128xf32>
    %71 = arith.mulf %70, %39 : vector<128x128xf32>
    %72 = arith.mulf %71, %71 : vector<128x128xf32>
    %cst_22 = arith.constant dense<0.000000e+00> : vector<128xf32>
    %73 = vector.multi_reduction <add>, %72, %cst_22 [1] : vector<128x128xf32> to vector<128xf32>
    %74 = vector.shape_cast %73 : vector<128xf32> to vector<128x1xf32>
    %cst_23 = arith.constant 1.000000e+00 : f32
    %75 = vector.broadcast %cst_23 : f32 to vector<128x1xf32>
    %76 = arith.addf %75, %74 : vector<128x1xf32>
    %cst_24 = arith.constant 1.000000e-07 : f32
    %77 = vector.broadcast %cst_24 : f32 to vector<128x1xf32>
    %78 = arith.maximumf %76, %77 : vector<128x1xf32>
    %79 = math.sqrt %78 : vector<128x1xf32>
    %80 = vector.shape_cast %79 : vector<128x1xf32> to vector<128x1xf32>
    %81 = vector.broadcast %80 : vector<128x1xf32> to vector<128x128xf32>
    %82 = arith.select %41, %81, %70 : vector<128x128xi1>, vector<128x128xf32>
    %83 = tpu.iota {dimensions = array<i32: 1>} : vector<1x128xi32>
    %c0_i32_25 = arith.constant 0 : i32
    %84 = vector.broadcast %c0_i32_25 : i32 to vector<1x128xi32>
    %85 = arith.cmpi sgt, %83, %84 : vector<1x128xi32>
    %86 = arith.extui %85 : vector<1x128xi1> to vector<1x128xi32>
    %87 = arith.sitofp %86 : vector<1x128xi32> to vector<1x128xf32>
    %88 = arith.mulf %2, %87 : vector<1x128xf32>
    %89 = arith.mulf %88, %88 : vector<1x128xf32>
    %cst_26 = arith.constant dense<0.000000e+00> : vector<1xf32>
    %90 = vector.multi_reduction <add>, %89, %cst_26 [1] : vector<1x128xf32> to vector<1xf32>
    %91 = vector.shape_cast %90 : vector<1xf32> to vector<1x1xf32>
    %92 = math.sqrt %91 : vector<1x1xf32>
    %cst_27 = arith.constant 1.000000e-15 : f32
    %93 = vector.broadcast %cst_27 : f32 to vector<1x1xf32>
    %94 = arith.maximumf %92, %93 : vector<1x1xf32>
    %95 = vector.extract_strided_slice %2 {offsets = [0, 0], sizes = [1, 1], strides = [1, 1]} : vector<1x128xf32> to vector<1x1xf32>
    %cst_28 = arith.constant 1.000000e+00 : f32
    %96 = vector.broadcast %cst_28 : f32 to vector<1x1xf32>
    %97 = arith.divf %95, %96 : vector<1x1xf32>
    %cst_29 = arith.constant 1.00000012 : f32
    %98 = vector.broadcast %cst_29 : f32 to vector<1x1xf32>
    %99 = arith.maximumf %97, %98 : vector<1x1xf32>
    %cst_30 = arith.constant 1.000000e+00 : f32
    %100 = vector.broadcast %cst_30 : f32 to vector<1x1xf32>
    %101 = arith.subf %99, %100 : vector<1x1xf32>
    %cst_31 = arith.constant 1.000000e+00 : f32
    %102 = vector.broadcast %cst_31 : f32 to vector<1x1xf32>
    %103 = arith.addf %99, %102 : vector<1x1xf32>
    %104 = arith.mulf %101, %103 : vector<1x1xf32>
    %105 = math.sqrt %104 : vector<1x1xf32>
    %106 = arith.addf %99, %105 : vector<1x1xf32>
    %107 = math.log %106 : vector<1x1xf32>
    %cst_32 = arith.constant 1.000000e+00 : f32
    %108 = vector.broadcast %cst_32 : f32 to vector<1x1xf32>
    %109 = arith.mulf %108, %107 : vector<1x1xf32>
    %110 = vector.broadcast %109 : vector<1x1xf32> to vector<1x128xf32>
    %111 = arith.mulf %110, %88 : vector<1x128xf32>
    %112 = vector.broadcast %94 : vector<1x1xf32> to vector<1x128xf32>
    %113 = arith.divf %111, %112 : vector<1x128xf32>
    %114 = vector.extract_strided_slice %82 {offsets = [0, 0], sizes = [128, 1], strides = [1, 1]} : vector<128x128xf32> to vector<128x1xf32>
    %115 = arith.mulf %82, %39 : vector<128x128xf32>
    %116 = arith.mulf %115, %115 : vector<128x128xf32>
    %cst_33 = arith.constant dense<0.000000e+00> : vector<128xf32>
    %117 = vector.multi_reduction <add>, %116, %cst_33 [1] : vector<128x128xf32> to vector<128xf32>
    %118 = vector.shape_cast %117 : vector<128xf32> to vector<128x1xf32>
    %119 = math.sqrt %118 : vector<128x1xf32>
    %cst_34 = arith.constant 1.000000e-15 : f32
    %120 = vector.broadcast %cst_34 : f32 to vector<128x1xf32>
    %121 = arith.maximumf %119, %120 : vector<128x1xf32>
    %122 = vector.broadcast %121 : vector<128x1xf32> to vector<128x128xf32>
    %123 = arith.divf %115, %122 : vector<128x128xf32>
    %cst_35 = arith.constant 0.000000e+00 : f32
    %124 = vector.broadcast %cst_35 : f32 to vector<128x1xf32>
    %125 = arith.subf %124, %121 : vector<128x1xf32>
    %cst_36 = arith.constant 1.000000e+00 : f32
    %126 = vector.broadcast %cst_36 : f32 to vector<128x1xf32>
    %127 = arith.subf %126, %114 : vector<128x1xf32>
    %128 = vector.broadcast %127 : vector<128x1xf32> to vector<128x128xf32>
    %129 = arith.mulf %128, %123 : vector<128x128xf32>
    %130 = vector.shape_cast %125 : vector<128x1xf32> to vector<128x1xf32>
    %131 = vector.broadcast %130 : vector<128x1xf32> to vector<128x128xf32>
    %132 = arith.select %41, %131, %129 : vector<128x128xi1>, vector<128x128xf32>
    %133 = vector.broadcast %113 : vector<1x128xf32> to vector<128x128xf32>
    %134 = arith.mulf %123, %133 : vector<128x128xf32>
    %cst_37 = arith.constant dense<0.000000e+00> : vector<128xf32>
    %135 = vector.multi_reduction <add>, %134, %cst_37 [1] : vector<128x128xf32> to vector<128xf32>
    %136 = vector.shape_cast %135 : vector<128xf32> to vector<128x1xf32>
    %cst_38 = arith.constant 1.000000e+00 : f32
    %137 = vector.broadcast %cst_38 : f32 to vector<128x1xf32>
    %138 = arith.divf %136, %137 : vector<128x1xf32>
    %139 = vector.broadcast %138 : vector<128x1xf32> to vector<128x128xf32>
    %140 = arith.mulf %139, %132 : vector<128x128xf32>
    %141 = vector.broadcast %113 : vector<1x128xf32> to vector<128x128xf32>
    %142 = arith.subf %141, %140 : vector<128x128xf32>
    %143 = arith.mulf %142, %39 : vector<128x128xf32>
    %144 = arith.mulf %115, %143 : vector<128x128xf32>
    %cst_39 = arith.constant dense<0.000000e+00> : vector<128xf32>
    %145 = vector.multi_reduction <add>, %144, %cst_39 [1] : vector<128x128xf32> to vector<128xf32>
    %146 = vector.shape_cast %145 : vector<128xf32> to vector<128x1xf32>
    %cst_40 = arith.constant 1.000000e-07 : f32
    %147 = vector.broadcast %cst_40 : f32 to vector<128x1xf32>
    %148 = arith.maximumf %114, %147 : vector<128x1xf32>
    %149 = arith.divf %146, %148 : vector<128x1xf32>
    %150 = vector.shape_cast %149 : vector<128x1xf32> to vector<128x1xf32>
    %151 = vector.broadcast %150 : vector<128x1xf32> to vector<128x128xf32>
    %152 = arith.select %41, %151, %142 : vector<128x128xi1>, vector<128x128xf32>
    %153 = arith.mulf %152, %152 : vector<128x128xf32>
    %cst_41 = arith.constant dense<0.000000e+00> : vector<128xf32>
    %154 = vector.multi_reduction <add>, %153, %cst_41 [1] : vector<128x128xf32> to vector<128xf32>
    %155 = vector.shape_cast %154 : vector<128xf32> to vector<128x1xf32>
    %156 = vector.extract_strided_slice %152 {offsets = [0, 0], sizes = [128, 1], strides = [1, 1]} : vector<128x128xf32> to vector<128x1xf32>
    %157 = arith.mulf %156, %156 : vector<128x1xf32>
    %cst_42 = arith.constant 2.000000e+00 : f32
    %158 = vector.broadcast %cst_42 : f32 to vector<128x1xf32>
    %159 = arith.mulf %158, %157 : vector<128x1xf32>
    %160 = arith.subf %155, %159 : vector<128x1xf32>
    %cst_43 = arith.constant 1.000000e-07 : f32
    %161 = vector.broadcast %cst_43 : f32 to vector<128x1xf32>
    %162 = arith.maximumf %160, %161 : vector<128x1xf32>
    %163 = math.sqrt %162 : vector<128x1xf32>
    %cst_44 = arith.constant 1.000000e+06 : f32
    %164 = vector.broadcast %cst_44 : f32 to vector<128x1xf32>
    %165 = arith.minimumf %163, %164 : vector<128x1xf32>
    %cst_45 = arith.constant 1.000000e+00 : f32
    %166 = vector.broadcast %cst_45 : f32 to vector<128x1xf32>
    %167 = arith.divf %165, %166 : vector<128x1xf32>
    %cst_46 = arith.constant 1.000000e-15 : f32
    %168 = vector.broadcast %cst_46 : f32 to vector<128x1xf32>
    %169 = arith.maximumf %167, %168 : vector<128x1xf32>
    %170 = math.exp %169 : vector<128x1xf32>
    %cst_47 = arith.constant 1.000000e+00 : f32
    %171 = vector.broadcast %cst_47 : f32 to vector<128x1xf32>
    %172 = arith.divf %171, %170 : vector<128x1xf32>
    %173 = arith.addf %170, %172 : vector<128x1xf32>
    %cst_48 = arith.constant 5.000000e-01 : f32
    %174 = vector.broadcast %cst_48 : f32 to vector<128x1xf32>
    %175 = arith.mulf %174, %173 : vector<128x1xf32>
    %176 = arith.subf %170, %172 : vector<128x1xf32>
    %cst_49 = arith.constant 5.000000e-01 : f32
    %177 = vector.broadcast %cst_49 : f32 to vector<128x1xf32>
    %178 = arith.mulf %177, %176 : vector<128x1xf32>
    %179 = vector.broadcast %175 : vector<128x1xf32> to vector<128x128xf32>
    %180 = arith.mulf %179, %82 : vector<128x128xf32>
    %181 = vector.broadcast %178 : vector<128x1xf32> to vector<128x128xf32>
    %182 = arith.mulf %181, %152 : vector<128x128xf32>
    %183 = vector.broadcast %169 : vector<128x1xf32> to vector<128x128xf32>
    %184 = arith.divf %182, %183 : vector<128x128xf32>
    %185 = arith.addf %180, %184 : vector<128x128xf32>
    %186 = arith.mulf %185, %39 : vector<128x128xf32>
    %187 = arith.mulf %186, %186 : vector<128x128xf32>
    %cst_50 = arith.constant dense<0.000000e+00> : vector<128xf32>
    %188 = vector.multi_reduction <add>, %187, %cst_50 [1] : vector<128x128xf32> to vector<128xf32>
    %189 = vector.shape_cast %188 : vector<128xf32> to vector<128x1xf32>
    %cst_51 = arith.constant 1.000000e+00 : f32
    %190 = vector.broadcast %cst_51 : f32 to vector<128x1xf32>
    %191 = arith.addf %190, %189 : vector<128x1xf32>
    %cst_52 = arith.constant 1.000000e-07 : f32
    %192 = vector.broadcast %cst_52 : f32 to vector<128x1xf32>
    %193 = arith.maximumf %191, %192 : vector<128x1xf32>
    %194 = math.sqrt %193 : vector<128x1xf32>
    %195 = vector.shape_cast %194 : vector<128x1xf32> to vector<128x1xf32>
    %196 = vector.broadcast %195 : vector<128x1xf32> to vector<128x128xf32>
    %197 = arith.select %41, %196, %185 : vector<128x128xi1>, vector<128x128xf32>
    %c0_53 = arith.constant 0 : index
    %c0_54 = arith.constant 0 : index
    %198 = vector.load %arg4[%c0_53, %c0_54] : memref<128x128xf32, #tpu.memory_space<vmem>>, vector<128x128xf32>
    tpu.vector_store %arg4[%c0_53, %c0_54], %197 {strides = array<i32>} : memref<128x128xf32, #tpu.memory_space<vmem>>, vector<128x128xf32>,
    %199 = arith.mulf %197, %39 : vector<128x128xf32>
    %cst_55 = arith.constant 1.000000e+00 : f32
    %200 = vector.broadcast %cst_55 : f32 to vector<128x128xf32>
    %201 = arith.mulf %200, %199 : vector<128x128xf32>
    %202 = vector.extract_strided_slice %197 {offsets = [0, 0], sizes = [128, 1], strides = [1, 1]} : vector<128x128xf32> to vector<128x1xf32>
    %cst_56 = arith.constant 1.000000e+00 : f32
    %203 = vector.broadcast %cst_56 : f32 to vector<128x1xf32>
    %204 = arith.addf %202, %203 : vector<128x1xf32>
    %205 = vector.broadcast %204 : vector<128x1xf32> to vector<128x128xf32>
    %206 = arith.divf %201, %205 : vector<128x128xf32>
    %207 = arith.mulf %206, %206 : vector<128x128xf32>
    %cst_57 = arith.constant dense<0.000000e+00> : vector<128xf32>
    %208 = vector.multi_reduction <add>, %207, %cst_57 [1] : vector<128x128xf32> to vector<128xf32>
    %209 = vector.shape_cast %208 : vector<128xf32> to vector<128x1xf32>
    %cst_58 = arith.constant 1.000000e+00 : f32
    %210 = vector.broadcast %cst_58 : f32 to vector<128x1xf32>
    %211 = arith.mulf %210, %209 : vector<128x1xf32>
    %cst_59 = arith.constant 1.000000e+00 : f32
    %212 = vector.broadcast %cst_59 : f32 to vector<128x1xf32>
    %213 = arith.subf %212, %211 : vector<128x1xf32>
    %cst_60 = arith.constant 1.000000e-15 : f32
    %214 = vector.broadcast %cst_60 : f32 to vector<128x1xf32>
    %215 = arith.maximumf %213, %214 : vector<128x1xf32>
    %cst_61 = arith.constant 2.000000e+00 : f32
    %216 = vector.broadcast %cst_61 : f32 to vector<128x1xf32>
    %217 = arith.divf %216, %215 : vector<128x1xf32>
    %cst_62 = arith.constant 1.000000e+00 : f32
    %218 = vector.broadcast %cst_62 : f32 to vector<128x1xf32>
    %219 = arith.subf %217, %218 : vector<128x1xf32>
    %220 = vector.broadcast %217 : vector<128x1xf32> to vector<128x128xf32>
    %221 = arith.mulf %220, %206 : vector<128x128xf32>
    %222 = vector.shape_cast %219 : vector<128x1xf32> to vector<128x1xf32>
    %223 = vector.broadcast %222 : vector<128x1xf32> to vector<128x128xf32>
    %224 = arith.select %41, %223, %221 : vector<128x128xi1>, vector<128x128xf32>
    %225 = arith.truncf %224 : vector<128x128xf32> to vector<128x128xbf16>
    %c0_63 = arith.constant 0 : index
    %c0_64 = arith.constant 0 : index
    %226 = vector.load %arg5[%c0_63, %c0_64] : memref<128x128xbf16, #tpu.memory_space<vmem>>, vector<128x128xbf16>
    tpu.vector_store %arg5[%c0_63, %c0_64], %225 {strides = array<i32>} : memref<128x128xbf16, #tpu.memory_space<vmem>>, vector<128x128xbf16>,
    return
  }
  func.func @transform_0(%arg0: i32) -> (i32, i32) {
    %c0_i32 = arith.constant 0 : i32
    %c0_i32_0 = arith.constant 0 : i32
    return %arg0, %c0_i32 : i32, i32
  }
  func.func @transform_1(%arg0: i32) -> (i32, i32) {
    %c0_i32 = arith.constant 0 : i32
    %c0_i32_0 = arith.constant 0 : i32
    %c0_i32_1 = arith.constant 0 : i32
    return %c0_i32, %c0_i32_0 : i32, i32
  }
  func.func @transform_2(%arg0: i32) -> (i32, i32) {
    %c0_i32 = arith.constant 0 : i32
    %c0_i32_0 = arith.constant 0 : i32
    %c0_i32_1 = arith.constant 0 : i32
    return %c0_i32, %c0_i32_0 : i32, i32
  }
  func.func @transform_3(%arg0: i32) -> (i32, i32) {
    %c0_i32 = arith.constant 0 : i32
    %c0_i32_0 = arith.constant 0 : i32
    return %arg0, %c0_i32 : i32, i32
  }
  func.func @transform_4(%arg0: i32) -> (i32, i32) {
    %c0_i32 = arith.constant 0 : i32
    %c0_i32_0 = arith.constant 0 : i32
    return %arg0, %c0_i32 : i32, i32
  }
}

</mosaic_0001>

<bundles_post_ra>
// kernel: tpu_custom_call.1
= control target key start
LH: loop header
LB: loop body
LE: loop exit
PB: predicated region body
PF: predicated region fallthrough
CT: control target
= control target key end

     0   :  { %10 = vsyncpa [#allocation3], 0  ;;  %s11398_s0 = inlined_call_operand.hbm [shape: f32[128,128], index: 0, kind: input, shape index: {}]   ;;  %s11399_s1 = inlined_call_operand.hbm [shape: f32[128,128], index: 1, kind: input, shape index: {}]   ;;  %s11400_s2 = inlined_call_operand.vmem [shape: f32[1,128], index: 2, kind: input, shape index: {}]   ;;  %s11401_s3 = inlined_call_operand.hbm [shape: f32[128,128], index: 3, kind: output, shape index: {0}]   ;;  %s11402_s4 = inlined_call_operand.hbm [shape: bf16[128,128], index: 4, kind: output, shape index: {1}]  }
   0x1   :  { %11 = vsyncpa [#allocation6], 0 }
   0x2   :  { %12 = vsyncpa [#allocation4], 0 }
   0x3   :  { %13 = vsyncpa [#allocation9], 0  ;;  %s18_s17 = sshll.u32 %s11398_s0, 4  ;;  %s6621_s18 = smov [#allocation2]   ;;  %s19_s17 = int_to_ptr.hbm [resolvable:$true] %s18_s17 }
   0x4   :  { %s20_s19 = sshll.u32 %s6621_s18, 4  ;;  %s31_s22 = sshll.u32 %s11399_s1, 4  ;;  %s21_s19 = int_to_ptr.vmem [resolvable:$true] %s20_s19  ;;  %s32_s22 = int_to_ptr.hbm [resolvable:$true] %s31_s22 }
   0x5   :  { %s6622_s23 = smov 128   ;;  %s6623_s24 = smov 8  }
   0x6   :  { %26 = dma.hbm_to_vmem [thread:$0]  %s19_s17, 2048, %s21_s19, [#allocation3], %s6622_s23, %s6622_s23, %s6623_s24  }
   0x7   :  { %s6624_s25 = smov [#allocation5]  }
   0x8   :  { %s33_s26 = sshll.u32 %s6624_s25, 4  ;;  %s34_s26 = int_to_ptr.vmem [resolvable:$true] %s33_s26 }
   0x9   :  { %39 = dma.hbm_to_vmem [thread:$0]  %s32_s22, 2048, %s34_s26, [#allocation6], %s6622_s23, %s6622_s23, %s6623_s24  }
   0xa   :  { %6613 = dma.done.wait [#allocation3], 2048  }
   0xb   :  { %6614 = vsyncadd [#allocation3], 4294965248 }
   0xc   :  { %6615 = dma.done.wait [#allocation6], 2048  }
   0xd   :  { %6616 = vsyncadd [#allocation6], 4294965248  ;;  %v83_v0 = vlaneseq  ;;  %v6625_v2 = vmov 0.0   ;;  %v54_v4 = vld [vmem:[#allocation2 + $0x20] sm:$0xff]  ;;  %v52_v5 = vld [vmem:[#allocation2 + $0x10] sm:$0xff]  ;;  %s5727_s28 = sshll.u32 %s11401_s3, 4  ;;  %s5728_s28 = int_to_ptr.hbm [resolvable:$true] %s5727_s28 }
   0xe   :  { %v50_v6 = vld [vmem:[#allocation2] sm:$0xff]  ;;  %v55_v10 = vld [vmem:[#allocation2 + $0x28] sm:$0xff]  ;;  %v53_v13 = vld [vmem:[#allocation2 + $0x18] sm:$0xff]  ;;  %v6686_v14 = vmax.f32 %v54_v4, 1.0000001  ;;  %s6627_s29 = smov [#allocation7]  }
   0xf   :  { %v6668_v1 = vand.u32 127, %v83_v0  ;;  %v51_v16 = vld [vmem:[#allocation2 + $0x8] sm:$0xff]  ;;  %v6690_v17 = vmax.f32 %v52_v5, 1.0000001  ;;  %v6695_v19 = vmax.f32 %v50_v6, 1.0000001 }
  0x10   :  { %v5764_v22 = vadd.f32 -1.0, %v6686_v14  ;;  %v6704_v23 = vmax.f32 %v55_v10, 1.0000001  ;;  %v396_v24 = vadd.f32 1.0, %v6686_v14  ;;  %v58_v32 = vld [vmem:[#allocation2 + $0x40] sm:$0xff]  ;;  %v57_v33 = vld [vmem:[#allocation2 + $0x38] sm:$0xff] }
  0x11   :  { %11476 = vst [vmem:[#allocation14_spill] sm:$0xff] %v6668_v1  ;;  %vm85_vm0 = vcmp.gt.s32.totalorder %v6668_v1, 0  ;;  %v5762_v25 = vadd.f32 -1.0, %v6690_v17  ;;  %v394_v28 = vadd.f32 1.0, %v6690_v17  ;;  %v5760_v29 = vadd.f32 -1.0, %v6695_v19  ;;  %v56_v36 = vld [vmem:[#allocation2 + $0x30] sm:$0xff] }
  0x12   :  { %v6671_v3 = vsel %vm85_vm0, 1.0, %v6625_v2  ;;  %v392_v30 = vadd.f32 1.0, %v6695_v19  ;;  %v6717_v34 = vmax.f32 %v53_v13, 1.0000001  ;;  %v6719_v35 = vmax.f32 %v51_v16, 1.0000001 }
  0x13   :  { %11477 = vst [vmem:[#allocation15_spill] sm:$0xff] %v6671_v3  ;;  %v6674_v7 = vmul.f32 %v6671_v3, %v54_v4  ;;  %v6677_v8 = vmul.f32 %v6671_v3, %v52_v5  ;;  %v6680_v9 = vmul.f32 %v6671_v3, %v50_v6  ;;  %v6693_v18 = vmul.f32 %v6671_v3, %v55_v10  ;;  %v61_v47 = vld [vmem:[#allocation2 + $0x58] sm:$0xff]  ;;  %v60_v56 = vld [vmem:[#allocation2 + $0x50] sm:$0xff]  ;;  %v59_v57 = vld [vmem:[#allocation2 + $0x48] sm:$0xff]  ;;  %s5725_s30 = sshll.u32 %s6627_s29, 4  ;;  %s6628_s3 = smov [#allocation8]   ;;  %s5726_s30 = int_to_ptr.vmem [resolvable:$true] %s5725_s30 }
  0x14   :  { %v6698_v20 = vmul.f32 %v6671_v3, %v53_v13  ;;  %v6701_v21 = vmul.f32 %v6671_v3, %v51_v16  ;;  %v5765_v37 = vadd.f32 -1.0, %v6704_v23  ;;  %v397_v38 = vadd.f32 1.0, %v6704_v23  ;;  %v64_v16 = vld [vmem:[#allocation2 + $0x70] sm:$0xff]  ;;  %s5738_s5 = sshll.u32 %s6628_s3, 4  ;;  %s5740_s8 = sshll.u32 %s11402_s4, 4  ;;  %s5739_s5 = int_to_ptr.vmem [resolvable:$true] %s5738_s5  ;;  %s5741_s8 = int_to_ptr.hbm [resolvable:$true] %s5740_s8 }
  0x15   :  { %11478 = vst [vmem:[#allocation16_spill] sm:$0xff] %v6674_v7  ;;  %v108_v11 = vmul.f32 %v6674_v7, %v6674_v7  ;;  %v106_v12 = vmul.f32 %v6677_v8, %v6677_v8  ;;  %v104_v15 = vmul.f32 %v6680_v9, %v6680_v9  ;;  %v109_v26 = vmul.f32 %v6693_v18, %v6693_v18  ;;  %s6629_s9 = smov 64   ;;  %s6630_s10 = smov 4  }
  0x16   :  { %11479 = vst [vmem:[#allocation17_spill] sm:$0xff] %v6677_v8  ;;  %v107_v27 = vmul.f32 %v6698_v20, %v6698_v20  ;;  %v105_v31 = vmul.f32 %v6701_v21, %v6701_v21  ;;  %v6723_v39 = vmax.f32 %v58_v32, 1.0000001  ;;  %v6725_v40 = vmul.f32 %v5764_v22, %v396_v24 }
  0x17   :  { %11480 = vst [vmem:[#allocation18_spill] sm:$0xff] %v6680_v9  ;;  %128 = vadd.xlane.f32.xlu2 %v108_v11  ;;  %124 = vadd.xlane.f32.xlu1 %v106_v12  ;;  %v6728_v41 = vmul.f32 %v6671_v3, %v58_v32  ;;  %v6731_v42 = vmul.f32 %v6671_v3, %v57_v33  ;;  %v6737_v45 = vmax.f32 %v57_v33, 1.0000001  ;;  %v5763_v48 = vadd.f32 -1.0, %v6717_v34 }
  0x18   :  { %11481 = vst [vmem:[#allocation19_spill] sm:$0xff] %v6693_v18  ;;  %120 = vadd.xlane.f32.xlu0 %v104_v15  ;;  %v6733_v43 = vmul.f32 %v5762_v25, %v394_v28  ;;  %v6735_v44 = vmul.f32 %v5760_v29, %v392_v30  ;;  %v6740_v46 = vmul.f32 %v6671_v3, %v56_v36  ;;  %v395_v49 = vadd.f32 1.0, %v6717_v34 }
  0x19   :  { %11482 = vst [vmem:[#allocation20_spill] sm:$0xff] %v6698_v20  ;;  %v5761_v50 = vadd.f32 -1.0, %v6719_v35  ;;  %v393_v51 = vadd.f32 1.0, %v6719_v35  ;;  %v6746_v52 = vmul.f32 %v5765_v37, %v397_v38  ;;  %v5768_v53 = vadd.f32 -1.0, %v6723_v39  ;;  %v62_v37 = vld [vmem:[#allocation2 + $0x60] sm:$0xff] }
  0x1a   :  { %11483 = vst [vmem:[#allocation21_spill] sm:$0xff] %v6701_v21  ;;  %v400_v54 = vadd.f32 1.0, %v6723_v39  ;;  %v6750_v55 = vmax.f32 %v56_v36, 1.0000001  ;;  %v112_v58 = vmul.f32 %v6728_v41, %v6728_v41  ;;  %v111_v59 = vmul.f32 %v6731_v42, %v6731_v42 }
  0x1b   :  { %11484 = vst [vmem:[#allocation22_spill] sm:$0xff] %v6728_v41  ;;  %v6757_v60 = vmul.f32 %v6671_v3, %v61_v47  ;;  %v6759_v61 = vmax.f32 %v59_v57, 1.0000001  ;;  %v5767_v62 = vadd.f32 -1.0, %v6737_v45  ;;  %v399_v63 = vadd.f32 1.0, %v6737_v45 }
  0x1c   :  { %11485 = vst [vmem:[#allocation23_spill] sm:$0xff] %v6731_v42  ;;  %v110_v0 = vmul.f32 %v6740_v46, %v6740_v46  ;;  %v6765_v2 = vmax.f32 %v61_v47, 1.0000001  ;;  %v6767_v4 = vmul.f32 %v5763_v48, %v395_v49  ;;  %v6769_v5 = vmul.f32 %v5761_v50, %v393_v51  ;;  %v65_v49 = vld [vmem:[#allocation2 + $0x78] sm:$0xff] }
  0x1d   :  { %11486 = vst [vmem:[#allocation24_spill] sm:$0xff] %v6740_v46  ;;  %v6772_v6 = vmul.f32 %v6671_v3, %v60_v56  ;;  %v6774_v10 = vmax.f32 %v60_v56, 1.0000001  ;;  %v6776_v11 = vmul.f32 %v5768_v53, %v400_v54  ;;  %v5766_v12 = vadd.f32 -1.0, %v6750_v55 }
  0x1e   :  { %11487 = vst [vmem:[#allocation25_spill] sm:$0xff] %v6757_v60  ;;  %v398_v13 = vadd.f32 1.0, %v6750_v55  ;;  %v6781_v15 = vmul.f32 %v6671_v3, %v59_v57  ;;  %v115_v22 = vmul.f32 %v6757_v60, %v6757_v60  ;;  %v5769_v24 = vadd.f32 -1.0, %v6759_v61 }
  0x1f   :  { %130 = vadd.xlane.f32.xlu2 %v109_v26  ;;  %126 = vadd.xlane.f32.xlu1 %v107_v27  ;;  %11488 = vst [vmem:[#allocation26_spill] sm:$0xff] %v6772_v6  ;;  %v401_v25 = vadd.f32 1.0, %v6759_v61  ;;  %v6787_v26 = vmax.f32 %v64_v16, 1.0000001  ;;  %v63_v27 = vld [vmem:[#allocation2 + $0x68] sm:$0xff]  ;;  %v6789_v28 = vmul.f32 %v5767_v62, %v399_v63  ;;  %v5771_v29 = vadd.f32 -1.0, %v6765_v2 }
  0x20   :  { %122 = vadd.xlane.f32.xlu0 %v105_v31  ;;  %11489 = vst [vmem:[#allocation27_spill] sm:$0xff] %v6781_v15  ;;  %v403_v30 = vadd.f32 1.0, %v6765_v2  ;;  %v6793_v31 = vmax.f32 %v63_v27, 1.0000001  ;;  %v114_v32 = vmul.f32 %v6772_v6, %v6772_v6  ;;  %v5770_v33 = vadd.f32 -1.0, %v6774_v10 }
  0x21   :  { %v402_v36 = vadd.f32 1.0, %v6774_v10  ;;  %v113_v38 = vmul.f32 %v6781_v15, %v6781_v15  ;;  %v6802_v47 = vmul.f32 %v6671_v3, %v64_v16  ;;  %v6804_v48 = vmax.f32 %v62_v37, 1.0000001 }
  0x22   :  { %v6626_v50 = vmov 0   ;;  %5901 = vrsqrt.f32 %v6769_v5  ;;  %v6807_v51 = vmul.f32 %v5769_v24, %v401_v25  ;;  %v5774_v53 = vadd.f32 -1.0, %v6787_v26 }
  0x23   :  { %11490 = vst [vmem:[#allocation28_spill] sm:$0xff] %v6802_v47  ;;  %5899 = vset.pattern.permute.xlu2 %v6626_v50  ;;  %5898 = vset.pattern.permute.xlu1 %v6626_v50  ;;  %v406_v54 = vadd.f32 1.0, %v6787_v26  ;;  %v6812_v56 = vmul.f32 %v6671_v3, %v63_v27  ;;  %v5773_v57 = vadd.f32 -1.0, %v6793_v31  ;;  %5903 = vrsqrt.f32 %v6735_v44 }
  0x24   :  { %5900 = vset.pattern.permute.xlu0 %v6626_v50  ;;  %v6820_v62 = vmul.f32 %v5766_v12, %v398_v13  ;;  %v6823_v63 = vmul.f32 %v6671_v3, %v65_v49  ;;  %5905 = vrsqrt.f32 %v6733_v43  ;;  %v6828_v16 = vmul.f32 %v5771_v29, %v403_v30 }
  0x25   :  { %11491 = vst [vmem:[#allocation29_spill] sm:$0xff] %v6812_v56  ;;  %v5772_v24 = vadd.f32 -1.0, %v6804_v48  ;;  %v404_v25 = vadd.f32 1.0, %v6804_v48  ;;  %5907 = vrsqrt.f32 %v6767_v4  ;;  %v6833_v27 = vmul.f32 %v5770_v33, %v402_v36 }
  0x26   :  { %11493 = vst [vmem:[#allocation31_spill] sm:$0xff] %v6823_v63  ;;  %v118_v12 = vmul.f32 %v6802_v47, %v6802_v47  ;;  %v117_v13 = vmul.f32 %v6812_v56, %v6812_v56  ;;  %5909 = vrsqrt.f32 %v6725_v40  ;;  %v6840_v30 = vmul.f32 %v5774_v53, %v406_v54 }
  0x27   :  { %136 = vadd.xlane.f32.xlu2 %v112_v58  ;;  %134 = vadd.xlane.f32.xlu1 %v111_v59  ;;  %v405_v58 = vadd.f32 1.0, %v6793_v31  ;;  %v6817_v59 = vmul.f32 %v6671_v3, %v62_v37  ;;  %5911 = vrsqrt.f32 %v6807_v51  ;;  %vm443_vm1 = vcmp.eq.f32.partialorder %v6769_v5, inf }
  0x28   :  { %132 = vadd.xlane.f32.xlu0 %v110_v0  ;;  %v6825_v0 = vmax.f32 %v65_v49, 1.0000001  ;;  %v5902_v29 = vpop.eup %5901  ;;  %5913 = vrsqrt.f32 %v6746_v52  ;;  %v6856_v49 = vmul.f32 %v5772_v24, %v404_v25  ;;  %vm445_vm2 = vcmp.eq.f32.partialorder %v6769_v5, 0.0 }
  0x29   :  { %11492 = vst [vmem:[#allocation30_spill] sm:$0xff] %v6817_v59  ;;  %v6842_v37 = vmul.f32 %v5773_v57, %v405_v58  ;;  %v437_v36 = vmul.f32 %v5902_v29, %v6769_v5  ;;  %5915 = vrsqrt.f32 %v6820_v62  ;;  %v446_v57 = vand.u32 2147483648, %v6769_v5 }
  0x2a   :  { %v6852_v33 = vadd.f32 -1.0, %v6825_v0  ;;  %v6859_v50 = vadd.f32 1.0, %v6825_v0  ;;  %vm431_vm3 = vcmp.eq.f32.partialorder %v6735_v44, inf  ;;  %vm433_vm4 = vcmp.eq.f32.partialorder %v6735_v44, 0.0 }
  0x2b   :  { %v438_v54 = vmul.f32 %v5902_v29, %v437_v36  ;;  %vm455_vm5 = vcmp.eq.f32.partialorder %v6733_v43, inf  ;;  %vm457_vm6 = vcmp.eq.f32.partialorder %v6733_v43, 0.0  ;;  %vm467_vm7 = vcmp.eq.f32.partialorder %v6767_v4, inf }
  0x2c   :  { %5917 = vrsqrt.f32 %v6856_v49  ;;  %vm469_vm8 = vcmp.eq.f32.partialorder %v6767_v4, 0.0  ;;  %vm479_vm9 = vcmp.eq.f32.partialorder %v6725_v40, inf  ;;  %vm481_vm10 = vcmp.eq.f32.partialorder %v6725_v40, 0.0 }
  0x2d   :  { %v439_v47 = vmul.f32 0.5, %v438_v54  ;;  %5919 = vrsqrt.f32 %v6789_v28  ;;  %vm539_vm11 = vcmp.eq.f32.partialorder %v6807_v51, inf  ;;  %vm491_vm12 = vcmp.eq.f32.partialorder %v6746_v52, inf }
  0x2e   :  { %vm541_vm13 = vcmp.eq.f32.partialorder %v6807_v51, 0.0  ;;  %vm493_vm14 = vcmp.eq.f32.partialorder %v6746_v52, 0.0  ;;  %vm503_vm15 = vcmp.eq.f32.partialorder %v6820_v62, inf  ;;  %vm505_vm0 = vcmp.eq.f32.partialorder %v6820_v62, 0.0 }
  0x2f   :  { %142 = vadd.xlane.f32.xlu2 %v115_v22  ;;  %140 = vadd.xlane.f32.xlu1 %v114_v32  ;;  %v116_v22 = vmul.f32 %v6817_v59, %v6817_v59  ;;  %v6849_v32 = vmul.f32 %v6823_v63, %v6823_v63 }
  0x30   :  { %138 = vadd.xlane.f32.xlu0 %v113_v38  ;;  %v5904_v38 = vpop.eup %5903 }
  0x31   :  { %v5906_v53 = vpop.eup %5905  ;;  %v425_v58 = vmul.f32 %v5904_v38, %v6735_v44 }
  0x32   :  { %v5908_v1 = vpop.eup %5907  ;;  %v449_v25 = vmul.f32 %v5906_v53, %v6733_v43 }
  0x33   :  { %v5910_v60 = vpop.eup %5909  ;;  %v426_v6 = vmul.f32 %v5904_v38, %v425_v58  ;;  %v461_v36 = vmul.f32 %v5908_v1, %v6767_v4  ;;  %v440_v58 = vsub.f32 1.5, %v439_v47 }
  0x34   :  { %v5912_v56 = vpop.eup %5911  ;;  %v450_v41 = vmul.f32 %v5906_v53, %v449_v25  ;;  %v473_v24 = vmul.f32 %v5910_v60, %v6725_v40 }
  0x35   :  { %v5914_v54 = vpop.eup %5913  ;;  %v427_v42 = vmul.f32 0.5, %v426_v6  ;;  %v462_v46 = vmul.f32 %v5908_v1, %v461_v36  ;;  %v533_v25 = vmul.f32 %v5912_v56, %v6807_v51 }
  0x36   :  { %v6882_v15 = vpop.eup %5915  ;;  %v451_v20 = vmul.f32 0.5, %v450_v41  ;;  %v474_v59 = vmul.f32 %v5910_v60, %v473_v24  ;;  %v485_v63 = vmul.f32 %v5914_v54, %v6746_v52 }
  0x37   :  { %148 = vadd.xlane.f32.xlu2 %v118_v12  ;;  %146 = vadd.xlane.f32.xlu1 %v117_v13  ;;  %v441_v12 = vmul.f32 %v5902_v29, %v440_v58  ;;  %v428_v13 = vsub.f32 1.5, %v427_v42  ;;  %v463_v47 = vmul.f32 0.5, %v462_v46  ;;  %v534_v6 = vmul.f32 %v5912_v56, %v533_v25  ;;  %v6891_v21 = vpop.eup %5917 }
  0x38   :  { %144 = vadd.xlane.f32.xlu0 %v116_v22  ;;  %v452_v36 = vsub.f32 1.5, %v451_v20  ;;  %v475_v7 = vmul.f32 0.5, %v474_v59  ;;  %v486_v8 = vmul.f32 %v5914_v54, %v485_v63  ;;  %v497_v22 = vmul.f32 %v6882_v15, %v6820_v62  ;;  %v6898_v3 = vpop.eup %5919 }
  0x39   :  { %v442_v41 = vmul.f32 %v441_v12, %v6769_v5  ;;  %v429_v24 = vmul.f32 %v5904_v38, %v428_v13  ;;  %v464_v18 = vsub.f32 1.5, %v463_v47  ;;  %v535_v9 = vmul.f32 0.5, %v534_v6 }
  0x3a   :  { %v453_v42 = vmul.f32 %v5906_v53, %v452_v36  ;;  %v476_v46 = vsub.f32 1.5, %v475_v7  ;;  %v487_v29 = vmul.f32 0.5, %v486_v8  ;;  %v498_v58 = vmul.f32 %v6882_v15, %v497_v22 }
  0x3b   :  { %v444_v20 = vsel %vm443_vm1, %v6769_v5, %v442_v41  ;;  %v430_v59 = vmul.f32 %v429_v24, %v6735_v44  ;;  %v465_v63 = vmul.f32 %v5908_v1, %v464_v18  ;;  %v536_v25 = vsub.f32 1.5, %v535_v9 }
  0x3c   :  { %v447_v38 = vsel %vm445_vm2, %v446_v57, %v444_v20  ;;  %v454_v12 = vmul.f32 %v453_v42, %v6733_v43  ;;  %v477_v53 = vmul.f32 %v5910_v60, %v476_v46  ;;  %v488_v7 = vsub.f32 1.5, %v487_v29 }
  0x3d   :  { %v617_v8 = vadd.f32 %v447_v38, %v6719_v35  ;;  %v432_v13 = vsel %vm431_vm3, %v6735_v44, %v430_v59  ;;  %v466_v47 = vmul.f32 %v465_v63, %v6767_v4  ;;  %v537_v6 = vmul.f32 %v5912_v56, %v536_v25 }
  0x3e   :  { %v11494_v1 = vand.u32 2147483648, %v6735_v44  ;;  %v456_v18 = vsel %vm455_vm5, %v6733_v43, %v454_v12  ;;  %v478_v35 = vmul.f32 %v477_v53, %v6725_v40  ;;  %v489_v60 = vmul.f32 %v5914_v54, %v488_v7 }
  0x3f   :  { %5921 = vlog2.f32 %v617_v8  ;;  %v11495_v57 = vand.u32 2147483648, %v6733_v43  ;;  %v468_v44 = vsel %vm467_vm7, %v6767_v4, %v466_v47  ;;  %v11496_v36 = vand.u32 2147483648, %v6767_v4 }
  0x40   :  { %150 = vadd.xlane.f32.xlu0 %v6849_v32  ;;  %v435_v9 = vsel %vm433_vm4, %v11494_v1, %v432_v13  ;;  %v538_v54 = vmul.f32 %v537_v6, %v6807_v51  ;;  %v542_v43 = vand.u32 2147483648, %v6807_v51  ;;  %v490_v41 = vmul.f32 %v489_v60, %v6746_v52 }
  0x41   :  { %v616_v5 = vadd.f32 %v435_v9, %v6695_v19  ;;  %v459_v56 = vsel %vm457_vm6, %v11495_v57, %v456_v18  ;;  %v471_v22 = vsel %vm469_vm8, %v11496_v36, %v468_v44  ;;  %v480_v19 = vsel %vm479_vm9, %v6725_v40, %v478_v35 }
  0x42   :  { %v618_v32 = vadd.f32 %v459_v56, %v6690_v17  ;;  %v11497_v17 = vand.u32 2147483648, %v6725_v40  ;;  %v540_v4 = vsel %vm539_vm11, %v6807_v51, %v538_v54  ;;  %v499_v42 = vmul.f32 0.5, %v498_v58  ;;  %v6956_v40 = vld [vmem:[%s11400_s2] sm:$0x1] }
  0x43   :  { %5923 = vlog2.f32 %v616_v5  ;;  %v6947_v46 = vmul.f32 %v6852_v33, %v6859_v50  ;;  %v619_v29 = vadd.f32 %v471_v22, %v6717_v34  ;;  %v494_v20 = vand.u32 2147483648, %v6746_v52 }
  0x44   :  { %v483_v24 = vsel %vm481_vm10, %v11497_v17, %v480_v19  ;;  %v569_v59 = vmul.f32 %v6891_v21, %v6856_v49  ;;  %5925 = vlog2.f32 %v618_v32  ;;  %v492_v51 = vsel %vm491_vm12, %v6746_v52, %v490_v41 }
  0x45   :  { %v500_v58 = vsub.f32 1.5, %v499_v42  ;;  %v5922_v33 = vpop.eup %5921  ;;  %v620_v50 = vadd.f32 %v483_v24, %v6686_v14  ;;  %v543_v34 = vsel %vm541_vm13, %v542_v43, %v540_v4  ;;  %v509_v25 = vmul.f32 %v6898_v3, %v6789_v28 }
  0x46   :  { %v570_v63 = vmul.f32 %v6891_v21, %v569_v59  ;;  %v506_v12 = vand.u32 2147483648, %v6820_v62  ;;  %v6968_v53 = vmax.f32 %v6956_v40, 1.0000001  ;;  %5927 = vlog2.f32 %v619_v29 }
  0x47   :  { %v501_v38 = vmul.f32 %v6882_v15, %v500_v58  ;;  %v495_v7 = vsel %vm493_vm14, %v494_v20, %v492_v51  ;;  %v510_v14 = vmul.f32 %v6898_v3, %v509_v25  ;;  %v625_v13 = vadd.f32 %v543_v34, %v6759_v61 }
  0x48   :  { %v571_v8 = vmul.f32 0.5, %v570_v63  ;;  %5929 = vrsqrt.f32 %v6776_v11  ;;  %v635_v15 = vmul.f32 0.6931472, %v5922_v33  ;;  %v621_v35 = vadd.f32 %v495_v7, %v6704_v23 }
  0x49   :  { %v5924_v52 = vpop.eup %5923  ;;  %v502_v47 = vmul.f32 %v501_v38, %v6820_v62  ;;  %5931 = vlog2.f32 %v620_v50  ;;  %v511_v1 = vmul.f32 0.5, %v510_v14  ;;  %vm575_vm1 = vcmp.eq.f32.partialorder %v6856_v49, inf }
  0x4a   :  { %v572_v6 = vsub.f32 1.5, %v571_v8  ;;  %v5926_v9 = vpop.eup %5925  ;;  %v633_v18 = vmul.f32 0.6931472, %v5924_v52  ;;  %5933 = vrsqrt.f32 %v6947_v46  ;;  %vm577_vm2 = vcmp.eq.f32.partialorder %v6856_v49, 0.0 }
  0x4b   :  { %v504_v60 = vsel %vm503_vm15, %v6820_v62, %v502_v47  ;;  %v512_v57 = vsub.f32 1.5, %v511_v1  ;;  %5935 = vlog2.f32 %v625_v13  ;;  %v578_v44 = vand.u32 2147483648, %v6856_v49 }
  0x4c   :  { %v507_v61 = vsel %vm505_vm0, %v506_v12, %v504_v60  ;;  %v573_v5 = vmul.f32 %v6891_v21, %v572_v6  ;;  %v5928_v23 = vpop.eup %5927  ;;  %vm515_vm3 = vcmp.eq.f32.partialorder %v6789_v28, inf  ;;  %5937 = vrsqrt.f32 %v6833_v27 }
  0x4d   :  { %v622_v56 = vadd.f32 %v507_v61, %v6750_v55  ;;  %v513_v62 = vmul.f32 %v6898_v3, %v512_v57  ;;  %v637_v36 = vmul.f32 0.6931472, %v5926_v9  ;;  %5939 = vlog2.f32 %v621_v35 }
  0x4e   :  { %v574_v32 = vmul.f32 %v573_v5, %v6856_v49  ;;  %v5930_v21 = vpop.eup %5929  ;;  %vm517_vm4 = vcmp.eq.f32.partialorder %v6789_v28, 0.0  ;;  %v518_v55 = vand.u32 2147483648, %v6789_v28  ;;  %v639_v41 = vmul.f32 0.6931472, %v5928_v23 }
  0x4f   :  { %671 = vperm.xlu2 %5899, %v635_v15   ;;  %v5932_v22 = vpop.eup %5931  ;;  %5941 = vlog2.f32 %v622_v56  ;;  %v514_v3 = vmul.f32 %v513_v62, %v6789_v28  ;;  %v521_v54 = vmul.f32 %v5930_v21, %v6776_v11  ;;  %vm527_vm5 = vcmp.eq.f32.partialorder %v6776_v11, inf }
  0x50   :  { %666 = vperm.xlu1 %5898, %v633_v18   ;;  %v576_v19 = vsel %vm575_vm1, %v6856_v49, %v574_v32  ;;  %v5934_v43 = vpop.eup %5933  ;;  %5943 = vrsqrt.f32 %v6828_v16  ;;  %vm529_vm6 = vcmp.eq.f32.partialorder %v6776_v11, 0.0  ;;  %v641_v59 = vmul.f32 0.6931472, %v5932_v22 }
  0x51   :  { %v579_v17 = vsel %vm577_vm2, %v578_v44, %v576_v19  ;;  %v516_v4 = vsel %vm515_vm3, %v6789_v28, %v514_v3  ;;  %v522_v42 = vmul.f32 %v5930_v21, %v521_v54  ;;  %v605_v29 = vmul.f32 %v5934_v43, %v6947_v46  ;;  %v5936_v20 = vpop.eup %5935 }
  0x52   :  { %v628_v24 = vadd.f32 %v579_v17, %v6804_v48  ;;  %v519_v49 = vsel %vm517_vm4, %v518_v55, %v516_v4  ;;  %v5776_v51 = vadd.f32 -1.0, %v6968_v53  ;;  %v2271_v58 = vadd.f32 1.0, %v6968_v53  ;;  %v5938_v48 = vpop.eup %5937 }
  0x53   :  { %v623_v33 = vadd.f32 %v519_v49, %v6737_v45  ;;  %v523_v50 = vmul.f32 0.5, %v522_v42  ;;  %v530_v34 = vand.u32 2147483648, %v6776_v11  ;;  %v606_v63 = vmul.f32 %v5934_v43, %v605_v29  ;;  %v5940_v25 = vpop.eup %5939 }
  0x54   :  { %676 = vperm.xlu0 %5900, %v637_v36   ;;  %vm611_vm7 = vcmp.eq.f32.partialorder %v6947_v46, inf  ;;  %v545_v38 = vmul.f32 %v5938_v48, %v6833_v27  ;;  %v7014_v12 = vmul.f32 %v5776_v51, %v2271_v58  ;;  %5945 = vrsqrt.f32 %v6842_v37 }
  0x55   :  { %v5942_v28 = vpop.eup %5941  ;;  %5947 = vlog2.f32 %v628_v24  ;;  %v524_v52 = vsub.f32 1.5, %v523_v50  ;;  %v607_v7 = vmul.f32 0.5, %v606_v63  ;;  %vm613_vm8 = vcmp.eq.f32.partialorder %v6947_v46, 0.0 }
  0x56   :  { %v5944_v45 = vpop.eup %5943  ;;  %v651_v8 = vmul.f32 0.6931472, %v5936_v20  ;;  %v614_v14 = vand.u32 2147483648, %v6947_v46  ;;  %v546_v13 = vmul.f32 %v5938_v48, %v545_v38  ;;  %5949 = vrsqrt.f32 %v7014_v12 }
  0x57   :  { %681 = vperm.xlu2 %5899, %v639_v41   ;;  %5951 = vlog2.f32 %v623_v33  ;;  %v525_v47 = vmul.f32 %v5930_v21, %v524_v52  ;;  %v608_v15 = vsub.f32 1.5, %v607_v7  ;;  %v557_v6 = vmul.f32 %v5944_v45, %v6828_v16 }
  0x58   :  { %686 = vperm.xlu1 %5898, %v641_v59   ;;  %v643_v1 = vmul.f32 0.6931472, %v5940_v25  ;;  %v547_v9 = vmul.f32 0.5, %v546_v13  ;;  %vm551_vm9 = vcmp.eq.f32.partialorder %v6833_v27, inf  ;;  %5953 = vrsqrt.f32 %v6840_v30 }
  0x59   :  { %v526_v18 = vmul.f32 %v525_v47, %v6776_v11  ;;  %v609_v35 = vmul.f32 %v5934_v43, %v608_v15  ;;  %vm553_vm10 = vcmp.eq.f32.partialorder %v6833_v27, 0.0  ;;  %v558_v60 = vmul.f32 %v5944_v45, %v557_v6 }
  0x5a   :  { %v5946_v61 = vpop.eup %5945  ;;  %v645_v5 = vmul.f32 0.6931472, %v5942_v28  ;;  %v548_v57 = vsub.f32 1.5, %v547_v9  ;;  %v554_v56 = vand.u32 2147483648, %v6833_v27  ;;  %vm563_vm11 = vcmp.eq.f32.partialorder %v6828_v16, inf }
  0x5b   :  { %v5948_v44 = vpop.eup %5947  ;;  %v528_v23 = vsel %vm527_vm5, %v6776_v11, %v526_v18  ;;  %v610_v32 = vmul.f32 %v609_v35, %v6947_v46  ;;  %v559_v62 = vmul.f32 0.5, %v558_v60  ;;  %v581_v21 = vmul.f32 %v5946_v61, %v6842_v37 }
  0x5c   :  { %711 = vperm.xlu0 %5900, %v651_v8   ;;  %v5950_v36 = vpop.eup %5949  ;;  %v531_v55 = vsel %vm529_vm6, %v530_v34, %v528_v23  ;;  %v549_v22 = vmul.f32 %v5938_v48, %v548_v57  ;;  %vm565_vm12 = vcmp.eq.f32.partialorder %v6828_v16, 0.0  ;;  %v566_v19 = vand.u32 2147483648, %v6828_v16 }
  0x5d   :  { %v5952_v3 = vpop.eup %5951  ;;  %v624_v54 = vadd.f32 %v531_v55, %v6723_v39  ;;  %v612_v43 = vsel %vm611_vm7, %v6947_v46, %v610_v32  ;;  %v560_v41 = vsub.f32 1.5, %v559_v62  ;;  %v2274_v17 = vmul.f32 %v5950_v36, %v7014_v12 }
  0x5e   :  { %v5954_v24 = vpop.eup %5953  ;;  %v657_v11 = vmul.f32 0.6931472, %v5948_v44  ;;  %v615_v4 = vsel %vm613_vm8, %v614_v14, %v612_v43  ;;  %v550_v42 = vmul.f32 %v549_v22, %v6833_v27  ;;  %v582_v29 = vmul.f32 %v5946_v61, %v581_v21  ;;  %v80_v43 = vld [vmem:[#allocation5 + $0x70] sm:$0xff] }
  0x5f   :  { %691 = vperm.xlu2 %5899, %v643_v1   ;;  %5955 = vlog2.f32 %v624_v54  ;;  %v631_v20 = vadd.f32 %v615_v4, %v6825_v0  ;;  %v561_v39 = vmul.f32 %v5944_v45, %v560_v41  ;;  %v2275_v59 = vmul.f32 %v5950_v36, %v2274_v17  ;;  %v79_v41 = vld [vmem:[#allocation5 + $0x68] sm:$0xff] }
  0x60   :  { %696 = vperm.xlu1 %5898, %v645_v5   ;;  %v647_v49 = vmul.f32 0.6931472, %v5952_v3  ;;  %v552_v51 = vsel %vm551_vm9, %v6833_v27, %v550_v42  ;;  %v583_v58 = vmul.f32 0.5, %v582_v29  ;;  %v593_v48 = vmul.f32 %v5954_v24, %v6840_v30  ;;  %v78_v29 = vld [vmem:[#allocation5 + $0x60] sm:$0xff] }
  0x61   :  { %5957 = vlog2.f32 %v631_v20  ;;  %v555_v46 = vsel %vm553_vm10, %v554_v56, %v552_v51  ;;  %v562_v33 = vmul.f32 %v561_v39, %v6828_v16  ;;  %v2276_v50 = vmul.f32 0.5, %v2275_v59 }
  0x62   :  { %v626_v0 = vadd.f32 %v555_v46, %v6774_v10  ;;  %v584_v34 = vsub.f32 1.5, %v583_v58  ;;  %v594_v63 = vmul.f32 %v5954_v24, %v593_v48  ;;  %vm2280_vm13 = vcmp.eq.f32.partialorder %v7014_v12, inf  ;;  %v77_v58 = vld [vmem:[#allocation5 + $0x58] sm:$0xff]  ;;  %v76_v46 = vld [vmem:[#allocation5 + $0x50] sm:$0xff] }
  0x63   :  { %v564_v25 = vsel %vm563_vm11, %v6828_v16, %v562_v33  ;;  %v2277_v38 = vsub.f32 1.5, %v2276_v50  ;;  %vm587_vm14 = vcmp.eq.f32.partialorder %v6842_v37, inf  ;;  %v2283_v8 = vand.u32 2147483648, %v7014_v12 }
  0x64   :  { %726 = vperm.xlu0 %5900, %v657_v11   ;;  %5959 = vlog2.f32 %v626_v0  ;;  %v567_v27 = vsel %vm565_vm12, %v566_v19, %v564_v25  ;;  %v585_v28 = vmul.f32 %v5946_v61, %v584_v34  ;;  %v595_v52 = vmul.f32 0.5, %v594_v63  ;;  %v75_v34 = vld [vmem:[#allocation5 + $0x48] sm:$0xff] }
  0x65   :  { %v5956_v7 = vpop.eup %5955  ;;  %v627_v10 = vadd.f32 %v567_v27, %v6765_v2  ;;  %v2278_v45 = vmul.f32 %v5950_v36, %v2277_v38  ;;  %v590_v14 = vand.u32 2147483648, %v6842_v37  ;;  %vm589_vm15 = vcmp.eq.f32.partialorder %v6842_v37, 0.0 }
  0x66   :  { %v649_v13 = vmul.f32 0.6931472, %v5956_v7  ;;  %v586_v47 = vmul.f32 %v585_v28, %v6842_v37  ;;  %v596_v15 = vsub.f32 1.5, %v595_v52  ;;  %vm2282_vm0 = vcmp.eq.f32.partialorder %v7014_v12, 0.0 }
  0x67   :  { %701 = vperm.xlu2 %5899, %v647_v49   ;;  %v5958_v6 = vpop.eup %5957  ;;  %5961 = vlog2.f32 %v627_v10  ;;  %v2279_v16 = vmul.f32 %v2278_v45, %v7014_v12  ;;  %vm599_vm1 = vcmp.eq.f32.partialorder %v6840_v30, inf  ;;  %v602_v60 = vand.u32 2147483648, %v6840_v30  ;;  %v11498_v49 = vld [vmem:[#allocation15_spill] sm:$0xff]  ;;  %v74_v10 = vld [vmem:[#allocation5 + $0x40] sm:$0xff] }
  0x68   :  { %706 = vperm.xlu1 %5898, %v649_v13   ;;  %v663_v1 = vmul.f32 0.6931472, %v5958_v6  ;;  %v588_v2 = vsel %vm587_vm14, %v6842_v37, %v586_v47  ;;  %v597_v9 = vmul.f32 %v5954_v24, %v596_v15  ;;  %vm601_vm2 = vcmp.eq.f32.partialorder %v6840_v30, 0.0  ;;  %v73_v47 = vld [vmem:[#allocation5 + $0x38] sm:$0xff] }
  0x69   :  { %v2281_v18 = vsel %vm2280_vm13, %v7014_v12, %v2279_v16  ;;  %v591_v35 = vsel %vm589_vm15, %v590_v14, %v588_v2  ;;  %v7110_v51 = vmul.f32 %v11498_v49, %v6956_v40  ;;  %vm2252_vm3 = vcmask 1040384   ;;  %v72_v2 = vld [vmem:[#allocation5 + $0x30] sm:$0xff] }
  0x6a   :  { %v5960_v61 = vpop.eup %5959  ;;  %v2284_v5 = vsel %vm2282_vm0, %v2283_v8, %v2281_v18  ;;  %v629_v57 = vadd.f32 %v591_v35, %v6793_v31  ;;  %v598_v56 = vmul.f32 %v597_v9, %v6840_v30 }
  0x6b   :  { %v653_v37 = vmul.f32 0.6931472, %v5960_v61  ;;  %v2285_v44 = vadd.f32 %v2284_v5, %v6968_v53  ;;  %11499 = vst [vmem:[#allocation15_spill] sm:$0xff] %v7110_v51  ;;  %v2251_v0 = vmul.f32 %v7110_v51, %v7110_v51 }
  0x6c   :  { %741 = vperm.xlu0 %5900, %v663_v1   ;;  %5963 = vlog2.f32 %v629_v57  ;;  %v600_v12 = vsel %vm599_vm1, %v6840_v30, %v598_v56 }
  0x6d   :  { %v5962_v23 = vpop.eup %5961  ;;  %5965 = vlog2.f32 %v2285_v44  ;;  %v603_v32 = vsel %vm601_vm2, %v602_v60, %v600_v12  ;;  %v2253_v13 = vsel %vm2252_vm3, %v2251_v0, 0.0  ;;  %v71_v60 = vld [vmem:[#allocation5 + $0x28] sm:$0xff] }
  0x6e   :  { %v655_v62 = vmul.f32 0.6931472, %v5962_v23  ;;  %v630_v21 = vadd.f32 %v603_v32, %v6787_v26  ;;  %v81_v26 = vld [vmem:[#allocation5 + $0x78] sm:$0xff]  ;;  %v70_v32 = vld [vmem:[#allocation5 + $0x20] sm:$0xff] }
  0x6f   :  { %716 = vperm.xlu2 %5899, %v653_v37   ;;  %1000 = vmatpush.msra.mxu0 %v81_v26 }
  0x70   :  { %721 = vperm.xlu1 %5898, %v655_v62   ;;  %5967 = vlog2.f32 %v630_v21  ;;  %5840 = vmatpush.msra.mxu1 %v81_v26 }
  0x71   :  { %5842 = vmatpush.msra.mxu3 %v81_v26  ;;  %5841 = vmatpush.msra.mxu2 %v81_v26 }
  0x72   :  { %v5964_v31 = vpop.eup %5963  ;;  %1001 = vmatpush.msra.mxu0 %v80_v43  ;;  %5843 = vmatpush.msra.mxu1 %v80_v43 }
  0x73   :  { %v5966_v36 = vpop.eup %5965  ;;  %v659_v55 = vmul.f32 0.6931472, %v5964_v31  ;;  %5845 = vmatpush.msra.mxu3 %v80_v43  ;;  %5844 = vmatpush.msra.mxu2 %v80_v43 }
  0x74   :  { %v2287_v22 = vmul.f32 0.6931472, %v5966_v36  ;;  %1002 = vmatpush.msra.mxu0 %v79_v41  ;;  %5846 = vmatpush.msra.mxu1 %v79_v41 }
  0x75   :  { %5848 = vmatpush.msra.mxu3 %v79_v41  ;;  %5847 = vmatpush.msra.mxu2 %v79_v41 }
  0x76   :  { %v5968_v19 = vpop.eup %5967  ;;  %2290 = vperm.xlu0 %5900, %v2287_v22   ;;  %1003 = vmatpush.msra.mxu0 %v78_v29 }
  0x77   :  { %731 = vperm.xlu2 %5899, %v659_v55   ;;  %v661_v53 = vmul.f32 0.6931472, %v5968_v19  ;;  %5849 = vmatpush.msra.mxu1 %v78_v29 }
  0x78   :  { %5851 = vmatpush.msra.mxu3 %v78_v29  ;;  %5850 = vmatpush.msra.mxu2 %v78_v29 }
  0x79   :  { %736 = vperm.xlu1 %5898, %v661_v53   ;;  %1004 = vmatpush.msra.mxu0 %v77_v58  ;;  %v69_v53 = vld [vmem:[#allocation5 + $0x18] sm:$0xff] }
  0x7a   :  { %5852 = vmatpush.msra.mxu1 %v77_v58  ;;  %5854 = vmatpush.msra.mxu3 %v77_v58 }
  0x7b   :  { %5853 = vmatpush.msra.mxu2 %v77_v58  ;;  %1005 = vmatpush.msra.mxu0 %v76_v46 }
  0x7c   :  { %5855 = vmatpush.msra.mxu1 %v76_v46  ;;  %5857 = vmatpush.msra.mxu3 %v76_v46 }
  0x7d   :  { %5856 = vmatpush.msra.mxu2 %v76_v46  ;;  %1006 = vmatpush.msra.mxu0 %v75_v34 }
  0x7e   :  { %5858 = vmatpush.msra.mxu1 %v75_v34  ;;  %5860 = vmatpush.msra.mxu3 %v75_v34 }
  0x7f   :  { %5859 = vmatpush.msra.mxu2 %v75_v34  ;;  %1007 = vmatpush.msra.mxu0 %v74_v10 }
  0x80   :  { %5861 = vmatpush.msra.mxu1 %v74_v10  ;;  %5863 = vmatpush.msra.mxu3 %v74_v10 }
  0x81   :  { %5862 = vmatpush.msra.mxu2 %v74_v10  ;;  %1008 = vmatpush.msra.mxu0 %v73_v47 }
  0x82   :  { %5864 = vmatpush.msra.mxu1 %v73_v47  ;;  %5866 = vmatpush.msra.mxu3 %v73_v47 }
  0x83   :  { %5865 = vmatpush.msra.mxu2 %v73_v47  ;;  %1009 = vmatpush.msra.mxu0 %v72_v2 }
  0x84   :  { %5867 = vmatpush.msra.mxu1 %v72_v2  ;;  %5869 = vmatpush.msra.mxu3 %v72_v2 }
  0x85   :  { %1010 = vmatpush.msra.mxu0 %v71_v60  ;;  %5868 = vmatpush.msra.mxu2 %v72_v2 }
  0x86   :  { %5870 = vmatpush.msra.mxu1 %v71_v60  ;;  %5872 = vmatpush.msra.mxu3 %v71_v60 }
  0x87   :  { %1011 = vmatpush.msra.mxu0 %v70_v32  ;;  %5871 = vmatpush.msra.mxu2 %v71_v60 }
  0x88   :  { %5873 = vmatpush.msra.mxu1 %v70_v32  ;;  %5875 = vmatpush.msra.mxu3 %v70_v32 }
  0x89   :  { %1012 = vmatpush.msra.mxu0 %v69_v53  ;;  %5874 = vmatpush.msra.mxu2 %v70_v32 }
  0x8a   :  { %v7081_v3 = vpop.xlane.xlu2 %128  ;;  %v7083_v30 = vpop.xlane.xlu1 %124  ;;  %5876 = vmatpush.msra.mxu1 %v69_v53  ;;  %5878 = vmatpush.msra.mxu3 %v69_v53 }
  0x8b   :  { %v7085_v54 = vpop.xlane.xlu0 %120  ;;  %5969 = vrsqrt.f32 %v7081_v3  ;;  %vm207_vm4 = vcmp.eq.f32.partialorder %v7081_v3, inf  ;;  %v210_v21 = vand.u32 2147483648, %v7081_v3  ;;  %v186_v31 = vand.u32 2147483648, %v7083_v30  ;;  %5877 = vmatpush.msra.mxu2 %v69_v53 }
  0x8c   :  { %5971 = vrsqrt.f32 %v7085_v54  ;;  %vm183_vm5 = vcmp.eq.f32.partialorder %v7083_v30, inf  ;;  %vm159_vm6 = vcmp.eq.f32.partialorder %v7085_v54, inf  ;;  %vm161_vm7 = vcmp.eq.f32.partialorder %v7085_v54, 0.0 }
  0x8d   :  { %5973 = vrsqrt.f32 %v7083_v30  ;;  %v162_v26 = vand.u32 2147483648, %v7085_v54  ;;  %vm209_vm13 = vcmp.eq.f32.partialorder %v7081_v3, 0.0  ;;  %vm185_vm3 = vcmp.eq.f32.partialorder %v7083_v30, 0.0 }
  0x91   :  { %v7090_v17 = vpop.eup %5969 }
  0x92   :  { %v7092_v24 = vpop.xlane.xlu2 %130  ;;  %v7094_v11 = vpop.xlane.xlu1 %126  ;;  %v201_v39 = vmul.f32 %v7090_v17, %v7081_v3 }
  0x93   :  { %v7096_v4 = vpop.eup %5971  ;;  %5975 = vrsqrt.f32 %v7092_v24  ;;  %v7099_v42 = vpop.xlane.xlu0 %122  ;;  %vm219_vm8 = vcmp.eq.f32.partialorder %v7092_v24, inf  ;;  %v222_v58 = vand.u32 2147483648, %v7092_v24  ;;  %v198_v34 = vand.u32 2147483648, %v7094_v11 }
  0x94   :  { %v7101_v20 = vpop.eup %5973  ;;  %5977 = vrsqrt.f32 %v7094_v11  ;;  %v153_v59 = vmul.f32 %v7096_v4, %v7085_v54  ;;  %v202_v40 = vmul.f32 %v7090_v17, %v201_v39  ;;  %vm195_vm9 = vcmp.eq.f32.partialorder %v7094_v11, inf }
  0x95   :  { %5979 = vrsqrt.f32 %v7099_v42  ;;  %v177_v48 = vmul.f32 %v7101_v20, %v7083_v30  ;;  %v174_v10 = vand.u32 2147483648, %v7099_v42  ;;  %vm171_vm10 = vcmp.eq.f32.partialorder %v7099_v42, inf }
  0x96   :  { %v154_v50 = vmul.f32 %v7096_v4, %v153_v59  ;;  %v203_v8 = vmul.f32 0.5, %v202_v40  ;;  %v68_v59 = vld [vmem:[#allocation5 + $0x10] sm:$0xff]  ;;  %vm173_vm12 = vcmp.eq.f32.partialorder %v7099_v42, 0.0  ;;  %vm221_vm1 = vcmp.eq.f32.partialorder %v7092_v24, 0.0 }
  0x97   :  { %v178_v27 = vmul.f32 %v7101_v20, %v177_v48  ;;  %1013 = vmatpush.msra.mxu0 %v68_v59  ;;  %5879 = vmatpush.msra.mxu1 %v68_v59 }
  0x98   :  { %v155_v14 = vmul.f32 0.5, %v154_v50  ;;  %v204_v18 = vsub.f32 1.5, %v203_v8  ;;  %5881 = vmatpush.msra.mxu3 %v68_v59  ;;  %5880 = vmatpush.msra.mxu2 %v68_v59 }
  0x99   :  { %v7115_v33 = vpop.eup %5975  ;;  %v179_v6 = vmul.f32 0.5, %v178_v27 }
  0x9a   :  { %v7121_v63 = vpop.eup %5977  ;;  %v7123_v25 = vpop.xlane.xlu2 %136  ;;  %v213_v28 = vmul.f32 %v7115_v33, %v7092_v24  ;;  %v156_v35 = vsub.f32 1.5, %v155_v14  ;;  %v205_v55 = vmul.f32 %v7090_v17, %v204_v18 }
  0x9b   :  { %v7125_v38 = vpop.xlane.xlu1 %134  ;;  %v189_v52 = vmul.f32 %v7121_v63, %v7094_v11  ;;  %5981 = vrsqrt.f32 %v7123_v25  ;;  %v7133_v7 = vpop.xlane.xlu0 %132  ;;  %v180_v37 = vsub.f32 1.5, %v179_v6  ;;  %vm255_vm11 = vcmp.eq.f32.partialorder %v7123_v25, inf }
  0x9c   :  { %v7135_v45 = vpop.eup %5979  ;;  %5983 = vrsqrt.f32 %v7125_v38  ;;  %v214_v16 = vmul.f32 %v7115_v33, %v213_v28  ;;  %v157_v22 = vmul.f32 %v7096_v4, %v156_v35  ;;  %v206_v50 = vmul.f32 %v205_v55, %v7081_v3  ;;  %v66_v28 = vld [vmem:[#allocation5] sm:$0xff] }
  0x9d   :  { %v165_v15 = vmul.f32 %v7135_v45, %v7099_v42  ;;  %v190_v1 = vmul.f32 %v7121_v63, %v189_v52  ;;  %5985 = vrsqrt.f32 %v7133_v7  ;;  %v181_v17 = vmul.f32 %v7101_v20, %v180_v37  ;;  %v67_v20 = vld [vmem:[#allocation5 + $0x8] sm:$0xff] }
  0x9e   :  { %v7153_v44 = vmul.f32 0.5, %v214_v16  ;;  %v158_v0 = vmul.f32 %v157_v22, %v7085_v54  ;;  %1014 = vmatpush.msra.mxu0 %v67_v20  ;;  %5882 = vmatpush.msra.mxu1 %v67_v20  ;;  %v258_v35 = vand.u32 2147483648, %v7123_v25  ;;  %vm243_vm14 = vcmp.eq.f32.partialorder %v7125_v38, inf }
  0x9f   :  { %v166_v61 = vmul.f32 %v7135_v45, %v165_v15  ;;  %v7155_v12 = vmul.f32 0.5, %v190_v1  ;;  %v182_v6 = vmul.f32 %v181_v17, %v7083_v30  ;;  %5884 = vmatpush.msra.mxu3 %v67_v20  ;;  %5883 = vmatpush.msra.mxu2 %v67_v20  ;;  %vm231_vm15 = vcmp.eq.f32.partialorder %v7133_v7, inf }
  0xa0   :  { %2254 = vadd.xlane.f32.xlu2 %v2253_v13  ;;  %v216_v4 = vsub.f32 1.5, %v7153_v44  ;;  %1015 = vmatpush.msra.mxu0 %v66_v28 }
  0xa1   :  { %v7143_v9 = vpop.eup %5981  ;;  %v167_v43 = vmul.f32 0.5, %v166_v61  ;;  %v192_v29 = vsub.f32 1.5, %v7155_v12  ;;  %5885 = vmatpush.msra.mxu1 %v66_v28  ;;  %5887 = vmatpush.msra.mxu3 %v66_v28  ;;  %v7230_v55 = vsel %vm183_vm5, %v7083_v30, %v182_v6 }
  0xa2   :  { %v249_v5 = vmul.f32 %v7143_v9, %v7123_v25  ;;  %v7149_v57 = vpop.xlane.xlu2 %142  ;;  %v7160_v62 = vpop.eup %5983  ;;  %v217_v16 = vmul.f32 %v7115_v33, %v216_v4  ;;  %v7216_v33 = vsel %vm207_vm4, %v7081_v3, %v206_v50  ;;  %5886 = vmatpush.msra.mxu2 %v66_v28 }
  0xa3   :  { %v7151_v56 = vpop.xlane.xlu1 %140  ;;  %5987 = vrsqrt.f32 %v7149_v57  ;;  %v7158_v23 = vpop.xlane.xlu0 %138  ;;  %v237_v19 = vmul.f32 %v7160_v62, %v7125_v38  ;;  %v168_v52 = vsub.f32 1.5, %v167_v43  ;;  %v193_v1 = vmul.f32 %v7121_v63, %v192_v29 }
  0xa4   :  { %v250_v36 = vmul.f32 %v7143_v9, %v249_v5  ;;  %5989 = vrsqrt.f32 %v7151_v56  ;;  %v7175_v41 = vpop.eup %5985  ;;  %v160_v63 = vsel %vm159_vm6, %v7085_v54, %v158_v0  ;;  %v218_v22 = vmul.f32 %v217_v16, %v7092_v24 }
  0xa5   :  { %v238_v39 = vmul.f32 %v7160_v62, %v237_v19  ;;  %v225_v46 = vmul.f32 %v7175_v41, %v7133_v7  ;;  %5991 = vrsqrt.f32 %v7158_v23  ;;  %v169_v44 = vmul.f32 %v7135_v45, %v168_v52 }
  0xa6   :  { %v251_v48 = vmul.f32 0.5, %v250_v36  ;;  %v194_v19 = vmul.f32 %v193_v1, %v7094_v11  ;;  %v246_v43 = vand.u32 2147483648, %v7125_v38  ;;  %v234_v29 = vand.u32 2147483648, %v7133_v7 }
  0xa7   :  { %v239_v27 = vmul.f32 0.5, %v238_v39  ;;  %v226_v8 = vmul.f32 %v7175_v41, %v225_v46  ;;  %v163_v59 = vsel %vm161_vm7, %v162_v26, %v160_v63  ;;  %v7255_v0 = vsel %vm219_vm8, %v7092_v24, %v218_v22 }
  0xa8   :  { %v252_v18 = vsub.f32 1.5, %v251_v48  ;;  %vm291_vm0 = vcmp.eq.f32.partialorder %v7149_v57, inf  ;;  %v294_v54 = vand.u32 2147483648, %v7149_v57  ;;  %v282_v28 = vand.u32 2147483648, %v7151_v56 }
  0xa9   :  { %v7186_v40 = vpop.eup %5987  ;;  %v240_v5 = vsub.f32 1.5, %v239_v27  ;;  %v227_v12 = vmul.f32 0.5, %v226_v8  ;;  %vm279_vm2 = vcmp.eq.f32.partialorder %v7151_v56, inf }
  0xaa   :  { %v285_v14 = vmul.f32 %v7186_v40, %v7149_v57  ;;  %v7196_v13 = vpop.xlane.xlu2 %148  ;;  %v7200_v15 = vpop.eup %5989  ;;  %v253_v45 = vmul.f32 %v7143_v9, %v252_v18  ;;  %v170_v9 = vmul.f32 %v169_v44, %v7099_v42  ;;  %v270_v44 = vand.u32 2147483648, %v7158_v23 }
  0xab   :  { %v7198_v47 = vpop.xlane.xlu1 %146  ;;  %5993 = vrsqrt.f32 %v7196_v13  ;;  %v7207_v2 = vpop.xlane.xlu0 %144  ;;  %v273_v61 = vmul.f32 %v7200_v15, %v7151_v56  ;;  %v241_v4 = vmul.f32 %v7160_v62, %v240_v5  ;;  %v228_v48 = vsub.f32 1.5, %v227_v12 }
  0xac   :  { %v286_v60 = vmul.f32 %v7186_v40, %v285_v14  ;;  %5995 = vrsqrt.f32 %v7198_v47  ;;  %v7223_v37 = vpop.eup %5991  ;;  %v7260_v62 = vsel %vm195_vm9, %v7094_v11, %v194_v19  ;;  %v254_v27 = vmul.f32 %v253_v45, %v7123_v25 }
  0xad   :  { %v274_v36 = vmul.f32 %v7200_v15, %v273_v61  ;;  %v261_v53 = vmul.f32 %v7223_v37, %v7158_v23  ;;  %5997 = vrsqrt.f32 %v7207_v2  ;;  %v7271_v14 = vmax.f32 %v163_v59, 1e-15 }
  0xae   :  { %v287_v32 = vmul.f32 0.5, %v286_v60  ;;  %v242_v6 = vmul.f32 %v241_v4, %v7125_v38  ;;  %v172_v60 = vsel %vm171_vm10, %v7099_v42, %v170_v9  ;;  %v229_v61 = vmul.f32 %v7175_v41, %v228_v48 }
  0xaf   :  { %v275_v39 = vmul.f32 0.5, %v274_v36  ;;  %v262_v20 = vmul.f32 %v7223_v37, %v261_v53  ;;  %v330_v12 = vand.u32 2147483648, %v7196_v13  ;;  %v7288_v22 = vsel %vm255_vm11, %v7123_v25, %v254_v27 }
  0xb0   :  { %v288_v46 = vsub.f32 1.5, %v287_v32  ;;  %v7298_v19 = vsel %vm243_vm14, %v7125_v38, %v242_v6  ;;  %v175_v48 = vsel %vm173_vm12, %v174_v10, %v172_v60  ;;  %vm303_vm4 = vcmp.eq.f32.partialorder %v7207_v2, inf }
  0xb1   :  { %v7242_v17 = vpop.eup %5993  ;;  %v276_v16 = vsub.f32 1.5, %v275_v39  ;;  %v263_v5 = vmul.f32 0.5, %v262_v20  ;;  %v230_v39 = vmul.f32 %v229_v61, %v7133_v7  ;;  %vm305_vm5 = vcmp.eq.f32.partialorder %v7207_v2, 0.0 }
  0xb2   :  { %v5996_v50 = vpop.eup %5995  ;;  %v321_v52 = vmul.f32 %v7242_v17, %v7196_v13  ;;  %v672_v8 = vpop.permute.xlu2 %671  ;;  %v289_v63 = vmul.f32 %v7186_v40, %v288_v46  ;;  %v318_v40 = vand.u32 2147483648, %v7198_v47  ;;  %v306_v6 = vand.u32 2147483648, %v7207_v2 }
  0xb3   :  { %v7265_v26 = vpop.xlane.xlu0 %150  ;;  %v309_v1 = vmul.f32 %v5996_v50, %v7198_v47  ;;  %v5998_v18 = vpop.eup %5997  ;;  %v277_v53 = vmul.f32 %v7200_v15, %v276_v16  ;;  %v264_v9 = vsub.f32 1.5, %v263_v5  ;;  %v211_v15 = vsel %vm209_vm13, %v210_v21, %v7216_v33 }
  0xb4   :  { %5999 = vrsqrt.f32 %v7265_v26  ;;  %v297_v36 = vmul.f32 %v5998_v18, %v7207_v2  ;;  %v322_v41 = vmul.f32 %v7242_v17, %v321_v52  ;;  %v290_v59 = vmul.f32 %v289_v63, %v7149_v57 }
  0xb5   :  { %v310_v32 = vmul.f32 %v5996_v50, %v309_v1  ;;  %6001 = vrcp.f32 %v7271_v14  ;;  %v278_v10 = vmul.f32 %v277_v53, %v7151_v56  ;;  %v11500_v1 = vld [vmem:[#allocation21_spill] sm:$0xff]  ;;  %v7323_v61 = vmax.f32 %v175_v48, 1e-15 }
  0xb6   :  { %v298_v4 = vmul.f32 %v5998_v18, %v297_v36  ;;  %v323_v52 = vmul.f32 0.5, %v322_v41  ;;  %v7321_v60 = vmul.f32 %v672_v8, %v11500_v1  ;;  %v7328_v3 = vsel %vm231_vm15, %v7133_v7, %v230_v39 }
  0xb7   :  { %v311_v45 = vmul.f32 0.5, %v310_v32  ;;  %v7333_v21 = vsel %vm291_vm0, %v7149_v57, %v290_v59  ;;  %v265_v33 = vmul.f32 %v7223_v37, %v264_v9  ;;  %vm315_vm6 = vcmp.eq.f32.partialorder %v7198_v47, inf }
  0xb8   :  { %v299_v27 = vmul.f32 0.5, %v298_v4  ;;  %v7339_v8 = vmax.f32 %v211_v15, 1e-15  ;;  %v771_v39 = vand.u32 2147483648, %v7271_v14  ;;  %6003 = vrcp.f32 %v7323_v61 }
  0xb9   :  { %v312_v20 = vsub.f32 1.5, %v311_v45  ;;  %v324_v45 = vsub.f32 1.5, %v323_v52  ;;  %v7349_v37 = vsel %vm279_vm2, %v7151_v56, %v278_v10  ;;  %vm765_vm7 = vweird.f32 %v7271_v14  ;;  %v11501_v10 = vld [vmem:[#allocation18_spill] sm:$0xff] }
  0xba   :  { %v7307_v46 = vpop.eup %5999  ;;  %v300_v16 = vsub.f32 1.5, %v299_v27  ;;  %v7337_v5 = vpop.permute.xlu2 %681  ;;  %6005 = vrcp.f32 %v7339_v8  ;;  %v187_v48 = vsel %vm185_vm3, %v186_v31, %v7230_v55  ;;  %v772_v55 = vor.u32 1.1754944e-38, %v771_v39 }
  0xbb   :  { %v333_v42 = vmul.f32 %v7307_v46, %v7265_v26  ;;  %v6002_v63 = vpop.eup %6001  ;;  %v313_v32 = vmul.f32 %v5996_v50, %v312_v20  ;;  %v223_v20 = vsel %vm221_vm1, %v222_v58, %v7255_v0  ;;  %v7373_v30 = vmul.f32 %v7242_v17, %v324_v45 }
  0xbc   :  { %v301_v36 = vmul.f32 %v5998_v18, %v300_v16  ;;  %v761_v53 = vmul.f32 %v6002_v63, %v7271_v14  ;;  %v769_v18 = vand.u32 2147483647, %v7271_v14  ;;  %vm766_vm8 = vweird.f32 %v6002_v63 }
  0xbd   :  { %v334_v4 = vmul.f32 %v7307_v46, %v333_v42  ;;  %v314_v27 = vmul.f32 %v313_v32, %v7198_v47  ;;  %v7370_v42 = vmul.f32 %v265_v33, %v7158_v23  ;;  %v7382_v16 = vmax.f32 %v187_v48, 1e-15  ;;  %vm767_vm10 = vmor %vm765_vm7, %vm766_vm8 }
  0xbe   :  { %v302_v59 = vmul.f32 %v301_v36, %v7207_v2  ;;  %v762_v50 = vsub.f32 1.0, %v761_v53  ;;  %vm7378_vm9 = vcmp.eq.f32.partialorder %v769_v18, 8.507059e+37  ;;  %v6004_v1 = vpop.eup %6003  ;;  %vm780_vm11 = vweird.f32 %v7323_v61 }
  0xbf   :  { %v7375_v31 = vmul.f32 0.5, %v334_v4  ;;  %v784_v17 = vand.u32 2147483647, %v7323_v61  ;;  %v7388_v33 = vmax.f32 %v223_v20, 1e-15  ;;  %vm233_vm12 = vcmp.eq.f32.partialorder %v7133_v7, 0.0 }
  0xc0   :  { %v304_v15 = vsel %vm303_vm4, %v7207_v2, %v302_v59  ;;  %v763_v52 = vmul.f32 %v6002_v63, %v762_v50  ;;  %v7396_v53 = vsel %vm315_vm6, %v7198_v47, %v314_v27  ;;  %v776_v14 = vmul.f32 %v6004_v1, %v7323_v61  ;;  %v6006_v39 = vpop.eup %6005 }
  0xc1   :  { %v307_v36 = vsel %vm305_vm5, %v306_v6, %v304_v15  ;;  %v786_v4 = vand.u32 2147483648, %v7323_v61  ;;  %v336_v59 = vsub.f32 1.5, %v7375_v31  ;;  %v829_v6 = vand.u32 2147483647, %v7339_v8  ;;  %v11506_v15 = vld [vmem:[#allocation19_spill] sm:$0xff] }
  0xc2   :  { %v667_v9 = vpop.permute.xlu1 %666  ;;  %v764_v58 = vadd.f32 %v6002_v63, %v763_v52  ;;  %v692_v50 = vpop.permute.xlu2 %691  ;;  %6007 = vrcp.f32 %v7382_v16  ;;  %vm197_vm13 = vcmp.eq.f32.partialorder %v7094_v11, 0.0  ;;  %v7407_v48 = vmax.f32 %v307_v36, 1e-15 }
  0xc3   :  { %v744_v24 = vmul.f32 %v667_v9, %v11501_v10  ;;  %v777_v9 = vsub.f32 1.0, %v776_v14  ;;  %vm7409_vm14 = vcmp.eq.f32.partialorder %v784_v17, 8.507059e+37  ;;  %vm825_vm15 = vweird.f32 %v7339_v8 }
  0xc4   :  { %v768_v45 = vsel %vm767_vm10, %v6002_v63, %v764_v58  ;;  %v821_v63 = vmul.f32 %v6006_v39, %v7339_v8  ;;  %v831_v27 = vand.u32 2147483648, %v7339_v8  ;;  %6009 = vrcp.f32 %v7388_v33 }
  0xc5   :  { %v773_v2 = vsel %vm7378_vm9, %v772_v55, %v768_v45  ;;  %v7417_v52 = vmul.f32 %v692_v50, %v11506_v15  ;;  %v778_v55 = vmul.f32 %v6004_v1, %v777_v9  ;;  %vm781_vm0 = vweird.f32 %v6004_v1 }
  0xc6   :  { %v677_v32 = vpop.permute.xlu0 %676  ;;  %v774_v18 = vmul.f32 %v773_v2, %v744_v24  ;;  %v822_v10 = vsub.f32 1.0, %v821_v63  ;;  %vm257_vm1 = vcmp.eq.f32.partialorder %v7123_v25, 0.0  ;;  %v787_v58 = vor.u32 1.1754944e-38, %v786_v4  ;;  %v11509_v2 = vld [vmem:[#allocation17_spill] sm:$0xff]  ;;  %vm782_vm5 = vmor %vm780_vm11, %vm781_vm0 }
  0xc7   :  { %vm7420_vm2 = vcmp.eq.f32.partialorder %v829_v6, 8.507059e+37  ;;  %v799_v17 = vand.u32 2147483647, %v7382_v16  ;;  %v801_v36 = vand.u32 2147483648, %v7382_v16  ;;  %v779_v45 = vadd.f32 %v6004_v1, %v778_v55  ;;  %v11510_v6 = vld [vmem:[#allocation16_spill] sm:$0xff] }
  0xc8   :  { %1016 = vmatmul.f32.vlgmr.msra.gmra.mxu0 %v774_v18  ;;  %v823_v14 = vmul.f32 %v6006_v39, %v822_v10  ;;  %vm826_vm3 = vweird.f32 %v6006_v39  ;;  %6011 = vrcp.f32 %v7407_v48  ;;  %v6008_v50 = vpop.eup %6007  ;;  %vm267_vm4 = vcmp.eq.f32.partialorder %v7158_v23, inf }
  0xc9   :  { %v746_v18 = vmul.f32 %v677_v32, %v11509_v2  ;;  %v832_v4 = vor.u32 1.1754944e-38, %v831_v27  ;;  %vm795_vm6 = vweird.f32 %v7382_v16  ;;  %vm840_vm7 = vweird.f32 %v7388_v33  ;;  %vm827_vm9 = vmor %vm825_vm15, %vm826_vm3 }
  0xca   :  { %v687_v24 = vpop.permute.xlu1 %686  ;;  %v783_v15 = vsel %vm782_vm5, %v6004_v1, %v779_v45  ;;  %v824_v55 = vadd.f32 %v6006_v39, %v823_v14  ;;  %v791_v10 = vmul.f32 %v6008_v50, %v7382_v16  ;;  %v6010_v41 = vpop.eup %6009  ;;  %vm317_vm8 = vcmp.eq.f32.partialorder %v7198_v47, 0.0 }
  0xcb   :  { %v748_v63 = vmul.f32 %v687_v24, %v11510_v6  ;;  %v788_v32 = vsel %vm7409_vm14, %v787_v58, %v783_v15  ;;  %vm7444_vm10 = vcmp.eq.f32.partialorder %v799_v17, 8.507059e+37  ;;  %v802_v27 = vor.u32 1.1754944e-38, %v801_v36 }
  0xcc   :  { %v844_v1 = vand.u32 2147483647, %v7388_v33  ;;  %v789_v24 = vmul.f32 %v788_v32, %v7321_v60  ;;  %v828_v45 = vsel %vm827_vm9, %v6006_v39, %v824_v55  ;;  %v792_v14 = vsub.f32 1.0, %v791_v10 }
  0xcd   :  { %v836_v2 = vmul.f32 %v6010_v41, %v7388_v33  ;;  %v833_v20 = vsel %vm7420_vm2, %v832_v4, %v828_v45  ;;  %v846_v58 = vand.u32 2147483648, %v7388_v33  ;;  %v199_v8 = vsel %vm197_vm13, %v198_v34, %v7260_v62  ;;  %v7469_v62 = vpop.permute.xlu2 %701 }
  0xce   :  { %v7429_v9 = vpop.permute.xlu0 %711  ;;  %v235_v60 = vsel %vm233_vm12, %v234_v29, %v7328_v3  ;;  %v6012_v39 = vpop.eup %6011  ;;  %vm327_vm11 = vcmp.eq.f32.partialorder %v7196_v13, inf  ;;  %v834_v0 = vmul.f32 %v833_v20, %v748_v63  ;;  %v793_v17 = vmul.f32 %v6008_v50, %v792_v14 }
  0xcf   :  { %vm796_vm14 = vweird.f32 %v6008_v50  ;;  %vm945_vm15 = vweird.f32 %v7407_v48  ;;  %v837_v36 = vsub.f32 1.0, %v836_v2  ;;  %vm841_vm0 = vweird.f32 %v6010_v41 }
  0xd0   :  { %1019 = vmatmul.f32.gmra.mxu0 %v789_v24  ;;  %v941_v11 = vmul.f32 %v6012_v39, %v7407_v48  ;;  %v7467_v34 = vmax.f32 %v199_v8, 1e-15  ;;  %1028 = vmatmul.f32.vlgmr.msra.gmra.mxu1 %v834_v0  ;;  %v794_v7 = vadd.f32 %v6008_v50, %v793_v17  ;;  %vm7471_vm12 = vcmp.eq.f32.partialorder %v844_v1, 8.507059e+37  ;;  %vm797_vm13 = vmor %vm795_vm6, %vm796_vm14 }
  0xd1   :  { %v951_v3 = vand.u32 2147483648, %v7407_v48  ;;  %v7476_v4 = vmax.f32 %v235_v60, 1e-15  ;;  %v838_v6 = vmul.f32 %v6010_v41, %v837_v36  ;;  %v847_v63 = vor.u32 1.1754944e-38, %v846_v58  ;;  %vm7485_vm3 = vmor %vm840_vm7, %vm841_vm0 }
  0xd2   :  { %v942_v15 = vsub.f32 1.0, %v941_v11  ;;  %6013 = vrcp.f32 %v7467_v34  ;;  %vm269_vm2 = vcmp.eq.f32.partialorder %v7158_v23, 0.0  ;;  %v798_v10 = vsel %vm797_vm13, %v6008_v50, %v794_v7 }
  0xd3   :  { %vm946_vm5 = vweird.f32 %v6012_v39  ;;  %v949_v16 = vand.u32 2147483647, %v7407_v48  ;;  %v259_v1 = vsel %vm257_vm1, %v258_v35, %v7288_v22  ;;  %v803_v24 = vsel %vm7444_vm10, %v802_v27, %v798_v10  ;;  %v11517_v22 = vld [vmem:[#allocation30_spill] sm:$0xff] }
  0xd4   :  { %v839_v50 = vadd.f32 %v6010_v41, %v838_v6  ;;  %v943_v45 = vmul.f32 %v6012_v39, %v942_v15  ;;  %6015 = vrcp.f32 %v7476_v4  ;;  %vm245_vm6 = vcmp.eq.f32.partialorder %v7125_v38, 0.0 }
  0xd5   :  { %v268_v33 = vsel %vm267_vm4, %v7158_v23, %v7370_v42  ;;  %v804_v14 = vmul.f32 %v803_v24, %v746_v18  ;;  %v952_v2 = vor.u32 1.1754944e-38, %v951_v3  ;;  %v319_v25 = vsel %vm317_vm8, %v318_v40, %v7396_v53  ;;  %vm947_vm4 = vmor %vm945_vm15, %vm946_vm5  ;;  %v11519_v3 = vld [vmem:[#allocation24_spill] sm:$0xff] }
  0xd6   :  { %v727_v55 = vpop.permute.xlu0 %726  ;;  %v326_v35 = vmul.f32 %v7373_v30, %v7196_v13  ;;  %v843_v27 = vsel %vm7485_vm3, %v6010_v41, %v839_v50  ;;  %v944_v20 = vadd.f32 %v6012_v39, %v943_v45  ;;  %vm281_vm1 = vcmp.eq.f32.partialorder %v7151_v56, 0.0  ;;  %v697_v41 = vpop.permute.xlu1 %696 }
  0xd7   :  { %v756_v61 = vmul.f32 %v727_v55, %v11517_v22  ;;  %v337_v42 = vmul.f32 %v7307_v46, %v336_v59  ;;  %v848_v47 = vsel %vm7471_vm12, %v847_v63, %v843_v27  ;;  %vm950_vm7 = vcmp.eq.f32.partialorder %v949_v16, 8.507059e+37  ;;  %v11518_v46 = vld [vmem:[#allocation20_spill] sm:$0xff] }
  0xd8   :  { %1022 = vmatmul.f32.gmra.mxu0 %v804_v14  ;;  %v7522_v40 = vmax.f32 %v259_v1, 1e-15  ;;  %v6014_v30 = vpop.eup %6013  ;;  %v849_v53 = vmul.f32 %v848_v47, %v7417_v52  ;;  %v948_v18 = vsel %vm947_vm4, %v6012_v39, %v944_v20  ;;  %v814_v31 = vand.u32 2147483647, %v7467_v34 }
  0xd9   :  { %v7526_v58 = vmax.f32 %v319_v25, 1e-15  ;;  %v747_v59 = vmul.f32 %v7337_v5, %v11518_v46  ;;  %v953_v8 = vsel %vm950_vm7, %v952_v2, %v948_v18  ;;  %v806_v60 = vmul.f32 %v6014_v30, %v7467_v34  ;;  %v7541_v5 = vpop.permute.xlu2 %716 }
  0xda   :  { %v816_v48 = vand.u32 2147483648, %v7467_v34  ;;  %v6016_v0 = vpop.eup %6015  ;;  %v7535_v17 = vsel %vm327_vm11, %v7196_v13, %v326_v35  ;;  %1031 = vmatmul.f32.gmra.mxu1 %v849_v53  ;;  %v954_v52 = vmul.f32 %v953_v8, %v756_v61  ;;  %v859_v39 = vand.u32 2147483647, %v7476_v4 }
  0xdb   :  { %6017 = vrcp.f32 %v7522_v40  ;;  %v338_v36 = vmul.f32 %v337_v42, %v7265_v26  ;;  %vm339_vm8 = vcmp.eq.f32.partialorder %v7265_v26, inf  ;;  %v807_v11 = vsub.f32 1.0, %v806_v60 }
  0xdc   :  { %v851_v7 = vmul.f32 %v6016_v0, %v7476_v4  ;;  %v861_v29 = vand.u32 2147483648, %v7476_v4  ;;  %v750_v6 = vmul.f32 %v697_v41, %v11519_v3  ;;  %1052 = vmatmul.f32.vlgmr.msra.gmra.mxu3 %v954_v52  ;;  %vm810_vm9 = vweird.f32 %v7467_v34 }
  0xdd   :  { %vm7547_vm10 = vcmp.eq.f32.partialorder %v814_v31, 8.507059e+37  ;;  %6019 = vrcp.f32 %v7526_v58  ;;  %v808_v15 = vmul.f32 %v6014_v30, %v807_v11  ;;  %vm811_vm11 = vweird.f32 %v6014_v30  ;;  %v11524_v31 = vld [vmem:[#allocation23_spill] sm:$0xff] }
  0xde   :  { %v817_v55 = vor.u32 1.1754944e-38, %v816_v48  ;;  %v852_v10 = vsub.f32 1.0, %v851_v7  ;;  %vm855_vm14 = vweird.f32 %v7476_v4  ;;  %vm7553_vm15 = vcmp.eq.f32.partialorder %v859_v39, 8.507059e+37  ;;  %vm812_vm13 = vmor %vm810_vm9, %vm811_vm11  ;;  %v707_v25 = vpop.permute.xlu1 %706 }
  0xdf   :  { %v247_v16 = vsel %vm245_vm6, %v246_v43, %v7298_v19  ;;  %v271_v1 = vsel %vm269_vm2, %v270_v44, %v268_v33  ;;  %vm329_vm0 = vcmp.eq.f32.partialorder %v7196_v13, 0.0  ;;  %v809_v24 = vadd.f32 %v6014_v30, %v808_v15 }
  0xe0   :  { %v853_v50 = vmul.f32 %v6016_v0, %v852_v10  ;;  %vm856_vm12 = vweird.f32 %v6016_v0  ;;  %v862_v45 = vor.u32 1.1754944e-38, %v861_v29  ;;  %vm885_vm3 = vweird.f32 %v7522_v40 }
  0xe1   :  { %v6018_v14 = vpop.eup %6017  ;;  %v889_v38 = vand.u32 2147483647, %v7522_v40  ;;  %v7571_v43 = vmax.f32 %v247_v16, 1e-15  ;;  %v283_v23 = vsel %vm281_vm1, %v282_v28, %v7349_v37  ;;  %v813_v44 = vsel %vm812_vm13, %v6014_v30, %v809_v24  ;;  %vm857_vm5 = vmor %vm855_vm14, %vm856_vm12  ;;  %v732_v4 = vpop.permute.xlu2 %731 }
  0xe2   :  { %v854_v19 = vadd.f32 %v6016_v0, %v853_v50  ;;  %v881_v33 = vmul.f32 %v6018_v14, %v7522_v40  ;;  %v7579_v2 = vmax.f32 %v271_v1, 1e-15  ;;  %vm293_vm2 = vcmp.eq.f32.partialorder %v7149_v57, 0.0 }
  0xe3   :  { %v6020_v34 = vpop.eup %6019  ;;  %v818_v35 = vsel %vm7547_vm10, %v817_v55, %v813_v44  ;;  %vm886_vm6 = vweird.f32 %v6018_v14  ;;  %v891_v56 = vand.u32 2147483648, %v7522_v40  ;;  %6021 = vrcp.f32 %v7571_v43 }
  0xe4   :  { %v819_v28 = vmul.f32 %v818_v35, %v747_v59  ;;  %v858_v37 = vsel %vm857_vm5, %v6016_v0, %v854_v19  ;;  %v882_v22 = vsub.f32 1.0, %v881_v33  ;;  %v956_v61 = vmul.f32 %v6020_v34, %v7526_v58  ;;  %v11525_v59 = vld [vmem:[#allocation22_spill] sm:$0xff]  ;;  %vm7607_vm4 = vmor %vm885_vm3, %vm886_vm6 }
  0xe5   :  { %v863_v27 = vsel %vm7553_vm15, %v862_v45, %v858_v37  ;;  %v964_v20 = vand.u32 2147483647, %v7526_v58  ;;  %v966_v42 = vand.u32 2147483648, %v7526_v58  ;;  %v7594_v47 = vmax.f32 %v283_v23, 1e-15  ;;  %v742_v23 = vpop.permute.xlu0 %741 }
  0xe6   :  { %1025 = vmatmul.f32.gmra.mxu0 %v819_v28  ;;  %v864_v30 = vmul.f32 %v863_v27, %v750_v6  ;;  %v883_v41 = vmul.f32 %v6018_v14, %v882_v22  ;;  %v957_v53 = vsub.f32 1.0, %v956_v61  ;;  %6023 = vrcp.f32 %v7579_v2  ;;  %v7629_v1 = vpop.permute.xlu1 %721  ;;  %v11534_v22 = vld [vmem:[#allocation27_spill] sm:$0xff] }
  0xe7   :  { %v340_v18 = vsel %vm339_vm8, %v7265_v26, %v338_v36  ;;  %vm341_vm1 = vcmp.eq.f32.partialorder %v7265_v26, 0.0  ;;  %v751_v46 = vmul.f32 %v7469_v62, %v11524_v31  ;;  %v752_v8 = vmul.f32 %v707_v25, %v11525_v59  ;;  %v11528_v36 = vld [vmem:[#allocation29_spill] sm:$0xff] }
  0xe8   :  { %v892_v48 = vor.u32 1.1754944e-38, %v891_v56  ;;  %1034 = vmatmul.f32.gmra.mxu1 %v864_v30  ;;  %v884_v0 = vadd.f32 %v6018_v14, %v883_v41  ;;  %vm890_vm7 = vcmp.eq.f32.partialorder %v889_v38, 8.507059e+37  ;;  %v958_v52 = vmul.f32 %v6020_v34, %v957_v53 }
  0xe9   :  { %vm961_vm8 = vweird.f32 %v6020_v34  ;;  %v6022_v39 = vpop.eup %6021  ;;  %v757_v11 = vmul.f32 %v732_v4, %v11528_v36  ;;  %vm960_vm9 = vweird.f32 %v7526_v58  ;;  %vm7613_vm10 = vcmp.eq.f32.partialorder %v964_v20, 8.507059e+37  ;;  %v11536_v36 = vld [vmem:[#allocation28_spill] sm:$0xff] }
  0xea   :  { %6025 = vrcp.f32 %v7594_v47  ;;  %v888_v40 = vsel %vm7607_vm4, %v6018_v14, %v884_v0  ;;  %v959_v7 = vadd.f32 %v6020_v34, %v958_v52  ;;  %v967_v29 = vor.u32 1.1754944e-38, %v966_v42  ;;  %vm962_vm11 = vmor %vm960_vm9, %vm961_vm8  ;;  %v11535_v52 = vld [vmem:[#allocation26_spill] sm:$0xff] }
  0xeb   :  { %v866_v3 = vmul.f32 %v6022_v39, %v7571_v43  ;;  %v893_v6 = vsel %vm890_vm7, %v892_v48, %v888_v40  ;;  %v874_v63 = vand.u32 2147483647, %v7571_v43  ;;  %v876_v15 = vand.u32 2147483648, %v7571_v43 }
  0xec   :  { %v331_v58 = vsel %vm329_vm0, %v330_v12, %v7535_v17  ;;  %v6024_v55 = vpop.eup %6023  ;;  %v894_v10 = vmul.f32 %v893_v6, %v752_v8  ;;  %v963_v32 = vsel %vm962_vm11, %v6020_v34, %v959_v7  ;;  %vm870_vm14 = vweird.f32 %v7571_v43 }
  0xed   :  { %v867_v16 = vsub.f32 1.0, %v866_v3  ;;  %v968_v24 = vsel %vm7613_vm10, %v967_v29, %v963_v32  ;;  %vm871_vm15 = vweird.f32 %v6022_v39  ;;  %v896_v50 = vmul.f32 %v6024_v55, %v7579_v2 }
  0xee   :  { %v906_v45 = vand.u32 2147483648, %v7579_v2  ;;  %1040 = vmatmul.f32.vlgmr.msra.gmra.mxu2 %v894_v10  ;;  %v969_v14 = vmul.f32 %v968_v24, %v757_v11  ;;  %v7635_v12 = vmax.f32 %v331_v58, 1e-15  ;;  %v295_v17 = vsel %vm293_vm2, %v294_v54, %v7333_v21  ;;  %vm872_vm13 = vmor %vm870_vm14, %vm871_vm15  ;;  %v737_v53 = vpop.permute.xlu1 %736 }
  0xef   :  { %v868_v13 = vmul.f32 %v6022_v39, %v867_v16  ;;  %vm7644_vm0 = vcmp.eq.f32.partialorder %v874_v63, 8.507059e+37  ;;  %v877_v44 = vor.u32 1.1754944e-38, %v876_v15  ;;  %v897_v19 = vsub.f32 1.0, %v896_v50 }
  0xf0   :  { %v7642_v38 = vpop.eup %6025  ;;  %v7648_v33 = vmax.f32 %v295_v17, 1e-15  ;;  %1055 = vmatmul.f32.gmra.mxu3 %v969_v14  ;;  %vm900_vm12 = vweird.f32 %v7579_v2  ;;  %6027 = vrcp.f32 %v7635_v12  ;;  %vm901_vm3 = vweird.f32 %v6024_v55 }
  0xf1   :  { %v869_v34 = vadd.f32 %v6022_v39, %v868_v13  ;;  %v911_v25 = vmul.f32 %v7642_v38, %v7594_v47  ;;  %v898_v57 = vmul.f32 %v6024_v55, %v897_v19  ;;  %v904_v54 = vand.u32 2147483647, %v7579_v2  ;;  %vm902_vm2 = vmor %vm900_vm12, %vm901_vm3  ;;  %v11541_v19 = vld [vmem:[#allocation25_spill] sm:$0xff] }
  0xf2   :  { %v907_v21 = vor.u32 1.1754944e-38, %v906_v45  ;;  %6029 = vrcp.f32 %v7648_v33  ;;  %v11533_v28 = vand.u32 2147483648, %v7265_v26  ;;  %v753_v61 = vmul.f32 %v7429_v9, %v11534_v22 }
  0xf3   :  { %v873_v35 = vsel %vm872_vm13, %v6022_v39, %v869_v34  ;;  %v912_v56 = vsub.f32 1.0, %v911_v25  ;;  %v899_v27 = vadd.f32 %v6024_v55, %v898_v57  ;;  %vm905_vm5 = vcmp.eq.f32.partialorder %v904_v54, 8.507059e+37 }
  0xf4   :  { %v343_v37 = vsel %vm341_vm1, %v11533_v28, %v340_v18  ;;  %v878_v43 = vsel %vm7644_vm0, %v877_v44, %v873_v35  ;;  %vm915_vm6 = vweird.f32 %v7594_v47  ;;  %vm916_vm1 = vweird.f32 %v7642_v38 }
  0xf5   :  { %v879_v20 = vmul.f32 %v878_v43, %v751_v46  ;;  %v913_v42 = vmul.f32 %v7642_v38, %v912_v56  ;;  %v903_v4 = vsel %vm902_vm2, %v6024_v55, %v899_v27  ;;  %v7670_v30 = vmax.f32 %v343_v37, 1e-15  ;;  %vm7690_vm8 = vmor %vm915_vm6, %vm916_vm1 }
  0xf6   :  { %v6028_v41 = vpop.eup %6027  ;;  %v908_v26 = vsel %vm905_vm5, %v907_v21, %v903_v4  ;;  %v919_v46 = vand.u32 2147483647, %v7594_v47  ;;  %v921_v59 = vand.u32 2147483648, %v7594_v47  ;;  %vm975_vm4 = vweird.f32 %v7635_v12  ;;  %v11542_v21 = vld [vmem:[#allocation31_spill] sm:$0xff] }
  0xf7   :  { %1037 = vmatmul.f32.gmra.mxu1 %v879_v20  ;;  %v909_v9 = vmul.f32 %v908_v26, %v753_v61  ;;  %v914_v18 = vadd.f32 %v7642_v38, %v913_v42  ;;  %v971_v2 = vmul.f32 %v6028_v41, %v7635_v12  ;;  %6031 = vrcp.f32 %v7670_v30 }
  0xf8   :  { %v6030_v31 = vpop.eup %6029  ;;  %v981_v8 = vand.u32 2147483648, %v7635_v12  ;;  %vm976_vm7 = vweird.f32 %v6028_v41  ;;  %v979_v48 = vand.u32 2147483647, %v7635_v12  ;;  %v754_v39 = vmul.f32 %v7541_v5, %v11535_v52 }
  0xf9   :  { %1043 = vmatmul.f32.gmra.mxu2 %v909_v9  ;;  %v972_v60 = vsub.f32 1.0, %v971_v2  ;;  %v926_v0 = vmul.f32 %v6030_v31, %v7648_v33  ;;  %v758_v11 = vmul.f32 %v737_v53, %v11536_v36  ;;  %vm930_vm9 = vweird.f32 %v7648_v33  ;;  %vm977_vm14 = vmor %vm975_vm4, %vm976_vm7 }
  0xfa   :  { %v918_v40 = vsel %vm7690_vm8, %v7642_v38, %v914_v18  ;;  %vm931_vm10 = vweird.f32 %v6030_v31  ;;  %vm920_vm11 = vcmp.eq.f32.partialorder %v919_v46, 8.507059e+37  ;;  %v922_v5 = vor.u32 1.1754944e-38, %v921_v59 }
  0xfb   :  { %v973_v7 = vmul.f32 %v6028_v41, %v972_v60  ;;  %v927_v29 = vsub.f32 1.0, %v926_v0  ;;  %v982_v3 = vor.u32 1.1754944e-38, %v981_v8  ;;  %v936_v47 = vand.u32 2147483648, %v7648_v33  ;;  %vm7704_vm0 = vmor %vm930_vm9, %vm931_vm10 }
  0xfc   :  { %vm980_vm15 = vcmp.eq.f32.partialorder %v979_v48, 8.507059e+37  ;;  %v934_v58 = vand.u32 2147483647, %v7648_v33  ;;  %v923_v55 = vsel %vm920_vm11, %v922_v5, %v918_v40  ;;  %v996_v12 = vand.u32 2147483648, %v7670_v30 }
  0xfd   :  { %v6032_v6 = vpop.eup %6031  ;;  %v974_v63 = vadd.f32 %v6028_v41, %v973_v7  ;;  %v928_v15 = vmul.f32 %v6030_v31, %v927_v29  ;;  %v924_v16 = vmul.f32 %v923_v55, %v754_v39  ;;  %v937_v14 = vor.u32 1.1754944e-38, %v936_v47 }
  0xfe   :  { %v986_v32 = vmul.f32 %v6032_v6, %v7670_v30  ;;  %vm935_vm12 = vcmp.eq.f32.partialorder %v934_v58, 8.507059e+37  ;;  %vm990_vm13 = vweird.f32 %v7670_v30  ;;  %vm991_vm3 = vweird.f32 %v6032_v6 }
  0xff   :  { %v978_v24 = vsel %vm977_vm14, %v6028_v41, %v974_v63  ;;  %v929_v50 = vadd.f32 %v6030_v31, %v928_v15  ;;  %v755_v33 = vmul.f32 %v7629_v1, %v11541_v19  ;;  %v994_v34 = vand.u32 2147483647, %v7670_v30  ;;  %vm992_vm2 = vmor %vm990_vm13, %vm991_vm3 }
 0x100   :  { %v983_v45 = vsel %vm980_vm15, %v982_v3, %v978_v24  ;;  %v987_v13 = vsub.f32 1.0, %v986_v32  ;;  %v997_v54 = vor.u32 1.1754944e-38, %v996_v12  ;;  %v759_v35 = vmul.f32 %v742_v23, %v11542_v21 }
 0x101   :  { %1046 = vmatmul.f32.gmra.mxu2 %v924_v16  ;;  %v984_v17 = vmul.f32 %v983_v45, %v758_v11  ;;  %v933_v38 = vsel %vm7704_vm0, %v6030_v31, %v929_v50  ;;  %vm995_vm5 = vcmp.eq.f32.partialorder %v994_v34, 8.507059e+37 }
 0x102   :  { %v988_v44 = vmul.f32 %v6032_v6, %v987_v13  ;;  %v938_v25 = vsel %vm935_vm12, %v937_v14, %v933_v38 }
 0x103   :  { %1058 = vmatmul.f32.gmra.mxu3 %v984_v17  ;;  %v939_v28 = vmul.f32 %v938_v25, %v755_v33 }
 0x104   :  { %v989_v57 = vadd.f32 %v6032_v6, %v988_v44 }
 0x106   :  { %v993_v56 = vsel %vm992_vm2, %v6032_v6, %v989_v57 }
 0x107   :  { %v998_v37 = vsel %vm995_vm5, %v997_v54, %v993_v56  ;;  %v7799_v56 = vpop.permute.xlu0 %2290 }
 0x108   :  { %v999_v22 = vmul.f32 %v998_v37, %v759_v35  ;;  %11551 = vst [vmem:[#allocation23_spill] sm:$0xff] %v7799_v56 }
 0x109   :  { %1049 = vmatmul.f32.gmra.mxu2 %v939_v28 }
 0x10b   :  { %1061 = vmatmul.f32.gmra.mxu3 %v999_v22 }
 0x113   :  { %v7797_v23 = vpop.xlane.xlu2 %2254 }
 0x114   :  { %11550 = vst [vmem:[#allocation24_spill] sm:$0xff] %v7797_v23 }
 0x145   :  { %v1017_v61 = vpop.f32.mrf.mxu0 }
 0x146   :  { %v7718_v43 = vmul.f32 %v11498_v49, %v1017_v61 }
 0x148   :  { %v1082_v1 = vmul.f32 %v7718_v43, %v7718_v43 }
 0x14a   :  { %1098 = vadd.xlane.f32.xlu2 %v1082_v1 }
 0x14d   :  { %v1029_v27 = vpop.f32.mrf.mxu1  ;;  %v1020_v4 = vpop.f32.mrf.mxu0 }
 0x14e   :  { %v7723_v20 = vmul.f32 %v11498_v49, %v1029_v27  ;;  %v7728_v30 = vmul.f32 %v11498_v49, %v1020_v4 }
 0x150   :  { %v1086_v42 = vmul.f32 %v7723_v20, %v7723_v20  ;;  %v1083_v41 = vmul.f32 %v7728_v30, %v7728_v30 }
 0x152   :  { %1106 = vadd.xlane.f32.xlu1 %v1086_v42 }
 0x155   :  { %v1023_v62 = vpop.f32.mrf.mxu0 }
 0x156   :  { %v7758_v40 = vmul.f32 %v11498_v49, %v1023_v62 }
 0x157   :  { %v1032_v46 = vpop.f32.mrf.mxu1 }
 0x158   :  { %v7748_v48 = vmul.f32 %v11498_v49, %v1032_v46  ;;  %11543 = vst [vmem:[#allocation21_spill] sm:$0xff] %v7758_v40  ;;  %v1084_v47 = vmul.f32 %v7758_v40, %v7758_v40 }
 0x15a   :  { %1100 = vadd.xlane.f32.xlu1 %v1083_v41  ;;  %v1087_v52 = vmul.f32 %v7748_v48, %v7748_v48 }
 0x15f   :  { %v1053_v26 = vpop.f32.mrf.mxu3 }
 0x160   :  { %v7733_v9 = vmul.f32 %v11498_v49, %v1053_v26 }
 0x162   :  { %v1094_v53 = vmul.f32 %v7733_v9, %v7733_v9 }
 0x163   :  { %v1026_v58 = vpop.f32.mrf.mxu0 }
 0x164   :  { %1122 = vadd.xlane.f32.xlu0 %v1094_v53  ;;  %v7779_v32 = vmul.f32 %v11498_v49, %v1026_v58 }
 0x165   :  { %v1035_v36 = vpop.f32.mrf.mxu1 }
 0x166   :  { %v7773_v55 = vmul.f32 %v11498_v49, %v1035_v36  ;;  %11547 = vst [vmem:[#allocation16_spill] sm:$0xff] %v7779_v32  ;;  %v1085_v45 = vmul.f32 %v7779_v32, %v7779_v32 }
 0x168   :  { %11545 = vst [vmem:[#allocation19_spill] sm:$0xff] %v7773_v55  ;;  %v1088_v16 = vmul.f32 %v7773_v55, %v7773_v55 }
 0x171   :  { %v1041_v18 = vpop.f32.mrf.mxu2 }
 0x172   :  { %v7738_v2 = vmul.f32 %v11498_v49, %v1041_v18 }
 0x173   :  { %v1056_v31 = vpop.f32.mrf.mxu3 }
 0x174   :  { %v7741_v59 = vmul.f32 %v11498_v49, %v1056_v31  ;;  %v1090_v8 = vmul.f32 %v7738_v2, %v7738_v2  ;;  %v1038_v63 = vpop.f32.mrf.mxu1 }
 0x175   :  { %v7776_v10 = vmul.f32 %v11498_v49, %v1038_v63 }
 0x176   :  { %1114 = vadd.xlane.f32.xlu2 %v1090_v8  ;;  %v1095_v60 = vmul.f32 %v7741_v59, %v7741_v59 }
 0x177   :  { %11546 = vst [vmem:[#allocation17_spill] sm:$0xff] %v7776_v10  ;;  %v1089_v24 = vmul.f32 %v7776_v10, %v7776_v10 }
 0x178   :  { %1124 = vadd.xlane.f32.xlu1 %v1095_v60 }
 0x17c   :  { %v1044_v0 = vpop.f32.mrf.mxu2 }
 0x17d   :  { %v7753_v39 = vmul.f32 %v11498_v49, %v1044_v0 }
 0x17e   :  { %1108 = vadd.xlane.f32.xlu2 %v1087_v52 }
 0x17f   :  { %v1091_v11 = vmul.f32 %v7753_v39, %v7753_v39 }
 0x181   :  { %1116 = vadd.xlane.f32.xlu0 %v1091_v11 }
 0x184   :  { %v1047_v7 = vpop.f32.mrf.mxu2 }
 0x185   :  { %v7761_v29 = vmul.f32 %v11498_v49, %v1047_v7 }
 0x186   :  { %v1059_v5 = vpop.f32.mrf.mxu3 }
 0x187   :  { %v7764_v3 = vmul.f32 %v11498_v49, %v1059_v5  ;;  %v1092_v6 = vmul.f32 %v7761_v29, %v7761_v29 }
 0x189   :  { %11544 = vst [vmem:[#allocation18_spill] sm:$0xff] %v7764_v3  ;;  %1102 = vadd.xlane.f32.xlu0 %v1084_v47  ;;  %1118 = vadd.xlane.f32.xlu1 %v1092_v6  ;;  %v1096_v15 = vmul.f32 %v7764_v3, %v7764_v3 }
 0x18b   :  { %1126 = vadd.xlane.f32.xlu2 %v1096_v15 }
 0x18c   :  { %v1050_v14 = vpop.f32.mrf.mxu2 }
 0x18d   :  { %v7791_v12 = vmul.f32 %v11498_v49, %v1050_v14 }
 0x18e   :  { %v1062_v50 = vpop.f32.mrf.mxu3 }
 0x18f   :  { %v7788_v13 = vmul.f32 %v11498_v49, %v1062_v50  ;;  %11549 = vst [vmem:[#allocation20_spill] sm:$0xff] %v7791_v12  ;;  %v1093_v38 = vmul.f32 %v7791_v12, %v7791_v12 }
 0x191   :  { %1110 = vadd.xlane.f32.xlu0 %v1088_v16  ;;  %1112 = vadd.xlane.f32.xlu1 %v1089_v24  ;;  %11548 = vst [vmem:[#allocation30_spill] sm:$0xff] %v7788_v13  ;;  %v1097_v17 = vmul.f32 %v7788_v13, %v7788_v13 }
 0x193   :  { %1104 = vadd.xlane.f32.xlu2 %v1085_v45 }
 0x199   :  { %1128 = vadd.xlane.f32.xlu0 %v1097_v17 }
 0x19b   :  { %1120 = vadd.xlane.f32.xlu2 %v1093_v38 }
 0x1bd   :  { %v1099_v44 = vpop.xlane.xlu2 %1098 }
 0x1be   :  { %6033 = vrsqrt.f32 %v1099_v44  ;;  %vm1137_vm6 = vcmp.eq.f32.partialorder %v1099_v44, inf  ;;  %v1140_v60 = vand.u32 2147483648, %v1099_v44  ;;  %vm1139_vm1 = vcmp.eq.f32.partialorder %v1099_v44, 0.0 }
 0x1c4   :  { %v6034_v19 = vpop.eup %6033 }
 0x1c5   :  { %v1131_v33 = vmul.f32 %v6034_v19, %v1099_v44  ;;  %v1107_v34 = vpop.xlane.xlu1 %1106 }
 0x1c6   :  { %6035 = vrsqrt.f32 %v1107_v34  ;;  %vm1185_vm4 = vcmp.eq.f32.partialorder %v1107_v34, inf  ;;  %v1188_v15 = vand.u32 2147483648, %v1107_v34  ;;  %vm1187_vm7 = vcmp.eq.f32.partialorder %v1107_v34, 0.0 }
 0x1c7   :  { %v1132_v25 = vmul.f32 %v6034_v19, %v1131_v33 }
 0x1c9   :  { %v1133_v54 = vmul.f32 0.5, %v1132_v25 }
 0x1cb   :  { %v1134_v37 = vsub.f32 1.5, %v1133_v54 }
 0x1cc   :  { %v6036_v57 = vpop.eup %6035 }
 0x1cd   :  { %v1179_v21 = vmul.f32 %v6036_v57, %v1107_v34  ;;  %v1101_v35 = vpop.xlane.xlu1 %1100  ;;  %v1135_v1 = vmul.f32 %v6034_v19, %v1134_v37 }
 0x1ce   :  { %6037 = vrsqrt.f32 %v1101_v35  ;;  %vm1149_vm8 = vcmp.eq.f32.partialorder %v1101_v35, inf  ;;  %v1152_v14 = vand.u32 2147483648, %v1101_v35  ;;  %vm1151_vm9 = vcmp.eq.f32.partialorder %v1101_v35, 0.0 }
 0x1cf   :  { %v1180_v28 = vmul.f32 %v6036_v57, %v1179_v21  ;;  %v1136_v26 = vmul.f32 %v1135_v1, %v1099_v44 }
 0x1d1   :  { %v1181_v61 = vmul.f32 0.5, %v1180_v28  ;;  %v1138_v8 = vsel %vm1137_vm6, %v1099_v44, %v1136_v26 }
 0x1d2   :  { %v1141_v52 = vsel %vm1139_vm1, %v1140_v60, %v1138_v8 }
 0x1d3   :  { %v1182_v41 = vsub.f32 1.5, %v1181_v61  ;;  %v7805_v5 = vmax.f32 %v1141_v52, 1e-15 }
 0x1d4   :  { %v6038_v22 = vpop.eup %6037 }
 0x1d5   :  { %v1143_v27 = vmul.f32 %v6038_v22, %v1101_v35  ;;  %v1183_v18 = vmul.f32 %v6036_v57, %v1182_v41  ;;  %v1338_v58 = vmul.f32 1.442695, %v7805_v5  ;;  %v1701_v60 = vand.u32 2147483648, %v7805_v5 }
 0x1d6   :  { %v1699_v52 = vand.u32 2147483647, %v7805_v5  ;;  %vm1695_vm15 = vweird.f32 %v7805_v5 }
 0x1d7   :  { %v7801_v42 = vpop.xlane.xlu0 %1122  ;;  %v1144_v4 = vmul.f32 %v6038_v22, %v1143_v27  ;;  %v1184_v36 = vmul.f32 %v1183_v18, %v1107_v34 }
 0x1d8   :  { %6039 = vrsqrt.f32 %v7801_v42  ;;  %vm1281_vm10 = vcmp.eq.f32.partialorder %v7801_v42, inf  ;;  %v1284_v61 = vand.u32 2147483648, %v7801_v42  ;;  %vm1283_vm11 = vcmp.eq.f32.partialorder %v7801_v42, 0.0 }
 0x1d9   :  { %v1145_v53 = vmul.f32 0.5, %v1144_v4  ;;  %v1186_v47 = vsel %vm1185_vm4, %v1107_v34, %v1184_v36  ;;  %6041 = vrcp.f32 %v7805_v5  ;;  %vm7868_vm3 = vcmp.eq.f32.partialorder %v1699_v52, 8.507059e+37 }
 0x1da   :  { %v1189_v16 = vsel %vm1187_vm7, %v1188_v15, %v1186_v47 }
 0x1db   :  { %v1146_v31 = vsub.f32 1.5, %v1145_v53  ;;  %v7814_v38 = vmax.f32 %v1189_v16, 1e-15 }
 0x1dd   :  { %v1147_v11 = vmul.f32 %v6038_v22, %v1146_v31  ;;  %v1346_v25 = vmul.f32 1.442695, %v7814_v38 }
 0x1de   :  { %v6040_v46 = vpop.eup %6039 }
 0x1df   :  { %v1275_v0 = vmul.f32 %v6040_v46, %v7801_v42  ;;  %v1148_v6 = vmul.f32 %v1147_v11, %v1101_v35  ;;  %v7818_v33 = vpop.eup %6041 }
 0x1e0   :  { %v1691_v37 = vmul.f32 %v7818_v33, %v7805_v5  ;;  %vm1696_vm2 = vweird.f32 %v7818_v33 }
 0x1e1   :  { %v1276_v62 = vmul.f32 %v6040_v46, %v1275_v0  ;;  %v1150_v50 = vsel %vm1149_vm8, %v1101_v35, %v1148_v6  ;;  %vm7903_vm6 = vmor %vm1695_vm15, %vm1696_vm2 }
 0x1e2   :  { %v1153_v44 = vsel %vm1151_vm9, %v1152_v14, %v1150_v50  ;;  %v1692_v31 = vsub.f32 1.0, %v1691_v37  ;;  %v1702_v50 = vor.u32 1.1754944e-38, %v1701_v60 }
 0x1e3   :  { %v1277_v7 = vmul.f32 0.5, %v1276_v62  ;;  %v7821_v57 = vmax.f32 %v1153_v44, 1e-15 }
 0x1e5   :  { %v1278_v63 = vsub.f32 1.5, %v1277_v7  ;;  %v1340_v4 = vmul.f32 1.442695, %v7821_v57 }
 0x1e7   :  { %v1279_v45 = vmul.f32 %v6040_v46, %v1278_v63  ;;  %v1693_v63 = vmul.f32 %v7818_v33, %v1692_v31 }
 0x1e9   :  { %v7809_v24 = vpop.xlane.xlu2 %1114  ;;  %v1280_v19 = vmul.f32 %v1279_v45, %v7801_v42 }
 0x1ea   :  { %6043 = vrsqrt.f32 %v7809_v24  ;;  %vm1233_vm14 = vcmp.eq.f32.partialorder %v7809_v24, inf  ;;  %vm1235_vm0 = vcmp.eq.f32.partialorder %v7809_v24, 0.0  ;;  %v1236_v47 = vand.u32 2147483648, %v7809_v24 }
 0x1eb   :  { %v7812_v17 = vpop.xlane.xlu1 %1124  ;;  %v1282_v28 = vsel %vm1281_vm10, %v7801_v42, %v1280_v19 }
 0x1ec   :  { %6045 = vrsqrt.f32 %v7812_v17  ;;  %v1285_v26 = vsel %vm1283_vm11, %v1284_v61, %v1282_v28  ;;  %vm1293_vm12 = vcmp.eq.f32.partialorder %v7812_v17, inf  ;;  %vm1295_vm13 = vcmp.eq.f32.partialorder %v7812_v17, 0.0 }
 0x1ed   :  { %6047 = vpow2.f32 %v1338_v58  ;;  %v7846_v42 = vmax.f32 %v1285_v26, 1e-15  ;;  %v1694_v26 = vadd.f32 %v7818_v33, %v1693_v63 }
 0x1ee   :  { %6049 = vrcp.f32 %v7814_v38 }
 0x1f0   :  { %v6044_v34 = vpop.eup %6043 }
 0x1f1   :  { %v1227_v54 = vmul.f32 %v6044_v34, %v7809_v24  ;;  %v7825_v21 = vpop.xlane.xlu2 %1108 }
 0x1f2   :  { %v6046_v35 = vpop.eup %6045  ;;  %6051 = vrsqrt.f32 %v7825_v21  ;;  %vm1197_vm5 = vcmp.eq.f32.partialorder %v7825_v21, inf  ;;  %vm1199_vm1 = vcmp.eq.f32.partialorder %v7825_v21, 0.0 }
 0x1f3   :  { %v7831_v22 = vpop.eup %6047  ;;  %v1228_v1 = vmul.f32 %v6044_v34, %v1227_v54  ;;  %v1287_v27 = vmul.f32 %v6046_v35, %v7812_v17  ;;  %6053 = vpow2.f32 %v1346_v25 }
 0x1f4   :  { %v7838_v41 = vpop.xlane.xlu0 %1116  ;;  %v7844_v0 = vpop.eup %6049  ;;  %v1381_v31 = vand.u32 2147483648, %v7831_v22  ;;  %vm1375_vm2 = vweird.f32 %v7831_v22 }
 0x1f5   :  { %v1229_v53 = vmul.f32 0.5, %v1228_v1  ;;  %v1288_v18 = vmul.f32 %v6046_v35, %v1287_v27  ;;  %6055 = vrsqrt.f32 %v7838_v41  ;;  %vm1245_vm4 = vcmp.eq.f32.partialorder %v7838_v41, inf }
 0x1f6   :  { %6057 = vrcp.f32 %v7831_v22  ;;  %vm1247_vm7 = vcmp.eq.f32.partialorder %v7838_v41, 0.0 }
 0x1f7   :  { %6059 = vrcp.f32 %v7821_v57  ;;  %v1230_v46 = vsub.f32 1.5, %v1229_v53  ;;  %v1289_v8 = vmul.f32 0.5, %v1288_v18  ;;  %v1296_v53 = vand.u32 2147483648, %v7812_v17 }
 0x1f8   :  { %6061 = vpow2.f32 %v1340_v4  ;;  %v6052_v36 = vpop.eup %6051 }
 0x1f9   :  { %v1231_v11 = vmul.f32 %v6044_v34, %v1230_v46  ;;  %v1290_v62 = vsub.f32 1.5, %v1289_v8  ;;  %v7851_v7 = vpop.eup %6053  ;;  %v1191_v6 = vmul.f32 %v6052_v36, %v7825_v21  ;;  %6063 = vrcp.f32 %v7846_v42 }
 0x1fb   :  { %v6056_v15 = vpop.eup %6055  ;;  %v1232_v58 = vmul.f32 %v1231_v11, %v7809_v24  ;;  %v1291_v16 = vmul.f32 %v6046_v35, %v1290_v62  ;;  %v1192_v14 = vmul.f32 %v6052_v36, %v1191_v6  ;;  %v1362_v35 = vmul.f32 1.442695, %v7846_v42 }
 0x1fc   :  { %v7859_v45 = vpop.eup %6057  ;;  %v1239_v44 = vmul.f32 %v6056_v15, %v7838_v41  ;;  %v7864_v19 = vpop.xlane.xlu1 %1118  ;;  %v1200_v62 = vand.u32 2147483648, %v7825_v21 }
 0x1fd   :  { %v7866_v34 = vpop.xlane.xlu0 %1102  ;;  %v7872_v54 = vpop.eup %6059  ;;  %v1292_v28 = vmul.f32 %v1291_v16, %v7812_v17  ;;  %6065 = vrsqrt.f32 %v7864_v19  ;;  %v1234_v61 = vsel %vm1233_vm14, %v7809_v24, %v1232_v58  ;;  %v1193_v1 = vmul.f32 0.5, %v1192_v14 }
 0x1fe   :  { %v7878_v37 = vpop.eup %6061  ;;  %v1240_v27 = vmul.f32 %v6056_v15, %v1239_v44  ;;  %v7883_v4 = vpop.xlane.xlu2 %1126  ;;  %v1371_v18 = vmul.f32 %v7859_v45, %v7831_v22  ;;  %v1237_v11 = vsel %vm1235_vm0, %v1236_v47, %v1234_v61  ;;  %v1698_v24 = vsel %vm7903_vm6, %v7818_v33, %v1694_v26 }
 0x1ff   :  { %6067 = vrsqrt.f32 %v7883_v4  ;;  %v1294_v46 = vsel %vm1293_vm12, %v7812_v17, %v1292_v28  ;;  %v1194_v8 = vsub.f32 1.5, %v1193_v1  ;;  %v7907_v63 = vpop.eup %6063  ;;  %v7917_v44 = vor.u32 1.1754944e-38, %v1381_v31 }
 0x200   :  { %v1241_v60 = vmul.f32 0.5, %v1240_v27  ;;  %6069 = vpow2.f32 %v1362_v35  ;;  %v1297_v5 = vsel %vm1295_vm13, %v1296_v53, %v1294_v46  ;;  %v1372_v14 = vsub.f32 1.0, %v1371_v18 }
 0x201   :  { %v1195_v58 = vmul.f32 %v6052_v36, %v1194_v8  ;;  %6071 = vrsqrt.f32 %v7866_v34  ;;  %v7919_v35 = vmax.f32 %v1237_v11, 1e-15  ;;  %v1248_v17 = vand.u32 2147483648, %v7838_v41 }
 0x202   :  { %v1242_v16 = vsub.f32 1.5, %v1241_v60  ;;  %v7929_v33 = vsel %vm7868_vm3, %v1702_v50, %v1698_v24  ;;  %6073 = vrcp.f32 %v7851_v7  ;;  %v7932_v26 = vmax.f32 %v1297_v5, 1e-15 }
 0x203   :  { %v6066_v47 = vpop.eup %6065  ;;  %v1196_v36 = vmul.f32 %v1195_v58, %v7825_v21  ;;  %vm1257_vm8 = vcmp.eq.f32.partialorder %v7864_v19, inf  ;;  %v7945_v50 = vmul.f32 %v7859_v45, %v1372_v14  ;;  %v1354_v11 = vmul.f32 1.442695, %v7919_v35 }
 0x204   :  { %v1243_v28 = vmul.f32 %v6056_v15, %v1242_v16  ;;  %v1251_v61 = vmul.f32 %v6066_v47, %v7864_v19  ;;  %v7923_v1 = vpop.xlane.xlu1 %1112  ;;  %vm1259_vm9 = vcmp.eq.f32.partialorder %v7864_v19, 0.0  ;;  %v1260_v24 = vand.u32 2147483648, %v7864_v19 }
 0x205   :  { %v6068_v27 = vpop.eup %6067  ;;  %v7938_v46 = vpop.xlane.xlu0 %1110  ;;  %6075 = vrsqrt.f32 %v7923_v1  ;;  %v1198_v6 = vsel %vm1197_vm5, %v7825_v21, %v1196_v36  ;;  %v1364_v14 = vmul.f32 1.442695, %v7932_v26  ;;  %vm1305_vm10 = vcmp.eq.f32.partialorder %v7883_v4, inf }
 0x206   :  { %v1244_v53 = vmul.f32 %v1243_v28, %v7838_v41  ;;  %v1252_v15 = vmul.f32 %v6066_v47, %v1251_v61  ;;  %v1299_v18 = vmul.f32 %v6068_v27, %v7883_v4  ;;  %v7936_v31 = vpop.xlane.xlu2 %1104  ;;  %v7940_v8 = vpop.eup %6069  ;;  %vm1307_vm11 = vcmp.eq.f32.partialorder %v7883_v4, 0.0 }
 0x207   :  { %v6072_v60 = vpop.eup %6071  ;;  %6077 = vrsqrt.f32 %v7936_v31  ;;  %v1308_v51 = vand.u32 2147483648, %v7883_v4  ;;  %vm1161_vm14 = vcmp.eq.f32.partialorder %v7866_v34, inf  ;;  %vm1163_vm15 = vcmp.eq.f32.partialorder %v7866_v34, 0.0 }
 0x208   :  { %v1253_v58 = vmul.f32 0.5, %v1252_v15  ;;  %v1300_v16 = vmul.f32 %v6068_v27, %v1299_v18  ;;  %v1155_v5 = vmul.f32 %v6072_v60, %v7866_v34  ;;  %6079 = vrcp.f32 %v7919_v35  ;;  %v7962_v36 = vpop.eup %6073 }
 0x209   :  { %v1246_v28 = vsel %vm1245_vm4, %v7838_v41, %v1244_v53  ;;  %v1201_v15 = vsel %vm1199_vm1, %v1200_v62, %v1198_v6  ;;  %6081 = vrsqrt.f32 %v7938_v46  ;;  %v1164_v23 = vand.u32 2147483648, %v7866_v34 }
 0x20a   :  { %v1254_v61 = vsub.f32 1.5, %v1253_v58  ;;  %v1301_v18 = vmul.f32 0.5, %v1300_v16  ;;  %v1156_v25 = vmul.f32 %v6072_v60, %v1155_v5  ;;  %6083 = vpow2.f32 %v1354_v11 }
 0x20b   :  { %v6076_v53 = vpop.eup %6075  ;;  %6085 = vrcp.f32 %v7932_v26  ;;  %v1249_v58 = vsel %vm1247_vm7, %v1248_v17, %v1246_v28  ;;  %v7973_v6 = vmax.f32 %v1201_v15, 1e-15  ;;  %vm1221_vm0 = vcmp.eq.f32.partialorder %v7923_v1, inf }
 0x20c   :  { %v1255_v52 = vmul.f32 %v6066_v47, %v1254_v61  ;;  %v1302_v21 = vsub.f32 1.5, %v1301_v18  ;;  %v1157_v62 = vmul.f32 0.5, %v1156_v25  ;;  %6087 = vpow2.f32 %v1364_v14 }
 0x20d   :  { %v1215_v47 = vmul.f32 %v6076_v53, %v7923_v1  ;;  %v6078_v5 = vpop.eup %6077  ;;  %v7984_v17 = vmax.f32 %v1249_v58, 1e-15  ;;  %v7990_v28 = vpop.xlane.xlu0 %1128  ;;  %v1224_v58 = vand.u32 2147483648, %v7923_v1  ;;  %vm1223_vm12 = vcmp.eq.f32.partialorder %v7923_v1, 0.0 }
 0x20e   :  { %v1256_v11 = vmul.f32 %v1255_v52, %v7864_v19  ;;  %v7978_v16 = vpop.xlane.xlu2 %1120  ;;  %v1303_v61 = vmul.f32 %v6068_v27, %v1302_v21  ;;  %v1158_v56 = vsub.f32 1.5, %v1157_v62  ;;  %v7982_v41 = vpop.eup %6079  ;;  %v1167_v14 = vmul.f32 %v6078_v5, %v7936_v31 }
 0x20f   :  { %6089 = vrsqrt.f32 %v7978_v16  ;;  %v1216_v25 = vmul.f32 %v6076_v53, %v1215_v47  ;;  %v6082_v15 = vpop.eup %6081  ;;  %vm1376_vm13 = vweird.f32 %v7859_v45  ;;  %vm1173_vm3 = vcmp.eq.f32.partialorder %v7936_v31, inf }
 0x210   :  { %v1258_v52 = vsel %vm1257_vm8, %v7864_v19, %v1256_v11  ;;  %v1304_v18 = vmul.f32 %v1303_v61, %v7883_v4  ;;  %v1159_v21 = vmul.f32 %v6072_v60, %v1158_v56  ;;  %v7997_v62 = vpop.eup %6083  ;;  %v1348_v11 = vmul.f32 1.442695, %v7973_v6  ;;  %vm1377_vm8 = vmor %vm1375_vm2, %vm1376_vm13 }
 0x211   :  { %v1261_v27 = vsel %vm1259_vm9, %v1260_v24, %v1258_v52  ;;  %v1217_v47 = vmul.f32 0.5, %v1216_v25  ;;  %v1168_v13 = vmul.f32 %v6078_v5, %v1167_v14  ;;  %v1203_v32 = vmul.f32 %v6082_v15, %v7938_v46  ;;  %v8002_v12 = vpop.eup %6085 }
 0x212   :  { %v8004_v19 = vmax.f32 %v1261_v27, 1e-15  ;;  %v1306_v56 = vsel %vm1305_vm10, %v7883_v4, %v1304_v18  ;;  %v1160_v60 = vmul.f32 %v1159_v21, %v7866_v34  ;;  %6091 = vrsqrt.f32 %v7990_v28  ;;  %v8012_v24 = vpop.eup %6087 }
 0x213   :  { %6093 = vrcp.f32 %v7973_v6  ;;  %v1356_v61 = vmul.f32 1.442695, %v7984_v17  ;;  %v1218_v52 = vsub.f32 1.5, %v1217_v47  ;;  %v1309_v14 = vsel %vm1307_vm11, %v1308_v51, %v1306_v56 }
 0x214   :  { %v1162_v27 = vsel %vm1161_vm14, %v7866_v34, %v1160_v60  ;;  %v1169_v18 = vmul.f32 0.5, %v1168_v13  ;;  %v1204_v21 = vmul.f32 %v6082_v15, %v1203_v32  ;;  %6095 = vpow2.f32 %v1348_v11 }
 0x215   :  { %v6090_v25 = vpop.eup %6089  ;;  %v1219_v55 = vmul.f32 %v6076_v53, %v1218_v52  ;;  %vm1175_vm5 = vcmp.eq.f32.partialorder %v7936_v31, 0.0  ;;  %6097 = vrcp.f32 %v7984_v17  ;;  %v1358_v3 = vmul.f32 1.442695, %v8004_v19 }
 0x216   :  { %v1263_v47 = vmul.f32 %v6090_v25, %v7978_v16  ;;  %v1165_v51 = vsel %vm1163_vm15, %v1164_v23, %v1162_v27  ;;  %v1170_v4 = vsub.f32 1.5, %v1169_v18  ;;  %v11556_v56 = vand.u32 2147483647, %v7831_v22 }
 0x217   :  { %v8035_v13 = vmax.f32 %v1309_v14, 1e-15  ;;  %v1220_v53 = vmul.f32 %v1219_v55, %v7923_v1  ;;  %v1205_v11 = vmul.f32 0.5, %v1204_v21  ;;  %6099 = vpow2.f32 %v1356_v61 }
 0x218   :  { %vm8031_vm6 = vcmp.eq.f32.partialorder %v11556_v56, 8.507059e+37  ;;  %v1264_v60 = vmul.f32 %v6090_v25, %v1263_v47  ;;  %v6092_v52 = vpop.eup %6091  ;;  %v1171_v10 = vmul.f32 %v6078_v5, %v1170_v4  ;;  %v1176_v40 = vand.u32 2147483648, %v7936_v31 }
 0x219   :  { %vm1209_vm1 = vcmp.eq.f32.partialorder %v7938_v46, inf  ;;  %v8040_v23 = vpop.eup %6093  ;;  %v8042_v34 = vmax.f32 %v1165_v51, 1e-15  ;;  %v1222_v14 = vsel %vm1221_vm0, %v7923_v1, %v1220_v53  ;;  %v1206_v27 = vsub.f32 1.5, %v1205_v11 }
 0x21a   :  { %v1265_v18 = vmul.f32 0.5, %v1264_v60  ;;  %6101 = vrcp.f32 %v8004_v19  ;;  %v1225_v55 = vsel %vm1223_vm12, %v1224_v58, %v1222_v14  ;;  %v1172_v5 = vmul.f32 %v1171_v10, %v7936_v31  ;;  %v8053_v21 = vpop.eup %6095 }
 0x21b   :  { %vm1211_vm4 = vcmp.eq.f32.partialorder %v7938_v46, 0.0  ;;  %v1311_v61 = vmul.f32 %v6092_v52, %v7990_v28  ;;  %6103 = vpow2.f32 %v1358_v3  ;;  %v1366_v47 = vmul.f32 1.442695, %v8035_v13  ;;  %v8056_v56 = vpop.eup %6097 }
 0x21c   :  { %v1207_v51 = vmul.f32 %v6082_v15, %v1206_v27  ;;  %v1266_v4 = vsub.f32 1.5, %v1265_v18  ;;  %v1174_v1 = vsel %vm1173_vm3, %v7936_v31, %v1172_v5  ;;  %v1374_v10 = vadd.f32 %v7859_v45, %v7945_v50 }
 0x21d   :  { %v1312_v58 = vmul.f32 %v6092_v52, %v1311_v61  ;;  %v1431_v53 = vmul.f32 %v7962_v36, %v7851_v7  ;;  %vm1435_vm7 = vweird.f32 %v7851_v7  ;;  %6105 = vrcp.f32 %v8035_v13  ;;  %v8075_v60 = vpop.eup %6099 }
 0x21e   :  { %v1342_v3 = vmul.f32 1.442695, %v8042_v34  ;;  %v8068_v15 = vmax.f32 %v1225_v55, 1e-15  ;;  %v1208_v11 = vmul.f32 %v1207_v51, %v7938_v46  ;;  %v1177_v50 = vsel %vm1175_vm5, %v1176_v40, %v1174_v1 }
 0x21f   :  { %v1267_v14 = vmul.f32 %v6090_v25, %v1266_v4  ;;  %v1313_v27 = vmul.f32 0.5, %v1312_v58  ;;  %v1378_v18 = vsel %vm1377_vm8, %v7859_v45, %v1374_v10  ;;  %6107 = vpow2.f32 %v1366_v47 }
 0x220   :  { %v1212_v55 = vand.u32 2147483648, %v7938_v46  ;;  %v1383_v5 = vsel %vm8031_vm6, %v7917_v44, %v1378_v18  ;;  %v1432_v61 = vsub.f32 1.0, %v1431_v53  ;;  %v8084_v51 = vpop.eup %6101  ;;  %6109 = vrcp.f32 %v8042_v34 }
 0x221   :  { %v1210_v40 = vsel %vm1209_vm1, %v7938_v46, %v1208_v11  ;;  %vm1269_vm9 = vcmp.eq.f32.partialorder %v7978_v16, inf  ;;  %vm1271_vm10 = vcmp.eq.f32.partialorder %v7978_v16, 0.0  ;;  %v8092_v45 = vpop.eup %6103  ;;  %v1352_v31 = vmul.f32 1.442695, %v8068_v15 }
 0x222   :  { %v8095_v25 = vmax.f32 %v1177_v50, 1e-15  ;;  %v1314_v44 = vsub.f32 1.5, %v1313_v27  ;;  %v1642_v32 = vsub.f32 %v7831_v22, %v1383_v5  ;;  %6111 = vpow2.f32 %v1342_v3 }
 0x223   :  { %v1268_v47 = vmul.f32 %v1267_v14, %v7978_v16  ;;  %v1433_v4 = vmul.f32 %v7962_v36, %v1432_v61  ;;  %vm1436_vm11 = vweird.f32 %v7962_v36  ;;  %v8101_v1 = vpop.eup %6105  ;;  %6113 = vrcp.f32 %v8068_v15 }
 0x224   :  { %11559 = vst [vmem:[#allocation22_spill] sm:$0xff] %v8095_v25  ;;  %v1213_v58 = vsel %vm1211_vm4, %v1212_v55, %v1210_v40  ;;  %v1272_v10 = vand.u32 2147483648, %v7978_v16  ;;  %vm1317_vm14 = vcmp.eq.f32.partialorder %v7990_v28, inf  ;;  %v1315_v53 = vmul.f32 %v6092_v52, %v1314_v44  ;;  %vm8116_vm15 = vmor %vm1435_vm7, %vm1436_vm11 }
 0x225   :  { %11560 = vst [vmem:[#allocation29_spill] sm:$0xff] %v8101_v1  ;;  %v1610_v3 = vadd.f32 %v7831_v22, %v1383_v5  ;;  %v1658_v11 = vmul.f32 0.5, %v1642_v32  ;;  %v1434_v50 = vadd.f32 %v7962_v36, %v1433_v4  ;;  %v8110_v14 = vpop.eup %6107  ;;  %6115 = vpow2.f32 %v1352_v31  ;;  %v11563_v31 = vld [vmem:[#allocation14_spill] sm:$0xff] }
 0x226   :  { %v1344_v27 = vmul.f32 1.442695, %v8095_v25  ;;  %v1320_v18 = vand.u32 2147483648, %v7990_v28  ;;  %v1441_v52 = vand.u32 2147483648, %v7851_v7  ;;  %v8121_v55 = vpop.eup %6109  ;;  %v8123_v22 = vmax.f32 %v1213_v58, 1e-15 }
 0x227   :  { %v1270_v5 = vsel %vm1269_vm9, %v7978_v16, %v1268_v47  ;;  %v1674_v61 = vmul.f32 %v1658_v11, %v7718_v43  ;;  %v1438_v40 = vsel %vm8116_vm15, %v7962_v36, %v1434_v50  ;;  %6117 = vrcp.f32 %v8095_v25 }
 0x228   :  { %vm1065_vm0 = vcmp.eq.s32.totalorder %v11563_v31, 0  ;;  %v1442_v44 = vor.u32 1.1754944e-38, %v1441_v52  ;;  %v1751_v32 = vmul.f32 %v7844_v0, %v7814_v38  ;;  %v8136_v4 = vpop.eup %6111  ;;  %v1316_v58 = vmul.f32 %v1315_v53, %v7990_v28 }
 0x229   :  { %v1626_v1 = vmul.f32 0.5, %v1610_v3  ;;  %v8140_v47 = vmul.f32 %v7929_v33, %v1674_v61  ;;  %v11565_v43 = vand.u32 2147483647, %v7851_v7  ;;  %v8144_v36 = vpop.eup %6113  ;;  %6119 = vpow2.f32 %v1344_v27 }
 0x22a   :  { %v1273_v11 = vsel %vm1271_vm10, %v1272_v10, %v1270_v5  ;;  %v1752_v46 = vsub.f32 1.0, %v1751_v32  ;;  %v1350_v52 = vmul.f32 1.442695, %v8123_v22  ;;  %v1761_v3 = vand.u32 2147483648, %v7814_v38 }
 0x22b   :  { %11564 = vst [vmem:[#allocation27_spill] sm:$0xff] %v8140_v47  ;;  %vm1440_vm12 = vcmp.eq.f32.partialorder %v11565_v43, 8.507059e+37  ;;  %v1930_v53 = vsel %vm1065_vm0, %v1626_v1, %v8140_v47  ;;  %v8154_v61 = vpop.eup %6115  ;;  %vm1756_vm13 = vweird.f32 %v7844_v0  ;;  %v1759_v16 = vand.u32 2147483647, %v7814_v38 }
 0x22c   :  { %v1443_v50 = vsel %vm1440_vm12, %v1442_v44, %v1438_v40  ;;  %v1946_v43 = vmul.f32 %v11498_v49, %v1930_v53  ;;  %v1753_v27 = vmul.f32 %v7844_v0, %v1752_v46  ;;  %v8160_v10 = vmax.f32 %v1273_v11, 1e-15 }
 0x22d   :  { %v1646_v33 = vsub.f32 %v7851_v7, %v1443_v50  ;;  %v1318_v1 = vsel %vm1317_vm14, %v7990_v28, %v1316_v58  ;;  %v1614_v5 = vadd.f32 %v7851_v7, %v1443_v50  ;;  %v8166_v44 = vpop.eup %6117  ;;  %6121 = vrcp.f32 %v8123_v22 }
 0x22e   :  { %11566 = vst [vmem:[#allocation26_spill] sm:$0xff] %v8160_v10  ;;  %v1962_v32 = vmul.f32 %v1946_v43, %v1946_v43  ;;  %v1754_v46 = vadd.f32 %v7844_v0, %v1753_v27  ;;  %vm1755_vm3 = vweird.f32 %v7814_v38  ;;  %vm1319_vm2 = vcmp.eq.f32.partialorder %v7990_v28, 0.0 }
 0x22f   :  { %v1662_v40 = vmul.f32 0.5, %v1646_v33  ;;  %11567 = vst [vmem:[#allocation28_spill] sm:$0xff] %v8166_v44  ;;  %vm1757_vm5 = vmor %vm1755_vm3, %vm1756_vm13  ;;  %v1762_v53 = vor.u32 1.1754944e-38, %v1761_v3  ;;  %6123 = vrcp.f32 %v7878_v37  ;;  %v8174_v58 = vpop.eup %6119  ;;  %v1321_v7 = vsel %vm1319_vm2, %v1320_v18, %v1318_v1 }
 0x230   :  { %11568 = vst [vmem:[#allocation25_spill] sm:$0xff] %v8174_v58  ;;  %1978 = vadd.xlane.f32.xlu1 %v1962_v32  ;;  %v1758_v50 = vsel %vm1757_vm5, %v7844_v0, %v1754_v46  ;;  %vm1760_vm6 = vcmp.eq.f32.partialorder %v1759_v16, 8.507059e+37  ;;  %v1706_v33 = vmul.f32 %v7872_v54, %v7821_v57  ;;  %6125 = vpow2.f32 %v1350_v52 }
 0x231   :  { %v1678_v11 = vmul.f32 %v1662_v40, %v7723_v20  ;;  %v8180_v38 = vmul.f32 1.442695, %v8160_v10  ;;  %v1630_v28 = vmul.f32 0.5, %v1614_v5  ;;  %v1763_v20 = vsel %vm1760_vm6, %v1762_v53, %v1758_v50 }
 0x232   :  { %v1394_v3 = vand.u32 2147483647, %v7878_v37  ;;  %v1707_v27 = vsub.f32 1.0, %v1706_v33  ;;  %6127 = vrcp.f32 %v7940_v8  ;;  %v8187_v0 = vmax.f32 %v1321_v7, 1e-15 }
 0x233   :  { %v8182_v43 = vmul.f32 %v1763_v20, %v1678_v11  ;;  %6129 = vrcp.f32 %v8160_v10  ;;  %v1396_v18 = vand.u32 2147483648, %v7878_v37  ;;  %v1714_v52 = vand.u32 2147483647, %v7821_v57  ;;  %v8191_v16 = vpop.eup %6121 }
 0x234   :  { %vm1390_vm1 = vweird.f32 %v7878_v37  ;;  %v1708_v5 = vmul.f32 %v7872_v54, %v1707_v27  ;;  %v1716_v40 = vand.u32 2147483648, %v7821_v57  ;;  %v1871_v32 = vmul.f32 %v7907_v63, %v7846_v42 }
 0x235   :  { %11569 = vst [vmem:[#allocation31_spill] sm:$0xff] %v8182_v43  ;;  %v1934_v1 = vsel %vm1065_vm0, %v1630_v28, %v8182_v43  ;;  %v6124_v46 = vpop.eup %6123  ;;  %vm1710_vm4 = vweird.f32 %v7821_v57  ;;  %vm1711_vm7 = vweird.f32 %v7872_v54  ;;  %v1559_v53 = vand.u32 2147483647, %v7940_v8 }
 0x236   :  { %v1950_v11 = vmul.f32 %v11498_v49, %v1934_v1  ;;  %v1386_v7 = vmul.f32 %v6124_v46, %v7878_v37  ;;  %vm8206_vm8 = vcmp.eq.f32.partialorder %v1394_v3, 8.507059e+37  ;;  %v1709_v33 = vadd.f32 %v7872_v54, %v1708_v5  ;;  %v8212_v27 = vpop.eup %6125  ;;  %vm8221_vm11 = vmor %vm1710_vm4, %vm1711_vm7 }
 0x237   :  { %v1561_v28 = vand.u32 2147483648, %v7940_v8  ;;  %v1872_v20 = vsub.f32 1.0, %v1871_v32  ;;  %v1397_v43 = vor.u32 1.1754944e-38, %v1396_v18  ;;  %vm8214_vm9 = vcmp.eq.f32.partialorder %v1714_v52, 8.507059e+37 }
 0x238   :  { %v1966_v1 = vmul.f32 %v1950_v11, %v1950_v11  ;;  %vm1555_vm10 = vweird.f32 %v7940_v8  ;;  %v6128_v44 = vpop.eup %6127  ;;  %v1387_v3 = vsub.f32 1.0, %v1386_v7  ;;  %v1717_v5 = vor.u32 1.1754944e-38, %v1716_v40 }
 0x239   :  { %v1873_v32 = vmul.f32 %v7907_v63, %v1872_v20  ;;  %6131 = vrcp.f32 %v7997_v62  ;;  %v8227_v18 = vpop.eup %6129  ;;  %v1713_v52 = vsel %vm8221_vm11, %v7872_v54, %v1709_v33  ;;  %v1551_v11 = vmul.f32 %v6128_v44, %v7940_v8 }
 0x23a   :  { %11576 = vst [vmem:[#allocation32_spill] sm:$0xff] %v8227_v18  ;;  %1986 = vadd.xlane.f32.xlu2 %v1966_v1  ;;  %v1879_v57 = vand.u32 2147483647, %v7846_v42  ;;  %v1881_v7 = vand.u32 2147483648, %v7846_v42  ;;  %v1388_v58 = vmul.f32 %v6124_v46, %v1387_v3  ;;  %vm1391_vm14 = vweird.f32 %v6124_v46 }
 0x23b   :  { %vm8235_vm15 = vcmp.eq.f32.partialorder %v1559_v53, 8.507059e+37  ;;  %v1562_v20 = vor.u32 1.1754944e-38, %v1561_v28  ;;  %v1552_v10 = vsub.f32 1.0, %v1551_v11  ;;  %v1874_v1 = vadd.f32 %v7907_v63, %v1873_v32  ;;  %vm1392_vm2 = vmor %vm1390_vm1, %vm1391_vm14 }
 0x23c   :  { %vm1876_vm12 = vweird.f32 %v7907_v63  ;;  %v1811_v54 = vmul.f32 %v7982_v41, %v7919_v35  ;;  %v1389_v25 = vadd.f32 %v6124_v46, %v1388_v58  ;;  %v1718_v33 = vsel %vm8214_vm9, %v1717_v5, %v1713_v52 }
 0x23d   :  { %vm1556_vm13 = vweird.f32 %v6128_v44  ;;  %vm1875_vm3 = vweird.f32 %v7846_v42  ;;  %v1553_v53 = vmul.f32 %v6128_v44, %v1552_v10  ;;  %vm8248_vm5 = vcmp.eq.f32.partialorder %v1879_v57, 8.507059e+37 }
 0x23e   :  { %v1882_v3 = vor.u32 1.1754944e-38, %v1881_v7  ;;  %vm1495_vm6 = vweird.f32 %v7997_v62  ;;  %v1393_v11 = vsel %vm1392_vm2, %v6124_v46, %v1389_v25  ;;  %vm8253_vm4 = vmor %vm1875_vm3, %vm1876_vm12  ;;  %v1499_v47 = vand.u32 2147483647, %v7997_v62 }
 0x23f   :  { %v6132_v32 = vpop.eup %6131  ;;  %v1501_v42 = vand.u32 2147483648, %v7997_v62  ;;  %v1812_v5 = vsub.f32 1.0, %v1811_v54  ;;  %v1398_v10 = vsel %vm8206_vm8, %v1397_v43, %v1393_v11  ;;  %v1554_v52 = vadd.f32 %v6128_v44, %v1553_v53  ;;  %vm1557_vm1 = vmor %vm1555_vm10, %vm1556_vm13 }
 0x240   :  { %v1878_v57 = vsel %vm8253_vm4, %v7907_v63, %v1874_v1  ;;  %v1491_v7 = vmul.f32 %v6132_v32, %v7997_v62  ;;  %v1643_v46 = vsub.f32 %v7878_v37, %v1398_v10  ;;  %vm1815_vm7 = vweird.f32 %v7919_v35 }
 0x241   :  { %v1813_v25 = vmul.f32 %v7982_v41, %v1812_v5  ;;  %vm1816_vm9 = vweird.f32 %v7982_v41  ;;  %v1558_v43 = vsel %vm1557_vm1, %v6128_v44, %v1554_v52  ;;  %v1819_v54 = vand.u32 2147483647, %v7919_v35 }
 0x242   :  { %v1492_v50 = vsub.f32 1.0, %v1491_v7  ;;  %6133 = vrcp.f32 %v8012_v24  ;;  %v1611_v63 = vadd.f32 %v7878_v37, %v1398_v10  ;;  %v1659_v1 = vmul.f32 0.5, %v1643_v46  ;;  %vm8292_vm11 = vmor %vm1815_vm7, %vm1816_vm9 }
 0x243   :  { %v1563_v53 = vsel %vm8235_vm15, %v1562_v20, %v1558_v43  ;;  %v1821_v11 = vand.u32 2147483648, %v7919_v35  ;;  %vm1496_vm8 = vweird.f32 %v6132_v32  ;;  %v1814_v18 = vadd.f32 %v7982_v41, %v1813_v25 }
 0x244   :  { %v1654_v58 = vsub.f32 %v7940_v8, %v1563_v53  ;;  %v1493_v5 = vmul.f32 %v6132_v32, %v1492_v50  ;;  %v1675_v44 = vmul.f32 %v1659_v1, %v7728_v30  ;;  %v1883_v52 = vsel %vm8248_vm5, %v1882_v3, %v1878_v57  ;;  %vm1497_vm15 = vmor %vm1495_vm6, %vm1496_vm8 }
 0x245   :  { %vm8283_vm10 = vcmp.eq.f32.partialorder %v1499_v47, 8.507059e+37  ;;  %v1502_v37 = vor.u32 1.1754944e-38, %v1501_v42  ;;  %v1622_v40 = vadd.f32 %v7940_v8, %v1563_v53  ;;  %vm8296_vm14 = vcmp.eq.f32.partialorder %v1819_v54, 8.507059e+37 }
 0x246   :  { %v1670_v20 = vmul.f32 0.5, %v1654_v58  ;;  %v1494_v10 = vadd.f32 %v6132_v32, %v1493_v5  ;;  %v1627_v28 = vmul.f32 0.5, %v1611_v63  ;;  %v8300_v3 = vmul.f32 %v1718_v33, %v1675_v44 }
 0x247   :  { %v1822_v8 = vor.u32 1.1754944e-38, %v1821_v11  ;;  %v1886_v47 = vmul.f32 %v8002_v12, %v7932_v26  ;;  %v1818_v25 = vsel %vm8292_vm11, %v7982_v41, %v1814_v18  ;;  %vm1570_vm12 = vweird.f32 %v8012_v24 }
 0x248   :  { %v6134_v42 = vpop.eup %6133  ;;  %v1686_v35 = vmul.f32 %v1670_v20, %v7733_v9  ;;  %v1498_v57 = vsel %vm1497_vm15, %v6132_v32, %v1494_v10  ;;  %v1931_v33 = vsel %vm1065_vm0, %v1627_v28, %v8300_v3  ;;  %v1576_v54 = vand.u32 2147483648, %v8012_v24 }
 0x249   :  { %v1503_v43 = vsel %vm8283_vm10, %v1502_v37, %v1498_v57  ;;  %v1566_v50 = vmul.f32 %v6134_v42, %v8012_v24  ;;  %v1947_v9 = vmul.f32 %v11498_v49, %v1931_v33  ;;  %v1638_v32 = vmul.f32 0.5, %v1622_v40 }
 0x24a   :  { %v8319_v63 = vmul.f32 %v1883_v52, %v1686_v35  ;;  %v1650_v41 = vsub.f32 %v7997_v62, %v1503_v43  ;;  %v1823_v18 = vsel %vm8296_vm14, %v1822_v8, %v1818_v25  ;;  %v1574_v53 = vand.u32 2147483647, %v8012_v24 }
 0x24b   :  { %v1567_v1 = vsub.f32 1.0, %v1566_v50  ;;  %v1887_v11 = vsub.f32 1.0, %v1886_v47  ;;  %v1963_v58 = vmul.f32 %v1947_v9, %v1947_v9  ;;  %v1618_v44 = vadd.f32 %v7997_v62, %v1503_v43 }
 0x24c   :  { %v1942_v5 = vsel %vm1065_vm0, %v1638_v32, %v8319_v63  ;;  %v1666_v7 = vmul.f32 0.5, %v1650_v41  ;;  %vm1571_vm13 = vweird.f32 %v6134_v42  ;;  %v1577_v10 = vor.u32 1.1754944e-38, %v1576_v54 }
 0x24d   :  { %v1958_v52 = vmul.f32 %v11498_v49, %v1942_v5  ;;  %v1568_v37 = vmul.f32 %v6134_v42, %v1567_v1  ;;  %v1888_v40 = vmul.f32 %v8002_v12, %v1887_v11  ;;  %1980 = vadd.xlane.f32.xlu2 %v1963_v58  ;;  %v1894_v46 = vand.u32 2147483647, %v7932_v26  ;;  %vm1572_vm2 = vmor %vm1570_vm12, %vm1571_vm13 }
 0x24e   :  { %v1682_v20 = vmul.f32 %v1666_v7, %v7738_v2  ;;  %6135 = vrcp.f32 %v8053_v21  ;;  %vm1891_vm3 = vweird.f32 %v8002_v12  ;;  %v1896_v62 = vand.u32 2147483648, %v7932_v26 }
 0x24f   :  { %v1974_v30 = vmul.f32 %v1958_v52, %v1958_v52  ;;  %v1569_v28 = vadd.f32 %v6134_v42, %v1568_v37  ;;  %v1634_v8 = vmul.f32 0.5, %v1618_v44  ;;  %v1889_v35 = vadd.f32 %v8002_v12, %v1888_v40 }
 0x250   :  { %v8336_v47 = vmul.f32 %v1823_v18, %v1682_v20  ;;  %v1766_v2 = vmul.f32 %v8040_v23, %v7973_v6  ;;  %6137 = vpow2.f32 %v8180_v38  ;;  %v8345_v57 = vmul.f32 1.442695, %v8187_v0 }
 0x251   :  { %2002 = vadd.xlane.f32.xlu1 %v1974_v30  ;;  %v1573_v25 = vsel %vm1572_vm2, %v6134_v42, %v1569_v28  ;;  %vm1575_vm5 = vcmp.eq.f32.partialorder %v1574_v53, 8.507059e+37  ;;  %vm1890_vm6 = vweird.f32 %v7932_v26  ;;  %vm8351_vm4 = vcmp.eq.f32.partialorder %v1894_v46, 8.507059e+37 }
 0x252   :  { %v1938_v33 = vsel %vm1065_vm0, %v1634_v8, %v8336_v47  ;;  %v1578_v43 = vsel %vm1575_vm5, %v1577_v10, %v1573_v25  ;;  %vm8359_vm1 = vmor %vm1890_vm6, %vm1891_vm3  ;;  %v1454_v9 = vand.u32 2147483647, %v8053_v21  ;;  %v1767_v32 = vsub.f32 1.0, %v1766_v2 }
 0x253   :  { %v1954_v54 = vmul.f32 %v11498_v49, %v1938_v33  ;;  %v1655_v38 = vsub.f32 %v8012_v24, %v1578_v43  ;;  %v1893_v26 = vsel %vm8359_vm1, %v8002_v12, %v1889_v35  ;;  %v1897_v18 = vor.u32 1.1754944e-38, %v1896_v62 }
 0x254   :  { %v6136_v41 = vpop.eup %6135  ;;  %v1456_v1 = vand.u32 2147483648, %v8053_v21  ;;  %6139 = vrcp.f32 %v8075_v60  ;;  %v1623_v11 = vadd.f32 %v8012_v24, %v1578_v43  ;;  %vm1450_vm7 = vweird.f32 %v8053_v21 }
 0x255   :  { %v1970_v53 = vmul.f32 %v1954_v54, %v1954_v54  ;;  %v1671_v58 = vmul.f32 0.5, %v1655_v38  ;;  %v1446_v5 = vmul.f32 %v6136_v41, %v8053_v21  ;;  %vm1770_vm9 = vweird.f32 %v7973_v6 }
 0x256   :  { %v1774_v44 = vand.u32 2147483647, %v7973_v6  ;;  %v1776_v7 = vand.u32 2147483648, %v7973_v6  ;;  %v8375_v12 = vpop.eup %6137  ;;  %vm8378_vm8 = vcmp.eq.f32.partialorder %v1454_v9, 8.507059e+37  ;;  %v1768_v24 = vmul.f32 %v8040_v23, %v1767_v32 }
 0x257   :  { %1994 = vadd.xlane.f32.xlu0 %v1970_v53  ;;  %v1687_v52 = vmul.f32 %v1671_v58, %v7741_v59  ;;  %v1447_v37 = vsub.f32 1.0, %v1446_v5  ;;  %v1898_v20 = vsel %vm8351_vm4, %v1897_v18, %v1893_v26  ;;  %v1457_v10 = vor.u32 1.1754944e-38, %v1456_v1 }
 0x258   :  { %vm1771_vm10 = vweird.f32 %v8040_v23  ;;  %v1826_v46 = vmul.f32 %v8056_v56, %v7984_v17  ;;  %v1639_v30 = vmul.f32 0.5, %v1623_v11  ;;  %vm1451_vm11 = vweird.f32 %v6136_v41 }
 0x259   :  { %v8388_v28 = vmul.f32 %v1898_v20, %v1687_v52  ;;  %v1448_v59 = vmul.f32 %v6136_v41, %v1447_v37  ;;  %vm8390_vm14 = vcmp.eq.f32.partialorder %v1774_v44, 8.507059e+37  ;;  %v1777_v35 = vor.u32 1.1754944e-38, %v1776_v7  ;;  %vm1452_vm12 = vmor %vm1450_vm7, %vm1451_vm11 }
 0x25a   :  { %v6140_v62 = vpop.eup %6139  ;;  %vm1510_vm15 = vweird.f32 %v8075_v60  ;;  %v1827_v2 = vsub.f32 1.0, %v1826_v46  ;;  %v1769_v43 = vadd.f32 %v8040_v23, %v1768_v24  ;;  %v1514_v38 = vand.u32 2147483647, %v8075_v60  ;;  %vm8414_vm3 = vmor %vm1770_vm9, %vm1771_vm10 }
 0x25b   :  { %v1943_v25 = vsel %vm1065_vm0, %v1639_v30, %v8388_v28  ;;  %v1449_v33 = vadd.f32 %v6136_v41, %v1448_v59  ;;  %v1506_v50 = vmul.f32 %v6140_v62, %v8075_v60  ;;  %v1516_v42 = vand.u32 2147483648, %v8075_v60 }
 0x25c   :  { %v1959_v54 = vmul.f32 %v11498_v49, %v1943_v25  ;;  %v1828_v9 = vmul.f32 %v8056_v56, %v1827_v2  ;;  %vm1830_vm13 = vweird.f32 %v7984_v17  ;;  %6141 = vrcp.f32 %v8092_v45 }
 0x25d   :  { %v1453_v32 = vsel %vm1452_vm12, %v6136_v41, %v1449_v33  ;;  %v1507_v26 = vsub.f32 1.0, %v1506_v50  ;;  %v1834_v11 = vand.u32 2147483647, %v7984_v17  ;;  %v1836_v41 = vand.u32 2147483648, %v7984_v17 }
 0x25e   :  { %v1975_v18 = vmul.f32 %v1959_v54, %v1959_v54  ;;  %v1458_v1 = vsel %vm8378_vm8, %v1457_v10, %v1453_v32  ;;  %v1773_v5 = vsel %vm8414_vm3, %v8040_v23, %v1769_v43  ;;  %vm1511_vm2 = vweird.f32 %v6140_v62 }
 0x25f   :  { %v1647_v58 = vsub.f32 %v8053_v21, %v1458_v1  ;;  %v1508_v44 = vmul.f32 %v6140_v62, %v1507_v26  ;;  %vm8424_vm5 = vcmp.eq.f32.partialorder %v1514_v38, 8.507059e+37  ;;  %v1829_v6 = vadd.f32 %v8056_v56, %v1828_v9  ;;  %vm1512_vm4 = vmor %vm1510_vm15, %vm1511_vm2 }
 0x260   :  { %2004 = vadd.xlane.f32.xlu2 %v1975_v18  ;;  %vm1831_vm6 = vweird.f32 %v8056_v56  ;;  %v1841_v52 = vmul.f32 %v8084_v51, %v8004_v19  ;;  %v1615_v37 = vadd.f32 %v8053_v21, %v1458_v1  ;;  %v1517_v20 = vor.u32 1.1754944e-38, %v1516_v42 }
 0x261   :  { %v1663_v40 = vmul.f32 0.5, %v1647_v58  ;;  %v1509_v24 = vadd.f32 %v6140_v62, %v1508_v44  ;;  %v1778_v23 = vsel %vm8390_vm14, %v1777_v35, %v1773_v5  ;;  %vm8437_vm1 = vcmp.eq.f32.partialorder %v1834_v11, 8.507059e+37  ;;  %vm8444_vm7 = vmor %vm1830_vm13, %vm1831_vm6 }
 0x262   :  { %v1837_v46 = vor.u32 1.1754944e-38, %v1836_v41  ;;  %v1842_v30 = vsub.f32 1.0, %v1841_v52  ;;  %v6142_v59 = vpop.eup %6141  ;;  %vm1525_vm9 = vweird.f32 %v8092_v45  ;;  %v1529_v8 = vand.u32 2147483647, %v8092_v45 }
 0x263   :  { %v1679_v2 = vmul.f32 %v1663_v40, %v7748_v48  ;;  %v1513_v25 = vsel %vm1512_vm4, %v6140_v62, %v1509_v24  ;;  %v1833_v33 = vsel %vm8444_vm7, %v8056_v56, %v1829_v6  ;;  %v1521_v48 = vmul.f32 %v6142_v59, %v8092_v45 }
 0x264   :  { %v1518_v35 = vsel %vm8424_vm5, %v1517_v20, %v1513_v25  ;;  %v1843_v62 = vmul.f32 %v8084_v51, %v1842_v30  ;;  %v1631_v17 = vmul.f32 0.5, %v1615_v37  ;;  %v1531_v54 = vand.u32 2147483648, %v8092_v45 }
 0x265   :  { %v8457_v43 = vmul.f32 %v1778_v23, %v1679_v2  ;;  %v1651_v50 = vsub.f32 %v8075_v60, %v1518_v35  ;;  %v1522_v38 = vsub.f32 1.0, %v1521_v48  ;;  %vm1846_vm8 = vweird.f32 %v8084_v51 }
 0x266   :  { %v1849_v42 = vand.u32 2147483647, %v8004_v19  ;;  %6143 = vrcp.f32 %v8136_v4  ;;  %v1619_v9 = vadd.f32 %v8075_v60, %v1518_v35  ;;  %v1851_v26 = vand.u32 2147483648, %v8004_v19 }
 0x267   :  { %v1935_v56 = vsel %vm1065_vm0, %v1631_v17, %v8457_v43  ;;  %v1667_v32 = vmul.f32 0.5, %v1651_v50  ;;  %v1523_v1 = vmul.f32 %v6142_v59, %v1522_v38  ;;  %vm1526_vm10 = vweird.f32 %v6142_v59 }
 0x268   :  { %v1951_v18 = vmul.f32 %v11498_v49, %v1935_v56  ;;  %v1844_v53 = vadd.f32 %v8084_v51, %v1843_v62  ;;  %v1838_v41 = vsel %vm8437_vm1, %v1837_v46, %v1833_v33  ;;  %vm1845_vm11 = vweird.f32 %v8004_v19  ;;  %vm1527_vm12 = vmor %vm1525_vm9, %vm1526_vm10 }
 0x269   :  { %v1683_v11 = vmul.f32 %v1667_v32, %v7753_v39  ;;  %v1721_v58 = vmul.f32 %v8121_v55, %v8042_v34  ;;  %v1524_v5 = vadd.f32 %v6142_v59, %v1523_v1  ;;  %vm1530_vm14 = vcmp.eq.f32.partialorder %v1529_v8, 8.507059e+37  ;;  %vm8479_vm15 = vmor %vm1845_vm11, %vm1846_vm8 }
 0x26a   :  { %v1967_v60 = vmul.f32 %v1951_v18, %v1951_v18  ;;  %v1532_v44 = vor.u32 1.1754944e-38, %v1531_v54  ;;  %v1635_v6 = vmul.f32 0.5, %v1619_v9  ;;  %vm8487_vm13 = vcmp.eq.f32.partialorder %v1849_v42, 8.507059e+37 }
 0x26b   :  { %v8483_v39 = vmul.f32 %v1838_v41, %v1683_v11  ;;  %v1852_v52 = vor.u32 1.1754944e-38, %v1851_v26  ;;  %v1528_v40 = vsel %vm1527_vm12, %v6142_v59, %v1524_v5  ;;  %v1848_v24 = vsel %vm8479_vm15, %v8084_v51, %v1844_v53 }
 0x26c   :  { %v6144_v37 = vpop.eup %6143  ;;  %1988 = vadd.xlane.f32.xlu0 %v1967_v60  ;;  %v1722_v20 = vsub.f32 1.0, %v1721_v58  ;;  %6145 = vrcp.f32 %v8154_v61  ;;  %v1533_v10 = vsel %vm1530_vm14, %v1532_v44, %v1528_v40  ;;  %v1409_v30 = vand.u32 2147483647, %v8136_v4 }
 0x26d   :  { %v1939_v23 = vsel %vm1065_vm0, %v1635_v6, %v8483_v39  ;;  %v1401_v46 = vmul.f32 %v6144_v37, %v8136_v4  ;;  %v1652_v59 = vsub.f32 %v8092_v45, %v1533_v10  ;;  %vm1405_vm3 = vweird.f32 %v8136_v4 }
 0x26e   :  { %v1955_v2 = vmul.f32 %v11498_v49, %v1939_v23  ;;  %v1411_v51 = vand.u32 2147483648, %v8136_v4  ;;  %v1853_v25 = vsel %vm8487_vm13, %v1852_v52, %v1848_v24  ;;  %v1729_v8 = vand.u32 2147483647, %v8042_v34 }
 0x26f   :  { %v1402_v21 = vsub.f32 1.0, %v1401_v46  ;;  %v1731_v35 = vand.u32 2147483648, %v8042_v34  ;;  %v1620_v48 = vadd.f32 %v8092_v45, %v1533_v10  ;;  %v1668_v62 = vmul.f32 0.5, %v1652_v59 }
 0x270   :  { %v1971_v33 = vmul.f32 %v1955_v2, %v1955_v2  ;;  %v1723_v17 = vmul.f32 %v8121_v55, %v1722_v20  ;;  %vm1406_vm2 = vweird.f32 %v6144_v37  ;;  %vm8510_vm5 = vcmp.eq.f32.partialorder %v1409_v30, 8.507059e+37 }
 0x271   :  { %v1403_v50 = vmul.f32 %v6144_v37, %v1402_v21  ;;  %v1796_v38 = vmul.f32 %v8144_v36, %v8068_v15  ;;  %v1684_v56 = vmul.f32 %v1668_v62, %v7761_v29  ;;  %v1412_v9 = vor.u32 1.1754944e-38, %v1411_v51  ;;  %vm1407_vm7 = vmor %vm1405_vm3, %vm1406_vm2  ;;  %v11622_v62 = vld [vmem:[#allocation18_spill] sm:$0xff] }
 0x272   :  { %v6146_v42 = vpop.eup %6145  ;;  %1996 = vadd.xlane.f32.xlu1 %v1971_v33  ;;  %vm1725_vm6 = vweird.f32 %v8042_v34  ;;  %vm1726_vm4 = vweird.f32 %v8121_v55  ;;  %vm8519_vm1 = vcmp.eq.f32.partialorder %v1729_v8, 8.507059e+37  ;;  %v1732_v26 = vor.u32 1.1754944e-38, %v1731_v35 }
 0x273   :  { %v1404_v45 = vadd.f32 %v6144_v37, %v1403_v50  ;;  %v1476_v18 = vmul.f32 %v6146_v42, %v8154_v61  ;;  %v1636_v1 = vmul.f32 0.5, %v1620_v48  ;;  %v8524_v53 = vmul.f32 %v1853_v25, %v1684_v56  ;;  %vm8545_vm9 = vmor %vm1725_vm6, %vm1726_vm4 }
 0x274   :  { %v1724_v29 = vadd.f32 %v8121_v55, %v1723_v17  ;;  %v1797_v11 = vsub.f32 1.0, %v1796_v38  ;;  %v1484_v60 = vand.u32 2147483647, %v8154_v61  ;;  %v1486_v5 = vand.u32 2147483648, %v8154_v61 }
 0x275   :  { %v1408_v41 = vsel %vm1407_vm7, %v6144_v37, %v1404_v45  ;;  %v1477_v58 = vsub.f32 1.0, %v1476_v18  ;;  %v1940_v44 = vsel %vm1065_vm0, %v1636_v1, %v8524_v53  ;;  %6147 = vrcp.f32 %v8110_v14 }
 0x276   :  { %v1413_v7 = vsel %vm8510_vm5, %v1412_v9, %v1408_v41  ;;  %v1798_v6 = vmul.f32 %v8144_v36, %v1797_v11  ;;  %v1956_v19 = vmul.f32 %v11498_v49, %v1940_v44  ;;  %vm1481_vm8 = vweird.f32 %v6146_v42 }
 0x277   :  { %v1644_v52 = vsub.f32 %v8136_v4, %v1413_v7  ;;  %v1478_v40 = vmul.f32 %v6146_v42, %v1477_v58  ;;  %v1612_v24 = vadd.f32 %v8136_v4, %v1413_v7  ;;  %v1728_v20 = vsel %vm8545_vm9, %v8121_v55, %v1724_v29  ;;  %v11615_v4 = vld [vmem:[#allocation29_spill] sm:$0xff] }
 0x278   :  { %vm1480_vm10 = vweird.f32 %v8154_v61  ;;  %vm1801_vm11 = vweird.f32 %v8144_v36  ;;  %v1972_v23 = vmul.f32 %v1956_v19, %v1956_v19  ;;  %v1799_v34 = vadd.f32 %v8144_v36, %v1798_v6  ;;  %v11616_v55 = vld [vmem:[#allocation21_spill] sm:$0xff] }
 0x279   :  { %v1660_v10 = vmul.f32 0.5, %v1644_v52  ;;  %v1479_v46 = vadd.f32 %v6146_v42, %v1478_v40  ;;  %vm1482_vm14 = vmor %vm1480_vm10, %vm1481_vm8  ;;  %v1487_v30 = vor.u32 1.1754944e-38, %v1486_v5  ;;  %v1804_v2 = vand.u32 2147483647, %v8068_v15 }
 0x27a   :  { %v1806_v59 = vand.u32 2147483648, %v8068_v15  ;;  %v1901_v51 = vmul.f32 %v11615_v4, %v8035_v13  ;;  %1998 = vadd.xlane.f32.xlu2 %v1972_v23  ;;  %vm1485_vm15 = vcmp.eq.f32.partialorder %v1484_v60, 8.507059e+37  ;;  %vm1800_vm12 = vweird.f32 %v8068_v15 }
 0x27b   :  { %v1676_v25 = vmul.f32 %v1660_v10, %v11616_v55  ;;  %v1483_v21 = vsel %vm1482_vm14, %v6146_v42, %v1479_v46  ;;  %v6148_v8 = vpop.eup %6147  ;;  %v1628_v35 = vmul.f32 0.5, %v1612_v24  ;;  %v1733_v33 = vsel %vm8519_vm1, %v1732_v26, %v1728_v20  ;;  %vm8566_vm13 = vmor %vm1800_vm12, %vm1801_vm11 }
 0x27c   :  { %v1488_v48 = vsel %vm1485_vm15, %v1487_v30, %v1483_v21  ;;  %v1902_v17 = vsub.f32 1.0, %v1901_v51  ;;  %v1803_v15 = vsel %vm8566_vm13, %v8144_v36, %v1799_v34  ;;  %v1581_v38 = vmul.f32 %v6148_v8, %v8110_v14 }
 0x27d   :  { %v8570_v50 = vmul.f32 %v1733_v33, %v1676_v25  ;;  %v1649_v54 = vsub.f32 %v8154_v61, %v1488_v48  ;;  %v1617_v42 = vadd.f32 %v8154_v61, %v1488_v48  ;;  %vm1805_vm3 = vcmp.eq.f32.partialorder %v1804_v2, 8.507059e+37  ;;  %v11619_v61 = vld [vmem:[#allocation17_spill] sm:$0xff] }
 0x27e   :  { %v1807_v56 = vor.u32 1.1754944e-38, %v1806_v59  ;;  %v1903_v9 = vmul.f32 %v11615_v4, %v1902_v17  ;;  %v1582_v26 = vsub.f32 1.0, %v1581_v38  ;;  %vm1585_vm2 = vweird.f32 %v8110_v14 }
 0x27f   :  { %v1932_v45 = vsel %vm1065_vm0, %v1628_v35, %v8570_v50  ;;  %v1665_v32 = vmul.f32 0.5, %v1649_v54  ;;  %v1589_v36 = vand.u32 2147483647, %v8110_v14  ;;  %v1591_v29 = vand.u32 2147483648, %v8110_v14 }
 0x280   :  { %v1948_v18 = vmul.f32 %v11498_v49, %v1932_v45  ;;  %v1808_v1 = vsel %vm1805_vm3, %v1807_v56, %v1803_v15  ;;  %v1583_v41 = vmul.f32 %v6148_v8, %v1582_v26  ;;  %vm1586_vm5 = vweird.f32 %v6148_v8  ;;  %v11624_v15 = vld [vmem:[#allocation32_spill] sm:$0xff] }
 0x281   :  { %v1681_v11 = vmul.f32 %v1665_v32, %v11619_v61  ;;  %6149 = vrcp.f32 %v8212_v27  ;;  %v1633_v60 = vmul.f32 0.5, %v1617_v42  ;;  %v1904_v5 = vadd.f32 %v11615_v4, %v1903_v9  ;;  %vm1587_vm4 = vmor %vm1585_vm2, %vm1586_vm5 }
 0x282   :  { %v1964_v58 = vmul.f32 %v1948_v18, %v1948_v18  ;;  %vm1906_vm6 = vweird.f32 %v11615_v4  ;;  %v1584_v7 = vadd.f32 %v6148_v8, %v1583_v41  ;;  %v1911_v6 = vand.u32 2147483648, %v8035_v13 }
 0x283   :  { %v8590_v44 = vmul.f32 %v1808_v1, %v1681_v11  ;;  %v1781_v19 = vmul.f32 %v8191_v16, %v8123_v22  ;;  %6151 = vrcp.f32 %v8187_v0  ;;  %vm1590_vm1 = vcmp.eq.f32.partialorder %v1589_v36, 8.507059e+37 }
 0x284   :  { %1982 = vadd.xlane.f32.xlu0 %v1964_v58  ;;  %v1592_v52 = vor.u32 1.1754944e-38, %v1591_v29  ;;  %vm1905_vm7 = vweird.f32 %v8035_v13  ;;  %v1588_v40 = vsel %vm1587_vm4, %v6148_v8, %v1584_v7  ;;  %v1909_v24 = vand.u32 2147483647, %v8035_v13 }
 0x285   :  { %v1937_v37 = vsel %vm1065_vm0, %v1633_v60, %v8590_v44  ;;  %v1782_v20 = vsub.f32 1.0, %v1781_v19  ;;  %6153 = vpow2.f32 %v8345_v57  ;;  %vm8607_vm9 = vmor %vm1905_vm7, %vm1906_vm6  ;;  %v1912_v13 = vor.u32 1.1754944e-38, %v1911_v6 }
 0x286   :  { %v1953_v23 = vmul.f32 %v11498_v49, %v1937_v37  ;;  %v1593_v10 = vsel %vm1590_vm1, %v1592_v52, %v1588_v40  ;;  %v1908_v2 = vsel %vm8607_vm9, %v11615_v4, %v1904_v5  ;;  %6155 = vrcp.f32 %v8375_v12  ;;  %v11631_v5 = vld [vmem:[#allocation25_spill] sm:$0xff] }
 0x287   :  { %v6150_v34 = vpop.eup %6149  ;;  %v1656_v30 = vsub.f32 %v8110_v14, %v1593_v10  ;;  %v1469_v51 = vand.u32 2147483647, %v8212_v27  ;;  %v1783_v55 = vmul.f32 %v8191_v16, %v1782_v20  ;;  %v1624_v25 = vadd.f32 %v8110_v14, %v1593_v10  ;;  %v11623_v14 = vld [vmem:[#allocation26_spill] sm:$0xff] }
 0x288   :  { %v1969_v57 = vmul.f32 %v1953_v23, %v1953_v23  ;;  %v1461_v59 = vmul.f32 %v6150_v34, %v8212_v27  ;;  %vm1910_vm8 = vcmp.eq.f32.partialorder %v1909_v24, 8.507059e+37  ;;  %vm1465_vm10 = vweird.f32 %v8212_v27 }
 0x289   :  { %v1672_v21 = vmul.f32 0.5, %v1656_v30  ;;  %v8621_v8 = vpop.eup %6151  ;;  %v1913_v4 = vsel %vm1910_vm8, %v1912_v13, %v1908_v2  ;;  %v1471_v33 = vand.u32 2147483648, %v8212_v27  ;;  %v1789_v48 = vand.u32 2147483647, %v8123_v22  ;;  %v11633_v30 = vld [vmem:[#allocation28_spill] sm:$0xff] }
 0x28a   :  { %1992 = vadd.xlane.f32.xlu2 %v1969_v57  ;;  %v1462_v35 = vsub.f32 1.0, %v1461_v59  ;;  %vm1786_vm11 = vweird.f32 %v8191_v16  ;;  %v1791_v54 = vand.u32 2147483648, %v8123_v22  ;;  %v1856_v38 = vmul.f32 %v11624_v15, %v11623_v14 }
 0x28b   :  { %v1688_v17 = vmul.f32 %v1672_v21, %v11622_v62  ;;  %v8630_v42 = vpop.eup %6153  ;;  %vm1466_vm14 = vweird.f32 %v6150_v34  ;;  %vm8632_vm15 = vcmp.eq.f32.partialorder %v1469_v51, 8.507059e+37  ;;  %v1784_v45 = vadd.f32 %v8191_v16, %v1783_v55 }
 0x28c   :  { %v1463_v56 = vmul.f32 %v6150_v34, %v1462_v35  ;;  %v6156_v32 = vpop.eup %6155  ;;  %v1640_v26 = vmul.f32 0.5, %v1624_v25  ;;  %vm1785_vm12 = vweird.f32 %v8123_v22  ;;  %v1857_v1 = vsub.f32 1.0, %v1856_v38  ;;  %vm1467_vm2 = vmor %vm1465_vm10, %vm1466_vm14 }
 0x28d   :  { %v8637_v18 = vmul.f32 %v1913_v4, %v1688_v17  ;;  %v1472_v29 = vor.u32 1.1754944e-38, %v1471_v33  ;;  %vm8642_vm13 = vmor %vm1785_vm12, %vm1786_vm11  ;;  %vm8646_vm3 = vcmp.eq.f32.partialorder %v1789_v48, 8.507059e+37  ;;  %v1536_v41 = vmul.f32 %v6156_v32, %v8375_v12  ;;  %v11634_v4 = vld [vmem:[#allocation19_spill] sm:$0xff] }
 0x28e   :  { %v1464_v36 = vadd.f32 %v6150_v34, %v1463_v56  ;;  %v1792_v22 = vor.u32 1.1754944e-38, %v1791_v54  ;;  %v1544_v60 = vand.u32 2147483647, %v8375_v12  ;;  %6157 = vrcp.f32 %v11631_v5 }
 0x28f   :  { %v1944_v58 = vsel %vm1065_vm0, %v1640_v26, %v8637_v18  ;;  %v1788_v19 = vsel %vm8642_vm13, %v8191_v16, %v1784_v45  ;;  %v1537_v52 = vsub.f32 1.0, %v1536_v41  ;;  %vm1540_vm5 = vweird.f32 %v8375_v12 }
 0x290   :  { %v1960_v7 = vmul.f32 %v11498_v49, %v1944_v58  ;;  %v1468_v6 = vsel %vm1467_vm2, %v6150_v34, %v1464_v36  ;;  %v1546_v40 = vand.u32 2147483648, %v8375_v12  ;;  %v1858_v24 = vmul.f32 %v11624_v15, %v1857_v1  ;;  %v11632_v34 = vld [vmem:[#allocation22_spill] sm:$0xff]  ;;  %v11639_v58 = vld [vmem:[#allocation20_spill] sm:$0xff] }
 0x291   :  { %v1473_v37 = vsel %vm8632_vm15, %v1472_v29, %v1468_v6  ;;  %v1538_v10 = vmul.f32 %v6156_v32, %v1537_v52  ;;  %vm1541_vm6 = vweird.f32 %v6156_v32  ;;  %v1793_v46 = vsel %vm8646_vm3, %v1792_v22, %v1788_v19 }
 0x292   :  { %v1976_v20 = vmul.f32 %v1960_v7, %v1960_v7  ;;  %v1648_v23 = vsub.f32 %v8212_v27, %v1473_v37  ;;  %vm1860_vm4 = vweird.f32 %v11623_v14  ;;  %v1866_v16 = vand.u32 2147483648, %v11623_v14  ;;  %vm1542_vm7 = vmor %vm1540_vm5, %vm1541_vm6 }
 0x293   :  { %v1736_v2 = vmul.f32 %v11633_v30, %v11632_v34  ;;  %v1616_v13 = vadd.f32 %v8212_v27, %v1473_v37  ;;  %v1539_v59 = vadd.f32 %v6156_v32, %v1538_v10  ;;  %vm1545_vm1 = vcmp.eq.f32.partialorder %v1544_v60, 8.507059e+37 }
 0x294   :  { %2006 = vadd.xlane.f32.xlu0 %v1976_v20  ;;  %v1664_v57 = vmul.f32 0.5, %v1648_v23  ;;  %v6158_v51 = vpop.eup %6157  ;;  %v1547_v55 = vor.u32 1.1754944e-38, %v1546_v40  ;;  %v1859_v25 = vadd.f32 %v11624_v15, %v1858_v24  ;;  %vm1861_vm9 = vweird.f32 %v11624_v15 }
 0x295   :  { %v1737_v21 = vsub.f32 1.0, %v1736_v2  ;;  %v1543_v33 = vsel %vm1542_vm7, %v6156_v32, %v1539_v59  ;;  %v1864_v48 = vand.u32 2147483647, %v11623_v14  ;;  %v1416_v27 = vmul.f32 %v6158_v51, %v11631_v5  ;;  %vm8689_vm8 = vmor %vm1860_vm4, %vm1861_vm9 }
 0x296   :  { %v1680_v35 = vmul.f32 %v1664_v57, %v11634_v4  ;;  %v1548_v62 = vsel %vm1545_vm1, %v1547_v55, %v1543_v33  ;;  %v1867_v17 = vor.u32 1.1754944e-38, %v1866_v16  ;;  %v1424_v54 = vand.u32 2147483647, %v11631_v5 }
 0x297   :  { %v1426_v38 = vand.u32 2147483648, %v11631_v5  ;;  %v1632_v56 = vmul.f32 0.5, %v1616_v13  ;;  %v1653_v45 = vsub.f32 %v8375_v12, %v1548_v62  ;;  %v1417_v32 = vsub.f32 1.0, %v1416_v27  ;;  %v11642_v27 = vld [vmem:[#allocation16_spill] sm:$0xff] }
 0x298   :  { %v8684_v9 = vmul.f32 %v1793_v46, %v1680_v35  ;;  %v1863_v1 = vsel %vm8689_vm8, %v11624_v15, %v1859_v25  ;;  %vm1421_vm10 = vweird.f32 %v6158_v51  ;;  %v1738_v36 = vmul.f32 %v11633_v30, %v1737_v21 }
 0x299   :  { %6159 = vrcp.f32 %v8630_v42  ;;  %v1621_v14 = vadd.f32 %v8375_v12, %v1548_v62  ;;  %v1669_v61 = vmul.f32 0.5, %v1653_v45  ;;  %v1418_v11 = vmul.f32 %v6158_v51, %v1417_v32 }
 0x29a   :  { %v1936_v29 = vsel %vm1065_vm0, %v1632_v56, %v8684_v9  ;;  %vm1865_vm11 = vcmp.eq.f32.partialorder %v1864_v48, 8.507059e+37  ;;  %vm1420_vm14 = vweird.f32 %v11631_v5  ;;  %vm8704_vm15 = vcmp.eq.f32.partialorder %v1424_v54, 8.507059e+37 }
 0x29b   :  { %v1952_v41 = vmul.f32 %v11498_v49, %v1936_v29  ;;  %v1685_v22 = vmul.f32 %v1669_v61, %v11639_v58  ;;  %v1868_v60 = vsel %vm1865_vm11, %v1867_v17, %v1863_v1  ;;  %v1419_v7 = vadd.f32 %v6158_v51, %v1418_v11  ;;  %vm1422_vm12 = vmor %vm1420_vm14, %vm1421_vm10 }
 0x29c   :  { %v1427_v6 = vor.u32 1.1754944e-38, %v1426_v38  ;;  %vm1741_vm13 = vweird.f32 %v11633_v30  ;;  %v1744_v12 = vand.u32 2147483647, %v11632_v34  ;;  %v1916_v52 = vmul.f32 %v8621_v8, %v8187_v0 }
 0x29d   :  { %v1968_v19 = vmul.f32 %v1952_v41, %v1952_v41  ;;  %v1637_v37 = vmul.f32 0.5, %v1621_v14  ;;  %v8714_v40 = vmul.f32 %v1868_v60, %v1685_v22  ;;  %v1423_v24 = vsel %vm1422_vm12, %v6158_v51, %v1419_v7 }
 0x29e   :  { %v1739_v20 = vadd.f32 %v11633_v30, %v1738_v36  ;;  %v1428_v10 = vsel %vm8704_vm15, %v1427_v6, %v1423_v24  ;;  %vm1740_vm3 = vweird.f32 %v11632_v34  ;;  %v1746_v46 = vand.u32 2147483648, %v11632_v34 }
 0x29f   :  { %v6160_v23 = vpop.eup %6159  ;;  %1990 = vadd.xlane.f32.xlu1 %v1968_v19  ;;  %v1941_v16 = vsel %vm1065_vm0, %v1637_v37, %v8714_v40  ;;  %v1645_v2 = vsub.f32 %v11631_v5, %v1428_v10  ;;  %v1917_v57 = vsub.f32 1.0, %v1916_v52  ;;  %vm8729_vm2 = vmor %vm1740_vm3, %vm1741_vm13  ;;  %vm1745_vm5 = vcmp.eq.f32.partialorder %v1744_v12, 8.507059e+37  ;;  %v11643_v52 = vld [vmem:[#allocation30_spill] sm:$0xff] }
 0x2a0   :  { %v1596_v13 = vmul.f32 %v6160_v23, %v8630_v42  ;;  %v1957_v59 = vmul.f32 %v11498_v49, %v1941_v16  ;;  %v1613_v34 = vadd.f32 %v11631_v5, %v1428_v10  ;;  %v1743_v25 = vsel %vm8729_vm2, %v11633_v30, %v1739_v20 }
 0x2a1   :  { %v1661_v55 = vmul.f32 0.5, %v1645_v2  ;;  %v1747_v35 = vor.u32 1.1754944e-38, %v1746_v46  ;;  %v1604_v33 = vand.u32 2147483647, %v8630_v42  ;;  %v1606_v48 = vand.u32 2147483648, %v8630_v42 }
 0x2a2   :  { %v1597_v21 = vsub.f32 1.0, %v1596_v13  ;;  %v1973_v4 = vmul.f32 %v1957_v59, %v1957_v59  ;;  %vm1601_vm6 = vweird.f32 %v6160_v23  ;;  %v1918_v54 = vmul.f32 %v8621_v8, %v1917_v57 }
 0x2a3   :  { %v1677_v62 = vmul.f32 %v1661_v55, %v11642_v27  ;;  %v1979_v38 = vpop.xlane.xlu1 %1978  ;;  %v1748_v5 = vsel %vm1745_vm5, %v1747_v35, %v1743_v25  ;;  %v1629_v45 = vmul.f32 0.5, %v1613_v34  ;;  %vm1600_vm4 = vweird.f32 %v8630_v42  ;;  %v11644_v27 = vld [vmem:[#allocation27_spill] sm:$0xff] }
 0x2a4   :  { %v1598_v17 = vmul.f32 %v6160_v23, %v1597_v21  ;;  %2000 = vadd.xlane.f32.xlu0 %v1973_v4  ;;  %v2010_v56 = vadd.f32 1.0, %v1979_v38  ;;  %vm1602_vm1 = vmor %vm1600_vm4, %vm1601_vm6  ;;  %vm1605_vm7 = vcmp.eq.f32.partialorder %v1604_v33, 8.507059e+37  ;;  %v1607_v32 = vor.u32 1.1754944e-38, %v1606_v48 }
 0x2a5   :  { %v8741_v26 = vmul.f32 %v1748_v5, %v1677_v62  ;;  %v1919_v14 = vadd.f32 %v8621_v8, %v1918_v54  ;;  %vm1921_vm9 = vweird.f32 %v8621_v8  ;;  %v1926_v41 = vand.u32 2147483648, %v8187_v0 }
 0x2a6   :  { %v1599_v30 = vadd.f32 %v6160_v23, %v1598_v17  ;;  %v2026_v1 = vmax.f32 %v2010_v56, 1e-07  ;;  %vm1920_vm8 = vweird.f32 %v8187_v0  ;;  %v1924_v58 = vand.u32 2147483647, %v8187_v0 }
 0x2a7   :  { %v1933_v36 = vsel %vm1065_vm0, %v1629_v45, %v8741_v26  ;;  %vm1922_vm10 = vmor %vm1920_vm8, %vm1921_vm9  ;;  %v1927_v19 = vor.u32 1.1754944e-38, %v1926_v41 }
 0x2a8   :  { %v1603_v29 = vsel %vm1602_vm1, %v6160_v23, %v1599_v30  ;;  %v1949_v61 = vmul.f32 %v11498_v49, %v1933_v36  ;;  %6161 = vrsqrt.f32 %v2026_v1  ;;  %v1923_v6 = vsel %vm1922_vm10, %v8621_v8, %v1919_v14  ;;  %v11645_v36 = vld [vmem:[#allocation31_spill] sm:$0xff] }
 0x2a9   :  { %v1608_v11 = vsel %vm1605_vm7, %v1607_v32, %v1603_v29  ;;  %vm1925_vm11 = vcmp.eq.f32.partialorder %v1924_v58, 8.507059e+37  ;;  %vm2049_vm14 = vcmp.eq.f32.partialorder %v2026_v1, inf  ;;  %v2052_v21 = vand.u32 2147483648, %v2026_v1 }
 0x2aa   :  { %v1657_v15 = vsub.f32 %v8630_v42, %v1608_v11  ;;  %v1965_v22 = vmul.f32 %v1949_v61, %v1949_v61  ;;  %v1625_v60 = vadd.f32 %v8630_v42, %v1608_v11  ;;  %v1928_v23 = vsel %vm1925_vm11, %v1927_v19, %v1923_v6 }
 0x2ab   :  { %vm2051_vm15 = vcmp.eq.f32.partialorder %v2026_v1, 0.0 }
 0x2ac   :  { %v1673_v7 = vmul.f32 0.5, %v1657_v15  ;;  %1984 = vadd.xlane.f32.xlu1 %v1965_v22  ;;  %v1641_v10 = vmul.f32 0.5, %v1625_v60 }
 0x2ad   :  { %v1987_v12 = vpop.xlane.xlu2 %1986 }
 0x2ae   :  { %v1689_v37 = vmul.f32 %v1673_v7, %v11643_v52  ;;  %v2014_v24 = vadd.f32 1.0, %v1987_v12  ;;  %v6162_v20 = vpop.eup %6161 }
 0x2af   :  { %v2043_v16 = vmul.f32 %v6162_v20, %v2026_v1 }
 0x2b0   :  { %v8757_v46 = vmul.f32 %v1928_v23, %v1689_v37  ;;  %v2030_v0 = vmax.f32 %v2014_v24, 1e-07 }
 0x2b1   :  { %v2044_v8 = vmul.f32 %v6162_v20, %v2043_v16 }
 0x2b2   :  { %v1945_v42 = vsel %vm1065_vm0, %v1641_v10, %v8757_v46  ;;  %6163 = vrsqrt.f32 %v2030_v0  ;;  %vm2097_vm12 = vcmp.eq.f32.partialorder %v2030_v0, inf  ;;  %v2100_v30 = vand.u32 2147483648, %v2030_v0 }
 0x2b3   :  { %v1961_v2 = vmul.f32 %v11498_v49, %v1945_v42  ;;  %v2045_v13 = vmul.f32 0.5, %v2044_v8  ;;  %vm2099_vm13 = vcmp.eq.f32.partialorder %v2030_v0, 0.0 }
 0x2b5   :  { %v1977_v57 = vmul.f32 %v1961_v2, %v1961_v2  ;;  %v2046_v59 = vsub.f32 1.5, %v2045_v13 }
 0x2b7   :  { %2008 = vadd.xlane.f32.xlu1 %v1977_v57  ;;  %v2047_v34 = vmul.f32 %v6162_v20, %v2046_v59 }
 0x2b8   :  { %v6164_v51 = vpop.eup %6163 }
 0x2b9   :  { %v2091_v55 = vmul.f32 %v6164_v51, %v2030_v0  ;;  %v2048_v25 = vmul.f32 %v2047_v34, %v2026_v1 }
 0x2bb   :  { %v2092_v4 = vmul.f32 %v6164_v51, %v2091_v55  ;;  %v2050_v35 = vsel %vm2049_vm14, %v2026_v1, %v2048_v25 }
 0x2bc   :  { %v2053_v33 = vsel %vm2051_vm15, %v2052_v21, %v2050_v35 }
 0x2bd   :  { %v2093_v48 = vmul.f32 0.5, %v2092_v4  ;;  %v8766_v62 = vsel %vm1065_vm0, %v2053_v33, %v11644_v27 }
 0x2be   :  { %v2838_v17 = vsub.f32 1.0, %v8766_v62  ;;  %v8771_v54 = vmul.f32 %v11498_v49, %v8766_v62 }
 0x2bf   :  { %v2094_v38 = vsub.f32 1.5, %v2093_v48 }
 0x2c0   :  { %2856 = vperm.xlu0 %5900, %v2838_v17   ;;  %v2326_v5 = vmul.f32 %v8771_v54, %v8771_v54  ;;  %v1981_v23 = vpop.xlane.xlu2 %1980 }
 0x2c1   :  { %v2095_v56 = vmul.f32 %v6164_v51, %v2094_v38  ;;  %v2011_v8 = vadd.f32 1.0, %v1981_v23 }
 0x2c2   :  { %2342 = vadd.xlane.f32.xlu1 %v2326_v5 }
 0x2c3   :  { %v2096_v45 = vmul.f32 %v2095_v56, %v2030_v0  ;;  %v8789_v34 = vmax.f32 %v2011_v8, 1e-07 }
 0x2c4   :  { %v2003_v22 = vpop.xlane.xlu1 %2002 }
 0x2c5   :  { %v2098_v32 = vsel %vm2097_vm12, %v2030_v0, %v2096_v45  ;;  %v2022_v60 = vadd.f32 1.0, %v2003_v22  ;;  %vm2061_vm8 = vcmp.eq.f32.partialorder %v8789_v34, inf  ;;  %vm2063_vm10 = vcmp.eq.f32.partialorder %v8789_v34, 0.0 }
 0x2c6   :  { %v2101_v1 = vsel %vm2099_vm13, %v2100_v30, %v2098_v32 }
 0x2c7   :  { %v8778_v29 = vsel %vm1065_vm0, %v2101_v1, %v11645_v36  ;;  %v2038_v19 = vmax.f32 %v2022_v60, 1e-07 }
 0x2c8   :  { %11646 = vst [vmem:[#allocation29_spill] sm:$0xff] %v8778_v29  ;;  %v2842_v14 = vsub.f32 1.0, %v8778_v29  ;;  %v8783_v61 = vmul.f32 %v11498_v49, %v8778_v29 }
 0x2c9   :  { %vm2193_vm5 = vcmp.eq.f32.partialorder %v2038_v19, inf  ;;  %v2196_v36 = vand.u32 2147483648, %v2038_v19  ;;  %vm2195_vm6 = vcmp.eq.f32.partialorder %v2038_v19, 0.0 }
 0x2ca   :  { %2876 = vperm.xlu2 %5899, %v2842_v14   ;;  %v2330_v11 = vmul.f32 %v8783_v61, %v8783_v61  ;;  %v1995_v41 = vpop.xlane.xlu0 %1994 }
 0x2cb   :  { %v2018_v15 = vadd.f32 1.0, %v1995_v41 }
 0x2cc   :  { %2350 = vadd.xlane.f32.xlu1 %v2330_v11 }
 0x2cd   :  { %v2034_v58 = vmax.f32 %v2018_v15, 1e-07 }
 0x2cf   :  { %6165 = vrsqrt.f32 %v2034_v58  ;;  %vm2145_vm3 = vcmp.eq.f32.partialorder %v2034_v58, inf  ;;  %v2148_v55 = vand.u32 2147483648, %v2034_v58  ;;  %vm2147_vm2 = vcmp.eq.f32.partialorder %v2034_v58, 0.0 }
 0x2d0   :  { %6167 = vrsqrt.f32 %v2038_v19 }
 0x2d5   :  { %v6166_v6 = vpop.eup %6165 }
 0x2d6   :  { %v2139_v52 = vmul.f32 %v6166_v6, %v2034_v58  ;;  %v6168_v42 = vpop.eup %6167 }
 0x2d7   :  { %v2187_v59 = vmul.f32 %v6168_v42, %v2038_v19 }
 0x2d8   :  { %v2140_v24 = vmul.f32 %v6166_v6, %v2139_v52 }
 0x2d9   :  { %v2188_v21 = vmul.f32 %v6168_v42, %v2187_v59 }
 0x2da   :  { %v2141_v10 = vmul.f32 0.5, %v2140_v24 }
 0x2db   :  { %v2189_v33 = vmul.f32 0.5, %v2188_v21 }
 0x2dc   :  { %v2142_v16 = vsub.f32 1.5, %v2141_v10 }
 0x2dd   :  { %v2190_v17 = vsub.f32 1.5, %v2189_v33 }
 0x2de   :  { %v2143_v2 = vmul.f32 %v6166_v6, %v2142_v16 }
 0x2df   :  { %v1989_v7 = vpop.xlane.xlu0 %1988  ;;  %v2191_v5 = vmul.f32 %v6168_v42, %v2190_v17  ;;  %v2005_v42 = vpop.xlane.xlu2 %2004 }
 0x2e0   :  { %v2015_v12 = vadd.f32 1.0, %v1989_v7  ;;  %v2144_v57 = vmul.f32 %v2143_v2, %v2034_v58  ;;  %v2023_v59 = vadd.f32 1.0, %v2005_v42 }
 0x2e1   :  { %v2192_v30 = vmul.f32 %v2191_v5, %v2038_v19 }
 0x2e2   :  { %v2031_v37 = vmax.f32 %v2015_v12, 1e-07  ;;  %v2146_v25 = vsel %vm2145_vm3, %v2034_v58, %v2144_v57 }
 0x2e3   :  { %v2149_v4 = vsel %vm2147_vm2, %v2148_v55, %v2146_v25  ;;  %v2194_v14 = vsel %vm2193_vm5, %v2038_v19, %v2192_v30 }
 0x2e4   :  { %6169 = vrsqrt.f32 %v2031_v37  ;;  %v8795_v35 = vsel %vm1065_vm0, %v2149_v4, %v8336_v47  ;;  %v2197_v11 = vsel %vm2195_vm6, %v2196_v36, %v2194_v14  ;;  %vm2109_vm4 = vcmp.eq.f32.partialorder %v2031_v37, inf }
 0x2e5   :  { %v1997_v20 = vpop.xlane.xlu1 %1996  ;;  %11647 = vst [vmem:[#allocation21_spill] sm:$0xff] %v8795_v35  ;;  %v2846_v27 = vsub.f32 1.0, %v8795_v35  ;;  %v8803_v15 = vsel %vm1065_vm0, %v2197_v11, %v8319_v63  ;;  %v8807_v22 = vmul.f32 %v11498_v49, %v8795_v35  ;;  %v2112_v6 = vand.u32 2147483648, %v2031_v37 }
 0x2e6   :  { %v2019_v0 = vadd.f32 1.0, %v1997_v20  ;;  %v2850_v7 = vsub.f32 1.0, %v8803_v15  ;;  %vm2111_vm1 = vcmp.eq.f32.partialorder %v2031_v37, 0.0  ;;  %v2064_v36 = vand.u32 2147483648, %v8789_v34 }
 0x2e7   :  { %2896 = vperm.xlu0 %5900, %v2846_v27   ;;  %v2334_v52 = vmul.f32 %v8807_v22, %v8807_v22 }
 0x2e8   :  { %v8787_v13 = vmax.f32 %v2019_v0, 1e-07  ;;  %2916 = vperm.xlu1 %5898, %v2850_v7  }
 0x2ea   :  { %v6170_v51 = vpop.eup %6169  ;;  %6171 = vrsqrt.f32 %v8787_v13  ;;  %vm2157_vm7 = vcmp.eq.f32.partialorder %v8787_v13, inf  ;;  %vm2159_vm9 = vcmp.eq.f32.partialorder %v8787_v13, 0.0 }
 0x2eb   :  { %v2103_v48 = vmul.f32 %v6170_v51, %v2031_v37  ;;  %6173 = vrsqrt.f32 %v8789_v34 }
 0x2ed   :  { %v2104_v38 = vmul.f32 %v6170_v51, %v2103_v48  ;;  %v8835_v48 = vmax.f32 %v2023_v59, 1e-07 }
 0x2ef   :  { %v2105_v56 = vmul.f32 0.5, %v2104_v38  ;;  %6175 = vrsqrt.f32 %v8835_v48  ;;  %vm2205_vm11 = vcmp.eq.f32.partialorder %v8835_v48, inf  ;;  %vm2207_vm14 = vcmp.eq.f32.partialorder %v8835_v48, 0.0 }
 0x2f0   :  { %v6172_v45 = vpop.eup %6171 }
 0x2f1   :  { %v2106_v32 = vsub.f32 1.5, %v2105_v56  ;;  %v6174_v1 = vpop.eup %6173  ;;  %v2151_v41 = vmul.f32 %v6172_v45, %v8787_v13 }
 0x2f2   :  { %v2055_v60 = vmul.f32 %v6174_v1, %v8789_v34 }
 0x2f3   :  { %v2107_v47 = vmul.f32 %v6170_v51, %v2106_v32  ;;  %v2152_v19 = vmul.f32 %v6172_v45, %v2151_v41  ;;  %2358 = vadd.xlane.f32.xlu2 %v2334_v52 }
 0x2f4   :  { %v2056_v16 = vmul.f32 %v6174_v1, %v2055_v60 }
 0x2f5   :  { %v2108_v58 = vmul.f32 %v2107_v47, %v2031_v37  ;;  %v2153_v24 = vmul.f32 0.5, %v2152_v19  ;;  %v6176_v30 = vpop.eup %6175 }
 0x2f6   :  { %v2057_v57 = vmul.f32 0.5, %v2056_v16 }
 0x2f7   :  { %v2110_v12 = vsel %vm2109_vm4, %v2031_v37, %v2108_v58  ;;  %v1983_v20 = vpop.xlane.xlu0 %1982  ;;  %v2154_v0 = vsub.f32 1.5, %v2153_v24  ;;  %v8821_v37 = vmul.f32 %v11498_v49, %v8803_v15 }
 0x2f8   :  { %v2113_v63 = vsel %vm2111_vm1, %v2112_v6, %v2110_v12  ;;  %v2058_v33 = vsub.f32 1.5, %v2057_v57  ;;  %v2012_v24 = vadd.f32 1.0, %v1983_v20 }
 0x2f9   :  { %v8816_v23 = vsel %vm1065_vm0, %v2113_v63, %v8457_v43  ;;  %v2155_v8 = vmul.f32 %v6172_v45, %v2154_v0  ;;  %v2160_v43 = vand.u32 2147483648, %v8787_v13  ;;  %v2338_v51 = vmul.f32 %v8821_v37, %v8821_v37 }
 0x2fa   :  { %11648 = vst [vmem:[#allocation17_spill] sm:$0xff] %v8816_v23  ;;  %v2843_v10 = vsub.f32 1.0, %v8816_v23  ;;  %v2059_v5 = vmul.f32 %v6174_v1, %v2058_v33  ;;  %v2199_v1 = vmul.f32 %v6176_v30, %v8835_v48  ;;  %v8863_v42 = vmax.f32 %v2012_v24, 1e-07 }
 0x2fb   :  { %v2156_v2 = vmul.f32 %v2155_v8, %v8787_v13  ;;  %2366 = vadd.xlane.f32.xlu2 %v2338_v51  ;;  %v8867_v8 = vmul.f32 %v11498_v49, %v8816_v23 }
 0x2fc   :  { %2881 = vperm.xlu0 %5900, %v2843_v10   ;;  %v2060_v56 = vmul.f32 %v2059_v5, %v8789_v34  ;;  %v2200_v60 = vmul.f32 %v6176_v30, %v2199_v1  ;;  %vm2073_vm1 = vcmp.eq.f32.partialorder %v8863_v42, inf }
 0x2fd   :  { %v2158_v55 = vsel %vm2157_vm7, %v8787_v13, %v2156_v2  ;;  %vm2075_vm7 = vcmp.eq.f32.partialorder %v8863_v42, 0.0 }
 0x2fe   :  { %v2161_v21 = vsel %vm2159_vm9, %v2160_v43, %v2158_v55  ;;  %v2062_v32 = vsel %vm2061_vm8, %v8789_v34, %v2060_v56  ;;  %v2201_v19 = vmul.f32 0.5, %v2200_v60  ;;  %v2331_v55 = vmul.f32 %v8867_v8, %v8867_v8 }
 0x2ff   :  { %v8833_v4 = vsel %vm1065_vm0, %v2161_v21, %v8483_v39  ;;  %v2065_v14 = vsel %vm2063_vm10, %v2064_v36, %v2062_v32 }
 0x300   :  { %11649 = vst [vmem:[#allocation18_spill] sm:$0xff] %v8833_v4  ;;  %v2847_v17 = vsub.f32 1.0, %v8833_v4  ;;  %v8853_v58 = vsel %vm1065_vm0, %v2065_v14, %v8300_v3  ;;  %v2202_v10 = vsub.f32 1.5, %v2201_v19  ;;  %v11651_v3 = vld [vmem:[#allocation24_spill] sm:$0xff] }
 0x301   :  { %11650 = vst [vmem:[#allocation26_spill] sm:$0xff] %v8853_v58  ;;  %v2839_v6 = vsub.f32 1.0, %v8853_v58  ;;  %vm2263_vm2 = vcmp.eq.f32.partialorder %v11651_v3, inf  ;;  %vm2265_vm6 = vcmp.eq.f32.partialorder %v11651_v3, 0.0 }
 0x302   :  { %2901 = vperm.xlu1 %5898, %v2847_v17   ;;  %v2203_v2 = vmul.f32 %v6176_v30, %v2202_v10  ;;  %v2208_v30 = vand.u32 2147483648, %v8835_v48 }
 0x304   :  { %v2204_v21 = vmul.f32 %v2203_v2, %v8835_v48 }
 0x307   :  { %v2007_v27 = vpop.xlane.xlu0 %2006 }
 0x308   :  { %v2024_v38 = vadd.f32 1.0, %v2007_v27 }
 0x30a   :  { %v8839_v13 = vmax.f32 %v2024_v38, 1e-07 }
 0x30c   :  { %6177 = vrsqrt.f32 %v8839_v13  ;;  %vm2217_vm15 = vcmp.eq.f32.partialorder %v8839_v13, inf  ;;  %v2220_v24 = vand.u32 2147483648, %v8839_v13  ;;  %vm2219_vm12 = vcmp.eq.f32.partialorder %v8839_v13, 0.0 }
 0x312   :  { %v1991_v25 = vpop.xlane.xlu1 %1990  ;;  %v6178_v41 = vpop.eup %6177 }
 0x313   :  { %v2211_v34 = vmul.f32 %v6178_v41, %v8839_v13  ;;  %2861 = vperm.xlu2 %5899, %v2839_v6   ;;  %v2016_v51 = vadd.f32 1.0, %v1991_v25  ;;  %v8883_v25 = vmul.f32 %v11498_v49, %v8833_v4 }
 0x315   :  { %v2212_v52 = vmul.f32 %v6178_v41, %v2211_v34  ;;  %v8878_v56 = vmax.f32 %v2016_v51, 1e-07  ;;  %v2335_v60 = vmul.f32 %v8883_v25, %v8883_v25 }
 0x317   :  { %v2001_v11 = vpop.xlane.xlu0 %2000  ;;  %v2213_v0 = vmul.f32 0.5, %v2212_v52  ;;  %vm2121_vm9 = vcmp.eq.f32.partialorder %v8878_v56, inf  ;;  %vm2123_vm8 = vcmp.eq.f32.partialorder %v8878_v56, 0.0 }
 0x318   :  { %v2021_v7 = vadd.f32 1.0, %v2001_v11 }
 0x319   :  { %v2214_v59 = vsub.f32 1.5, %v2213_v0 }
 0x31a   :  { %v8858_v12 = vmax.f32 %v2021_v7, 1e-07 }
 0x31b   :  { %v2215_v27 = vmul.f32 %v6178_v41, %v2214_v59 }
 0x31c   :  { %vm2181_vm5 = vcmp.eq.f32.partialorder %v8858_v12, inf  ;;  %vm2183_vm4 = vcmp.eq.f32.partialorder %v8858_v12, 0.0 }
 0x31d   :  { %v2216_v1 = vmul.f32 %v2215_v27, %v8839_v13 }
 0x31f   :  { %v1985_v45 = vpop.xlane.xlu1 %1984 }
 0x320   :  { %v2013_v39 = vadd.f32 1.0, %v1985_v45  ;;  %v2206_v45 = vsel %vm2205_vm11, %v8835_v48, %v2204_v21  ;;  %v2218_v48 = vsel %vm2217_vm15, %v8839_v13, %v2216_v1 }
 0x321   :  { %v2209_v36 = vsel %vm2207_vm14, %v2208_v30, %v2206_v45 }
 0x322   :  { %v8848_v47 = vmax.f32 %v2013_v39, 1e-07  ;;  %v8897_v6 = vsel %vm1065_vm0, %v2209_v36, %v8388_v28  ;;  %v2221_v28 = vsel %vm2219_vm12, %v2220_v24, %v2218_v48  ;;  %v2266_v48 = vand.u32 2147483648, %v11651_v3 }
 0x323   :  { %11652 = vst [vmem:[#allocation32_spill] sm:$0xff] %v8897_v6  ;;  %v8904_v10 = vmul.f32 %v11498_v49, %v8897_v6 }
 0x324   :  { %6179 = vrsqrt.f32 %v8848_v47  ;;  %vm2085_vm13 = vcmp.eq.f32.partialorder %v8848_v47, inf  ;;  %v2088_v45 = vand.u32 2147483648, %v8848_v47  ;;  %vm2087_vm3 = vcmp.eq.f32.partialorder %v8848_v47, 0.0 }
 0x325   :  { %6181 = vrsqrt.f32 %v8858_v12  ;;  %v2339_v51 = vmul.f32 %v8904_v10, %v8904_v10 }
 0x326   :  { %6183 = vrsqrt.f32 %v11651_v3  ;;  %2352 = vadd.xlane.f32.xlu0 %v2331_v55  ;;  %v8916_v55 = vsel %vm1065_vm0, %v2221_v28, %v8637_v18 }
 0x327   :  { %6185 = vrsqrt.f32 %v8863_v42  ;;  %11653 = vst [vmem:[#allocation25_spill] sm:$0xff] %v8916_v55 }
 0x328   :  { %6187 = vrsqrt.f32 %v8878_v56 }
 0x32a   :  { %v6180_v63 = vpop.eup %6179  ;;  %v8869_v57 = vpop.xlane.xlu1 %2008 }
 0x32b   :  { %v2079_v16 = vmul.f32 %v6180_v63, %v8848_v47  ;;  %v6182_v20 = vpop.eup %6181 }
 0x32c   :  { %v6184_v33 = vpop.eup %6183  ;;  %v2175_v38 = vmul.f32 %v6182_v20, %v8858_v12  ;;  %2360 = vadd.xlane.f32.xlu1 %v2335_v60 }
 0x32d   :  { %v2080_v43 = vmul.f32 %v6180_v63, %v2079_v16  ;;  %v2257_v5 = vmul.f32 %v6184_v33, %v11651_v3  ;;  %v6186_v39 = vpop.eup %6185 }
 0x32e   :  { %v2176_v11 = vmul.f32 %v6182_v20, %v2175_v38  ;;  %v2067_v7 = vmul.f32 %v6186_v39, %v8863_v42  ;;  %v6188_v16 = vpop.eup %6187 }
 0x32f   :  { %v2081_v17 = vmul.f32 0.5, %v2080_v43  ;;  %v2258_v41 = vmul.f32 %v6184_v33, %v2257_v5  ;;  %v2115_v21 = vmul.f32 %v6188_v16, %v8878_v56  ;;  %v2852_v5 = vsub.f32 1.0, %v8916_v55 }
 0x330   :  { %v2177_v19 = vmul.f32 0.5, %v2176_v11  ;;  %v2068_v0 = vmul.f32 %v6186_v39, %v2067_v7 }
 0x331   :  { %v2082_v14 = vsub.f32 1.5, %v2081_v17  ;;  %v2259_v52 = vmul.f32 0.5, %v2258_v41  ;;  %v2116_v18 = vmul.f32 %v6188_v16, %v2115_v21 }
 0x332   :  { %v2178_v43 = vsub.f32 1.5, %v2177_v19  ;;  %v2069_v13 = vmul.f32 0.5, %v2068_v0 }
 0x333   :  { %v2083_v34 = vmul.f32 %v6180_v63, %v2082_v14  ;;  %v2260_v63 = vsub.f32 1.5, %v2259_v52  ;;  %v2117_v7 = vmul.f32 0.5, %v2116_v18 }
 0x334   :  { %2368 = vadd.xlane.f32.xlu1 %v2339_v51  ;;  %v2179_v17 = vmul.f32 %v6182_v20, %v2178_v43  ;;  %v2070_v36 = vsub.f32 1.5, %v2069_v13  ;;  %v8930_v20 = vmul.f32 %v11498_v49, %v8853_v58 }
 0x335   :  { %v8887_v32 = vpop.xlane.xlu1 %2342  ;;  %v2084_v59 = vmul.f32 %v2083_v34, %v8848_v47  ;;  %v2261_v38 = vmul.f32 %v6184_v33, %v2260_v63  ;;  %v2118_v28 = vsub.f32 1.5, %v2117_v7  ;;  %v8950_v63 = vpop.xlane.xlu2 %1998 }
 0x336   :  { %v2180_v11 = vmul.f32 %v2179_v17, %v8858_v12  ;;  %v2071_v33 = vmul.f32 %v6186_v39, %v2070_v36  ;;  %v2327_v39 = vmul.f32 %v8930_v20, %v8930_v20  ;;  %vm2381_vm12 = vcmp.eq.f32.partialorder %v8887_v32, inf }
 0x337   :  { %v2086_v27 = vsel %vm2085_vm13, %v8848_v47, %v2084_v59  ;;  %v2262_v41 = vmul.f32 %v2261_v38, %v11651_v3  ;;  %v2119_v21 = vmul.f32 %v6188_v16, %v2118_v28 }
 0x338   :  { %v2089_v1 = vsel %vm2087_vm3, %v2088_v45, %v2086_v27  ;;  %v2182_v34 = vsel %vm2181_vm5, %v8858_v12, %v2180_v11  ;;  %v2072_v24 = vmul.f32 %v2071_v33, %v8863_v42  ;;  %v2076_v27 = vand.u32 2147483648, %v8863_v42 }
 0x339   :  { %v8935_v47 = vsel %vm1065_vm0, %v2089_v1, %v8741_v26  ;;  %v2264_v19 = vsel %vm2263_vm2, %v11651_v3, %v2262_v41  ;;  %v2184_v26 = vand.u32 2147483648, %v8858_v12  ;;  %v2120_v18 = vmul.f32 %v2119_v21, %v8878_v56 }
 0x33a   :  { %2926 = vperm.xlu0 %5900, %v2852_v5   ;;  %11654 = vst [vmem:[#allocation22_spill] sm:$0xff] %v8935_v47  ;;  %v2841_v52 = vsub.f32 1.0, %v8935_v47  ;;  %v2267_v43 = vsel %vm2265_vm6, %v2266_v48, %v2264_v19  ;;  %v2074_v12 = vsel %vm2073_vm1, %v8863_v42, %v2072_v24  ;;  %vm2383_vm3 = vcmp.eq.f32.partialorder %v8887_v32, 0.0 }
 0x33b   :  { %v2185_v59 = vsel %vm2183_vm4, %v2184_v26, %v2182_v34  ;;  %v2268_v17 = vmax.f32 %v2267_v43, 1e-15  ;;  %v2077_v45 = vsel %vm2075_vm7, %v2076_v27, %v2074_v12  ;;  %v2122_v1 = vsel %vm2121_vm9, %v8878_v56, %v2120_v18  ;;  %v11658_v18 = vld [vmem:[#allocation23_spill] sm:$0xff] }
 0x33c   :  { %2344 = vadd.xlane.f32.xlu2 %v2327_v39  ;;  %v8955_v51 = vsel %vm1065_vm0, %v2185_v59, %v8714_v40  ;;  %v8966_v40 = vsel %vm1065_vm0, %v2077_v45, %v8570_v50  ;;  %v2851_v59 = vsub.f32 1.0, %v8897_v6 }
 0x33d   :  { %11655 = vst [vmem:[#allocation28_spill] sm:$0xff] %v8955_v51  ;;  %v2849_v38 = vsub.f32 1.0, %v8955_v51  ;;  %v1993_v11 = vpop.xlane.xlu2 %1992  ;;  %vm2300_vm14 = vweird.f32 %v2268_v17  ;;  %v2306_v43 = vand.u32 2147483648, %v2268_v17  ;;  %v2304_v21 = vand.u32 2147483647, %v2268_v17 }
 0x33e   :  { %11656 = vst [vmem:[#allocation19_spill] sm:$0xff] %v8966_v40  ;;  %v2017_v7 = vadd.f32 1.0, %v1993_v11 }
 0x33f   :  { %v8907_v2 = vpop.xlane.xlu1 %2350  ;;  %vm2305_vm2 = vcmp.eq.f32.partialorder %v2304_v21, 8.507059e+37 }
 0x340   :  { %6189 = vrsqrt.f32 %v8907_v2  ;;  %vm2429_vm10 = vcmp.eq.f32.partialorder %v8907_v2, inf  ;;  %v2432_v48 = vand.u32 2147483648, %v8907_v2  ;;  %vm2431_vm11 = vcmp.eq.f32.partialorder %v8907_v2, 0.0 }
 0x341   :  { %6191 = vrsqrt.f32 %v8887_v32  ;;  %v8983_v26 = vmax.f32 %v2017_v7, 1e-07 }
 0x342   :  { %2871 = vperm.xlu0 %5900, %v2841_v52   ;;  %6193 = vrcp.f32 %v2268_v17 }
 0x343   :  { %6195 = vrsqrt.f32 %v8983_v26  ;;  %vm2133_vm9 = vcmp.eq.f32.partialorder %v8983_v26, inf }
 0x346   :  { %v6190_v30 = vpop.eup %6189 }
 0x347   :  { %v2423_v14 = vmul.f32 %v6190_v30, %v8907_v2  ;;  %v6192_v3 = vpop.eup %6191 }
 0x348   :  { %v2375_v5 = vmul.f32 %v6192_v3, %v8887_v32  ;;  %v6194_v33 = vpop.eup %6193 }
 0x349   :  { %v2424_v60 = vmul.f32 %v6190_v30, %v2423_v14  ;;  %v2840_v14 = vsub.f32 1.0, %v8966_v40  ;;  %v2296_v19 = vmul.f32 %v6194_v33, %v2268_v17  ;;  %vm2301_vm15 = vweird.f32 %v6194_v33  ;;  %v6196_v12 = vpop.eup %6195 }
 0x34a   :  { %2911 = vperm.xlu0 %5900, %v2849_v38   ;;  %v2376_v16 = vmul.f32 %v6192_v3, %v2375_v5  ;;  %vm2302_vm13 = vmor %vm2300_vm14, %vm2301_vm15  ;;  %v2384_v38 = vand.u32 2147483648, %v8887_v32  ;;  %v2307_v5 = vor.u32 1.1754944e-38, %v2306_v43  ;;  %vm2135_vm14 = vcmp.eq.f32.partialorder %v8983_v26, 0.0 }
 0x34b   :  { %v2425_v0 = vmul.f32 0.5, %v2424_v60 }
 0x34c   :  { %v2377_v41 = vmul.f32 0.5, %v2376_v16  ;;  %v2293_v16 = vperm.slane %v11658_v18, 0 }
 0x34d   :  { %v2426_v13 = vsub.f32 1.5, %v2425_v0  ;;  %2866 = vperm.xlu1 %5898, %v2840_v14   ;;  %v2297_v0 = vsub.f32 1.0, %v2296_v19 }
 0x34f   :  { %v2427_v36 = vmul.f32 %v6190_v30, %v2426_v13  ;;  %v2124_v30 = vand.u32 2147483648, %v8878_v56  ;;  %v2378_v56 = vsub.f32 1.5, %v2377_v41  ;;  %v2020_v41 = vadd.f32 1.0, %v8950_v63 }
 0x351   :  { %v2428_v42 = vmul.f32 %v2427_v36, %v8907_v2  ;;  %v2125_v50 = vsel %vm2123_vm8, %v2124_v30, %v2122_v1  ;;  %v2379_v28 = vmul.f32 %v6192_v3, %v2378_v56  ;;  %v2127_v36 = vmul.f32 %v6196_v12, %v8983_v26  ;;  %v8998_v1 = vpop.permute.xlu2 %2876 }
 0x352   :  { %v8981_v34 = vsel %vm1065_vm0, %v2125_v50, %v8684_v9  ;;  %v2298_v9 = vmul.f32 %v6194_v33, %v2297_v0 }
 0x353   :  { %v2430_v60 = vsel %vm2429_vm10, %v8907_v2, %v2428_v42  ;;  %11657 = vst [vmem:[#allocation20_spill] sm:$0xff] %v8981_v34  ;;  %v2844_v39 = vsub.f32 1.0, %v8981_v34  ;;  %v2380_v2 = vmul.f32 %v2379_v28, %v8887_v32  ;;  %v2128_v50 = vmul.f32 %v6196_v12, %v2127_v36 }
 0x354   :  { %v2433_v52 = vsel %vm2431_vm11, %v2432_v48, %v2430_v60  ;;  %2921 = vperm.xlu2 %5899, %v2851_v59   ;;  %v2299_v13 = vadd.f32 %v6194_v33, %v2298_v9 }
 0x355   :  { %v8986_v24 = vmax.f32 %v2433_v52, 1e-15  ;;  %2886 = vperm.xlu1 %5898, %v2844_v39   ;;  %v2382_v3 = vsel %vm2381_vm12, %v8887_v32, %v2380_v2  ;;  %v11659_v32 = vld [vmem:[#allocation15_spill] sm:$0xff]  ;;  %v9009_v52 = vmax.f32 %v2020_v41, 1e-07  ;;  %v2129_v39 = vmul.f32 0.5, %v2128_v50 }
 0x356   :  { %v2385_v45 = vsel %vm2383_vm3, %v2384_v38, %v2382_v3  ;;  %v2303_v42 = vsel %vm2302_vm13, %v6194_v33, %v2299_v13  ;;  %v2294_v60 = vmul.f32 %v2293_v16, %v11659_v32  ;;  %v2025_v2 = vadd.f32 1.0, %v8869_v57 }
 0x357   :  { %6197 = vrcp.f32 %v8986_v24  ;;  %v9001_v14 = vmax.f32 %v2385_v45, 1e-15  ;;  %v2308_v11 = vsel %vm2305_vm2, %v2307_v5, %v2303_v42  ;;  %v2653_v48 = vand.u32 2147483648, %v8986_v24 }
 0x358   :  { %v2651_v33 = vand.u32 2147483647, %v8986_v24  ;;  %v2309_v19 = vmul.f32 %v2308_v11, %v2294_v60  ;;  %vm2647_vm6 = vweird.f32 %v8986_v24  ;;  %v2130_v13 = vsub.f32 1.5, %v2129_v39 }
 0x359   :  { %6199 = vrcp.f32 %v9001_v14  ;;  %v2654_v28 = vor.u32 1.1754944e-38, %v2653_v48  ;;  %v9020_v38 = vmax.f32 %v2025_v2, 1e-07  ;;  %v2591_v11 = vand.u32 2147483647, %v9001_v14 }
 0x35a   :  { %vm2652_vm1 = vcmp.eq.f32.partialorder %v2651_v33, 8.507059e+37  ;;  %v9013_v59 = vperm.slane %v2309_v19, 0  ;;  %vm2587_vm8 = vweird.f32 %v9001_v14  ;;  %v9036_v32 = vmul.f32 %v11498_v49, %v8966_v40 }
 0x35b   :  { %v2136_v33 = vand.u32 2147483648, %v8983_v26  ;;  %vm2592_vm11 = vcmp.eq.f32.partialorder %v2591_v11, 8.507059e+37  ;;  %vm2169_vm12 = vcmp.eq.f32.partialorder %v9009_v52, inf  ;;  %vm2171_vm3 = vcmp.eq.f32.partialorder %v9009_v52, 0.0 }
 0x35d   :  { %v6198_v27 = vpop.eup %6197 }
 0x35e   :  { %v2643_v17 = vmul.f32 %v6198_v27, %v8986_v24  ;;  %vm2648_vm5 = vweird.f32 %v6198_v27 }
 0x35f   :  { %vm2649_vm4 = vmor %vm2647_vm6, %vm2648_vm5  ;;  %v6200_v21 = vpop.eup %6199  ;;  %vm2229_vm5 = vcmp.eq.f32.partialorder %v9020_v38, inf }
 0x360   :  { %v2644_v30 = vsub.f32 1.0, %v2643_v17  ;;  %v2583_v5 = vmul.f32 %v6200_v21, %v9001_v14  ;;  %v2593_v17 = vand.u32 2147483648, %v9001_v14  ;;  %vm2588_vm7 = vweird.f32 %v6200_v21 }
 0x361   :  { %vm2589_vm10 = vmor %vm2587_vm8, %vm2588_vm7 }
 0x362   :  { %v2645_v7 = vmul.f32 %v6198_v27, %v2644_v30  ;;  %v2584_v16 = vsub.f32 1.0, %v2583_v5 }
 0x364   :  { %v2646_v56 = vadd.f32 %v6198_v27, %v2645_v7  ;;  %v2585_v30 = vmul.f32 %v6200_v21, %v2584_v16  ;;  %v2594_v7 = vor.u32 1.1754944e-38, %v2593_v17 }
 0x366   :  { %v9011_v63 = vpop.xlane.xlu2 %2358  ;;  %v2650_v0 = vsel %vm2649_vm4, %v6198_v27, %v2646_v56  ;;  %v2131_v27 = vmul.f32 %v6196_v12, %v2130_v13  ;;  %v2586_v41 = vadd.f32 %v6200_v21, %v2585_v30  ;;  %v2857_v13 = vpop.permute.xlu0 %2856  ;;  %vm2231_vm4 = vcmp.eq.f32.partialorder %v9020_v38, 0.0 }
 0x367   :  { %6201 = vrsqrt.f32 %v9011_v63  ;;  %v2655_v9 = vsel %vm2652_vm1, %v2654_v28, %v2650_v0  ;;  %v9043_v0 = vmul.f32 %v11498_v49, %v8981_v34  ;;  %vm2477_vm15 = vcmp.eq.f32.partialorder %v9011_v63, inf }
 0x368   :  { %6203 = vrsqrt.f32 %v9009_v52  ;;  %v2656_v43 = vmul.f32 %v2655_v9, %v8783_v61  ;;  %v2132_v42 = vmul.f32 %v2131_v27, %v8983_v26  ;;  %v2590_v56 = vsel %vm2589_vm10, %v6200_v21, %v2586_v41 }
 0x369   :  { %v2595_v28 = vsel %vm2592_vm11, %v2594_v7, %v2590_v56  ;;  %v2328_v27 = vmul.f32 %v9036_v32, %v9036_v32  ;;  %v2332_v17 = vmul.f32 %v9043_v0, %v9043_v0  ;;  %vm2479_vm13 = vcmp.eq.f32.partialorder %v9011_v63, 0.0 }
 0x36a   :  { %v2973_v3 = vmul.f32 %v9013_v59, %v2656_v43  ;;  %v2134_v60 = vsel %vm2133_vm9, %v8983_v26, %v2132_v42  ;;  %v9046_v2 = vmul.f32 %v2595_v28, %v8771_v54 }
 0x36b   :  { %v2137_v9 = vsel %vm2135_vm14, %v2136_v33, %v2134_v60 }
 0x36c   :  { %v2934_v26 = vmul.f32 %v2857_v13, %v9046_v2  ;;  %v9057_v42 = vsel %vm1065_vm0, %v2137_v9, %v8590_v44  ;;  %v2938_v44 = vmul.f32 %v8998_v1, %v2656_v43 }
 0x36d   :  { %v6202_v45 = vpop.eup %6201  ;;  %11660 = vst [vmem:[#allocation16_spill] sm:$0xff] %v9057_v42  ;;  %v9067_v41 = vmul.f32 %v11498_v49, %v9057_v42 }
 0x36e   :  { %v9023_v36 = vpop.xlane.xlu2 %2366  ;;  %v6204_v18 = vpop.eup %6203  ;;  %v2471_v57 = vmul.f32 %v6202_v45, %v9011_v63 }
 0x36f   :  { %6205 = vrsqrt.f32 %v9023_v36  ;;  %v2163_v12 = vmul.f32 %v6204_v18, %v9009_v52  ;;  %v9070_v60 = vpop.permute.xlu0 %2896  ;;  %v2333_v56 = vmul.f32 %v9067_v41, %v9067_v41  ;;  %vm2525_vm2 = vcmp.eq.f32.partialorder %v9023_v36, inf }
 0x370   :  { %6207 = vrsqrt.f32 %v9020_v38  ;;  %v2472_v50 = vmul.f32 %v6202_v45, %v2471_v57  ;;  %v2822_v57 = vsub.f32 0.0, %v9001_v14  ;;  %vm2527_vm6 = vcmp.eq.f32.partialorder %v9023_v36, 0.0 }
 0x371   :  { %v2164_v19 = vmul.f32 %v6204_v18, %v2163_v12 }
 0x372   :  { %v9063_v12 = vsel %vm1065_vm0, %v2822_v57, %v2934_v26  ;;  %v2172_v57 = vand.u32 2147483648, %v9009_v52 }
 0x373   :  { %v2165_v16 = vmul.f32 0.5, %v2164_v19  ;;  %v2826_v19 = vsub.f32 0.0, %v8986_v24 }
 0x374   :  { %2993 = vadd.xlane.f32.xlu0 %v2973_v3  ;;  %v2473_v3 = vmul.f32 0.5, %v2472_v50 }
 0x375   :  { %v6206_v48 = vpop.eup %6205  ;;  %v2166_v50 = vsub.f32 1.5, %v2165_v16  ;;  %v9077_v13 = vsel %vm1065_vm0, %v2826_v19, %v2938_v44 }
 0x376   :  { %v6208_v39 = vpop.eup %6207  ;;  %v2519_v21 = vmul.f32 %v6206_v48, %v9023_v36  ;;  %v2474_v30 = vsub.f32 1.5, %v2473_v3 }
 0x377   :  { %v2223_v5 = vmul.f32 %v6208_v39, %v9020_v38  ;;  %v2167_v9 = vmul.f32 %v6204_v18, %v2166_v50  ;;  %v2480_v18 = vand.u32 2147483648, %v9011_v63  ;;  %v9088_v26 = vpop.permute.xlu0 %2881 }
 0x378   :  { %v2520_v11 = vmul.f32 %v6206_v48, %v2519_v21  ;;  %v2475_v7 = vmul.f32 %v6202_v45, %v2474_v30  ;;  %v9084_v21 = vpop.permute.xlu1 %2916 }
 0x379   :  { %v2224_v14 = vmul.f32 %v6208_v39, %v2223_v5  ;;  %v2168_v43 = vmul.f32 %v2167_v9, %v9009_v52 }
 0x37a   :  { %v2521_v33 = vmul.f32 0.5, %v2520_v11  ;;  %v2476_v3 = vmul.f32 %v2475_v7, %v9011_v63  ;;  %v2232_v7 = vand.u32 2147483648, %v9020_v38 }
 0x37b   :  { %v2225_v28 = vmul.f32 0.5, %v2224_v14  ;;  %v2170_v16 = vsel %vm2169_vm12, %v9009_v52, %v2168_v43  ;;  %v2528_v52 = vand.u32 2147483648, %v9023_v36 }
 0x37c   :  { %v2478_v24 = vsel %vm2477_vm15, %v9011_v63, %v2476_v3  ;;  %v2173_v30 = vsel %vm2171_vm3, %v2172_v57, %v2170_v16 }
 0x37d   :  { %2354 = vadd.xlane.f32.xlu2 %v2332_v17  ;;  %v2226_v1 = vsub.f32 1.5, %v2225_v28  ;;  %v2481_v17 = vsel %vm2479_vm13, %v2480_v18, %v2478_v24 }
 0x37e   :  { %v9095_v14 = vmax.f32 %v2481_v17, 1e-15 }
 0x37f   :  { %2346 = vadd.xlane.f32.xlu1 %v2328_v27  ;;  %v2522_v27 = vsub.f32 1.5, %v2521_v33  ;;  %v2227_v5 = vmul.f32 %v6208_v39, %v2226_v1  ;;  %v9101_v39 = vsel %vm1065_vm0, %v2173_v30, %v8524_v53 }
 0x380   :  { %11661 = vst [vmem:[#allocation30_spill] sm:$0xff] %v9101_v39  ;;  %6209 = vrcp.f32 %v9095_v14  ;;  %v2848_v33 = vsub.f32 1.0, %v9101_v39  ;;  %v9111_v19 = vpop.permute.xlu1 %2901  ;;  %v2711_v17 = vand.u32 2147483647, %v9095_v14  ;;  %vm2707_vm7 = vweird.f32 %v9095_v14 }
 0x381   :  { %v2523_v45 = vmul.f32 %v6206_v48, %v2522_v27  ;;  %v2228_v11 = vmul.f32 %v2227_v5, %v9020_v38 }
 0x382   :  { %vm2712_vm11 = vcmp.eq.f32.partialorder %v2711_v17, 8.507059e+37 }
 0x383   :  { %v2524_v48 = vmul.f32 %v2523_v45, %v9023_v36  ;;  %v2230_v50 = vsel %vm2229_vm5, %v9020_v38, %v2228_v11 }
 0x385   :  { %v2526_v63 = vsel %vm2525_vm2, %v9023_v36, %v2524_v48 }
 0x386   :  { %v2529_v53 = vsel %vm2527_vm6, %v2528_v52, %v2526_v63  ;;  %v6210_v36 = vpop.eup %6209 }
 0x387   :  { %2356 = vadd.xlane.f32.xlu1 %v2333_v56  ;;  %v2233_v56 = vsel %vm2231_vm4, %v2232_v7, %v2230_v50  ;;  %v9114_v28 = vmax.f32 %v2529_v53, 1e-15  ;;  %v2703_v38 = vmul.f32 %v6210_v36, %v9095_v14  ;;  %vm2708_vm1 = vweird.f32 %v6210_v36 }
 0x388   :  { %v9119_v9 = vsel %vm1065_vm0, %v2233_v56, %v8757_v46  ;;  %v2713_v46 = vand.u32 2147483648, %v9095_v14  ;;  %vm2709_vm8 = vmor %vm2707_vm7, %vm2708_vm1 }
 0x389   :  { %11662 = vst [vmem:[#allocation27_spill] sm:$0xff] %v9119_v9  ;;  %v2853_v1 = vsub.f32 1.0, %v9119_v9  ;;  %v2704_v45 = vsub.f32 1.0, %v2703_v38  ;;  %vm2767_vm15 = vweird.f32 %v9114_v28 }
 0x38a   :  { %v2714_v7 = vor.u32 1.1754944e-38, %v2713_v46 }
 0x38b   :  { %v2705_v5 = vmul.f32 %v6210_v36, %v2704_v45 }
 0x38d   :  { %v2706_v48 = vadd.f32 %v6210_v36, %v2705_v5 }
 0x38f   :  { %v2710_v50 = vsel %vm2709_vm8, %v6210_v36, %v2706_v48  ;;  %v2771_v36 = vand.u32 2147483647, %v9114_v28  ;;  %v2830_v48 = vsub.f32 0.0, %v9095_v14 }
 0x391   :  { %vm2772_vm13 = vcmp.eq.f32.partialorder %v2771_v36, 8.507059e+37 }
 0x395   :  { %2906 = vperm.xlu2 %5899, %v2848_v33  }
 0x399   :  { %v2353_v44 = vpop.xlane.xlu0 %2352 }
 0x39a   :  { %6211 = vrsqrt.f32 %v2353_v44  ;;  %vm2441_vm9 = vcmp.eq.f32.partialorder %v2353_v44, inf  ;;  %vm2443_vm10 = vcmp.eq.f32.partialorder %v2353_v44, 0.0  ;;  %v2444_v56 = vand.u32 2147483648, %v2353_v44 }
 0x39b   :  { %6213 = vrcp.f32 %v9114_v28 }
 0x39f   :  { %v9123_v43 = vpop.xlane.xlu1 %2360 }
 0x3a0   :  { %v6212_v3 = vpop.eup %6211  ;;  %6215 = vrsqrt.f32 %v9123_v43  ;;  %2931 = vperm.xlu1 %5898, %v2853_v1   ;;  %v2715_v1 = vsel %vm2712_vm11, %v2714_v7, %v2710_v50  ;;  %vm2489_vm3 = vcmp.eq.f32.partialorder %v9123_v43, inf  ;;  %vm2491_vm2 = vcmp.eq.f32.partialorder %v9123_v43, 0.0 }
 0x3a1   :  { %v2435_v27 = vmul.f32 %v6212_v3, %v2353_v44  ;;  %v6214_v16 = vpop.eup %6213  ;;  %v9139_v45 = vmul.f32 %v2715_v1, %v8807_v22 }
 0x3a2   :  { %v2763_v33 = vmul.f32 %v6214_v16, %v9114_v28  ;;  %vm2768_vm14 = vweird.f32 %v6214_v16 }
 0x3a3   :  { %v2436_v24 = vmul.f32 %v6212_v3, %v2435_v27  ;;  %v2942_v17 = vmul.f32 %v9070_v60, %v9139_v45  ;;  %vm2769_vm12 = vmor %vm2767_vm15, %vm2768_vm14 }
 0x3a4   :  { %v2764_v38 = vsub.f32 1.0, %v2763_v33 }
 0x3a5   :  { %v2437_v18 = vmul.f32 0.5, %v2436_v24  ;;  %v9151_v33 = vsel %vm1065_vm0, %v2830_v48, %v2942_v17 }
 0x3a6   :  { %v6216_v30 = vpop.eup %6215 }
 0x3a7   :  { %v2438_v57 = vsub.f32 1.5, %v2437_v18  ;;  %v2483_v63 = vmul.f32 %v6216_v30, %v9123_v43  ;;  %v9131_v52 = vpop.xlane.xlu1 %2368  ;;  %v2773_v18 = vand.u32 2147483648, %v9114_v28 }
 0x3a8   :  { %6217 = vrsqrt.f32 %v9131_v52  ;;  %vm2537_vm5 = vcmp.eq.f32.partialorder %v9131_v52, inf  ;;  %vm2539_vm6 = vcmp.eq.f32.partialorder %v9131_v52, 0.0 }
 0x3a9   :  { %v2439_v11 = vmul.f32 %v6212_v3, %v2438_v57  ;;  %v2484_v27 = vmul.f32 %v6216_v30, %v2483_v63  ;;  %v9135_v3 = vpop.permute.xlu2 %2861  ;;  %v2765_v57 = vmul.f32 %v6214_v16, %v2764_v38  ;;  %v2774_v7 = vor.u32 1.1754944e-38, %v2773_v18 }
 0x3ab   :  { %v2440_v53 = vmul.f32 %v2439_v11, %v2353_v44  ;;  %v2485_v46 = vmul.f32 0.5, %v2484_v27 }
 0x3ad   :  { %v2442_v24 = vsel %vm2441_vm9, %v2353_v44, %v2440_v53  ;;  %v2486_v63 = vsub.f32 1.5, %v2485_v46  ;;  %v2766_v44 = vadd.f32 %v6214_v16, %v2765_v57  ;;  %v2834_v46 = vsub.f32 0.0, %v9114_v28 }
 0x3ae   :  { %v2445_v5 = vsel %vm2443_vm10, %v2444_v56, %v2442_v24  ;;  %v6218_v50 = vpop.eup %6217  ;;  %v2492_v24 = vand.u32 2147483648, %v9123_v43 }
 0x3af   :  { %v9146_v11 = vmax.f32 %v2445_v5, 1e-15  ;;  %v2487_v53 = vmul.f32 %v6216_v30, %v2486_v63  ;;  %v2531_v56 = vmul.f32 %v6218_v50, %v9131_v52  ;;  %v2770_v27 = vsel %vm2769_vm12, %v6214_v16, %v2766_v44 }
 0x3b0   :  { %v2775_v60 = vsel %vm2772_vm13, %v2774_v7, %v2770_v27  ;;  %v9181_v27 = vmul.f32 %v11498_v49, %v9101_v39 }
 0x3b1   :  { %6219 = vrcp.f32 %v9146_v11  ;;  %v2488_v14 = vmul.f32 %v2487_v53, %v9123_v43  ;;  %v2532_v1 = vmul.f32 %v6218_v50, %v2531_v56  ;;  %v9157_v38 = vmul.f32 %v2775_v60, %v8821_v37  ;;  %v2345_v18 = vpop.xlane.xlu2 %2344 }
 0x3b2   :  { %6221 = vrsqrt.f32 %v2345_v18  ;;  %vm2662_vm1 = vweird.f32 %v9146_v11  ;;  %vm2393_vm8 = vcmp.eq.f32.partialorder %v2345_v18, inf  ;;  %vm2395_vm10 = vcmp.eq.f32.partialorder %v2345_v18, 0.0 }
 0x3b3   :  { %v2490_v30 = vsel %vm2489_vm3, %v9123_v43, %v2488_v14  ;;  %v2533_v16 = vmul.f32 0.5, %v2532_v1  ;;  %v2946_v5 = vmul.f32 %v9084_v21, %v9157_v38  ;;  %v2540_v21 = vand.u32 2147483648, %v9131_v52 }
 0x3b4   :  { %v2493_v36 = vsel %vm2491_vm2, %v2492_v24, %v2490_v30  ;;  %v2668_v24 = vand.u32 2147483648, %v9146_v11 }
 0x3b5   :  { %v2534_v57 = vsub.f32 1.5, %v2533_v16  ;;  %v9166_v17 = vmax.f32 %v2493_v36, 1e-15  ;;  %v9170_v48 = vsel %vm1065_vm0, %v2834_v46, %v2946_v5  ;;  %v2666_v36 = vand.u32 2147483647, %v9146_v11 }
 0x3b7   :  { %v6220_v63 = vpop.eup %6219  ;;  %v2535_v44 = vmul.f32 %v6218_v50, %v2534_v57  ;;  %6223 = vrcp.f32 %v9166_v17  ;;  %v9192_v57 = vmul.f32 %v11498_v49, %v8916_v55  ;;  %vm2667_vm9 = vcmp.eq.f32.partialorder %v2666_v36, 8.507059e+37 }
 0x3b8   :  { %v6222_v7 = vpop.eup %6221  ;;  %v2658_v28 = vmul.f32 %v6220_v63, %v9146_v11  ;;  %vm2663_vm4 = vweird.f32 %v6220_v63  ;;  %v2728_v36 = vand.u32 2147483648, %v9166_v17  ;;  %v2827_v55 = vsub.f32 0.0, %v9146_v11 }
 0x3b9   :  { %v2536_v43 = vmul.f32 %v2535_v44, %v9131_v52  ;;  %v2387_v53 = vmul.f32 %v6222_v7, %v2345_v18  ;;  %vm2664_vm7 = vmor %vm2662_vm1, %vm2663_vm4  ;;  %vm2722_vm14 = vweird.f32 %v9166_v17 }
 0x3ba   :  { %v2659_v14 = vsub.f32 1.0, %v2658_v28 }
 0x3bb   :  { %v2538_v56 = vsel %vm2537_vm5, %v9131_v52, %v2536_v43  ;;  %v2388_v60 = vmul.f32 %v6222_v7, %v2387_v53  ;;  %v2336_v52 = vmul.f32 %v9181_v27, %v9181_v27  ;;  %v9197_v43 = vmul.f32 %v11498_v49, %v8955_v51 }
 0x3bc   :  { %v2541_v50 = vsel %vm2539_vm6, %v2540_v21, %v2538_v56  ;;  %v2660_v16 = vmul.f32 %v6220_v63, %v2659_v14  ;;  %v2669_v21 = vor.u32 1.1754944e-38, %v2668_v24  ;;  %v2340_v14 = vmul.f32 %v9192_v57, %v9192_v57 }
 0x3bd   :  { %v9183_v1 = vmax.f32 %v2541_v50, 1e-15  ;;  %v2389_v30 = vmul.f32 0.5, %v2388_v60  ;;  %v6224_v5 = vpop.eup %6223  ;;  %v2396_v51 = vand.u32 2147483648, %v2345_v18 }
 0x3be   :  { %v2661_v44 = vadd.f32 %v6220_v63, %v2660_v16  ;;  %2362 = vadd.xlane.f32.xlu2 %v2336_v52  ;;  %v2718_v50 = vmul.f32 %v6224_v5, %v9166_v17  ;;  %v2337_v52 = vmul.f32 %v9197_v43, %v9197_v43  ;;  %vm2723_vm11 = vweird.f32 %v6224_v5 }
 0x3bf   :  { %6225 = vrcp.f32 %v9183_v1  ;;  %v2390_v46 = vsub.f32 1.5, %v2389_v30  ;;  %vm2724_vm12 = vmor %vm2722_vm14, %vm2723_vm11  ;;  %vm2782_vm3 = vweird.f32 %v9183_v1 }
 0x3c0   :  { %v2665_v28 = vsel %vm2664_vm7, %v6220_v63, %v2661_v44  ;;  %v2719_v24 = vsub.f32 1.0, %v2718_v50  ;;  %v2786_v50 = vand.u32 2147483647, %v9183_v1 }
 0x3c1   :  { %v2391_v53 = vmul.f32 %v6222_v7, %v2390_v46  ;;  %v2670_v56 = vsel %vm2667_vm9, %v2669_v21, %v2665_v28  ;;  %v2726_v21 = vand.u32 2147483647, %v9166_v17 }
 0x3c2   :  { %v9203_v30 = vmul.f32 %v2670_v56, %v8867_v8  ;;  %v2720_v44 = vmul.f32 %v6224_v5, %v2719_v24  ;;  %v2729_v24 = vor.u32 1.1754944e-38, %v2728_v36  ;;  %vm2787_vm5 = vcmp.eq.f32.partialorder %v2786_v50, 8.507059e+37  ;;  %v2922_v50 = vpop.permute.xlu2 %2921 }
 0x3c3   :  { %v2392_v60 = vmul.f32 %v2391_v53, %v2345_v18  ;;  %vm2727_vm13 = vcmp.eq.f32.partialorder %v2726_v21, 8.507059e+37  ;;  %v2831_v21 = vsub.f32 0.0, %v9166_v17 }
 0x3c4   :  { %v2939_v56 = vmul.f32 %v9088_v26, %v9203_v30  ;;  %v9222_v26 = vmul.f32 %v11498_v49, %v9119_v9 }
 0x3c5   :  { %v6226_v16 = vpop.eup %6225  ;;  %v2394_v7 = vsel %vm2393_vm8, %v2345_v18, %v2392_v60  ;;  %v2788_v18 = vand.u32 2147483648, %v9183_v1  ;;  %v2721_v60 = vadd.f32 %v6224_v5, %v2720_v44 }
 0x3c6   :  { %v2778_v63 = vmul.f32 %v6226_v16, %v9183_v1  ;;  %v2397_v46 = vsel %vm2395_vm10, %v2396_v51, %v2394_v7  ;;  %2370 = vadd.xlane.f32.xlu2 %v2340_v14  ;;  %vm2783_vm15 = vweird.f32 %v6226_v16 }
 0x3c7   :  { %v9210_v53 = vmax.f32 %v2397_v46, 1e-15  ;;  %v2725_v11 = vsel %vm2724_vm12, %v6224_v5, %v2721_v60  ;;  %vm2784_vm2 = vmor %vm2782_vm3, %vm2783_vm15  ;;  %v2341_v60 = vmul.f32 %v9222_v26, %v9222_v26 }
 0x3c8   :  { %v2779_v28 = vsub.f32 1.0, %v2778_v63  ;;  %v2730_v14 = vsel %vm2727_vm13, %v2729_v24, %v2725_v11  ;;  %v9227_v63 = vsel %vm1065_vm0, %v2827_v55, %v2939_v56 }
 0x3c9   :  { %6227 = vrcp.f32 %v9210_v53  ;;  %v9230_v46 = vmul.f32 %v2730_v14, %v8883_v25  ;;  %v2606_v17 = vand.u32 2147483647, %v9210_v53  ;;  %vm2602_vm4 = vweird.f32 %v9210_v53 }
 0x3ca   :  { %2364 = vadd.xlane.f32.xlu1 %v2337_v52  ;;  %v2780_v51 = vmul.f32 %v6226_v16, %v2779_v28  ;;  %v2789_v52 = vor.u32 1.1754944e-38, %v2788_v18  ;;  %v2977_v14 = vmul.f32 %v9013_v59, %v9139_v45  ;;  %v2974_v45 = vmul.f32 %v9013_v59, %v9203_v30 }
 0x3cb   :  { %v2943_v5 = vmul.f32 %v9111_v19, %v9230_v46  ;;  %vm2607_vm7 = vcmp.eq.f32.partialorder %v2606_v17, 8.507059e+37 }
 0x3cc   :  { %v2781_v7 = vadd.f32 %v6226_v16, %v2780_v51  ;;  %v2608_v51 = vand.u32 2147483648, %v9210_v53 }
 0x3cd   :  { %v9241_v18 = vsel %vm1065_vm0, %v2831_v21, %v2943_v5 }
 0x3ce   :  { %v2785_v36 = vsel %vm2784_vm2, %v6226_v16, %v2781_v7  ;;  %v2835_v7 = vsub.f32 0.0, %v9183_v1  ;;  %v2845_v1 = vsub.f32 1.0, %v9057_v42 }
 0x3cf   :  { %v2790_v44 = vsel %vm2787_vm5, %v2789_v52, %v2785_v36  ;;  %v6228_v28 = vpop.eup %6227  ;;  %v2609_v52 = vor.u32 1.1754944e-38, %v2608_v51 }
 0x3d0   :  { %v2791_v55 = vmul.f32 %v2790_v44, %v8904_v10  ;;  %v2598_v56 = vmul.f32 %v6228_v28, %v9210_v53  ;;  %vm2603_vm6 = vweird.f32 %v6228_v28 }
 0x3d1   :  { %vm2604_vm1 = vmor %vm2602_vm4, %vm2603_vm6 }
 0x3d2   :  { %2372 = vadd.xlane.f32.xlu1 %v2341_v60  ;;  %v2599_v16 = vsub.f32 1.0, %v2598_v56  ;;  %v2947_v19 = vmul.f32 %v2922_v50, %v2791_v55  ;;  %v9256_v56 = vpop.permute.xlu1 %2866 }
 0x3d4   :  { %v2600_v24 = vmul.f32 %v6228_v28, %v2599_v16  ;;  %v9251_v44 = vsel %vm1065_vm0, %v2835_v7, %v2947_v19 }
 0x3d6   :  { %v2601_v11 = vadd.f32 %v6228_v28, %v2600_v24  ;;  %v2823_v24 = vsub.f32 0.0, %v9210_v53  ;;  %v9271_v53 = vmul.f32 %v11498_v49, %v8935_v47 }
 0x3d8   :  { %v2605_v36 = vsel %vm2604_vm1, %v6228_v28, %v2601_v11  ;;  %v2982_v28 = vmul.f32 %v9013_v59, %v2791_v55 }
 0x3d9   :  { %v2610_v5 = vsel %vm2607_vm7, %v2609_v52, %v2605_v36 }
 0x3da   :  { %3001 = vadd.xlane.f32.xlu1 %v2977_v14  ;;  %v2611_v21 = vmul.f32 %v2610_v5, %v8930_v20  ;;  %v9261_v16 = vpop.permute.xlu1 %2886 }
 0x3dc   :  { %v2970_v60 = vmul.f32 %v9013_v59, %v2611_v21  ;;  %v2935_v50 = vmul.f32 %v9135_v3, %v2611_v21 }
 0x3de   :  { %2987 = vadd.xlane.f32.xlu0 %v2970_v60  ;;  %2891 = vperm.xlu2 %5899, %v2845_v1   ;;  %v9267_v17 = vsel %vm1065_vm0, %v2823_v24, %v2935_v50 }
 0x3e2   :  { %2995 = vadd.xlane.f32.xlu1 %v2974_v45 }
 0x3e6   :  { %3011 = vadd.xlane.f32.xlu0 %v2982_v28 }
 0x3f0   :  { %v2355_v19 = vpop.xlane.xlu2 %2354 }
 0x3f1   :  { %vm2453_vm10 = vcmp.eq.f32.partialorder %v2355_v19, inf  ;;  %vm2455_vm11 = vcmp.eq.f32.partialorder %v2355_v19, 0.0 }
 0x3f2   :  { %v2347_v51 = vpop.xlane.xlu1 %2346 }
 0x3f3   :  { %6229 = vrsqrt.f32 %v2347_v51  ;;  %vm2405_vm9 = vcmp.eq.f32.partialorder %v2347_v51, inf  ;;  %v2408_v28 = vand.u32 2147483648, %v2347_v51  ;;  %vm2407_vm8 = vcmp.eq.f32.partialorder %v2347_v51, 0.0 }
 0x3f4   :  { %6231 = vrsqrt.f32 %v2355_v19 }
 0x3f9   :  { %v6230_v30 = vpop.eup %6229 }
 0x3fa   :  { %v6232_v11 = vpop.eup %6231  ;;  %v2399_v7 = vmul.f32 %v6230_v30, %v2347_v51 }
 0x3fb   :  { %v2447_v55 = vmul.f32 %v6232_v11, %v2355_v19 }
 0x3fc   :  { %v2400_v14 = vmul.f32 %v6230_v30, %v2399_v7  ;;  %v2456_v7 = vand.u32 2147483648, %v2355_v19 }
 0x3fd   :  { %v2448_v36 = vmul.f32 %v6232_v11, %v2447_v55 }
 0x3fe   :  { %v2401_v52 = vmul.f32 0.5, %v2400_v14 }
 0x3ff   :  { %v2449_v60 = vmul.f32 0.5, %v2448_v36  ;;  %v2357_v36 = vpop.xlane.xlu1 %2356 }
 0x400   :  { %v2402_v5 = vsub.f32 1.5, %v2401_v52  ;;  %vm2465_vm4 = vcmp.eq.f32.partialorder %v2357_v36, inf  ;;  %vm2467_vm1 = vcmp.eq.f32.partialorder %v2357_v36, 0.0 }
 0x401   :  { %v2450_v21 = vsub.f32 1.5, %v2449_v60 }
 0x402   :  { %v2403_v3 = vmul.f32 %v6230_v30, %v2402_v5  ;;  %v2329_v30 = vmul.f32 %v9271_v53, %v9271_v53 }
 0x403   :  { %v2451_v45 = vmul.f32 %v6232_v11, %v2450_v21 }
 0x404   :  { %v2404_v1 = vmul.f32 %v2403_v3, %v2347_v51 }
 0x405   :  { %v2452_v24 = vmul.f32 %v2451_v45, %v2355_v19 }
 0x406   :  { %v2406_v50 = vsel %vm2405_vm9, %v2347_v51, %v2404_v1  ;;  %v2969_v51 = vmul.f32 %v9013_v59, %v9046_v2  ;;  %v2981_v2 = vmul.f32 %v9013_v59, %v9157_v38 }
 0x407   :  { %v2409_v9 = vsel %vm2407_vm8, %v2408_v28, %v2406_v50  ;;  %v2454_v55 = vsel %vm2453_vm10, %v2355_v19, %v2452_v24  ;;  %2348 = vadd.xlane.f32.xlu2 %v2329_v30 }
 0x408   :  { %v2568_v14 = vmax.f32 %v2409_v9, 1e-15  ;;  %v2457_v52 = vsel %vm2455_vm11, %v2456_v7, %v2454_v55 }
 0x409   :  { %v9275_v11 = vmax.f32 %v2457_v52, 1e-15 }
 0x40a   :  { %6233 = vrcp.f32 %v2568_v14  ;;  %v2623_v21 = vand.u32 2147483648, %v2568_v14  ;;  %v2621_v45 = vand.u32 2147483647, %v2568_v14  ;;  %vm2617_vm15 = vweird.f32 %v2568_v14 }
 0x40b   :  { %6235 = vrcp.f32 %v9275_v11  ;;  %vm2677_vm2 = vweird.f32 %v9275_v11 }
 0x40c   :  { %6237 = vrsqrt.f32 %v2357_v36  ;;  %v2624_v55 = vor.u32 1.1754944e-38, %v2623_v21  ;;  %vm2622_vm13 = vcmp.eq.f32.partialorder %v2621_v45, 8.507059e+37 }
 0x40f   :  { %2985 = vadd.xlane.f32.xlu2 %v2969_v51 }
 0x410   :  { %v6234_v5 = vpop.eup %6233 }
 0x411   :  { %v2613_v60 = vmul.f32 %v6234_v5, %v2568_v14  ;;  %v6236_v9 = vpop.eup %6235  ;;  %vm2618_vm14 = vweird.f32 %v6234_v5 }
 0x412   :  { %v2673_v3 = vmul.f32 %v6236_v9, %v9275_v11  ;;  %v6238_v50 = vpop.eup %6237  ;;  %vm2619_vm12 = vmor %vm2617_vm15, %vm2618_vm14  ;;  %vm2678_vm3 = vweird.f32 %v6236_v9 }
 0x413   :  { %v2614_v19 = vsub.f32 1.0, %v2613_v60  ;;  %v2459_v30 = vmul.f32 %v6238_v50, %v2357_v36  ;;  %vm2679_vm5 = vmor %vm2677_vm2, %vm2678_vm3 }
 0x414   :  { %v2674_v28 = vsub.f32 1.0, %v2673_v3  ;;  %v2683_v3 = vand.u32 2147483648, %v9275_v11 }
 0x415   :  { %v2615_v1 = vmul.f32 %v6234_v5, %v2614_v19 }
 0x416   :  { %v2675_v7 = vmul.f32 %v6236_v9, %v2674_v28  ;;  %v2460_v28 = vmul.f32 %v6238_v50, %v2459_v30 }
 0x417   :  { %v2616_v24 = vadd.f32 %v6234_v5, %v2615_v1  ;;  %3009 = vadd.xlane.f32.xlu2 %v2981_v2  ;;  %v2681_v1 = vand.u32 2147483647, %v9275_v11  ;;  %v2824_v2 = vsub.f32 0.0, %v2568_v14  ;;  %v9298_v14 = vpop.permute.xlu2 %2906 }
 0x418   :  { %v2676_v60 = vadd.f32 %v6236_v9, %v2675_v7  ;;  %v2461_v7 = vmul.f32 0.5, %v2460_v28  ;;  %v9300_v28 = vpop.permute.xlu1 %2931 }
 0x419   :  { %v2620_v52 = vsel %vm2619_vm12, %v6234_v5, %v2616_v24  ;;  %v2684_v5 = vor.u32 1.1754944e-38, %v2683_v3  ;;  %v2978_v24 = vmul.f32 %v9013_v59, %v9230_v46  ;;  %vm2682_vm6 = vcmp.eq.f32.partialorder %v2681_v1, 8.507059e+37 }
 0x41a   :  { %v2625_v51 = vsel %vm2622_vm13, %v2624_v55, %v2620_v52  ;;  %v2680_v38 = vsel %vm2679_vm5, %v6236_v9, %v2676_v60  ;;  %v2468_v46 = vand.u32 2147483648, %v2357_v36 }
 0x41b   :  { %v2626_v19 = vmul.f32 %v2625_v51, %v9036_v32  ;;  %v2685_v55 = vsel %vm2682_vm6, %v2684_v5, %v2680_v38  ;;  %v2462_v51 = vsub.f32 1.5, %v2461_v7 }
 0x41c   :  { %v2686_v52 = vmul.f32 %v2685_v55, %v9043_v0 }
 0x41d   :  { %v2971_v21 = vmul.f32 %v9013_v59, %v2626_v19  ;;  %v2936_v45 = vmul.f32 %v9256_v56, %v2626_v19  ;;  %v2463_v60 = vmul.f32 %v6238_v50, %v2462_v51 }
 0x41e   :  { %v2975_v9 = vmul.f32 %v9013_v59, %v2686_v52  ;;  %v2940_v3 = vmul.f32 %v9261_v16, %v2686_v52 }
 0x41f   :  { %2989 = vadd.xlane.f32.xlu1 %v2971_v21  ;;  %3003 = vadd.xlane.f32.xlu2 %v2978_v24  ;;  %v9294_v30 = vsel %vm1065_vm0, %v2824_v2, %v2936_v45  ;;  %v2464_v56 = vmul.f32 %v2463_v60, %v2357_v36  ;;  %v2828_v21 = vsub.f32 0.0, %v9275_v11 }
 0x421   :  { %v2466_v19 = vsel %vm2465_vm4, %v2357_v36, %v2464_v56  ;;  %v9307_v50 = vsel %vm1065_vm0, %v2828_v21, %v2940_v3 }
 0x422   :  { %v2469_v1 = vsel %vm2467_vm1, %v2468_v46, %v2466_v19 }
 0x423   :  { %v9303_v38 = vmax.f32 %v2469_v1, 1e-15 }
 0x425   :  { %6239 = vrcp.f32 %v9303_v38  ;;  %vm2692_vm7 = vweird.f32 %v9303_v38  ;;  %v2696_v42 = vand.u32 2147483647, %v9303_v38 }
 0x427   :  { %2997 = vadd.xlane.f32.xlu2 %v2975_v9  ;;  %vm2697_vm12 = vcmp.eq.f32.partialorder %v2696_v42, 8.507059e+37 }
 0x42b   :  { %v6240_v16 = vpop.eup %6239 }
 0x42c   :  { %v2688_v24 = vmul.f32 %v6240_v16, %v9303_v38  ;;  %vm2693_vm9 = vweird.f32 %v6240_v16 }
 0x42d   :  { %vm2694_vm15 = vmor %vm2692_vm7, %vm2693_vm9 }
 0x42e   :  { %v2689_v51 = vsub.f32 1.0, %v2688_v24  ;;  %v2698_v24 = vand.u32 2147483648, %v9303_v38 }
 0x430   :  { %v2690_v46 = vmul.f32 %v6240_v16, %v2689_v51 }
 0x431   :  { %v2363_v45 = vpop.xlane.xlu2 %2362 }
 0x432   :  { %vm2501_vm11 = vcmp.eq.f32.partialorder %v2363_v45, inf  ;;  %vm2503_vm14 = vcmp.eq.f32.partialorder %v2363_v45, 0.0 }
 0x439   :  { %v2371_v2 = vpop.xlane.xlu2 %2370 }
 0x43a   :  { %vm2549_vm13 = vcmp.eq.f32.partialorder %v2371_v2, inf  ;;  %vm2551_vm3 = vcmp.eq.f32.partialorder %v2371_v2, 0.0 }
 0x43d   :  { %v2365_v5 = vpop.xlane.xlu1 %2364 }
 0x43e   :  { %6241 = vrsqrt.f32 %v2365_v5  ;;  %vm2513_vm8 = vcmp.eq.f32.partialorder %v2365_v5, inf  ;;  %vm2515_vm10 = vcmp.eq.f32.partialorder %v2365_v5, 0.0 }
 0x43f   :  { %6243 = vrsqrt.f32 %v2363_v45 }
 0x440   :  { %6245 = vrsqrt.f32 %v2371_v2 }
 0x444   :  { %v6242_v36 = vpop.eup %6241 }
 0x445   :  { %v6244_v7 = vpop.eup %6243  ;;  %v2507_v55 = vmul.f32 %v6242_v36, %v2365_v5  ;;  %v9313_v40 = vpop.xlane.xlu1 %2372 }
 0x446   :  { %v2495_v52 = vmul.f32 %v6244_v7, %v2363_v45  ;;  %v6246_v3 = vpop.eup %6245  ;;  %6247 = vrsqrt.f32 %v9313_v40 }
 0x447   :  { %v2508_v11 = vmul.f32 %v6242_v36, %v2507_v55  ;;  %v2543_v47 = vmul.f32 %v6246_v3, %v2371_v2 }
 0x448   :  { %v2496_v60 = vmul.f32 %v6244_v7, %v2495_v52 }
 0x449   :  { %v2509_v9 = vmul.f32 0.5, %v2508_v11  ;;  %v2516_v11 = vand.u32 2147483648, %v2365_v5  ;;  %v2544_v52 = vmul.f32 %v6246_v3, %v2543_v47 }
 0x44a   :  { %v2497_v19 = vmul.f32 0.5, %v2496_v60 }
 0x44b   :  { %v2510_v56 = vsub.f32 1.5, %v2509_v9  ;;  %v2691_v9 = vadd.f32 %v6240_v16, %v2690_v46 }
 0x44c   :  { %v2498_v21 = vsub.f32 1.5, %v2497_v19  ;;  %v2545_v19 = vmul.f32 0.5, %v2544_v52 }
 0x44d   :  { %v2511_v1 = vmul.f32 %v6242_v36, %v2510_v56  ;;  %v2504_v56 = vand.u32 2147483648, %v2363_v45 }
 0x44e   :  { %v2499_v55 = vmul.f32 %v6244_v7, %v2498_v21  ;;  %v9322_v7 = vpop.permute.xlu0 %2926  ;;  %v2699_v21 = vor.u32 1.1754944e-38, %v2698_v24 }
 0x44f   :  { %v2512_v39 = vmul.f32 %v2511_v1, %v2365_v5 }
 0x450   :  { %v2500_v36 = vmul.f32 %v2499_v55, %v2363_v45 }
 0x451   :  { %v2514_v51 = vsel %vm2513_vm8, %v2365_v5, %v2512_v39  ;;  %v2546_v39 = vsub.f32 1.5, %v2545_v19  ;;  %v2695_v5 = vsel %vm2694_vm15, %v6240_v16, %v2691_v9 }
 0x452   :  { %v2517_v60 = vsel %vm2515_vm10, %v2516_v11, %v2514_v51  ;;  %v2502_v6 = vsel %vm2501_vm11, %v2363_v45, %v2500_v36  ;;  %v2700_v11 = vsel %vm2697_vm12, %v2699_v21, %v2695_v5  ;;  %v6248_v45 = vpop.eup %6247  ;;  %v2552_v51 = vand.u32 2147483648, %v2371_v2  ;;  %v2892_v36 = vpop.permute.xlu2 %2891 }
 0x453   :  { %v9317_v1 = vmax.f32 %v2517_v60, 1e-15  ;;  %v2505_v47 = vsel %vm2503_vm14, %v2504_v56, %v2502_v6  ;;  %v2547_v55 = vmul.f32 %v6246_v3, %v2546_v39  ;;  %v9329_v6 = vmul.f32 %v2700_v11, %v9067_v41 }
 0x454   :  { %v9325_v46 = vmax.f32 %v2505_v47, 1e-15  ;;  %v2555_v9 = vmul.f32 %v6248_v45, %v9313_v40  ;;  %v2829_v39 = vsub.f32 0.0, %v9303_v38  ;;  %vm2561_vm12 = vcmp.eq.f32.partialorder %v9313_v40, inf }
 0x455   :  { %6249 = vrcp.f32 %v9317_v1  ;;  %v2548_v52 = vmul.f32 %v2547_v55, %v2371_v2  ;;  %v2941_v42 = vmul.f32 %v2892_v36, %v9329_v6  ;;  %v2758_v11 = vand.u32 2147483648, %v9317_v1 }
 0x456   :  { %6251 = vrcp.f32 %v9325_v46  ;;  %v9336_v47 = vpop.permute.xlu0 %2871  ;;  %v2556_v5 = vmul.f32 %v6248_v45, %v2555_v9  ;;  %v2741_v29 = vand.u32 2147483647, %v9325_v46  ;;  %vm2752_vm6 = vweird.f32 %v9317_v1 }
 0x457   :  { %v2550_v60 = vsel %vm2549_vm13, %v2371_v2, %v2548_v52  ;;  %11663 = vst [vmem:[#allocation31_spill] sm:$0xff] %v9336_v47  ;;  %v9344_v52 = vsel %vm1065_vm0, %v2829_v39, %v2941_v42  ;;  %vm2737_vm4 = vweird.f32 %v9325_v46  ;;  %v2759_v42 = vor.u32 1.1754944e-38, %v2758_v11 }
 0x458   :  { %v2553_v56 = vsel %vm2551_vm3, %v2552_v51, %v2550_v60  ;;  %v2743_v51 = vand.u32 2147483648, %v9325_v46  ;;  %v2756_v60 = vand.u32 2147483647, %v9317_v1  ;;  %v2557_v38 = vmul.f32 0.5, %v2556_v5 }
 0x459   :  { %v9332_v24 = vmax.f32 %v2553_v56, 1e-15  ;;  %vm2742_vm8 = vcmp.eq.f32.partialorder %v2741_v29, 8.507059e+37  ;;  %vm2563_vm13 = vcmp.eq.f32.partialorder %v9313_v40, 0.0 }
 0x45a   :  { %v2744_v39 = vor.u32 1.1754944e-38, %v2743_v51  ;;  %vm2757_vm9 = vcmp.eq.f32.partialorder %v2756_v60, 8.507059e+37  ;;  %v2558_v58 = vsub.f32 1.5, %v2557_v38  ;;  %v2833_v38 = vsub.f32 0.0, %v9317_v1 }
 0x45b   :  { %v6250_v16 = vpop.eup %6249  ;;  %6253 = vrcp.f32 %v9332_v24  ;;  %v2803_v4 = vand.u32 2147483648, %v9332_v24  ;;  %v2801_v51 = vand.u32 2147483647, %v9332_v24  ;;  %vm2797_vm11 = vweird.f32 %v9332_v24 }
 0x45c   :  { %v2748_v3 = vmul.f32 %v6250_v16, %v9317_v1  ;;  %v6252_v19 = vpop.eup %6251  ;;  %vm2753_vm2 = vweird.f32 %v6250_v16  ;;  %v2559_v60 = vmul.f32 %v6248_v45, %v2558_v58  ;;  %v2564_v1 = vand.u32 2147483648, %v9313_v40 }
 0x45d   :  { %v2733_v2 = vmul.f32 %v6252_v19, %v9325_v46  ;;  %vm2738_vm5 = vweird.f32 %v6252_v19  ;;  %vm2754_vm1 = vmor %vm2752_vm6, %vm2753_vm2  ;;  %vm2802_vm15 = vcmp.eq.f32.partialorder %v2801_v51, 8.507059e+37 }
 0x45e   :  { %v2749_v21 = vsub.f32 1.0, %v2748_v3  ;;  %vm2739_vm7 = vmor %vm2737_vm4, %vm2738_vm5  ;;  %v2912_v34 = vpop.permute.xlu0 %2911 }
 0x45f   :  { %v2734_v55 = vsub.f32 1.0, %v2733_v2 }
 0x460   :  { %v2750_v36 = vmul.f32 %v6250_v16, %v2749_v21 }
 0x461   :  { %v2735_v56 = vmul.f32 %v6252_v19, %v2734_v55  ;;  %v6254_v3 = vpop.eup %6253 }
 0x462   :  { %v2751_v9 = vadd.f32 %v6250_v16, %v2750_v36  ;;  %v2793_v21 = vmul.f32 %v6254_v3, %v9332_v24  ;;  %vm2798_vm10 = vweird.f32 %v6254_v3 }
 0x463   :  { %v2736_v2 = vadd.f32 %v6252_v19, %v2735_v56  ;;  %vm2799_vm14 = vmor %vm2797_vm11, %vm2798_vm10 }
 0x464   :  { %v2755_v23 = vsel %vm2754_vm1, %v6250_v16, %v2751_v9  ;;  %v2794_v36 = vsub.f32 1.0, %v2793_v21 }
 0x465   :  { %v2740_v55 = vsel %vm2739_vm7, %v6252_v19, %v2736_v2  ;;  %v2760_v47 = vsel %vm2757_vm9, %v2759_v42, %v2755_v23  ;;  %v2804_v23 = vor.u32 1.1754944e-38, %v2803_v4  ;;  %v2560_v2 = vmul.f32 %v2559_v60, %v9313_v40 }
 0x466   :  { %v2745_v5 = vsel %vm2742_vm8, %v2744_v39, %v2740_v55  ;;  %v2761_v35 = vmul.f32 %v2760_v47, %v9197_v43  ;;  %v2795_v11 = vmul.f32 %v6254_v3, %v2794_v36  ;;  %v2994_v58 = vpop.xlane.xlu0 %2993  ;;  %v2976_v4 = vmul.f32 %v9013_v59, %v9329_v6 }
 0x467   :  { %v2746_v56 = vmul.f32 %v2745_v5, %v9181_v27  ;;  %v3021_v21 = vmul.f32 %v2994_v58, %v9077_v13  ;;  %v2832_v5 = vsub.f32 0.0, %v9325_v46 }
 0x468   :  { %v2796_v19 = vadd.f32 %v6254_v3, %v2795_v11  ;;  %v2945_v29 = vmul.f32 %v2912_v34, %v2761_v35  ;;  %v2562_v34 = vsel %vm2561_vm12, %v9313_v40, %v2560_v2 }
 0x469   :  { %v2979_v16 = vmul.f32 %v9013_v59, %v2746_v56  ;;  %v2565_v55 = vsel %vm2563_vm13, %v2564_v1, %v2562_v34  ;;  %v9380_v6 = vsub.f32 %v9013_v59, %v3021_v21 }
 0x46a   :  { %v2800_v47 = vsel %vm2799_vm14, %v6254_v3, %v2796_v19  ;;  %v9363_v39 = vsel %vm1065_vm0, %v2833_v38, %v2945_v29  ;;  %v2944_v3 = vmul.f32 %v9298_v14, %v2746_v56  ;;  %v9382_v51 = vmax.f32 %v2565_v55, 1e-15 }
 0x46b   :  { %3005 = vadd.xlane.f32.xlu0 %v2979_v16  ;;  %v2805_v9 = vsel %vm2802_vm15, %v2804_v23, %v2800_v47  ;;  %v2980_v14 = vmul.f32 %v9013_v59, %v2761_v35  ;;  %v3053_v46 = vmul.f32 %v11498_v49, %v9380_v6  ;;  %v2836_v16 = vsub.f32 0.0, %v9332_v24 }
 0x46c   :  { %v2806_v42 = vmul.f32 %v2805_v9, %v9192_v57  ;;  %v9377_v11 = vsel %vm1065_vm0, %v2832_v5, %v2944_v3  ;;  %6255 = vrcp.f32 %v9382_v51  ;;  %vm2812_vm6 = vweird.f32 %v9382_v51 }
 0x46e   :  { %v2983_v45 = vmul.f32 %v9013_v59, %v2806_v42  ;;  %v2988_v36 = vpop.xlane.xlu0 %2987  ;;  %v2948_v13 = vmul.f32 %v9322_v7, %v2806_v42  ;;  %v3069_v7 = vmul.f32 %v3053_v46, %v8783_v61 }
 0x46f   :  { %v3018_v40 = vmul.f32 %v2988_v36, %v9267_v17 }
 0x470   :  { %3013 = vadd.xlane.f32.xlu1 %v2983_v45  ;;  %v9393_v60 = vsel %vm1065_vm0, %v2836_v16, %v2948_v13 }
 0x471   :  { %v9396_v35 = vsub.f32 %v9013_v59, %v3018_v40 }
 0x472   :  { %v6256_v29 = vpop.eup %6255 }
 0x473   :  { %2999 = vadd.xlane.f32.xlu0 %v2976_v4  ;;  %v3050_v38 = vmul.f32 %v11498_v49, %v9396_v35  ;;  %v2808_v42 = vmul.f32 %v6256_v29, %v9382_v51  ;;  %vm2813_vm5 = vweird.f32 %v6256_v29 }
 0x474   :  { %vm2814_vm4 = vmor %vm2812_vm6, %vm2813_vm5 }
 0x475   :  { %v3066_v4 = vmul.f32 %v3050_v38, %v8930_v20  ;;  %v2809_v1 = vsub.f32 1.0, %v2808_v42 }
 0x476   :  { %v3012_v19 = vpop.xlane.xlu0 %3011 }
 0x477   :  { %v3030_v23 = vmul.f32 %v3012_v19, %v9251_v44 }
 0x478   :  { %3007 = vadd.xlane.f32.xlu1 %v2980_v14  ;;  %v2810_v14 = vmul.f32 %v6256_v29, %v2809_v1 }
 0x479   :  { %v9408_v61 = vsub.f32 %v9013_v59, %v3030_v23 }
 0x47a   :  { %v2349_v56 = vpop.xlane.xlu2 %2348 }
 0x47b   :  { %6257 = vrsqrt.f32 %v2349_v56  ;;  %v3062_v21 = vmul.f32 %v11498_v49, %v9408_v61  ;;  %vm2417_vm3 = vcmp.eq.f32.partialorder %v2349_v56, inf  ;;  %v2420_v20 = vand.u32 2147483648, %v2349_v56 }
 0x47c   :  { %vm2419_vm2 = vcmp.eq.f32.partialorder %v2349_v56, 0.0 }
 0x47d   :  { %v3078_v46 = vmul.f32 %v3062_v21, %v8904_v10  ;;  %v2816_v10 = vand.u32 2147483647, %v9382_v51 }
 0x47f   :  { %vm2817_vm1 = vcmp.eq.f32.partialorder %v2816_v10, 8.507059e+37 }
 0x480   :  { %3089 = vadd.xlane.f32.xlu1 %v3069_v7 }
 0x481   :  { %v6258_v17 = vpop.eup %6257 }
 0x482   :  { %v2411_v47 = vmul.f32 %v6258_v17, %v2349_v56  ;;  %v2986_v24 = vpop.xlane.xlu2 %2985 }
 0x483   :  { %v3017_v9 = vmul.f32 %v2986_v24, %v9063_v12 }
 0x484   :  { %v2412_v2 = vmul.f32 %v6258_v17, %v2411_v47 }
 0x485   :  { %v9405_v58 = vsub.f32 %v9013_v59, %v3017_v9 }
 0x486   :  { %v2413_v45 = vmul.f32 0.5, %v2412_v2 }
 0x487   :  { %v3049_v44 = vmul.f32 %v11498_v49, %v9405_v58 }
 0x488   :  { %v2414_v34 = vsub.f32 1.5, %v2413_v45  ;;  %3083 = vadd.xlane.f32.xlu1 %v3066_v4 }
 0x489   :  { %v3065_v12 = vmul.f32 %v3049_v44, %v8771_v54 }
 0x48a   :  { %v2415_v3 = vmul.f32 %v6258_v17, %v2414_v34  ;;  %v3010_v55 = vpop.xlane.xlu2 %3009  ;;  %v2818_v17 = vand.u32 2147483648, %v9382_v51 }
 0x48b   :  { %v3029_v5 = vmul.f32 %v3010_v55, %v9170_v48  ;;  %3081 = vadd.xlane.f32.xlu0 %v3065_v12  ;;  %v2811_v48 = vadd.f32 %v6256_v29, %v2810_v14 }
 0x48c   :  { %v2416_v36 = vmul.f32 %v2415_v3, %v2349_v56  ;;  %v2819_v24 = vor.u32 1.1754944e-38, %v2818_v17 }
 0x48d   :  { %v9418_v13 = vsub.f32 %v9013_v59, %v3029_v5  ;;  %v2815_v47 = vsel %vm2814_vm4, %v6256_v29, %v2811_v48  ;;  %v2837_v5 = vsub.f32 0.0, %v9382_v51 }
 0x48e   :  { %v2418_v40 = vsel %vm2417_vm3, %v2349_v56, %v2416_v36  ;;  %v2820_v9 = vsel %vm2817_vm1, %v2819_v24, %v2815_v47 }
 0x48f   :  { %v2421_v54 = vsel %vm2419_vm2, %v2420_v20, %v2418_v40  ;;  %v3061_v16 = vmul.f32 %v11498_v49, %v9418_v13 }
 0x490   :  { %v9423_v7 = vmax.f32 %v2421_v54, 1e-15  ;;  %3107 = vadd.xlane.f32.xlu1 %v3078_v46  ;;  %v3002_v46 = vpop.xlane.xlu1 %3001 }
 0x491   :  { %v3077_v19 = vmul.f32 %v3061_v16, %v8821_v37  ;;  %v3025_v51 = vmul.f32 %v3002_v46, %v9151_v33 }
 0x492   :  { %6259 = vrcp.f32 %v9423_v7  ;;  %v3004_v23 = vpop.xlane.xlu2 %3003  ;;  %v2638_v34 = vand.u32 2147483648, %v9423_v7  ;;  %v2636_v3 = vand.u32 2147483647, %v9423_v7  ;;  %vm2632_vm9 = vweird.f32 %v9423_v7 }
 0x493   :  { %v3026_v56 = vmul.f32 %v3004_v23, %v9241_v18  ;;  %3105 = vadd.xlane.f32.xlu0 %v3077_v19  ;;  %v2821_v18 = vmul.f32 %v2820_v9, %v9222_v26 }
 0x494   :  { %vm2637_vm10 = vcmp.eq.f32.partialorder %v2636_v3, 8.507059e+37 }
 0x495   :  { %v9432_v38 = vsub.f32 %v9013_v59, %v3026_v56  ;;  %v2984_v16 = vmul.f32 %v9013_v59, %v2821_v18 }
 0x497   :  { %v3058_v37 = vmul.f32 %v11498_v49, %v9432_v38 }
 0x498   :  { %v6260_v2 = vpop.eup %6259  ;;  %v2996_v48 = vpop.xlane.xlu1 %2995 }
 0x499   :  { %v3074_v42 = vmul.f32 %v3058_v37, %v8883_v25  ;;  %v2628_v45 = vmul.f32 %v6260_v2, %v9423_v7  ;;  %vm2633_vm7 = vweird.f32 %v6260_v2  ;;  %v2949_v25 = vmul.f32 %v9300_v28, %v2821_v18 }
 0x49a   :  { %v2998_v4 = vpop.xlane.xlu2 %2997  ;;  %vm2634_vm8 = vmor %vm2632_vm9, %vm2633_vm7  ;;  %v3022_v19 = vmul.f32 %v2996_v48, %v9227_v63 }
 0x49b   :  { %v3023_v44 = vmul.f32 %v2998_v4, %v9307_v50  ;;  %3099 = vadd.xlane.f32.xlu0 %v3074_v42  ;;  %v2629_v29 = vsub.f32 1.0, %v2628_v45  ;;  %v2639_v50 = vor.u32 1.1754944e-38, %v2638_v34  ;;  %v9453_v40 = vsel %vm1065_vm0, %v2837_v5, %v2949_v25 }
 0x49c   :  { %v9469_v23 = vsub.f32 %v9013_v59, %v3022_v19  ;;  %v3113_v42 = vmax.f32 %v8766_v62, 1e-07 }
 0x49d   :  { %v9442_v1 = vsub.f32 %v9013_v59, %v3023_v44  ;;  %v2630_v12 = vmul.f32 %v6260_v2, %v2629_v29 }
 0x49e   :  { %v3054_v47 = vmul.f32 %v11498_v49, %v9469_v23  ;;  %6261 = vrcp.f32 %v3113_v42  ;;  %vm3134_vm14 = vweird.f32 %v3113_v42 }
 0x49f   :  { %v3055_v21 = vmul.f32 %v11498_v49, %v9442_v1  ;;  %v2631_v55 = vadd.f32 %v6260_v2, %v2630_v12  ;;  %v3125_v12 = vmax.f32 %v8803_v15, 1e-07 }
 0x4a0   :  { %v2990_v56 = vpop.xlane.xlu1 %2989  ;;  %v3070_v63 = vmul.f32 %v3054_v47, %v8867_v8 }
 0x4a1   :  { %v3071_v36 = vmul.f32 %v3055_v21, %v9043_v0  ;;  %v2635_v14 = vsel %vm2634_vm8, %v6260_v2, %v2631_v55  ;;  %v9462_v0 = vsub.f32 %v9013_v59, %v3025_v51  ;;  %v3019_v33 = vmul.f32 %v2990_v56, %v9294_v30 }
 0x4a2   :  { %v2640_v20 = vsel %vm2637_vm10, %v2639_v50, %v2635_v14  ;;  %6263 = vrcp.f32 %v3125_v12  ;;  %vm3314_vm3 = vweird.f32 %v3125_v12 }
 0x4a3   :  { %3093 = vadd.xlane.f32.xlu0 %v3071_v36  ;;  %v9456_v28 = vmul.f32 %v2640_v20, %v9271_v53  ;;  %v3057_v17 = vmul.f32 %v11498_v49, %v9462_v0  ;;  %v9476_v24 = vsub.f32 %v9013_v59, %v3019_v33  ;;  %v11664_v36 = vld [vmem:[#allocation18_spill] sm:$0xff] }
 0x4a4   :  { %v6262_v3 = vpop.eup %6261  ;;  %v3122_v14 = vmax.f32 %v11664_v36, 1e-07 }
 0x4a5   :  { %v2972_v54 = vmul.f32 %v9013_v59, %v9456_v28  ;;  %v3073_v10 = vmul.f32 %v3057_v17, %v8807_v22  ;;  %v3051_v37 = vmul.f32 %v11498_v49, %v9476_v24  ;;  %v3130_v50 = vmul.f32 %v6262_v3, %v3113_v42 }
 0x4a6   :  { %6265 = vrcp.f32 %v3122_v14  ;;  %vm3135_vm11 = vweird.f32 %v6262_v3  ;;  %v3140_v17 = vand.u32 2147483648, %v3113_v42  ;;  %vm3269_vm4 = vweird.f32 %v3122_v14 }
 0x4a7   :  { %2991 = vadd.xlane.f32.xlu2 %v2972_v54  ;;  %v3067_v9 = vmul.f32 %v3051_v37, %v9036_v32  ;;  %v3131_v20 = vsub.f32 1.0, %v3130_v50  ;;  %v11665_v54 = vld [vmem:[#allocation20_spill] sm:$0xff]  ;;  %vm3136_vm15 = vmor %vm3134_vm14, %vm3135_vm11  ;;  %v3275_v50 = vand.u32 2147483648, %v3122_v14 }
 0x4a8   :  { %v6264_v46 = vpop.eup %6263  ;;  %v9514_v51 = vmax.f32 %v11665_v54, 1e-07 }
 0x4a9   :  { %vm3315_vm13 = vweird.f32 %v6264_v46 }
 0x4aa   :  { %6267 = vrcp.f32 %v9514_v51  ;;  %vm3316_vm2 = vmor %vm3314_vm3, %vm3315_vm13  ;;  %vm3224_vm8 = vweird.f32 %v9514_v51 }
 0x4ac   :  { %v6266_v19 = vpop.eup %6265 }
 0x4ad   :  { %v3265_v47 = vmul.f32 %v6266_v19, %v3122_v14  ;;  %vm3270_vm6 = vweird.f32 %v6266_v19 }
 0x4ae   :  { %vm3271_vm1 = vmor %vm3269_vm4, %vm3270_vm6 }
 0x4af   :  { %3015 = vadd.xlane.f32.xlu2 %v2984_v16 }
 0x4b7   :  { %3097 = vadd.xlane.f32.xlu2 %v3073_v10  ;;  %v3138_v10 = vand.u32 2147483647, %v3113_v42 }
 0x4b9   :  { %vm3139_vm12 = vcmp.eq.f32.partialorder %v3138_v10, 8.507059e+37  ;;  %v3230_v10 = vand.u32 2147483648, %v9514_v51 }
 0x4bf   :  { %3091 = vadd.xlane.f32.xlu2 %v3070_v63  ;;  %v3141_v63 = vor.u32 1.1754944e-38, %v3140_v17 }
 0x4c7   :  { %3085 = vadd.xlane.f32.xlu2 %v3067_v9 }
 0x4de   :  { %v3006_v22 = vpop.xlane.xlu0 %3005 }
 0x4df   :  { %v3027_v2 = vmul.f32 %v3006_v22, %v9377_v11 }
 0x4e1   :  { %v9484_v30 = vsub.f32 %v9013_v59, %v3027_v2  ;;  %v3266_v2 = vsub.f32 1.0, %v3265_v47  ;;  %v3231_v47 = vor.u32 1.1754944e-38, %v3230_v10 }
 0x4e3   :  { %v3059_v45 = vmul.f32 %v11498_v49, %v9484_v30  ;;  %v3014_v4 = vpop.xlane.xlu1 %3013 }
 0x4e4   :  { %v3031_v18 = vmul.f32 %v3014_v4, %v9393_v60  ;;  %v3320_v4 = vand.u32 2147483648, %v3125_v12 }
 0x4e5   :  { %v3075_v8 = vmul.f32 %v3059_v45, %v9181_v27  ;;  %v6268_v45 = vpop.eup %6267 }
 0x4e6   :  { %v3000_v44 = vpop.xlane.xlu0 %2999  ;;  %v9493_v11 = vsub.f32 %v9013_v59, %v3031_v18  ;;  %vm3225_vm9 = vweird.f32 %v6268_v45 }
 0x4e7   :  { %v3024_v32 = vmul.f32 %v3000_v44, %v9344_v52  ;;  %3101 = vadd.xlane.f32.xlu1 %v3075_v8  ;;  %v3318_v8 = vand.u32 2147483647, %v3125_v12  ;;  %v3267_v44 = vmul.f32 %v6266_v19, %v3266_v2  ;;  %vm3226_vm10 = vmor %vm3224_vm8, %vm3225_vm9  ;;  %v11669_v2 = vld [vmem:[#allocation17_spill] sm:$0xff] }
 0x4e8   :  { %v3063_v34 = vmul.f32 %v11498_v49, %v9493_v11 }
 0x4e9   :  { %v9496_v29 = vsub.f32 %v9013_v59, %v3024_v32  ;;  %v3220_v32 = vmul.f32 %v6268_v45, %v9514_v51  ;;  %vm3319_vm5 = vcmp.eq.f32.partialorder %v3318_v8, 8.507059e+37 }
 0x4ea   :  { %v3079_v60 = vmul.f32 %v3063_v34, %v9192_v57  ;;  %v3321_v34 = vor.u32 1.1754944e-38, %v3320_v4  ;;  %v9534_v4 = vmax.f32 %v11669_v2, 1e-07 }
 0x4eb   :  { %v3056_v27 = vmul.f32 %v11498_v49, %v9496_v29  ;;  %v3008_v25 = vpop.xlane.xlu1 %3007 }
 0x4ec   :  { %v3028_v21 = vmul.f32 %v3008_v25, %v9363_v39  ;;  %3109 = vadd.xlane.f32.xlu2 %v3079_v60  ;;  %v3310_v39 = vmul.f32 %v6264_v46, %v3125_v12  ;;  %v3273_v12 = vand.u32 2147483647, %v3122_v14  ;;  %v3228_v14 = vand.u32 2147483647, %v9514_v51 }
 0x4ed   :  { %v3072_v52 = vmul.f32 %v3056_v27, %v9067_v41  ;;  %v3132_v41 = vmul.f32 %v6262_v3, %v3131_v20  ;;  %v11666_v27 = vld [vmem:[#allocation21_spill] sm:$0xff] }
 0x4ee   :  { %v9507_v55 = vsub.f32 %v9013_v59, %v3028_v21  ;;  %v3311_v48 = vsub.f32 1.0, %v3310_v39  ;;  %v9519_v60 = vmax.f32 %v11666_v27, 1e-07  ;;  %v3221_v21 = vsub.f32 1.0, %v3220_v32  ;;  %v11667_v39 = vld [vmem:[#allocation26_spill] sm:$0xff] }
 0x4ef   :  { %3095 = vadd.xlane.f32.xlu1 %v3072_v52  ;;  %v3133_v16 = vadd.f32 %v6262_v3, %v3132_v41  ;;  %v3268_v52 = vadd.f32 %v6266_v19, %v3267_v44  ;;  %vm3274_vm7 = vcmp.eq.f32.partialorder %v3273_v12, 8.507059e+37  ;;  %vm3229_vm11 = vcmp.eq.f32.partialorder %v3228_v14, 8.507059e+37 }
 0x4f0   :  { %v3060_v5 = vmul.f32 %v11498_v49, %v9507_v55  ;;  %v3312_v33 = vmul.f32 %v6264_v46, %v3311_v48  ;;  %6269 = vrcp.f32 %v9519_v60  ;;  %v3222_v20 = vmul.f32 %v6268_v45, %v3221_v21 }
 0x4f2   :  { %v3076_v57 = vmul.f32 %v3060_v5, %v9197_v43  ;;  %v3137_v43 = vsel %vm3136_vm15, %v6262_v3, %v3133_v16  ;;  %v3313_v22 = vadd.f32 %v6264_v46, %v3312_v33  ;;  %v3272_v5 = vsel %vm3271_vm1, %v6266_v19, %v3268_v52  ;;  %v11668_v19 = vld [vmem:[#allocation31_spill] sm:$0xff] }
 0x4f3   :  { %v3142_v37 = vsel %vm3139_vm12, %v3141_v63, %v3137_v43  ;;  %v9523_v16 = vmax.f32 %v11667_v39, 1e-07  ;;  %v3223_v17 = vadd.f32 %v6268_v45, %v3222_v20  ;;  %v11671_v20 = vld [vmem:[#allocation32_spill] sm:$0xff]  ;;  %vm3254_vm15 = vweird.f32 %v9519_v60 }
 0x4f4   :  { %3103 = vadd.xlane.f32.xlu2 %v3076_v57  ;;  %v3317_v42 = vsel %vm3316_vm2, %v6264_v46, %v3313_v22  ;;  %v3276_v46 = vor.u32 1.1754944e-38, %v3275_v50 }
 0x4f5   :  { %v3322_v3 = vsel %vm3319_vm5, %v3321_v34, %v3317_v42  ;;  %6271 = vrcp.f32 %v9523_v16  ;;  %v3227_v33 = vsel %vm3226_vm10, %v6268_v45, %v3223_v17  ;;  %v11670_v45 = vld [vmem:[#allocation29_spill] sm:$0xff]  ;;  %vm3149_vm2 = vweird.f32 %v9523_v16 }
 0x4f6   :  { %v3277_v41 = vsel %vm3274_vm7, %v3276_v46, %v3272_v5  ;;  %v6270_v43 = vpop.eup %6269  ;;  %v3232_v22 = vsel %vm3229_vm11, %v3231_v47, %v3227_v33  ;;  %v9539_v32 = vmax.f32 %v11670_v45, 1e-07  ;;  %6273 = vrcp.f32 %v9534_v4 }
 0x4f7   :  { %vm3255_vm14 = vweird.f32 %v6270_v43  ;;  %v9554_v46 = vmax.f32 %v11671_v20, 1e-07  ;;  %vm3209_vm7 = vweird.f32 %v9534_v4 }
 0x4f8   :  { %6275 = vrcp.f32 %v9539_v32  ;;  %vm3256_vm12 = vmor %vm3254_vm15, %vm3255_vm14  ;;  %vm3194_vm8 = vweird.f32 %v9539_v32 }
 0x4f9   :  { %6277 = vrcp.f32 %v9554_v46 }
 0x4fb   :  { %v6272_v44 = vpop.eup %6271 }
 0x4fc   :  { %vm3150_vm3 = vweird.f32 %v6272_v44 }
 0x4fd   :  { %vm3151_vm5 = vmor %vm3149_vm2, %vm3150_vm3 }
 0x4fe   :  { %v3082_v56 = vpop.xlane.xlu0 %3081 }
 0x4ff   :  { %v3143_v9 = vmul.f32 %v3142_v37, %v3082_v56  ;;  %v2937_v56 = vmul.f32 %v11668_v19, %v9456_v28  ;;  %v3250_v37 = vmul.f32 %v6270_v43, %v9519_v60 }
 0x501   :  { %v3251_v28 = vsub.f32 1.0, %v3250_v37 }
 0x506   :  { %v3106_v18 = vpop.xlane.xlu0 %3105 }
 0x507   :  { %v3323_v25 = vmul.f32 %v3322_v3, %v3106_v18 }
 0x508   :  { %3371 = vperm.xlu1 %5898, %v3143_v9   ;;  %v2825_v9 = vsub.f32 0.0, %v9423_v7  ;;  %v3145_v7 = vmul.f32 %v6272_v44, %v9523_v16 }
 0x50a   :  { %v2953_v42 = vsel %vm1065_vm0, %v2825_v9, %v2937_v56  ;;  %v3146_v50 = vsub.f32 1.0, %v3145_v7 }
 0x50c   :  { %v3147_v10 = vmul.f32 %v6272_v44, %v3146_v50 }
 0x50e   :  { %v3100_v57 = vpop.xlane.xlu0 %3099  ;;  %v3148_v37 = vadd.f32 %v6272_v44, %v3147_v10 }
 0x50f   :  { %v3278_v48 = vmul.f32 %v3277_v41, %v3100_v57  ;;  %v9551_v57 = vpop.eup %6273  ;;  %v3260_v41 = vand.u32 2147483648, %v9519_v60 }
 0x510   :  { %3431 = vperm.xlu1 %5898, %v3323_v25   ;;  %v3252_v25 = vmul.f32 %v6270_v43, %v3251_v28  ;;  %v9562_v17 = vpop.eup %6275  ;;  %v3205_v56 = vmul.f32 %v9551_v57, %v9534_v4  ;;  %vm3210_vm4 = vweird.f32 %v9551_v57 }
 0x511   :  { %v3190_v33 = vmul.f32 %v9562_v17, %v9539_v32  ;;  %v9580_v28 = vpop.eup %6277  ;;  %vm3195_vm1 = vweird.f32 %v9562_v17  ;;  %vm3211_vm9 = vmor %vm3209_vm7, %vm3210_vm4 }
 0x512   :  { %v3253_v5 = vadd.f32 %v6270_v43, %v3252_v25  ;;  %v3206_v9 = vsub.f32 1.0, %v3205_v56  ;;  %vm3196_vm10 = vmor %vm3194_vm8, %vm3195_vm1  ;;  %vm3330_vm15 = vweird.f32 %v9580_v28 }
 0x514   :  { %v3257_v14 = vsel %vm3256_vm12, %v6270_v43, %v3253_v5  ;;  %v3207_v7 = vmul.f32 %v9551_v57, %v3206_v9  ;;  %vm3329_vm12 = vweird.f32 %v9554_v46 }
 0x516   :  { %v3094_v63 = vpop.xlane.xlu0 %3093 }
 0x517   :  { %v3233_v51 = vmul.f32 %v3232_v22, %v3094_v63  ;;  %v11672_v22 = vld [vmem:[#allocation19_spill] sm:$0xff] }
 0x518   :  { %3416 = vperm.xlu1 %5898, %v3278_v48  }
 0x51a   :  { %v2992_v8 = vpop.xlane.xlu2 %2991 }
 0x51b   :  { %v3020_v18 = vmul.f32 %v2992_v8, %v2953_v42  ;;  %v3155_v8 = vand.u32 2147483648, %v9523_v16  ;;  %v3191_v42 = vsub.f32 1.0, %v3190_v33 }
 0x51d   :  { %v9542_v34 = vsub.f32 %v9013_v59, %v3020_v18  ;;  %v3153_v18 = vand.u32 2147483647, %v9523_v16  ;;  %v3208_v16 = vadd.f32 %v9551_v57, %v3207_v7 }
 0x51f   :  { %v3052_v3 = vmul.f32 %v11498_v49, %v9542_v34  ;;  %vm3154_vm6 = vcmp.eq.f32.partialorder %v3153_v18, 8.507059e+37  ;;  %v3212_v56 = vsel %vm3211_vm9, %v9551_v57, %v3208_v16 }
 0x520   :  { %3401 = vperm.xlu1 %5898, %v3233_v51   ;;  %v9575_v51 = vmax.f32 %v11672_v22, 1e-07 }
 0x521   :  { %v3068_v52 = vmul.f32 %v3052_v3, %v9271_v53  ;;  %v3258_v53 = vand.u32 2147483647, %v9519_v60  ;;  %v3156_v3 = vor.u32 1.1754944e-38, %v3155_v8 }
 0x522   :  { %v3016_v21 = vpop.xlane.xlu2 %3015  ;;  %6279 = vrcp.f32 %v9575_v51 }
 0x523   :  { %v3032_v12 = vmul.f32 %v3016_v21, %v9453_v40  ;;  %3087 = vadd.xlane.f32.xlu0 %v3068_v52  ;;  %v9564_v40 = vpop.xlane.xlu1 %3089  ;;  %vm3259_vm13 = vcmp.eq.f32.partialorder %v3258_v53, 8.507059e+37  ;;  %v3192_v52 = vmul.f32 %v9562_v17, %v3191_v42  ;;  %v3325_v21 = vmul.f32 %v9580_v28, %v9554_v46 }
 0x524   :  { %v3213_v53 = vand.u32 2147483647, %v9534_v4 }
 0x525   :  { %v9558_v48 = vsub.f32 %v9013_v59, %v3032_v12  ;;  %v3261_v59 = vor.u32 1.1754944e-38, %v3260_v41  ;;  %v3193_v5 = vadd.f32 %v9562_v17, %v3192_v52  ;;  %v3326_v41 = vsub.f32 1.0, %v3325_v21 }
 0x526   :  { %vm3214_vm11 = vcmp.eq.f32.partialorder %v3213_v53, 8.507059e+37  ;;  %v3170_v53 = vand.u32 2147483648, %v9575_v51 }
 0x527   :  { %v3064_v19 = vmul.f32 %v11498_v49, %v9558_v48  ;;  %v3262_v47 = vsel %vm3259_vm13, %v3261_v59, %v3257_v14  ;;  %v3200_v14 = vand.u32 2147483648, %v9539_v32  ;;  %v11673_v59 = vld [vmem:[#allocation30_spill] sm:$0xff]  ;;  %vm3331_vm13 = vmor %vm3329_vm12, %vm3330_vm15 }
 0x528   :  { %v6280_v10 = vpop.eup %6279  ;;  %v9599_v33 = vmax.f32 %v11673_v59, 1e-07 }
 0x529   :  { %v3080_v60 = vmul.f32 %v3064_v19, %v9222_v26  ;;  %v3152_v26 = vsel %vm3151_vm5, %v6272_v44, %v3148_v37  ;;  %v3215_v44 = vand.u32 2147483648, %v9534_v4  ;;  %v3198_v19 = vand.u32 2147483647, %v9539_v32 }
 0x52a   :  { %v3098_v63 = vpop.xlane.xlu2 %3097  ;;  %v3157_v50 = vsel %vm3154_vm6, %v3156_v3, %v3152_v26  ;;  %v3327_v4 = vmul.f32 %v9580_v28, %v3326_v41  ;;  %v3160_v37 = vmul.f32 %v6280_v10, %v9575_v51  ;;  %6281 = vrcp.f32 %v9599_v33  ;;  %v11674_v26 = vld [vmem:[#allocation25_spill] sm:$0xff] }
 0x52b   :  { %v3263_v43 = vmul.f32 %v3262_v47, %v3098_v63  ;;  %3111 = vadd.xlane.f32.xlu0 %v3080_v60  ;;  %v3084_v25 = vpop.xlane.xlu1 %3083  ;;  %v3216_v60 = vor.u32 1.1754944e-38, %v3215_v44  ;;  %v3197_v63 = vsel %vm3196_vm10, %v9562_v17, %v3193_v5  ;;  %vm3199_vm14 = vcmp.eq.f32.partialorder %v3198_v19, 8.507059e+37 }
 0x52c   :  { %v3158_v12 = vmul.f32 %v3157_v50, %v3084_v25  ;;  %v3328_v42 = vadd.f32 %v9580_v28, %v3327_v4  ;;  %v3161_v18 = vsub.f32 1.0, %v3160_v37  ;;  %v3335_v17 = vand.u32 2147483648, %v9554_v46  ;;  %v11675_v25 = vld [vmem:[#allocation16_spill] sm:$0xff] }
 0x52d   :  { %3411 = vperm.xlu2 %5899, %v3263_v43   ;;  %v3201_v43 = vor.u32 1.1754944e-38, %v3200_v14  ;;  %v3217_v9 = vsel %vm3214_vm11, %v3216_v60, %v3212_v56  ;;  %v9610_v7 = vmax.f32 %v11674_v26, 1e-07  ;;  %v3333_v3 = vand.u32 2147483647, %v9554_v46  ;;  %v11676_v14 = vld [vmem:[#allocation28_spill] sm:$0xff] }
 0x52e   :  { %v9615_v52 = vmax.f32 %v11675_v25, 1e-07  ;;  %v3162_v21 = vmul.f32 %v6280_v10, %v3161_v18  ;;  %vm3165_vm2 = vweird.f32 %v6280_v10  ;;  %v9623_v19 = vmax.f32 %v11676_v14, 1e-07 }
 0x52f   :  { %v3202_v32 = vsel %vm3199_vm14, %v3201_v43, %v3197_v63  ;;  %6283 = vrcp.f32 %v9610_v7  ;;  %vm3334_vm3 = vcmp.eq.f32.partialorder %v3333_v3, 8.507059e+37  ;;  %vm3164_vm5 = vweird.f32 %v9575_v51 }
 0x530   :  { %v3203_v57 = vmul.f32 %v3202_v32, %v9564_v40  ;;  %v3332_v40 = vsel %vm3331_vm13, %v9580_v28, %v3328_v42  ;;  %v6282_v50 = vpop.eup %6281  ;;  %6285 = vrcp.f32 %v9615_v52  ;;  %v3163_v41 = vadd.f32 %v6280_v10, %v3162_v21  ;;  %vm3166_vm6 = vmor %vm3164_vm5, %vm3165_vm2 }
 0x531   :  { %v3280_v46 = vmul.f32 %v6282_v50, %v9599_v33  ;;  %v3168_v28 = vand.u32 2147483647, %v9575_v51  ;;  %v3171_v4 = vor.u32 1.1754944e-38, %v3170_v53  ;;  %6287 = vrcp.f32 %v9623_v19 }
 0x532   :  { %v3092_v47 = vpop.xlane.xlu2 %3091  ;;  %v3167_v60 = vsel %vm3166_vm6, %v6280_v10, %v3163_v41  ;;  %vm3285_vm1 = vweird.f32 %v6282_v50  ;;  %vm3284_vm7 = vweird.f32 %v9599_v33  ;;  %v3288_v3 = vand.u32 2147483647, %v9599_v33 }
 0x533   :  { %v3218_v8 = vmul.f32 %v3217_v9, %v3092_v47  ;;  %v3108_v16 = vpop.xlane.xlu1 %3107  ;;  %v3281_v47 = vsub.f32 1.0, %v3280_v46  ;;  %vm3169_vm4 = vcmp.eq.f32.partialorder %v3168_v28, 8.507059e+37  ;;  %vm3286_vm9 = vmor %vm3284_vm7, %vm3285_vm1  ;;  %vm3344_vm14 = vweird.f32 %v9610_v7 }
 0x534   :  { %v3172_v43 = vsel %vm3169_vm4, %v3171_v4, %v3167_v60  ;;  %vm3289_vm8 = vcmp.eq.f32.partialorder %v3288_v3, 8.507059e+37  ;;  %v3350_v60 = vand.u32 2147483648, %v9610_v7  ;;  %v3245_v4 = vand.u32 2147483648, %v9615_v52 }
 0x535   :  { %3376 = vperm.xlu2 %5899, %v3158_v12   ;;  %v3336_v12 = vor.u32 1.1754944e-38, %v3335_v17  ;;  %v6284_v56 = vpop.eup %6283  ;;  %v3282_v32 = vmul.f32 %v6282_v50, %v3281_v47  ;;  %v3290_v17 = vand.u32 2147483648, %v9599_v33  ;;  %v3348_v33 = vand.u32 2147483647, %v9610_v7 }
 0x536   :  { %v6286_v63 = vpop.eup %6285  ;;  %v3340_v9 = vmul.f32 %v6284_v56, %v9610_v7  ;;  %vm3345_vm10 = vweird.f32 %v6284_v56  ;;  %vm3239_vm12 = vweird.f32 %v9615_v52  ;;  %vm3299_vm6 = vweird.f32 %v9623_v19 }
 0x537   :  { %v3337_v44 = vsel %vm3334_vm3, %v3336_v12, %v3332_v40  ;;  %v6288_v42 = vpop.eup %6287  ;;  %v3283_v18 = vadd.f32 %v6282_v50, %v3282_v32  ;;  %vm3240_vm11 = vweird.f32 %v6286_v63  ;;  %vm3346_vm15 = vmor %vm3344_vm14, %vm3345_vm10  ;;  %vm3349_vm3 = vcmp.eq.f32.partialorder %v3348_v33, 8.507059e+37 }
 0x538   :  { %v3338_v5 = vmul.f32 %v3337_v44, %v3108_v16  ;;  %v3341_v51 = vsub.f32 1.0, %v3340_v9  ;;  %v3295_v21 = vmul.f32 %v6288_v42, %v9623_v19  ;;  %v3291_v44 = vor.u32 1.1754944e-38, %v3290_v17  ;;  %vm3241_vm13 = vmor %vm3239_vm12, %vm3240_vm11 }
 0x539   :  { %v3287_v12 = vsel %vm3286_vm9, %v6282_v50, %v3283_v18  ;;  %v3243_v50 = vand.u32 2147483647, %v9615_v52  ;;  %v3351_v9 = vor.u32 1.1754944e-38, %v3350_v60  ;;  %v3246_v32 = vor.u32 1.1754944e-38, %v3245_v4 }
 0x53a   :  { %v3086_v37 = vpop.xlane.xlu2 %3085  ;;  %v3342_v40 = vmul.f32 %v6284_v56, %v3341_v51  ;;  %v3296_v53 = vsub.f32 1.0, %v3295_v21  ;;  %vm3300_vm5 = vweird.f32 %v6288_v42 }
 0x53b   :  { %vm3244_vm2 = vcmp.eq.f32.partialorder %v3243_v50, 8.507059e+37  ;;  %vm3301_vm4 = vmor %vm3299_vm6, %vm3300_vm5 }
 0x53c   :  { %v3343_v46 = vadd.f32 %v6284_v56, %v3342_v40  ;;  %v3305_v40 = vand.u32 2147483648, %v9623_v19 }
 0x53d   :  { %3396 = vperm.xlu2 %5899, %v3218_v8   ;;  %v3173_v8 = vmul.f32 %v3172_v43, %v3086_v37  ;;  %v3297_v43 = vmul.f32 %v6288_v42, %v3296_v53 }
 0x53e   :  { %v3347_v37 = vsel %vm3346_vm15, %v6284_v56, %v3343_v46 }
 0x53f   :  { %3391 = vperm.xlu0 %5900, %v3203_v57   ;;  %v3235_v57 = vmul.f32 %v6286_v63, %v9615_v52  ;;  %v3298_v17 = vadd.f32 %v6288_v42, %v3297_v43  ;;  %v3303_v52 = vand.u32 2147483647, %v9623_v19 }
 0x541   :  { %v3236_v10 = vsub.f32 1.0, %v3235_v57  ;;  %v3352_v57 = vsel %vm3349_vm3, %v3351_v9, %v3347_v37  ;;  %v3302_v56 = vsel %vm3301_vm4, %v6288_v42, %v3298_v17  ;;  %vm3304_vm1 = vcmp.eq.f32.partialorder %v3303_v52, 8.507059e+37 }
 0x543   :  { %v3237_v16 = vmul.f32 %v6286_v63, %v3236_v10 }
 0x545   :  { %v3238_v47 = vadd.f32 %v6286_v63, %v3237_v16 }
 0x547   :  { %3436 = vperm.xlu0 %5900, %v3338_v5   ;;  %v3292_v5 = vsel %vm3289_vm8, %v3291_v44, %v3287_v12  ;;  %v11677_v44 = vld [vmem:[#allocation22_spill] sm:$0xff] }
 0x54f   :  { %3381 = vperm.xlu0 %5900, %v3173_v8   ;;  %v3242_v8 = vsel %vm3241_vm13, %v6286_v63, %v3238_v47  ;;  %v3306_v63 = vor.u32 1.1754944e-38, %v3305_v40 }
 0x550   :  { %v3247_v7 = vsel %vm3244_vm2, %v3246_v32, %v3242_v8 }
 0x551   :  { %v3307_v21 = vsel %vm3304_vm1, %v3306_v63, %v3302_v56 }
 0x55a   :  { %v3102_v41 = vpop.xlane.xlu1 %3101 }
 0x55b   :  { %v3293_v28 = vmul.f32 %v3292_v5, %v3102_v41  ;;  %v3116_v5 = vmax.f32 %v11677_v44, 1e-07  ;;  %v11678_v41 = vld [vmem:[#allocation27_spill] sm:$0xff] }
 0x55c   :  { %v3128_v46 = vmax.f32 %v11678_v41, 1e-07 }
 0x55d   :  { %3421 = vperm.xlu0 %5900, %v3293_v28   ;;  %6289 = vrcp.f32 %v3116_v5  ;;  %vm3179_vm9 = vweird.f32 %v3116_v5 }
 0x55e   :  { %6291 = vrcp.f32 %v3128_v46  ;;  %vm3359_vm14 = vweird.f32 %v3128_v46 }
 0x55f   :  { %v3110_v51 = vpop.xlane.xlu2 %3109 }
 0x560   :  { %v3353_v18 = vmul.f32 %v3352_v57, %v3110_v51  ;;  %v3185_v57 = vand.u32 2147483648, %v3116_v5 }
 0x562   :  { %v3096_v10 = vpop.xlane.xlu1 %3095  ;;  %3441 = vperm.xlu2 %5899, %v3353_v18   ;;  %v3183_v18 = vand.u32 2147483647, %v3116_v5  ;;  %v3186_v17 = vor.u32 1.1754944e-38, %v3185_v57 }
 0x563   :  { %v3248_v3 = vmul.f32 %v3247_v7, %v3096_v10  ;;  %v6290_v53 = vpop.eup %6289 }
 0x564   :  { %v3175_v60 = vmul.f32 %v6290_v53, %v3116_v5  ;;  %v6292_v33 = vpop.eup %6291  ;;  %vm3180_vm7 = vweird.f32 %v6290_v53  ;;  %vm3184_vm10 = vcmp.eq.f32.partialorder %v3183_v18, 8.507059e+37 }
 0x565   :  { %3406 = vperm.xlu0 %5900, %v3248_v3   ;;  %v3355_v43 = vmul.f32 %v6292_v33, %v3128_v46  ;;  %vm3181_vm8 = vmor %vm3179_vm9, %vm3180_vm7  ;;  %vm3360_vm11 = vweird.f32 %v6292_v33 }
 0x566   :  { %v3176_v19 = vsub.f32 1.0, %v3175_v60  ;;  %vm3361_vm15 = vmor %vm3359_vm14, %vm3360_vm11 }
 0x567   :  { %v3104_v12 = vpop.xlane.xlu2 %3103  ;;  %v3356_v32 = vsub.f32 1.0, %v3355_v43 }
 0x568   :  { %v3308_v16 = vmul.f32 %v3307_v21, %v3104_v12  ;;  %v3177_v37 = vmul.f32 %v6290_v53, %v3176_v19  ;;  %v3365_v21 = vand.u32 2147483648, %v3128_v46 }
 0x569   :  { %v3357_v10 = vmul.f32 %v6292_v33, %v3356_v32 }
 0x56a   :  { %3426 = vperm.xlu2 %5899, %v3308_v16   ;;  %v3178_v8 = vadd.f32 %v6290_v53, %v3177_v37  ;;  %v3363_v16 = vand.u32 2147483647, %v3128_v46  ;;  %v3366_v5 = vor.u32 1.1754944e-38, %v3365_v21 }
 0x56b   :  { %v3358_v63 = vadd.f32 %v6292_v33, %v3357_v10 }
 0x56c   :  { %v3182_v7 = vsel %vm3181_vm8, %v6290_v53, %v3178_v8  ;;  %vm3364_vm12 = vcmp.eq.f32.partialorder %v3363_v16, 8.507059e+37 }
 0x56d   :  { %v3187_v3 = vsel %vm3184_vm10, %v3186_v17, %v3182_v7 }
 0x57a   :  { %v3372_v28 = vpop.permute.xlu1 %3371 }
 0x57b   :  { %v9648_v42 = vsel %vm1065_vm0, %v3372_v28, %v9405_v58 }
 0x57c   :  { %v9652_v50 = vmul.f32 %v9648_v42, %v9648_v42 }
 0x582   :  { %v3432_v4 = vpop.permute.xlu1 %3431 }
 0x583   :  { %v9658_v9 = vsel %vm1065_vm0, %v3432_v4, %v9418_v13 }
 0x584   :  { %v9662_v58 = vmul.f32 %v9658_v9, %v9658_v9 }
 0x587   :  { %v3412_v47 = vpop.permute.xlu2 %3411 }
 0x58a   :  { %v3417_v12 = vpop.permute.xlu1 %3416 }
 0x58b   :  { %v9678_v53 = vsel %vm1065_vm0, %v3417_v12, %v9432_v38 }
 0x58c   :  { %v9682_v4 = vmul.f32 %v9678_v53, %v9678_v53 }
 0x58f   :  { %3481 = vadd.xlane.f32.xlu0 %v9652_v50  ;;  %v3377_v51 = vpop.permute.xlu2 %3376 }
 0x590   :  { %v9668_v13 = vsel %vm1065_vm0, %v3377_v51, %v9396_v35  ;;  %v3362_v35 = vsel %vm3361_vm15, %v6292_v33, %v3358_v63  ;;  %v9718_v51 = vsel %vm1065_vm0, %v3412_v47, %v9462_v0 }
 0x591   :  { %v9672_v52 = vmul.f32 %v9668_v13, %v9668_v13  ;;  %v3367_v28 = vsel %vm3364_vm12, %v3366_v5, %v3362_v35  ;;  %v9722_v18 = vmul.f32 %v9718_v51, %v9718_v51 }
 0x592   :  { %v3402_v46 = vpop.permute.xlu1 %3401 }
 0x593   :  { %3505 = vadd.xlane.f32.xlu2 %v9662_v58  ;;  %v9688_v33 = vsel %vm1065_vm0, %v3402_v46, %v9442_v1 }
 0x594   :  { %v9692_v38 = vmul.f32 %v9688_v33, %v9688_v33 }
 0x596   :  { %v3088_v40 = vpop.xlane.xlu0 %3087  ;;  %v3519_v25 = vmul.f32 2.0, %v9692_v38 }
 0x597   :  { %v3188_v56 = vmul.f32 %v3187_v3, %v3088_v40  ;;  %v3397_v7 = vpop.permute.xlu2 %3396 }
 0x598   :  { %v9728_v10 = vsel %vm1065_vm0, %v3397_v7, %v9469_v23 }
 0x599   :  { %3386 = vperm.xlu1 %5898, %v3188_v56   ;;  %v9741_v47 = vmul.f32 %v9728_v10, %v9728_v10 }
 0x59b   :  { %3483 = vadd.xlane.f32.xlu2 %v9672_v52 }
 0x59e   :  { %v3112_v60 = vpop.xlane.xlu0 %3111 }
 0x59f   :  { %v3368_v19 = vmul.f32 %v3367_v28, %v3112_v60  ;;  %v3525_v60 = vmul.f32 2.0, %v9662_v58 }
 0x5a1   :  { %3446 = vperm.xlu1 %5898, %v3368_v19  }
 0x5a3   :  { %3499 = vadd.xlane.f32.xlu2 %v9682_v4 }
 0x5ab   :  { %3493 = vadd.xlane.f32.xlu2 %v9692_v38 }
 0x5b1   :  { %v3392_v37 = vpop.permute.xlu0 %3391 }
 0x5b2   :  { %v9698_v43 = vsel %vm1065_vm0, %v3392_v37, %v9380_v6 }
 0x5b3   :  { %v9702_v8 = vmul.f32 %v9698_v43, %v9698_v43 }
 0x5b5   :  { %3489 = vadd.xlane.f32.xlu0 %v9702_v8 }
 0x5b9   :  { %v3437_v1 = vpop.permute.xlu0 %3436 }
 0x5ba   :  { %v9708_v32 = vsel %vm1065_vm0, %v3437_v1, %v9408_v61 }
 0x5bb   :  { %v9712_v57 = vmul.f32 %v9708_v32, %v9708_v32 }
 0x5bc   :  { %v3442_v56 = vpop.permute.xlu2 %3441 }
 0x5bd   :  { %3507 = vadd.xlane.f32.xlu0 %v9712_v57 }
 0x5c1   :  { %v3382_v6 = vpop.permute.xlu0 %3381 }
 0x5c2   :  { %v9748_v23 = vsel %vm1065_vm0, %v3382_v6, %v9476_v24  ;;  %v9768_v24 = vsel %vm1065_vm0, %v3442_v56, %v9493_v11  ;;  %v3513_v11 = vmul.f32 2.0, %v9652_v50 }
 0x5c3   :  { %v9761_v63 = vmul.f32 %v9748_v23, %v9748_v23  ;;  %11681 = vst [vmem:[#allocation15_spill] sm:$0xff] %v9768_v24 }
 0x5c4   :  { %v3427_v21 = vpop.permute.xlu2 %3426 }
 0x5c5   :  { %v9778_v12 = vsel %vm1065_vm0, %v3427_v21, %v9507_v55 }
 0x5c6   :  { %11682 = vst [vmem:[#allocation18_spill] sm:$0xff] %v9778_v12  ;;  %v9782_v16 = vmul.f32 %v9778_v12, %v9778_v12 }
 0x5cb   :  { %3497 = vadd.xlane.f32.xlu1 %v9722_v18 }
 0x5cf   :  { %v3422_v61 = vpop.permute.xlu0 %3421 }
 0x5d0   :  { %v9733_v17 = vsel %vm1065_vm0, %v3422_v61, %v9484_v30 }
 0x5d1   :  { %11679 = vst [vmem:[#allocation24_spill] sm:$0xff] %v9733_v17  ;;  %v9737_v0 = vmul.f32 %v9733_v17, %v9733_v17 }
 0x5d3   :  { %3501 = vadd.xlane.f32.xlu0 %v9737_v0  ;;  %3491 = vadd.xlane.f32.xlu1 %v9741_v47 }
 0x5d7   :  { %v3407_v3 = vpop.permute.xlu0 %3406 }
 0x5d8   :  { %v9753_v30 = vsel %vm1065_vm0, %v3407_v3, %v9496_v29  ;;  %v9772_v29 = vmul.f32 %v9768_v24, %v9768_v24 }
 0x5d9   :  { %11680 = vst [vmem:[#allocation23_spill] sm:$0xff] %v9753_v30  ;;  %v9757_v40 = vmul.f32 %v9753_v30, %v9753_v30 }
 0x5db   :  { %3495 = vadd.xlane.f32.xlu0 %v9757_v40  ;;  %3485 = vadd.xlane.f32.xlu1 %v9761_v63 }
 0x5e3   :  { %3509 = vadd.xlane.f32.xlu1 %v9772_v29 }
 0x5eb   :  { %3503 = vadd.xlane.f32.xlu1 %v9782_v16 }
 0x602   :  { %v3482_v35 = vpop.xlane.xlu0 %3481 }
 0x603   :  { %v3529_v5 = vsub.f32 %v3482_v35, %v3513_v11 }
 0x605   :  { %v3545_v28 = vmax.f32 %v3529_v5, 1e-07 }
 0x606   :  { %v3506_v19 = vpop.xlane.xlu2 %3505 }
 0x607   :  { %6293 = vrsqrt.f32 %v3545_v28  ;;  %v3541_v46 = vsub.f32 %v3506_v19, %v3525_v60  ;;  %v3522_v19 = vmul.f32 2.0, %v9682_v4  ;;  %vm3568_vm13 = vcmp.eq.f32.partialorder %v3545_v28, inf }
 0x608   :  { %vm3570_vm3 = vcmp.eq.f32.partialorder %v3545_v28, 0.0 }
 0x609   :  { %v3557_v37 = vmax.f32 %v3541_v46, 1e-07 }
 0x60b   :  { %6295 = vrsqrt.f32 %v3557_v37  ;;  %v3387_v55 = vpop.permute.xlu1 %3386  ;;  %vm3712_vm2 = vcmp.eq.f32.partialorder %v3557_v37, inf  ;;  %vm3714_vm5 = vcmp.eq.f32.partialorder %v3557_v37, 0.0 }
 0x60c   :  { %v9790_v6 = vsel %vm1065_vm0, %v3387_v55, %v9542_v34 }
 0x60d   :  { %v6294_v1 = vpop.eup %6293  ;;  %v9794_v50 = vmul.f32 %v9790_v6, %v9790_v6 }
 0x60e   :  { %v3562_v7 = vmul.f32 %v6294_v1, %v3545_v28  ;;  %v3484_v61 = vpop.xlane.xlu2 %3483 }
 0x60f   :  { %3487 = vadd.xlane.f32.xlu2 %v9794_v50 }
 0x610   :  { %v3563_v3 = vmul.f32 %v6294_v1, %v3562_v7 }
 0x611   :  { %v6296_v56 = vpop.eup %6295 }
 0x612   :  { %v3564_v58 = vmul.f32 0.5, %v3563_v3  ;;  %v3706_v11 = vmul.f32 %v6296_v56, %v3557_v37 }
 0x613   :  { %v3447_v35 = vpop.permute.xlu1 %3446 }
 0x614   :  { %v3565_v21 = vsub.f32 1.5, %v3564_v58  ;;  %v9800_v5 = vsel %vm1065_vm0, %v3447_v35, %v9558_v48  ;;  %v3707_v60 = vmul.f32 %v6296_v56, %v3706_v11  ;;  %v3571_v58 = vand.u32 2147483648, %v3545_v28 }
 0x615   :  { %11683 = vst [vmem:[#allocation20_spill] sm:$0xff] %v9800_v5  ;;  %v9805_v46 = vmul.f32 %v9800_v5, %v9800_v5 }
 0x616   :  { %v3566_v34 = vmul.f32 %v6294_v1, %v3565_v21  ;;  %v3500_v55 = vpop.xlane.xlu2 %3499  ;;  %v3708_v3 = vmul.f32 0.5, %v3707_v60 }
 0x617   :  { %v3538_v14 = vsub.f32 %v3500_v55, %v3522_v19  ;;  %3511 = vadd.xlane.f32.xlu2 %v9805_v46 }
 0x618   :  { %v3567_v7 = vmul.f32 %v3566_v34, %v3545_v28  ;;  %v3709_v48 = vsub.f32 1.5, %v3708_v3  ;;  %v3715_v34 = vand.u32 2147483648, %v3557_v37 }
 0x619   :  { %v3554_v35 = vmax.f32 %v3538_v14, 1e-07  ;;  %v3514_v14 = vmul.f32 2.0, %v9672_v52 }
 0x61a   :  { %v3569_v12 = vsel %vm3568_vm13, %v3545_v28, %v3567_v7  ;;  %v3710_v11 = vmul.f32 %v6296_v56, %v3709_v48 }
 0x61b   :  { %v3572_v1 = vsel %vm3570_vm3, %v3571_v58, %v3569_v12  ;;  %6297 = vrsqrt.f32 %v3554_v35  ;;  %v3530_v3 = vsub.f32 %v3484_v61, %v3514_v14  ;;  %vm3676_vm6 = vcmp.eq.f32.partialorder %v3554_v35, inf }
 0x61c   :  { %v3753_v21 = vmin.f32 %v3572_v1, 1000000.0  ;;  %v3711_v31 = vmul.f32 %v3710_v11, %v3557_v37  ;;  %vm3678_vm4 = vcmp.eq.f32.partialorder %v3554_v35, 0.0 }
 0x61d   :  { %v9815_v1 = vmax.f32 %v3530_v3, 1e-07 }
 0x61e   :  { %v9808_v4 = vmax.f32 %v3753_v21, 1e-15  ;;  %v3494_v60 = vpop.xlane.xlu2 %3493  ;;  %v3713_v19 = vsel %vm3712_vm2, %v3557_v37, %v3711_v31  ;;  %v3517_v31 = vmul.f32 2.0, %v9702_v8  ;;  %v3526_v8 = vmul.f32 2.0, %v9712_v57 }
 0x61f   :  { %v3535_v55 = vsub.f32 %v3494_v60, %v3519_v25  ;;  %v3716_v28 = vsel %vm3714_vm5, %v3715_v34, %v3713_v19  ;;  %vm3580_vm10 = vcmp.eq.f32.partialorder %v9815_v1, inf  ;;  %vm3582_vm11 = vcmp.eq.f32.partialorder %v9815_v1, 0.0 }
 0x620   :  { %4315 = vperm.xlu1 %5898, %v9808_v4   ;;  %v3765_v12 = vmin.f32 %v3716_v28, 1000000.0  ;;  %v3679_v28 = vand.u32 2147483648, %v3554_v35 }
 0x621   :  { %v6298_v7 = vpop.eup %6297  ;;  %v3551_v56 = vmax.f32 %v3535_v55, 1e-07 }
 0x622   :  { %v3670_v58 = vmul.f32 %v6298_v7, %v3554_v35  ;;  %v9813_v48 = vmax.f32 %v3765_v12, 1e-15 }
 0x623   :  { %6299 = vrsqrt.f32 %v3551_v56  ;;  %vm3640_vm1 = vcmp.eq.f32.partialorder %v3551_v56, inf  ;;  %v3643_v57 = vand.u32 2147483648, %v3551_v56  ;;  %vm3642_vm7 = vcmp.eq.f32.partialorder %v3551_v56, 0.0 }
 0x624   :  { %v3671_v38 = vmul.f32 %v6298_v7, %v3670_v58  ;;  %6301 = vrsqrt.f32 %v9815_v1 }
 0x626   :  { %v3672_v21 = vmul.f32 0.5, %v3671_v38 }
 0x628   :  { %4375 = vperm.xlu1 %5898, %v9813_v48   ;;  %v3490_v25 = vpop.xlane.xlu0 %3489  ;;  %v3673_v37 = vsub.f32 1.5, %v3672_v21 }
 0x629   :  { %v6300_v11 = vpop.eup %6299  ;;  %v3533_v52 = vsub.f32 %v3490_v25, %v3517_v31 }
 0x62a   :  { %v3674_v34 = vmul.f32 %v6298_v7, %v3673_v37  ;;  %v3634_v61 = vmul.f32 %v6300_v11, %v3551_v56  ;;  %v6302_v58 = vpop.eup %6301 }
 0x62b   :  { %v3549_v60 = vmax.f32 %v3533_v52, 1e-07 }
 0x62c   :  { %v3675_v19 = vmul.f32 %v3674_v34, %v3554_v35  ;;  %v3635_v55 = vmul.f32 %v6300_v11, %v3634_v61  ;;  %v3574_v34 = vmul.f32 %v6302_v58, %v9815_v1 }
 0x62d   :  { %6303 = vrsqrt.f32 %v3549_v60  ;;  %vm3616_vm9 = vcmp.eq.f32.partialorder %v3549_v60, inf  ;;  %vm3618_vm8 = vcmp.eq.f32.partialorder %v3549_v60, 0.0 }
 0x62e   :  { %v3677_v14 = vsel %vm3676_vm6, %v3554_v35, %v3675_v19  ;;  %v3636_v12 = vmul.f32 0.5, %v3635_v55  ;;  %v3575_v19 = vmul.f32 %v6302_v58, %v3574_v34  ;;  %v3521_v34 = vmul.f32 2.0, %v9722_v18 }
 0x62f   :  { %v3680_v3 = vsel %vm3678_vm4, %v3679_v28, %v3677_v14 }
 0x630   :  { %v3762_v38 = vmin.f32 %v3680_v3, 1000000.0  ;;  %v3508_v21 = vpop.xlane.xlu0 %3507  ;;  %v3637_v31 = vsub.f32 1.5, %v3636_v12  ;;  %v3576_v12 = vmul.f32 0.5, %v3575_v19 }
 0x631   :  { %v3542_v25 = vsub.f32 %v3508_v21, %v3526_v8 }
 0x632   :  { %v9821_v30 = vmax.f32 %v3762_v38, 1e-15  ;;  %v3638_v7 = vmul.f32 %v6300_v11, %v3637_v31  ;;  %v3577_v8 = vsub.f32 1.5, %v3576_v12 }
 0x633   :  { %v6304_v37 = vpop.eup %6303  ;;  %v9823_v52 = vmax.f32 %v3542_v25, 1e-07 }
 0x634   :  { %4360 = vperm.xlu1 %5898, %v9821_v30   ;;  %v3639_v35 = vmul.f32 %v3638_v7, %v3551_v56  ;;  %v3610_v61 = vmul.f32 %v6304_v37, %v3549_v60  ;;  %v3578_v25 = vmul.f32 %v6302_v58, %v3577_v8  ;;  %v3583_v8 = vand.u32 2147483648, %v9815_v1 }
 0x635   :  { %6305 = vrsqrt.f32 %v9823_v52  ;;  %vm3724_vm14 = vcmp.eq.f32.partialorder %v9823_v52, inf  ;;  %vm3726_vm15 = vcmp.eq.f32.partialorder %v9823_v52, 0.0 }
 0x636   :  { %v3641_v55 = vsel %vm3640_vm1, %v3551_v56, %v3639_v35  ;;  %v3611_v28 = vmul.f32 %v6304_v37, %v3610_v61  ;;  %v3579_v61 = vmul.f32 %v3578_v25, %v9815_v1 }
 0x637   :  { %v3644_v14 = vsel %vm3642_vm7, %v3643_v57, %v3641_v55  ;;  %v3619_v55 = vand.u32 2147483648, %v3549_v60 }
 0x638   :  { %v3759_v11 = vmin.f32 %v3644_v14, 1000000.0  ;;  %v3612_v3 = vmul.f32 0.5, %v3611_v28  ;;  %v3581_v18 = vsel %vm3580_vm10, %v9815_v1, %v3579_v61 }
 0x63a   :  { %v9828_v38 = vmax.f32 %v3759_v11, 1e-15  ;;  %v3613_v21 = vsub.f32 1.5, %v3612_v3 }
 0x63b   :  { %v6306_v31 = vpop.eup %6305 }
 0x63c   :  { %4345 = vperm.xlu1 %5898, %v9828_v38   ;;  %v3614_v7 = vmul.f32 %v6304_v37, %v3613_v21  ;;  %v3718_v59 = vmul.f32 %v6306_v31, %v9823_v52  ;;  %v3809_v37 = vmul.f32 1.442695, %v9813_v48 }
 0x63e   :  { %v3498_v35 = vpop.xlane.xlu1 %3497  ;;  %v3615_v56 = vmul.f32 %v3614_v7, %v3549_v60  ;;  %v3719_v57 = vmul.f32 %v6306_v31, %v3718_v59  ;;  %v3523_v59 = vmul.f32 2.0, %v9737_v0 }
 0x63f   :  { %v3537_v19 = vsub.f32 %v3498_v35, %v3521_v34  ;;  %v3518_v34 = vmul.f32 2.0, %v9741_v47  ;;  %v3584_v35 = vsel %vm3582_vm11, %v3583_v8, %v3581_v18 }
 0x640   :  { %v3617_v28 = vsel %vm3616_vm9, %v3549_v60, %v3615_v56  ;;  %v3720_v14 = vmul.f32 0.5, %v3719_v57  ;;  %v3754_v0 = vmin.f32 %v3584_v35, 1000000.0 }
 0x641   :  { %v9834_v12 = vmax.f32 %v3537_v19, 1e-07  ;;  %v3620_v58 = vsel %vm3618_vm8, %v3619_v55, %v3617_v28  ;;  %v3727_v28 = vand.u32 2147483648, %v9823_v52 }
 0x642   :  { %v3757_v11 = vmin.f32 %v3620_v58, 1000000.0  ;;  %v3721_v3 = vsub.f32 1.5, %v3720_v14  ;;  %v3785_v58 = vmul.f32 1.442695, %v9808_v4 }
 0x643   :  { %6307 = vrsqrt.f32 %v9834_v12  ;;  %vm3664_vm12 = vcmp.eq.f32.partialorder %v9834_v12, inf  ;;  %vm3666_vm13 = vcmp.eq.f32.partialorder %v9834_v12, 0.0 }
 0x644   :  { %v3773_v60 = vmax.f32 %v3757_v11, 1e-15  ;;  %v3722_v25 = vmul.f32 %v6306_v31, %v3721_v3  ;;  %6309 = vpow2.f32 %v3809_v37  ;;  %v3520_v31 = vmul.f32 2.0, %v9757_v40 }
 0x645   :  { %v9859_v11 = vmax.f32 %v3754_v0, 1e-15 }
 0x646   :  { %v3502_v21 = vpop.xlane.xlu0 %3501  ;;  %v3492_v48 = vpop.xlane.xlu1 %3491  ;;  %4335 = vperm.xlu2 %5899, %v3773_v60   ;;  %v3723_v56 = vmul.f32 %v3722_v25, %v9823_v52 }
 0x647   :  { %v3539_v7 = vsub.f32 %v3502_v21, %v3523_v59  ;;  %v3534_v57 = vsub.f32 %v3492_v48, %v3518_v34  ;;  %v3515_v59 = vmul.f32 2.0, %v9761_v63  ;;  %v3803_v21 = vmul.f32 1.442695, %v9821_v30 }
 0x648   :  { %v3725_v1 = vsel %vm3724_vm14, %v9823_v52, %v3723_v56  ;;  %v3527_v30 = vmul.f32 2.0, %v9772_v29 }
 0x649   :  { %v9845_v61 = vmax.f32 %v3539_v7, 1e-07  ;;  %v6308_v19 = vpop.eup %6307  ;;  %v9848_v55 = vmax.f32 %v3534_v57, 1e-07  ;;  %v3728_v8 = vsel %vm3726_vm15, %v3727_v28, %v3725_v1 }
 0x64a   :  { %v3658_v47 = vmul.f32 %v6308_v19, %v9834_v12  ;;  %v9856_v14 = vpop.eup %6309  ;;  %v3766_v35 = vmin.f32 %v3728_v8, 1000000.0 }
 0x64b   :  { %6311 = vrsqrt.f32 %v9845_v61  ;;  %vm3688_vm3 = vcmp.eq.f32.partialorder %v9845_v61, inf  ;;  %vm3690_vm2 = vcmp.eq.f32.partialorder %v9845_v61, 0.0  ;;  %vm3628_vm5 = vcmp.eq.f32.partialorder %v9848_v55, inf }
 0x64c   :  { %6313 = vrsqrt.f32 %v9848_v55  ;;  %v3659_v18 = vmul.f32 %v6308_v19, %v3658_v47  ;;  %v9875_v47 = vmul.f32 1.442695, %v9828_v38  ;;  %v9882_v28 = vmax.f32 %v3766_v35, 1e-15 }
 0x64d   :  { %6315 = vrcp.f32 %v9856_v14  ;;  %v3667_v38 = vand.u32 2147483648, %v9834_v12  ;;  %v3691_v35 = vand.u32 2147483648, %v9845_v61  ;;  %vm3630_vm6 = vcmp.eq.f32.partialorder %v9848_v55, 0.0 }
 0x64e   :  { %v3496_v37 = vpop.xlane.xlu0 %3495  ;;  %v3486_v25 = vpop.xlane.xlu1 %3485  ;;  %4320 = vperm.xlu2 %5899, %v9859_v11   ;;  %v3660_v40 = vmul.f32 0.5, %v3659_v18  ;;  %6317 = vpow2.f32 %v3785_v58  ;;  %v3793_v18 = vmul.f32 1.442695, %v3773_v60  ;;  %vm4002_vm1 = vweird.f32 %v9856_v14 }
 0x64f   :  { %v3536_v3 = vsub.f32 %v3496_v37, %v3520_v31  ;;  %v3531_v4 = vsub.f32 %v3486_v25, %v3515_v59  ;;  %v9880_v31 = vmul.f32 2.0, %v9782_v16 }
 0x650   :  { %v3661_v52 = vsub.f32 1.5, %v3660_v40 }
 0x651   :  { %v6312_v7 = vpop.eup %6311  ;;  %v9865_v34 = vmax.f32 %v3536_v3, 1e-07  ;;  %v9870_v63 = vmax.f32 %v3531_v4, 1e-07 }
 0x652   :  { %v3682_v48 = vmul.f32 %v6312_v7, %v9845_v61  ;;  %v6314_v56 = vpop.eup %6313  ;;  %v3662_v57 = vmul.f32 %v6308_v19, %v3661_v52 }
 0x653   :  { %6319 = vrsqrt.f32 %v9865_v34  ;;  %v3622_v1 = vmul.f32 %v6314_v56, %v9848_v55  ;;  %v9885_v19 = vpop.eup %6315  ;;  %vm3652_vm7 = vcmp.eq.f32.partialorder %v9865_v34, inf  ;;  %vm3654_vm9 = vcmp.eq.f32.partialorder %v9865_v34, 0.0 }
 0x654   :  { %6321 = vpow2.f32 %v3803_v21  ;;  %v3683_v0 = vmul.f32 %v6312_v7, %v3682_v48  ;;  %v3663_v58 = vmul.f32 %v3662_v57, %v9834_v12  ;;  %v9890_v3 = vpop.eup %6317  ;;  %v3998_v25 = vmul.f32 %v9885_v19, %v9856_v14 }
 0x655   :  { %6323 = vrsqrt.f32 %v9870_v63  ;;  %v3623_v37 = vmul.f32 %v6314_v56, %v3622_v1  ;;  %vm4003_vm4 = vweird.f32 %v9885_v19  ;;  %vm3592_vm10 = vcmp.eq.f32.partialorder %v9870_v63, inf }
 0x656   :  { %v3684_v29 = vmul.f32 0.5, %v3683_v0  ;;  %v3510_v59 = vpop.xlane.xlu1 %3509  ;;  %4380 = vperm.xlu2 %5899, %v9882_v28   ;;  %v3665_v16 = vsel %vm3664_vm12, %v9834_v12, %v3663_v58  ;;  %vm9932_vm8 = vmor %vm4002_vm1, %vm4003_vm4  ;;  %vm3594_vm14 = vcmp.eq.f32.partialorder %v9870_v63, 0.0 }
 0x657   :  { %v3624_v21 = vmul.f32 0.5, %v3623_v37  ;;  %v3543_v60 = vsub.f32 %v3510_v59, %v3527_v30  ;;  %v3668_v4 = vsel %vm3666_vm13, %v3667_v38, %v3665_v16  ;;  %v3999_v30 = vsub.f32 1.0, %v3998_v25 }
 0x658   :  { %v3685_v8 = vsub.f32 1.5, %v3684_v29  ;;  %v3761_v48 = vmin.f32 %v3668_v4, 1000000.0  ;;  %vm3822_vm13 = vweird.f32 %v9890_v3 }
 0x659   :  { %v6320_v40 = vpop.eup %6319  ;;  %v3625_v0 = vsub.f32 1.5, %v3624_v21  ;;  %v9901_v58 = vmax.f32 %v3543_v60, 1e-07 }
 0x65a   :  { %v9898_v52 = vpop.eup %6321  ;;  %v3686_v57 = vmul.f32 %v6312_v7, %v3685_v8  ;;  %v3646_v1 = vmul.f32 %v6320_v40, %v9865_v34  ;;  %v3777_v29 = vmax.f32 %v3761_v48, 1e-15  ;;  %v3631_v7 = vand.u32 2147483648, %v9848_v55 }
 0x65b   :  { %v6324_v12 = vpop.eup %6323  ;;  %v3626_v38 = vmul.f32 %v6314_v56, %v3625_v0  ;;  %6325 = vrsqrt.f32 %v9901_v58  ;;  %v4000_v8 = vmul.f32 %v9885_v19, %v3999_v30  ;;  %vm3736_vm15 = vcmp.eq.f32.partialorder %v9901_v58, inf }
 0x65c   :  { %v3687_v37 = vmul.f32 %v3686_v57, %v9845_v61  ;;  %v3647_v59 = vmul.f32 %v6320_v40, %v3646_v1  ;;  %v3586_v16 = vmul.f32 %v6324_v12, %v9870_v63  ;;  %v3801_v21 = vmul.f32 1.442695, %v3777_v29  ;;  %4355 = vperm.xlu0 %5900, %v3777_v29  }
 0x65d   :  { %v3627_v25 = vmul.f32 %v3626_v38, %v9848_v55  ;;  %v4001_v57 = vadd.f32 %v9885_v19, %v4000_v8  ;;  %vm3738_vm12 = vcmp.eq.f32.partialorder %v9901_v58, 0.0 }
 0x65e   :  { %v3689_v60 = vsel %vm3688_vm3, %v9845_v61, %v3687_v37  ;;  %v3648_v4 = vmul.f32 0.5, %v3647_v59  ;;  %v3587_v48 = vmul.f32 %v6324_v12, %v3586_v16  ;;  %6327 = vpow2.f32 %v3801_v21 }
 0x65f   :  { %v3692_v56 = vsel %vm3690_vm2, %v3691_v35, %v3689_v60  ;;  %v3629_v1 = vsel %vm3628_vm5, %v9848_v55, %v3627_v25  ;;  %v4008_v61 = vand.u32 2147483648, %v9856_v14  ;;  %v4006_v16 = vand.u32 2147483647, %v9856_v14 }
 0x660   :  { %v3763_v0 = vmin.f32 %v3692_v56, 1000000.0  ;;  %v3649_v30 = vsub.f32 1.5, %v3648_v4  ;;  %v3632_v29 = vsel %vm3630_vm6, %v3631_v7, %v3629_v1  ;;  %v3588_v37 = vmul.f32 0.5, %v3587_v48 }
 0x661   :  { %v3758_v38 = vmin.f32 %v3632_v29, 1000000.0  ;;  %v6326_v8 = vpop.eup %6325  ;;  %6329 = vpow2.f32 %v3793_v18  ;;  %v4005_v18 = vsel %vm9932_vm8, %v9885_v19, %v4001_v57  ;;  %v3655_v25 = vand.u32 2147483648, %v9865_v34 }
 0x662   :  { %v9925_v35 = vmax.f32 %v3763_v0, 1e-15  ;;  %v3650_v59 = vmul.f32 %v6320_v40, %v3649_v30  ;;  %v3589_v21 = vsub.f32 1.5, %v3588_v37  ;;  %v3730_v60 = vmul.f32 %v6326_v8, %v9901_v58  ;;  %v3504_v0 = vpop.xlane.xlu1 %3503 }
 0x663   :  { %v3774_v7 = vmax.f32 %v3758_v38, 1e-15  ;;  %v4009_v56 = vor.u32 1.1754944e-38, %v4008_v61  ;;  %vm4007_vm11 = vcmp.eq.f32.partialorder %v4006_v16, 8.507059e+37  ;;  %v3595_v61 = vand.u32 2147483648, %v9870_v63 }
 0x664   :  { %4365 = vperm.xlu2 %5899, %v9925_v35   ;;  %v3651_v40 = vmul.f32 %v3650_v59, %v9865_v34  ;;  %v3590_v4 = vmul.f32 %v6324_v12, %v3589_v21  ;;  %v9944_v48 = vpop.eup %6327  ;;  %v3731_v29 = vmul.f32 %v6326_v8, %v3730_v60  ;;  %v3540_v21 = vsub.f32 %v3504_v0, %v9880_v31 }
 0x665   :  { %v3795_v1 = vmul.f32 1.442695, %v3774_v7  ;;  %4340 = vperm.xlu0 %5900, %v3774_v7   ;;  %v9952_v12 = vsel %vm4007_vm11, %v4009_v56, %v4005_v18  ;;  %6331 = vrcp.f32 %v9944_v48  ;;  %vm3942_vm3 = vweird.f32 %v9944_v48 }
 0x666   :  { %v3653_v30 = vsel %vm3652_vm7, %v9865_v34, %v3651_v40  ;;  %v3591_v57 = vmul.f32 %v3590_v4, %v9870_v63  ;;  %v3732_v38 = vmul.f32 0.5, %v3731_v29  ;;  %v4069_v7 = vadd.f32 %v9856_v14, %v9952_v12 }
 0x667   :  { %v3656_v19 = vsel %vm3654_vm9, %v3655_v25, %v3653_v30  ;;  %6333 = vpow2.f32 %v3795_v1  ;;  %v9956_v59 = vpop.eup %6329  ;;  %v9971_v25 = vmax.f32 %v3540_v21, 1e-07  ;;  %v3946_v30 = vand.u32 2147483647, %v9944_v48 }
 0x668   :  { %v3760_v37 = vmin.f32 %v3656_v19, 1000000.0  ;;  %v3593_v34 = vsel %vm3592_vm10, %v9870_v63, %v3591_v57  ;;  %6335 = vrcp.f32 %v9890_v3  ;;  %v3733_v40 = vsub.f32 1.5, %v3732_v38 }
 0x669   :  { %v3596_v55 = vsel %vm3594_vm14, %v3595_v61, %v3593_v34  ;;  %6337 = vpow2.f32 %v9875_v47  ;;  %v4085_v56 = vmul.f32 0.5, %v4069_v7  ;;  %v3739_v47 = vand.u32 2147483648, %v9901_v58 }
 0x66a   :  { %v9964_v16 = vmax.f32 %v3760_v37, 1e-15  ;;  %v3755_v18 = vmin.f32 %v3596_v55, 1000000.0  ;;  %v3734_v31 = vmul.f32 %v6326_v8, %v3733_v40  ;;  %6339 = vrcp.f32 %v9956_v59 }
 0x66b   :  { %v6332_v60 = vpop.eup %6331  ;;  %v3948_v29 = vand.u32 2147483648, %v9944_v48  ;;  %v3826_v34 = vand.u32 2147483647, %v9890_v3  ;;  %v3828_v55 = vand.u32 2147483648, %v9890_v3  ;;  %vm9993_vm5 = vcmp.eq.f32.partialorder %v3946_v30, 8.507059e+37 }
 0x66c   :  { %4350 = vperm.xlu2 %5899, %v9964_v16   ;;  %v3771_v63 = vmax.f32 %v3755_v18, 1e-15  ;;  %v3735_v0 = vmul.f32 %v3734_v31, %v9901_v58  ;;  %v3938_v1 = vmul.f32 %v6332_v60, %v9944_v48  ;;  %vm3943_vm2 = vweird.f32 %v6332_v60 }
 0x66d   :  { %v9975_v4 = vpop.eup %6333  ;;  %vm3944_vm4 = vmor %vm3942_vm3, %vm3943_vm2  ;;  %vm10002_vm1 = vcmp.eq.f32.partialorder %v3826_v34, 8.507059e+37  ;;  %vm3882_vm7 = vweird.f32 %v9956_v59  ;;  %vm3957_vm2 = vweird.f32 %v9898_v52 }
 0x66e   :  { %v6336_v8 = vpop.eup %6335  ;;  %4325 = vperm.xlu0 %5900, %v3771_v63   ;;  %6341 = vrcp.f32 %v9975_v4  ;;  %v3789_v19 = vmul.f32 1.442695, %v3771_v63  ;;  %v3737_v57 = vsel %vm3736_vm15, %v9901_v58, %v3735_v0  ;;  %v3939_v37 = vsub.f32 1.0, %v3938_v1 }
 0x66f   :  { %v3818_v61 = vmul.f32 %v6336_v8, %v9890_v3  ;;  %v9986_v38 = vpop.eup %6337  ;;  %v3740_v21 = vsel %vm3738_vm12, %v3739_v47, %v3737_v57  ;;  %v3949_v0 = vor.u32 1.1754944e-38, %v3948_v29  ;;  %vm3823_vm6 = vweird.f32 %v6336_v8 }
 0x670   :  { %v6340_v7 = vpop.eup %6339  ;;  %v3767_v40 = vmin.f32 %v3740_v21, 1000000.0  ;;  %v3940_v18 = vmul.f32 %v6332_v60, %v3939_v37  ;;  %6343 = vpow2.f32 %v3789_v19  ;;  %vm3824_vm9 = vmor %vm3822_vm13, %vm3823_vm6  ;;  %vm3897_vm14 = vweird.f32 %v9975_v4 }
 0x671   :  { %v3819_v31 = vsub.f32 1.0, %v3818_v61  ;;  %v3878_v58 = vmul.f32 %v6340_v7, %v9956_v59  ;;  %6345 = vrcp.f32 %v9898_v52  ;;  %vm3883_vm8 = vweird.f32 %v6340_v7 }
 0x672   :  { %v9998_v47 = vmax.f32 %v3767_v40, 1e-15  ;;  %v3941_v1 = vadd.f32 %v6332_v60, %v3940_v18  ;;  %v3886_v40 = vand.u32 2147483647, %v9956_v59  ;;  %vm10034_vm11 = vmor %vm3882_vm7, %vm3883_vm8  ;;  %6347 = vrsqrt.f32 %v9971_v25 }
 0x673   :  { %v3820_v57 = vmul.f32 %v6336_v8, %v3819_v31  ;;  %v3879_v30 = vsub.f32 1.0, %v3878_v58  ;;  %v3888_v31 = vand.u32 2147483648, %v9956_v59  ;;  %v3903_v58 = vand.u32 2147483648, %v9975_v4 }
 0x674   :  { %4183 = vperm.xlu2 %5899, %v4085_v56   ;;  %v6342_v17 = vpop.eup %6341  ;;  %v3945_v29 = vsel %vm3944_vm4, %v6332_v60, %v3941_v1  ;;  %v3829_v56 = vor.u32 1.1754944e-38, %v3828_v55  ;;  %vm3887_vm13 = vcmp.eq.f32.partialorder %v3886_v40, 8.507059e+37  ;;  %v3918_v24 = vand.u32 2147483648, %v9986_v38 }
 0x675   :  { %v3821_v19 = vadd.f32 %v6336_v8, %v3820_v57  ;;  %v3893_v61 = vmul.f32 %v6342_v17, %v9975_v4  ;;  %v10012_v21 = vsel %vm9993_vm5, %v3949_v0, %v3945_v29  ;;  %v3880_v34 = vmul.f32 %v6340_v7, %v3879_v30 }
 0x676   :  { %4385 = vperm.xlu0 %5900, %v9998_v47   ;;  %v4097_v60 = vsub.f32 %v9944_v48, %v10012_v21  ;;  %v3901_v0 = vand.u32 2147483647, %v9975_v4  ;;  %v10027_v57 = vpop.eup %6343  ;;  %vm3898_vm10 = vweird.f32 %v6342_v17 }
 0x677   :  { %v3825_v55 = vsel %vm3824_vm9, %v6336_v8, %v3821_v19  ;;  %v3894_v18 = vsub.f32 1.0, %v3893_v61  ;;  %v3881_v1 = vadd.f32 %v6340_v7, %v3880_v34  ;;  %v6346_v37 = vpop.eup %6345  ;;  %v3889_v34 = vor.u32 1.1754944e-38, %v3888_v31  ;;  %vm3899_vm15 = vmor %vm3897_vm14, %vm3898_vm10 }
 0x678   :  { %v10023_v63 = vsel %vm10002_vm1, %v3829_v56, %v3825_v55  ;;  %v4113_v30 = vmul.f32 0.5, %v4097_v60  ;;  %v3953_v60 = vmul.f32 %v6346_v37, %v9898_v52  ;;  %vm3902_vm12 = vcmp.eq.f32.partialorder %v3901_v0, 8.507059e+37 }
 0x679   :  { %v4057_v29 = vadd.f32 %v9890_v3, %v10023_v63  ;;  %v3895_v26 = vmul.f32 %v6342_v17, %v3894_v18  ;;  %v3885_v19 = vsel %vm10034_vm11, %v6340_v7, %v3881_v1  ;;  %v3904_v18 = vor.u32 1.1754944e-38, %v3903_v58  ;;  %v6348_v58 = vpop.eup %6347 }
 0x67a   :  { %v10045_v5 = vsel %vm3887_vm13, %v3889_v34, %v3885_v19  ;;  %v3954_v8 = vsub.f32 1.0, %v3953_v60  ;;  %6349 = vrcp.f32 %v10027_v57  ;;  %vm3958_vm3 = vweird.f32 %v6346_v37 }
 0x67b   :  { %v3896_v61 = vadd.f32 %v6342_v17, %v3895_v26  ;;  %v4073_v55 = vmul.f32 0.5, %v4057_v29  ;;  %v3963_v26 = vand.u32 2147483648, %v9898_v52  ;;  %v3961_v0 = vand.u32 2147483647, %v9898_v52  ;;  %vm3959_vm5 = vmor %vm3957_vm2, %vm3958_vm3 }
 0x67c   :  { %4259 = vperm.xlu2 %5899, %v4113_v30   ;;  %v3955_v1 = vmul.f32 %v6346_v37, %v3954_v8  ;;  %6351 = vrcp.f32 %v9986_v38  ;;  %vm3852_vm1 = vweird.f32 %v10027_v57  ;;  %vm3912_vm10 = vweird.f32 %v9986_v38 }
 0x67d   :  { %v3900_v41 = vsel %vm3899_vm15, %v6342_v17, %v3896_v61  ;;  %v4061_v17 = vadd.f32 %v9956_v59, %v10045_v5  ;;  %v3964_v29 = vor.u32 1.1754944e-38, %v3963_v26  ;;  %vm3962_vm6 = vcmp.eq.f32.partialorder %v3961_v0, 8.507059e+37 }
 0x67e   :  { %4123 = vperm.xlu0 %5900, %v4073_v55   ;;  %v10048_v7 = vsel %vm3902_vm12, %v3904_v18, %v3900_v41  ;;  %v3956_v30 = vadd.f32 %v6346_v37, %v3955_v1  ;;  %v3516_v41 = vmul.f32 2.0, %v9794_v50  ;;  %v3694_v50 = vmul.f32 %v6348_v58, %v9971_v25 }
 0x67f   :  { %v4094_v31 = vsub.f32 %v9975_v4, %v10048_v7  ;;  %v4077_v55 = vmul.f32 0.5, %v4061_v17  ;;  %v4089_v0 = vsub.f32 %v9890_v3, %v10023_v63  ;;  %v3858_v17 = vand.u32 2147483648, %v10027_v57 }
 0x680   :  { %v6350_v19 = vpop.eup %6349  ;;  %v3960_v34 = vsel %vm3959_vm5, %v6346_v37, %v3956_v30  ;;  %v3811_v37 = vmul.f32 1.442695, %v9882_v28  ;;  %vm3700_vm11 = vcmp.eq.f32.partialorder %v9971_v25, inf  ;;  %vm3702_vm14 = vcmp.eq.f32.partialorder %v9971_v25, 0.0 }
 0x681   :  { %v4110_v40 = vmul.f32 0.5, %v4094_v31  ;;  %v10059_v18 = vsel %vm3962_vm6, %v3964_v29, %v3960_v34  ;;  %v3848_v8 = vmul.f32 %v6350_v19, %v10027_v57  ;;  %vm3853_vm4 = vweird.f32 %v6350_v19 }
 0x682   :  { %v3488_v61 = vpop.xlane.xlu2 %3487  ;;  %v4066_v31 = vadd.f32 %v9898_v52, %v10059_v18  ;;  %v6352_v29 = vpop.eup %6351  ;;  %v3528_v34 = vmul.f32 2.0, %v9805_v46  ;;  %vm3854_vm7 = vmor %vm3852_vm1, %vm3853_vm4 }
 0x683   :  { %v3532_v60 = vsub.f32 %v3488_v61, %v3516_v41  ;;  %v3849_v26 = vsub.f32 1.0, %v3848_v8  ;;  %v3856_v41 = vand.u32 2147483647, %v10027_v57  ;;  %v3787_v61 = vmul.f32 1.442695, %v9859_v11 }
 0x684   :  { %4244 = vperm.xlu2 %5899, %v4110_v40   ;;  %v3695_v40 = vmul.f32 %v6348_v58, %v3694_v50  ;;  %v3908_v3 = vmul.f32 %v6352_v29, %v9986_v38  ;;  %v4105_v8 = vmul.f32 0.5, %v4089_v0  ;;  %v3859_v50 = vor.u32 1.1754944e-38, %v3858_v17 }
 0x685   :  { %v10065_v1 = vmax.f32 %v3532_v60, 1e-07  ;;  %v3850_v30 = vmul.f32 %v6350_v19, %v3849_v26  ;;  %v4082_v60 = vmul.f32 0.5, %v4066_v31  ;;  %vm3857_vm9 = vcmp.eq.f32.partialorder %v3856_v41, 8.507059e+37 }
 0x686   :  { %4143 = vperm.xlu0 %5900, %v4077_v55   ;;  %v3696_v55 = vmul.f32 0.5, %v3695_v40  ;;  %v3909_v46 = vsub.f32 1.0, %v3908_v3  ;;  %v3813_v31 = vmul.f32 1.442695, %v9998_v47  ;;  %vm3913_vm8 = vweird.f32 %v6352_v29 }
 0x687   :  { %6353 = vrsqrt.f32 %v10065_v1  ;;  %v3851_v28 = vadd.f32 %v6350_v19, %v3850_v30  ;;  %v3916_v17 = vand.u32 2147483647, %v9986_v38  ;;  %vm3914_vm15 = vmor %vm3912_vm10, %vm3913_vm8  ;;  %vm3604_vm13 = vcmp.eq.f32.partialorder %v10065_v1, inf }
 0x688   :  { %6355 = vpow2.f32 %v3811_v37  ;;  %v3697_v26 = vsub.f32 1.5, %v3696_v55  ;;  %v3910_v0 = vmul.f32 %v6352_v29, %v3909_v46  ;;  %vm3606_vm3 = vcmp.eq.f32.partialorder %v10065_v1, 0.0 }
 0x689   :  { %v3855_v56 = vsel %vm3854_vm7, %v6350_v19, %v3851_v28  ;;  %6357 = vpow2.f32 %v3787_v61  ;;  %v3919_v61 = vor.u32 1.1754944e-38, %v3918_v24  ;;  %vm3917_vm12 = vcmp.eq.f32.partialorder %v3916_v17, 8.507059e+37 }
 0x68a   :  { %v3512_v63 = vpop.xlane.xlu2 %3511  ;;  %v10079_v40 = vsel %vm3857_vm9, %v3859_v50, %v3855_v56  ;;  %v3698_v30 = vmul.f32 %v6348_v58, %v3697_v26  ;;  %v3703_v56 = vand.u32 2147483648, %v9971_v25  ;;  %v3911_v58 = vadd.f32 %v6352_v29, %v3910_v0 }
 0x68b   :  { %v3544_v11 = vsub.f32 %v3512_v63, %v3528_v34  ;;  %v4059_v37 = vadd.f32 %v10027_v57, %v10079_v40  ;;  %6359 = vpow2.f32 %v3813_v31  ;;  %v3805_v31 = vmul.f32 1.442695, %v9925_v35 }
 0x68c   :  { %4168 = vperm.xlu2 %5899, %v4082_v60   ;;  %v3699_v19 = vmul.f32 %v3698_v30, %v9971_v25  ;;  %v3915_v3 = vsel %vm3914_vm15, %v6352_v29, %v3911_v58  ;;  %v11692_v58 = vsub.f32 %v9856_v14, %v9952_v12  ;;  %v4091_v35 = vsub.f32 %v10027_v57, %v10079_v40 }
 0x68d   :  { %v6354_v41 = vpop.eup %6353  ;;  %v10087_v47 = vmax.f32 %v3544_v11, 1e-07  ;;  %v4075_v60 = vmul.f32 0.5, %v4059_v37  ;;  %v10130_v40 = vadd.f32 %v9944_v48, %v10012_v21 }
 0x68e   :  { %4219 = vperm.xlu0 %5900, %v4105_v8   ;;  %v10091_v34 = vpop.eup %6355  ;;  %v3701_v55 = vsel %vm3700_vm11, %v9971_v25, %v3699_v19  ;;  %v10095_v8 = vsel %vm3917_vm12, %v3919_v61, %v3915_v3  ;;  %v3598_v50 = vmul.f32 %v6354_v41, %v10065_v1 }
 0x68f   :  { %v3704_v28 = vsel %vm3702_vm14, %v3703_v56, %v3701_v55  ;;  %6361 = vrsqrt.f32 %v10087_v47  ;;  %v10099_v26 = vpop.eup %6357  ;;  %v4063_v25 = vadd.f32 %v9986_v38, %v10095_v8  ;;  %v4021_v14 = vand.u32 2147483647, %v10091_v34 }
 0x690   :  { %v3764_v63 = vmin.f32 %v3704_v28, 1000000.0  ;;  %v3599_v24 = vmul.f32 %v6354_v41, %v3598_v50  ;;  %6363 = vrcp.f32 %v10091_v34  ;;  %v4023_v12 = vand.u32 2147483648, %v10091_v34 }
 0x691   :  { %v10107_v46 = vpop.eup %6359  ;;  %v4079_v30 = vmul.f32 0.5, %v4063_v25  ;;  %6365 = vrcp.f32 %v10099_v26  ;;  %vm4017_vm5 = vweird.f32 %v10091_v34  ;;  %vm4022_vm4 = vcmp.eq.f32.partialorder %v4021_v14, 8.507059e+37 }
 0x692   :  { %v10101_v11 = vmax.f32 %v3764_v63, 1e-15  ;;  %v3600_v29 = vmul.f32 0.5, %v3599_v24  ;;  %6367 = vrcp.f32 %v10107_v46  ;;  %vm4032_vm7 = vweird.f32 %v10107_v46 }
 0x693   :  { %6369 = vpow2.f32 %v3805_v31  ;;  %v4107_v31 = vmul.f32 0.5, %v4091_v35  ;;  %vm3748_vm10 = vcmp.eq.f32.partialorder %v10087_v47, inf  ;;  %vm3750_vm11 = vcmp.eq.f32.partialorder %v10087_v47, 0.0 }
 0x694   :  { %4133 = vperm.xlu2 %5899, %v4075_v60   ;;  %v3601_v37 = vsub.f32 1.5, %v3600_v29  ;;  %v4117_v60 = vmul.f32 0.5, %v11692_v58  ;;  %v4024_v58 = vor.u32 1.1754944e-38, %v4023_v12  ;;  %v4036_v12 = vand.u32 2147483647, %v10107_v46 }
 0x695   :  { %v6362_v0 = vpop.eup %6361  ;;  %vm3837_vm12 = vweird.f32 %v10099_v26 }
 0x696   :  { %4370 = vperm.xlu0 %5900, %v10101_v11   ;;  %v6364_v17 = vpop.eup %6363  ;;  %v3602_v19 = vmul.f32 %v6354_v41, %v3601_v37  ;;  %v3607_v41 = vand.u32 2147483648, %v10065_v1  ;;  %v3742_v28 = vmul.f32 %v6362_v0, %v10087_v47  ;;  %vm4037_vm8 = vcmp.eq.f32.partialorder %v4036_v12, 8.507059e+37 }
 0x697   :  { %v4013_v56 = vmul.f32 %v6364_v17, %v10091_v34  ;;  %vm4018_vm2 = vweird.f32 %v6364_v17  ;;  %v10126_v63 = vpop.eup %6365 }
 0x698   :  { %v3603_v55 = vmul.f32 %v3602_v19, %v10065_v1  ;;  %v3743_v57 = vmul.f32 %v6362_v0, %v3742_v28  ;;  %v6368_v24 = vpop.eup %6367  ;;  %vm4019_vm6 = vmor %vm4017_vm5, %vm4018_vm2  ;;  %v3833_v48 = vmul.f32 %v10126_v63, %v10099_v26  ;;  %vm3838_vm14 = vweird.f32 %v10126_v63 }
 0x699   :  { %v4014_v61 = vsub.f32 1.0, %v4013_v56  ;;  %v4028_v19 = vmul.f32 %v6368_v24, %v10107_v46  ;;  %vm4033_vm1 = vweird.f32 %v6368_v24 }
 0x69a   :  { %v3605_v3 = vsel %vm3604_vm13, %v10065_v1, %v3603_v55  ;;  %v3799_v1 = vmul.f32 1.442695, %v9964_v16  ;;  %vm4034_vm9 = vmor %vm4032_vm7, %vm4033_vm1 }
 0x69b   :  { %v3608_v50 = vsel %vm3606_vm3, %v3607_v41, %v3605_v3  ;;  %v4015_v25 = vmul.f32 %v6364_v17, %v4014_v61  ;;  %v4029_v55 = vsub.f32 1.0, %v4028_v19  ;;  %v4038_v41 = vand.u32 2147483648, %v10107_v46  ;;  %vm10183_vm3 = vmor %vm3837_vm12, %vm3838_vm14 }
 0x69c   :  { %4153 = vperm.xlu2 %5899, %v4079_v30   ;;  %v3756_v29 = vmin.f32 %v3608_v50, 1000000.0  ;;  %v10132_v30 = vpop.eup %6369  ;;  %6371 = vpow2.f32 %v3799_v1  ;;  %v3834_v50 = vsub.f32 1.0, %v3833_v48 }
 0x69d   :  { %v4016_v37 = vadd.f32 %v6364_v17, %v4015_v25  ;;  %v4030_v3 = vmul.f32 %v6368_v24, %v4029_v55  ;;  %vm3972_vm13 = vweird.f32 %v10132_v30 }
 0x69e   :  { %4279 = vperm.xlu0 %5900, %v4117_v60   ;;  %v3772_v56 = vmax.f32 %v3756_v29, 1e-15  ;;  %v3744_v60 = vmul.f32 0.5, %v3743_v57  ;;  %v3807_v29 = vmul.f32 1.442695, %v10101_v11 }
 0x69f   :  { %v4020_v21 = vsel %vm4019_vm6, %v6364_v17, %v4016_v37  ;;  %v4093_v17 = vsub.f32 %v9956_v59, %v10045_v5  ;;  %v4031_v57 = vadd.f32 %v6368_v24, %v4030_v3  ;;  %v3751_v5 = vand.u32 2147483648, %v10087_v47 }
 0x6a0   :  { %v3791_v35 = vmul.f32 1.442695, %v3772_v56  ;;  %4330 = vperm.xlu1 %5898, %v3772_v56   ;;  %v10140_v16 = vsel %vm4022_vm4, %v4024_v58, %v4020_v21  ;;  %v3745_v61 = vsub.f32 1.5, %v3744_v60  ;;  %v4098_v56 = vsub.f32 %v9898_v52, %v10059_v18 }
 0x6a1   :  { %v4070_v28 = vadd.f32 %v10091_v34, %v10140_v16  ;;  %v4035_v1 = vsel %vm4034_vm9, %v6368_v24, %v4031_v57  ;;  %v4109_v59 = vmul.f32 0.5, %v4093_v17  ;;  %v4095_v18 = vsub.f32 %v9986_v38, %v10095_v8 }
 0x6a2   :  { %v3746_v14 = vmul.f32 %v6362_v0, %v3745_v61  ;;  %6373 = vpow2.f32 %v3791_v35  ;;  %v10162_v24 = vpop.eup %6371  ;;  %v3978_v3 = vand.u32 2147483648, %v10132_v30  ;;  %v3841_v8 = vand.u32 2147483647, %v10099_v26 }
 0x6a3   :  { %v4086_v25 = vmul.f32 0.5, %v4070_v28  ;;  %6375 = vrcp.f32 %v10132_v30 }
 0x6a4   :  { %4229 = vperm.xlu2 %5899, %v4107_v31   ;;  %v4039_v31 = vor.u32 1.1754944e-38, %v4038_v41  ;;  %v3747_v37 = vmul.f32 %v3746_v14, %v10087_v47  ;;  %6377 = vpow2.f32 %v3807_v29  ;;  %v3835_v41 = vmul.f32 %v10126_v63, %v3834_v50 }
 0x6a5   :  { %v3976_v50 = vand.u32 2147483647, %v10132_v30  ;;  %vm3842_vm6 = vcmp.eq.f32.partialorder %v3841_v8, 8.507059e+37 }
 0x6a6   :  { %4188 = vperm.xlu0 %5900, %v4086_v25   ;;  %v10154_v0 = vsel %vm4037_vm8, %v4039_v31, %v4035_v1  ;;  %v3749_v19 = vsel %vm3748_vm10, %v10087_v47, %v3747_v37  ;;  %v4114_v47 = vmul.f32 0.5, %v4098_v56  ;;  %v3836_v12 = vadd.f32 %v10126_v63, %v3835_v41 }
 0x6a7   :  { %v4103_v11 = vsub.f32 %v10107_v46, %v10154_v0  ;;  %v3752_v58 = vsel %vm3750_vm11, %v3751_v5, %v3749_v19  ;;  %v3843_v25 = vand.u32 2147483648, %v10099_v26  ;;  %v3979_v31 = vor.u32 1.1754944e-38, %v3978_v3 }
 0x6a8   :  { %4239 = vperm.xlu1 %5898, %v4109_v59   ;;  %v3768_v60 = vmin.f32 %v3752_v58, 1000000.0  ;;  %v10164_v48 = vpop.eup %6373  ;;  %v3840_v37 = vsel %vm10183_vm3, %v10126_v63, %v3836_v12  ;;  %v4111_v1 = vmul.f32 0.5, %v4095_v18  ;;  %vm3977_vm5 = vcmp.eq.f32.partialorder %v3976_v50, 8.507059e+37 }
 0x6a9   :  { %v4119_v21 = vmul.f32 0.5, %v4103_v11  ;;  %v6376_v55 = vpop.eup %6375  ;;  %6379 = vrcp.f32 %v10164_v48  ;;  %v3844_v56 = vor.u32 1.1754944e-38, %v3843_v25  ;;  %v4081_v63 = vmul.f32 0.5, %v10130_v40 }
 0x6aa   :  { %v3784_v35 = vmax.f32 %v3768_v60, 1e-15  ;;  %v3968_v61 = vmul.f32 %v6376_v55, %v10132_v30  ;;  %v10174_v17 = vpop.eup %6377  ;;  %vm3973_vm15 = vweird.f32 %v6376_v55  ;;  %vm3867_vm1 = vweird.f32 %v10164_v48 }
 0x6ab   :  { %vm3974_vm2 = vmor %vm3972_vm13, %vm3973_vm15  ;;  %vm3927_vm10 = vweird.f32 %v10162_v24 }
 0x6ac   :  { %4289 = vperm.xlu2 %5899, %v4119_v21   ;;  %v3815_v28 = vmul.f32 1.442695, %v3784_v35  ;;  %v3969_v52 = vsub.f32 1.0, %v3968_v61  ;;  %v10201_v21 = vsel %vm3842_vm6, %v3844_v56, %v3840_v37 }
 0x6ad   :  { %v4058_v18 = vadd.f32 %v10099_v26, %v10201_v21 }
 0x6ae   :  { %4264 = vperm.xlu0 %5900, %v4114_v47   ;;  %6381 = vpow2.f32 %v3815_v28  ;;  %v3970_v14 = vmul.f32 %v6376_v55, %v3969_v52 }
 0x6af   :  { %6383 = vrcp.f32 %v10162_v24  ;;  %v6380_v29 = vpop.eup %6379 }
 0x6b0   :  { %4390 = vperm.xlu1 %5898, %v3784_v35   ;;  %v3971_v57 = vadd.f32 %v6376_v55, %v3970_v14  ;;  %6385 = vrcp.f32 %v10174_v17  ;;  %v3863_v59 = vmul.f32 %v6380_v29, %v10164_v48  ;;  %v3873_v35 = vand.u32 2147483648, %v10164_v48 }
 0x6b1   :  { %vm3868_vm4 = vweird.f32 %v6380_v29 }
 0x6b2   :  { %v3975_v5 = vsel %vm3974_vm2, %v6376_v55, %v3971_v57  ;;  %v3864_v60 = vsub.f32 1.0, %v3863_v59  ;;  %v3871_v55 = vand.u32 2147483647, %v10164_v48  ;;  %vm3869_vm7 = vmor %vm3867_vm1, %vm3868_vm4  ;;  %v3874_v3 = vor.u32 1.1754944e-38, %v3873_v35 }
 0x6b3   :  { %v10195_v11 = vsel %vm3977_vm5, %v3979_v31, %v3975_v5  ;;  %v3931_v5 = vand.u32 2147483647, %v10162_v24  ;;  %v3933_v59 = vand.u32 2147483648, %v10162_v24  ;;  %vm3987_vm2 = vweird.f32 %v10174_v17 }
 0x6b4   :  { %v10193_v19 = vpop.eup %6381  ;;  %v4067_v41 = vadd.f32 %v10132_v30, %v10195_v11  ;;  %v3865_v47 = vmul.f32 %v6380_v29, %v3864_v60  ;;  %vm3872_vm9 = vcmp.eq.f32.partialorder %v3871_v55, 8.507059e+37  ;;  %v4099_v38 = vsub.f32 %v10132_v30, %v10195_v11 }
 0x6b5   :  { %v10197_v58 = vpop.eup %6383  ;;  %6387 = vrcp.f32 %v10193_v19  ;;  %v4053_v55 = vand.u32 2147483648, %v10193_v19  ;;  %vm3932_vm15 = vcmp.eq.f32.partialorder %v3931_v5, 8.507059e+37  ;;  %vm4047_vm12 = vweird.f32 %v10193_v19 }
 0x6b6   :  { %4249 = vperm.xlu0 %5900, %v4111_v1   ;;  %v3923_v61 = vmul.f32 %v10197_v58, %v10162_v24  ;;  %v10209_v28 = vpop.eup %6385  ;;  %v3866_v52 = vadd.f32 %v6380_v29, %v3865_v47  ;;  %v4083_v50 = vmul.f32 0.5, %v4067_v41  ;;  %vm3928_vm8 = vweird.f32 %v10197_v58 }
 0x6b7   :  { %v3983_v12 = vmul.f32 %v10209_v28, %v10174_v17  ;;  %v4051_v41 = vand.u32 2147483647, %v10193_v19  ;;  %vm10232_vm14 = vmor %vm3927_vm10, %vm3928_vm8  ;;  %vm3988_vm13 = vweird.f32 %v10209_v28 }
 0x6b8   :  { %4163 = vperm.xlu1 %5898, %v4081_v63   ;;  %v3924_v40 = vsub.f32 1.0, %v3923_v61  ;;  %v3870_v25 = vsel %vm3869_vm7, %v6380_v29, %v3866_v52  ;;  %v4074_v29 = vmul.f32 0.5, %v4058_v18  ;;  %v4062_v61 = vadd.f32 %v9975_v4, %v10048_v7  ;;  %vm3989_vm6 = vmor %vm3987_vm2, %vm3988_vm13 }
 0x6b9   :  { %v10219_v8 = vsel %vm3872_vm9, %v3874_v3, %v3870_v25  ;;  %v3984_v37 = vsub.f32 1.0, %v3983_v12  ;;  %v3993_v4 = vand.u32 2147483648, %v10174_v17  ;;  %vm4052_vm5 = vcmp.eq.f32.partialorder %v4051_v41, 8.507059e+37 }
 0x6ba   :  { %v3925_v57 = vmul.f32 %v10197_v58, %v3924_v40  ;;  %v4060_v63 = vadd.f32 %v10164_v48, %v10219_v8  ;;  %v3934_v40 = vor.u32 1.1754944e-38, %v3933_v59 }
 0x6bb   :  { %v6388_v14 = vpop.eup %6387  ;;  %v3985_v60 = vmul.f32 %v10209_v28, %v3984_v37 }
 0x6bc   :  { %v4043_v31 = vmul.f32 %v6388_v14, %v10193_v19  ;;  %v3926_v1 = vadd.f32 %v10197_v58, %v3925_v57  ;;  %vm4048_vm11 = vweird.f32 %v6388_v14  ;;  %v4076_v12 = vmul.f32 0.5, %v4060_v63  ;;  %v10247_v57 = vpop.permute.xlu2 %4335 }
 0x6bd   :  { %v3986_v3 = vadd.f32 %v10209_v28, %v3985_v60  ;;  %vm4049_vm3 = vmor %vm4047_vm12, %vm4048_vm11  ;;  %vm4458_vm13 = vweird.f32 %v10247_v57 }
 0x6be   :  { %4173 = vperm.xlu0 %5900, %v4083_v50   ;;  %v4044_v56 = vsub.f32 1.0, %v4043_v31  ;;  %v3930_v52 = vsel %vm10232_vm14, %v10197_v58, %v3926_v1  ;;  %v4054_v50 = vor.u32 1.1754944e-38, %v4053_v55  ;;  %v3991_v58 = vand.u32 2147483647, %v10174_v17 }
 0x6bf   :  { %v3935_v25 = vsel %vm3932_vm15, %v3934_v40, %v3930_v52  ;;  %v4078_v1 = vmul.f32 0.5, %v4062_v61  ;;  %v3990_v5 = vsel %vm3989_vm6, %v10209_v28, %v3986_v3  ;;  %v4090_v55 = vsub.f32 %v10099_v26, %v10201_v21 }
 0x6c0   :  { %4128 = vperm.xlu1 %5898, %v4074_v29   ;;  %v4045_v35 = vmul.f32 %v6388_v14, %v4044_v56  ;;  %v4064_v59 = vadd.f32 %v10162_v24, %v3935_v25  ;;  %v3994_v29 = vor.u32 1.1754944e-38, %v3993_v4  ;;  %vm3992_vm4 = vcmp.eq.f32.partialorder %v3991_v58, 8.507059e+37 }
 0x6c1   :  { %v4106_v28 = vmul.f32 0.5, %v4090_v55  ;;  %v4102_v52 = vsub.f32 %v10091_v34, %v10140_v16  ;;  %v4115_v34 = vmul.f32 0.5, %v4099_v38 }
 0x6c2   :  { %v4046_v18 = vadd.f32 %v6388_v14, %v4045_v35  ;;  %v3995_v60 = vsel %vm3992_vm4, %v3994_v29, %v3990_v5  ;;  %v4080_v35 = vmul.f32 0.5, %v4064_v59 }
 0x6c3   :  { %v4100_v41 = vsub.f32 %v10174_v17, %v3995_v60  ;;  %v4118_v26 = vmul.f32 0.5, %v4102_v52  ;;  %v4068_v29 = vadd.f32 %v10174_v17, %v3995_v60 }
 0x6c4   :  { %v4050_v7 = vsel %vm4049_vm3, %v6388_v14, %v4046_v18  ;;  %v4071_v14 = vadd.f32 %v10107_v46, %v10154_v0  ;;  %v10259_v47 = vpop.permute.xlu2 %4320  ;;  %v4092_v46 = vsub.f32 %v10164_v48, %v10219_v8  ;;  %v4316_v48 = vpop.permute.xlu1 %4315 }
 0x6c5   :  { %v4055_v31 = vsel %vm4052_vm5, %v4054_v50, %v4050_v7  ;;  %v4116_v0 = vmul.f32 0.5, %v4100_v41  ;;  %6389 = vrcp.f32 %v4316_v48  ;;  %v4096_v7 = vsub.f32 %v10162_v24, %v3935_v25 }
 0x6c6   :  { %4138 = vperm.xlu0 %5900, %v4076_v12   ;;  %v4072_v37 = vadd.f32 %v10193_v19, %v4055_v31  ;;  %v4108_v40 = vmul.f32 0.5, %v4092_v46  ;;  %v4104_v21 = vsub.f32 %v10193_v19, %v4055_v31  ;;  %v4087_v8 = vmul.f32 0.5, %v4071_v14 }
 0x6c7   :  { %v4084_v30 = vmul.f32 0.5, %v4068_v29  ;;  %vm4398_vm7 = vweird.f32 %v4316_v48  ;;  %v4402_v24 = vand.u32 2147483647, %v4316_v48 }
 0x6c8   :  { %v4088_v56 = vmul.f32 0.5, %v4072_v37  ;;  %4148 = vperm.xlu1 %5898, %v4078_v1   ;;  %v4120_v3 = vmul.f32 0.5, %v4104_v21  ;;  %v4112_v1 = vmul.f32 0.5, %v4096_v7 }
 0x6c9   :  { %vm4403_vm8 = vcmp.eq.f32.partialorder %v4402_v24, 8.507059e+37 }
 0x6ca   :  { %4198 = vperm.xlu2 %5899, %v4088_v56   ;;  %v4404_v56 = vand.u32 2147483648, %v4316_v48 }
 0x6cb   :  { %v6390_v16 = vpop.eup %6389 }
 0x6cc   :  { %v10268_v18 = vpop.permute.xlu2 %4380  ;;  %v4394_v19 = vmul.f32 %v6390_v16, %v4316_v48  ;;  %v4376_v5 = vpop.permute.xlu1 %4375  ;;  %vm4399_vm1 = vweird.f32 %v6390_v16  ;;  %v4405_v41 = vor.u32 1.1754944e-38, %v4404_v56 }
 0x6cd   :  { %6391 = vrcp.f32 %v4376_v5  ;;  %vm4400_vm9 = vmor %vm4398_vm7, %vm4399_vm1  ;;  %vm4578_vm11 = vweird.f32 %v4376_v5 }
 0x6ce   :  { %v10254_v63 = vpop.permute.xlu0 %4355  ;;  %4158 = vperm.xlu0 %5900, %v4080_v35   ;;  %v4395_v37 = vsub.f32 1.0, %v4394_v19  ;;  %6393 = vrcp.f32 %v10247_v57 }
 0x6d0   :  { %4224 = vperm.xlu1 %5898, %v4106_v28   ;;  %v4396_v59 = vmul.f32 %v6390_v16, %v4395_v37 }
 0x6d2   :  { %4274 = vperm.xlu2 %5899, %v4116_v0   ;;  %v4397_v11 = vadd.f32 %v6390_v16, %v4396_v59 }
 0x6d3   :  { %v6392_v55 = vpop.eup %6391 }
 0x6d4   :  { %v10272_v50 = vpop.permute.xlu2 %4365  ;;  %v4401_v25 = vsel %vm4400_vm9, %v6390_v16, %v4397_v11  ;;  %v4574_v35 = vmul.f32 %v6392_v55, %v4376_v5  ;;  %vm4579_vm10 = vweird.f32 %v6392_v55  ;;  %v4584_v16 = vand.u32 2147483648, %v4376_v5 }
 0x6d5   :  { %v4406_v17 = vsel %vm4403_vm8, %v4405_v41, %v4401_v25  ;;  %vm4580_vm14 = vmor %vm4578_vm11, %vm4579_vm10  ;;  %vm4518_vm8 = vweird.f32 %v10254_v63 }
 0x6d6   :  { %4234 = vperm.xlu0 %5900, %v4108_v40   ;;  %v4575_v52 = vsub.f32 1.0, %v4574_v35  ;;  %v4585_v29 = vor.u32 1.1754944e-38, %v4584_v16  ;;  %v4462_v16 = vand.u32 2147483647, %v10247_v57 }
 0x6d7   :  { %v10263_v61 = vpop.permute.xlu0 %4340 }
 0x6d8   :  { %4284 = vperm.xlu1 %5898, %v4118_v26   ;;  %v10289_v26 = vpop.permute.xlu1 %4360  ;;  %v4576_v48 = vmul.f32 %v6392_v55, %v4575_v52  ;;  %vm4463_vm5 = vcmp.eq.f32.partialorder %v4462_v16, 8.507059e+37 }
 0x6d9   :  { %6395 = vrcp.f32 %v10289_v26  ;;  %vm4533_vm6 = vweird.f32 %v10289_v26 }
 0x6da   :  { %6397 = vrcp.f32 %v10254_v63 }
 0x6dc   :  { %v10280_v31 = vpop.permute.xlu2 %4350 }
 0x6de   :  { %4294 = vperm.xlu0 %5900, %v4120_v3  }
 0x6e0   :  { %v10270_v12 = vpop.permute.xlu0 %4325  ;;  %4193 = vperm.xlu1 %5898, %v4087_v8   ;;  %v10302_v37 = vpop.permute.xlu1 %4345 }
 0x6e1   :  { %6399 = vrcp.f32 %v10302_v37  ;;  %vm4488_vm10 = vweird.f32 %v10302_v37 }
 0x6e2   :  { %6401 = vrcp.f32 %v10263_v61 }
 0x6e3   :  { %6403 = vrcp.f32 %v10270_v12 }
 0x6e4   :  { %v4184_v38 = vpop.permute.xlu2 %4183  ;;  %6405 = vrcp.f32 %v10259_v47 }
 0x6e5   :  { %v4213_v25 = vmul.f32 %v4184_v38, %v8803_v15 }
 0x6e8   :  { %v10274_v4 = vpop.permute.xlu0 %4385  ;;  %4269 = vperm.xlu1 %5898, %v4115_v34   ;;  %v4577_v34 = vadd.f32 %v6392_v55, %v4576_v48 }
 0x6ea   :  { %v4581_v59 = vsel %vm4580_vm14, %v6392_v55, %v4577_v34 }
 0x6ec   :  { %v10287_v40 = vpop.permute.xlu2 %4259 }
 0x6f0   :  { %v4124_v58 = vpop.permute.xlu0 %4123  ;;  %4254 = vperm.xlu1 %5898, %v4112_v1  }
 0x6f1   :  { %v4201_v60 = vmul.f32 %v4124_v58, %v8766_v62  ;;  %v6394_v62 = vpop.eup %6393  ;;  %v4582_v58 = vand.u32 2147483647, %v4376_v5 }
 0x6f2   :  { %v4454_v19 = vmul.f32 %v6394_v62, %v10247_v57  ;;  %v10304_v1 = vpop.eup %6395  ;;  %vm4459_vm12 = vweird.f32 %v6394_v62 }
 0x6f3   :  { %vm4583_vm15 = vcmp.eq.f32.partialorder %v4582_v58, 8.507059e+37  ;;  %v4529_v24 = vmul.f32 %v10304_v1, %v10289_v26  ;;  %v10314_v55 = vpop.eup %6397  ;;  %vm4460_vm3 = vmor %vm4458_vm13, %vm4459_vm12  ;;  %vm4534_vm2 = vweird.f32 %v10304_v1 }
 0x6f4   :  { %v10300_v7 = vpop.permute.xlu2 %4244  ;;  %v4455_v11 = vsub.f32 1.0, %v4454_v19  ;;  %v4586_v5 = vsel %vm4583_vm15, %v4585_v29, %v4581_v59  ;;  %v4514_v52 = vmul.f32 %v10314_v55, %v10254_v63  ;;  %vm4535_vm4 = vmor %vm4533_vm6, %vm4534_vm2  ;;  %vm4519_vm7 = vweird.f32 %v10314_v55 }
 0x6f5   :  { %vm10366_vm11 = vmor %vm4518_vm8, %vm4519_vm7  ;;  %vm4413_vm8 = vweird.f32 %v10259_v47 }
 0x6f6   :  { %v4456_v41 = vmul.f32 %v6394_v62, %v4455_v11  ;;  %v4515_v19 = vsub.f32 1.0, %v4514_v52 }
 0x6f8   :  { %v10283_v14 = vpop.permute.xlu0 %4143  ;;  %4178 = vperm.xlu1 %5898, %v4084_v30   ;;  %v4457_v15 = vadd.f32 %v6394_v62, %v4456_v41 }
 0x6fa   :  { %v4461_v58 = vsel %vm4460_vm3, %v6394_v62, %v4457_v15  ;;  %v4516_v62 = vmul.f32 %v10314_v55, %v4515_v19  ;;  %v4524_v15 = vand.u32 2147483648, %v10254_v63  ;;  %vm4473_vm3 = vweird.f32 %v10263_v61 }
 0x700   :  { %v4220_v28 = vpop.permute.xlu0 %4219 }
 0x701   :  { %v4297_v46 = vmul.f32 %v4220_v28, %v9648_v42 }
 0x703   :  { %v4407_v0 = vmul.f32 %v4406_v17, %v4297_v46  ;;  %v4530_v46 = vsub.f32 1.0, %v4529_v24  ;;  %v4539_v24 = vand.u32 2147483648, %v10289_v26 }
 0x705   :  { %v10292_v21 = vadd.f32 %v4407_v0, %v4201_v60  ;;  %v10318_v60 = vpop.eup %6399  ;;  %v4169_v0 = vpop.permute.xlu2 %4168  ;;  %v4531_v38 = vmul.f32 %v10304_v1, %v4530_v46  ;;  %v4540_v52 = vor.u32 1.1754944e-38, %v4539_v24  ;;  %v4525_v24 = vor.u32 1.1754944e-38, %v4524_v15 }
 0x706   :  { %v4484_v48 = vmul.f32 %v10318_v60, %v10302_v37  ;;  %vm4489_vm9 = vweird.f32 %v10318_v60 }
 0x707   :  { %v4649_v3 = vmul.f32 %v11498_v49, %v10292_v21  ;;  %v4532_v11 = vadd.f32 %v10304_v1, %v4531_v38  ;;  %v4517_v38 = vadd.f32 %v10314_v55, %v4516_v62  ;;  %vm10378_vm14 = vmor %vm4488_vm10, %vm4489_vm9  ;;  %vm4593_vm10 = vweird.f32 %v10268_v18 }
 0x708   :  { %v10296_v8 = vpop.permute.xlu0 %4370  ;;  %v4485_v59 = vsub.f32 1.0, %v4484_v48  ;;  %v4210_v48 = vmul.f32 %v4169_v0, %v11664_v36  ;;  %v4492_v0 = vand.u32 2147483647, %v10302_v37 }
 0x709   :  { %v4665_v42 = vmul.f32 %v4649_v3, %v4649_v3  ;;  %v4536_v46 = vsel %vm4535_vm4, %v10304_v1, %v4532_v11  ;;  %v10355_v1 = vpop.eup %6401  ;;  %vm4428_vm4 = vweird.f32 %v10270_v12 }
 0x70a   :  { %vm4493_vm12 = vcmp.eq.f32.partialorder %v4492_v0, 8.507059e+37  ;;  %vm4474_vm13 = vweird.f32 %v10355_v1 }
 0x70b   :  { %4681 = vadd.xlane.f32.xlu2 %v4665_v42  ;;  %v4464_v42 = vand.u32 2147483648, %v10247_v57  ;;  %vm10425_vm2 = vmor %vm4473_vm3, %vm4474_vm13 }
 0x70d   :  { %v4465_v29 = vor.u32 1.1754944e-38, %v4464_v42 }
 0x70f   :  { %v4466_v57 = vsel %vm4463_vm5, %v4465_v29, %v4461_v58 }
 0x710   :  { %v4280_v30 = vpop.permute.xlu0 %4279 }
 0x711   :  { %v4309_v56 = vmul.f32 %v4280_v30, %v9658_v9 }
 0x712   :  { %v10316_v17 = vpop.permute.xlu1 %4330 }
 0x713   :  { %v4587_v35 = vmul.f32 %v4586_v5, %v4309_v56  ;;  %v4537_v5 = vand.u32 2147483647, %v10289_v26  ;;  %6407 = vrcp.f32 %v10316_v17 }
 0x714   :  { %6409 = vrcp.f32 %v10268_v18 }
 0x715   :  { %v10312_v28 = vadd.f32 %v4587_v35, %v4213_v25  ;;  %v10340_v25 = vpop.permute.xlu2 %4133  ;;  %v4205_v35 = vmul.f32 %v10283_v14, %v11670_v45  ;;  %vm4538_vm1 = vcmp.eq.f32.partialorder %v4537_v5, 8.507059e+37  ;;  %6411 = vrcp.f32 %v10274_v4 }
 0x716   :  { %v4541_v45 = vsel %vm4538_vm1, %v4540_v52, %v4536_v46  ;;  %v4305_v46 = vmul.f32 %v10287_v40, %v9718_v51 }
 0x717   :  { %v4661_v9 = vmul.f32 %v11498_v49, %v10312_v28 }
 0x718   :  { %v10329_v34 = vpop.permute.xlu0 %4188 }
 0x719   :  { %v4677_v3 = vmul.f32 %v4661_v9, %v4661_v9 }
 0x71a   :  { %v4240_v30 = vpop.permute.xlu1 %4239 }
 0x71b   :  { %4705 = vadd.xlane.f32.xlu2 %v4677_v3  ;;  %v4301_v56 = vmul.f32 %v4240_v30, %v9698_v43  ;;  %v4486_v43 = vmul.f32 %v10318_v60, %v4485_v59  ;;  %v4494_v59 = vand.u32 2147483648, %v10302_v37  ;;  %v4521_v30 = vsel %vm10366_vm11, %v10314_v55, %v4517_v38 }
 0x71d   :  { %v4467_v41 = vmul.f32 %v4466_v57, %v4301_v56  ;;  %v4487_v19 = vadd.f32 %v10318_v60, %v4486_v43  ;;  %v10382_v56 = vpop.eup %6403  ;;  %v4154_v55 = vpop.permute.xlu2 %4153  ;;  %v4495_v5 = vor.u32 1.1754944e-38, %v4494_v59 }
 0x71e   :  { %v4207_v15 = vmul.f32 %v4154_v55, %v11665_v54  ;;  %vm4429_vm5 = vweird.f32 %v10382_v56 }
 0x71f   :  { %v10346_v9 = vadd.f32 %v4467_v41, %v4205_v35  ;;  %v4491_v57 = vsel %vm10378_vm14, %v10318_v60, %v4487_v19  ;;  %v4424_v60 = vmul.f32 %v10382_v56, %v10270_v12  ;;  %vm4430_vm1 = vmor %vm4428_vm4, %vm4429_vm5 }
 0x720   :  { %v4265_v3 = vpop.permute.xlu0 %4264 }
 0x721   :  { %v4306_v26 = vmul.f32 %v4265_v3, %v9678_v53  ;;  %v4653_v14 = vmul.f32 %v11498_v49, %v10346_v9  ;;  %v4522_v53 = vand.u32 2147483647, %v10254_v63  ;;  %v4469_v63 = vmul.f32 %v10355_v1, %v10263_v61 }
 0x722   :  { %v10358_v16 = vpop.permute.xlu1 %4390  ;;  %v4496_v3 = vsel %vm4493_vm12, %v4495_v5, %v4491_v57  ;;  %v4425_v51 = vsub.f32 1.0, %v4424_v60  ;;  %vm4443_vm12 = vweird.f32 %v10316_v17 }
 0x723   :  { %v4542_v42 = vmul.f32 %v4541_v45, %v4306_v26  ;;  %v4669_v58 = vmul.f32 %v4653_v14, %v4653_v14  ;;  %vm4523_vm15 = vcmp.eq.f32.partialorder %v4522_v53, 8.507059e+37  ;;  %v4470_v52 = vsub.f32 1.0, %v4469_v63 }
 0x724   :  { %v4526_v35 = vsel %vm4523_vm15, %v4525_v24, %v4521_v30  ;;  %v4426_v29 = vmul.f32 %v10382_v56, %v4425_v51  ;;  %v4479_v30 = vand.u32 2147483648, %v10263_v61  ;;  %v4477_v24 = vand.u32 2147483647, %v10263_v61 }
 0x725   :  { %v10370_v36 = vadd.f32 %v4542_v42, %v4210_v48  ;;  %4689 = vadd.xlane.f32.xlu0 %v4669_v58  ;;  %v4527_v45 = vmul.f32 %v4526_v35, %v4305_v46  ;;  %v4471_v42 = vmul.f32 %v10355_v1, %v4470_v52  ;;  %6413 = vrcp.f32 %v10358_v16  ;;  %v4230_v61 = vpop.permute.xlu2 %4229 }
 0x726   :  { %v4480_v35 = vor.u32 1.1754944e-38, %v4479_v30  ;;  %6415 = vrcp.f32 %v10272_v50  ;;  %vm4478_vm6 = vcmp.eq.f32.partialorder %v4477_v24, 8.507059e+37 }
 0x727   :  { %v4658_v37 = vmul.f32 %v11498_v49, %v10370_v36  ;;  %v4472_v59 = vadd.f32 %v10355_v1, %v4471_v42  ;;  %6417 = vrcp.f32 %v10280_v31 }
 0x728   :  { %v4250_v62 = vpop.permute.xlu0 %4249  ;;  %6419 = vrcp.f32 %v10296_v8 }
 0x729   :  { %v4303_v41 = vmul.f32 %v4250_v62, %v9688_v33  ;;  %v4674_v43 = vmul.f32 %v4658_v37, %v4658_v37  ;;  %v10399_v33 = vpop.eup %6405  ;;  %v4476_v5 = vsel %vm10425_vm2, %v10355_v1, %v4472_v59  ;;  %v4427_v62 = vadd.f32 %v10382_v56, %v4426_v29 }
 0x72a   :  { %v4164_v38 = vpop.permute.xlu1 %4163  ;;  %v4409_v53 = vmul.f32 %v10399_v33, %v10259_v47  ;;  %v10421_v11 = vpop.eup %6407  ;;  %v4432_v1 = vand.u32 2147483647, %v10270_v12  ;;  %vm4414_vm9 = vweird.f32 %v10399_v33 }
 0x72b   :  { %v4497_v26 = vmul.f32 %v4496_v3, %v4303_v41  ;;  %4699 = vadd.xlane.f32.xlu2 %v4674_v43  ;;  %v4209_v14 = vmul.f32 %v4164_v38, %v11666_v27  ;;  %v10429_v55 = vpop.eup %6409  ;;  %v4434_v41 = vand.u32 2147483648, %v10270_v12  ;;  %v4439_v43 = vmul.f32 %v10421_v11, %v10316_v17  ;;  %vm10484_vm11 = vmor %vm4413_vm8, %vm4414_vm9 }
 0x72c   :  { %v4410_v57 = vsub.f32 1.0, %v4409_v53  ;;  %v10445_v52 = vpop.eup %6411  ;;  %v4589_v60 = vmul.f32 %v10429_v55, %v10268_v18  ;;  %v4481_v3 = vsel %vm4478_vm6, %v4480_v35, %v4476_v5  ;;  %v4299_v38 = vmul.f32 %v4230_v61, %v9748_v23 }
 0x72d   :  { %v10397_v48 = vadd.f32 %v4497_v26, %v4207_v15  ;;  %v10403_v40 = vadd.f32 %v4527_v45, %v4209_v14  ;;  %v4302_v26 = vmul.f32 %v10300_v7, %v9728_v10  ;;  %v4431_v45 = vsel %vm4430_vm1, %v10382_v56, %v4427_v62  ;;  %v10454_v51 = vpop.eup %6413 }
 0x72e   :  { %v4411_v15 = vmul.f32 %v10399_v33, %v4410_v57  ;;  %v4435_v14 = vor.u32 1.1754944e-38, %v4434_v41  ;;  %v4440_v12 = vsub.f32 1.0, %v4439_v43  ;;  %vm4433_vm7 = vcmp.eq.f32.partialorder %v4432_v1, 8.507059e+37  ;;  %v10460_v7 = vpop.eup %6415 }
 0x72f   :  { %v4655_v54 = vmul.f32 %v11498_v49, %v10397_v48  ;;  %v4657_v27 = vmul.f32 %v11498_v49, %v10403_v40  ;;  %v4417_v10 = vand.u32 2147483647, %v10259_v47  ;;  %v4619_v30 = vmul.f32 %v10454_v51, %v10358_v16 }
 0x730   :  { %v10408_v19 = vpop.permute.xlu0 %4173  ;;  %v4436_v59 = vsel %vm4433_vm7, %v4435_v14, %v4431_v45  ;;  %v4412_v29 = vadd.f32 %v10399_v33, %v4411_v15  ;;  %v4203_v57 = vmul.f32 %v10340_v25, %v11672_v22  ;;  %v10481_v35 = vmul.f32 %v10460_v7, %v10272_v50 }
 0x731   :  { %v4671_v58 = vmul.f32 %v4655_v54, %v4655_v54  ;;  %v4673_v0 = vmul.f32 %v4657_v27, %v4657_v27  ;;  %v4482_v54 = vmul.f32 %v4481_v3, %v4302_v26  ;;  %v4604_v27 = vmul.f32 %v10445_v52, %v10274_v4 }
 0x732   :  { %v10419_v63 = vpop.permute.xlu1 %4128  ;;  %v4437_v23 = vmul.f32 %v4436_v59, %v4299_v38  ;;  %v4416_v25 = vsel %vm10484_vm11, %v10399_v33, %v4412_v29  ;;  %vm4418_vm14 = vcmp.eq.f32.partialorder %v4417_v10, 8.507059e+37  ;;  %v4620_v41 = vsub.f32 1.0, %v4619_v30 }
 0x733   :  { %4693 = vadd.xlane.f32.xlu2 %v4671_v58  ;;  %4697 = vadd.xlane.f32.xlu1 %v4673_v0  ;;  %v4590_v58 = vsub.f32 1.0, %v4589_v60  ;;  %v4441_v0 = vmul.f32 %v10421_v11, %v4440_v12  ;;  %v4605_v24 = vsub.f32 1.0, %v4604_v27  ;;  %vm4444_vm15 = vweird.f32 %v10421_v11  ;;  %v10511_v27 = vpop.eup %6417 }
 0x734   :  { %v10488_v22 = vadd.f32 %v4437_v23, %v4203_v57  ;;  %v4449_v26 = vand.u32 2147483648, %v10316_v17  ;;  %v4599_v38 = vand.u32 2147483648, %v10268_v18  ;;  %v4447_v45 = vand.u32 2147483647, %v10316_v17  ;;  %vm10504_vm3 = vmor %vm4443_vm12, %vm4444_vm15 }
 0x735   :  { %v4591_v62 = vmul.f32 %v10429_v55, %v4590_v58  ;;  %v4442_v60 = vadd.f32 %v10421_v11, %v4441_v0  ;;  %v4606_v3 = vmul.f32 %v10445_v52, %v4605_v24  ;;  %vm4594_vm13 = vweird.f32 %v10429_v55 }
 0x736   :  { %v4202_v14 = vmul.f32 %v10419_v63, %v11667_v39  ;;  %v4614_v17 = vand.u32 2147483648, %v10274_v4  ;;  %v4621_v58 = vmul.f32 %v10454_v51, %v4620_v41  ;;  %v4290_v63 = vpop.permute.xlu2 %4289  ;;  %vm4609_vm2 = vweird.f32 %v10445_v52  ;;  %vm10529_vm6 = vmor %vm4593_vm10, %vm4594_vm13 }
 0x737   :  { %v4446_v39 = vsel %vm10504_vm3, %v10421_v11, %v4442_v60  ;;  %v4450_v10 = vor.u32 1.1754944e-38, %v4449_v26  ;;  %v4597_v29 = vand.u32 2147483647, %v10268_v18  ;;  %v4607_v0 = vadd.f32 %v10445_v52, %v4606_v3  ;;  %v6420_v11 = vpop.eup %6419 }
 0x738   :  { %v10443_v46 = vpop.permute.xlu0 %4138  ;;  %vm4448_vm5 = vcmp.eq.f32.partialorder %v4447_v45, 8.507059e+37  ;;  %v4622_v18 = vadd.f32 %v10454_v51, %v4621_v58  ;;  %vm4624_vm4 = vweird.f32 %v10454_v51  ;;  %vm4623_vm7 = vweird.f32 %v10358_v16 }
 0x739   :  { %v4451_v24 = vsel %vm4448_vm5, %v4450_v10, %v4446_v39  ;;  %vm4598_vm1 = vcmp.eq.f32.partialorder %v4597_v29, 8.507059e+37  ;;  %vm4608_vm9 = vweird.f32 %v10274_v4  ;;  %vm10554_vm8 = vmor %vm4623_vm7, %vm4624_vm4  ;;  %vm4549_vm15 = vweird.f32 %v10460_v7 }
 0x73a   :  { %v4149_v42 = vpop.permute.xlu1 %4148  ;;  %vm10561_vm10 = vmor %vm4608_vm9, %vm4609_vm2  ;;  %vm4548_vm12 = vweird.f32 %v10272_v50  ;;  %vm4504_vm2 = vweird.f32 %v10511_v27  ;;  %vm4503_vm5 = vweird.f32 %v10280_v31  ;;  %vm4563_vm7 = vweird.f32 %v10296_v8 }
 0x73b   :  { %v4206_v53 = vmul.f32 %v4149_v42, %v11669_v2  ;;  %v4419_v2 = vand.u32 2147483648, %v10259_v47  ;;  %v4611_v26 = vsel %vm10561_vm10, %v10445_v52, %v4607_v0  ;;  %v11714_v42 = vld [vmem:[#allocation20_spill] sm:$0xff]  ;;  %v11715_v52 = vld [vmem:[#allocation27_spill] sm:$0xff]  ;;  %vm4550_vm13 = vmor %vm4548_vm12, %vm4549_vm15 }
 0x73d   :  { %v10462_v56 = vadd.f32 %v4482_v54, %v4206_v53  ;;  %v4420_v43 = vor.u32 1.1754944e-38, %v4419_v2  ;;  %v4651_v54 = vmul.f32 %v11498_v49, %v10488_v22  ;;  %v4545_v53 = vsub.f32 1.0, %v10481_v35 }
 0x73e   :  { %v4600_v2 = vor.u32 1.1754944e-38, %v4599_v38  ;;  %v4199_v38 = vpop.permute.xlu2 %4198 }
 0x73f   :  { %v4654_v5 = vmul.f32 %v11498_v49, %v10462_v56  ;;  %v4421_v33 = vsel %vm4418_vm14, %v4420_v43, %v4416_v25  ;;  %v4546_v3 = vmul.f32 %v10460_v7, %v4545_v53 }
 0x740   :  { %v10473_v37 = vpop.permute.xlu0 %4158 }
 0x741   :  { %v4670_v61 = vmul.f32 %v4654_v5, %v4654_v5  ;;  %v4667_v5 = vmul.f32 %v4651_v54, %v4651_v54 }
 0x742   :  { %v4225_v1 = vpop.permute.xlu1 %4224 }
 0x743   :  { %v4298_v15 = vmul.f32 %v4225_v1, %v9668_v13  ;;  %4691 = vadd.xlane.f32.xlu1 %v4670_v61  ;;  %v4592_v13 = vadd.f32 %v10429_v55, %v4591_v62  ;;  %v4214_v1 = vmul.f32 %v10329_v34, %v11671_v20  ;;  %v4626_v20 = vsel %vm10554_vm8, %v10454_v51, %v4622_v18  ;;  %v11713_v34 = vld [vmem:[#allocation15_spill] sm:$0xff] }
 0x744   :  { %v4499_v51 = vmul.f32 %v10511_v27, %v10280_v31 }
 0x745   :  { %v4422_v12 = vmul.f32 %v4421_v33, %v4298_v15  ;;  %v4596_v57 = vsel %vm10529_vm6, %v10429_v55, %v4592_v13  ;;  %v4629_v55 = vand.u32 2147483648, %v10358_v16  ;;  %v4311_v15 = vmul.f32 %v4290_v63, %v11713_v34  ;;  %vm4505_vm6 = vmor %vm4503_vm5, %vm4504_vm2 }
 0x746   :  { %v4601_v43 = vsel %vm4598_vm1, %v4600_v2, %v4596_v57  ;;  %v4216_v63 = vmul.f32 %v4199_v38, %v11715_v52  ;;  %v4509_v34 = vand.u32 2147483648, %v10280_v31  ;;  %vm4564_vm1 = vweird.f32 %v6420_v11 }
 0x747   :  { %v10520_v59 = vadd.f32 %v4422_v12, %v4202_v14  ;;  %v4630_v45 = vor.u32 1.1754944e-38, %v4629_v55  ;;  %v4615_v12 = vor.u32 1.1754944e-38, %v4614_v17  ;;  %v11716_v17 = vld [vmem:[#allocation25_spill] sm:$0xff]  ;;  %vm4565_vm9 = vmor %vm4563_vm7, %vm4564_vm1 }
 0x748   :  { %v4235_v23 = vpop.permute.xlu0 %4234 }
 0x749   :  { %v4300_v30 = vmul.f32 %v4235_v23, %v9790_v6  ;;  %v4650_v62 = vmul.f32 %v11498_v49, %v10520_v59  ;;  %v4204_v6 = vmul.f32 %v10443_v46, %v11677_v44  ;;  %v4627_v44 = vand.u32 2147483647, %v10358_v16 }
 0x74a   :  { %v4285_v47 = vpop.permute.xlu1 %4284  ;;  %v4612_v46 = vand.u32 2147483647, %v10274_v4 }
 0x74b   :  { %v4452_v35 = vmul.f32 %v4451_v24, %v4300_v30  ;;  %v4310_v25 = vmul.f32 %v4285_v47, %v9708_v32  ;;  %4685 = vadd.xlane.f32.xlu1 %v4667_v5  ;;  %v4666_v61 = vmul.f32 %v4650_v62, %v4650_v62  ;;  %vm4628_vm11 = vcmp.eq.f32.partialorder %v4627_v44, 8.507059e+37 }
 0x74c   :  { %vm4613_vm14 = vcmp.eq.f32.partialorder %v4612_v46, 8.507059e+37  ;;  %v4631_v53 = vsel %vm4628_vm11, %v4630_v45, %v4626_v20  ;;  %v4500_v24 = vsub.f32 1.0, %v4499_v51  ;;  %v4547_v5 = vadd.f32 %v10460_v7, %v4546_v3  ;;  %v4275_v51 = vpop.permute.xlu2 %4274 }
 0x74d   :  { %v10545_v41 = vadd.f32 %v4452_v35, %v4204_v6  ;;  %v4602_v60 = vmul.f32 %v4601_v43, %v4310_v25  ;;  %4683 = vadd.xlane.f32.xlu0 %v4666_v61  ;;  %v4616_v39 = vsel %vm4613_vm14, %v4615_v12, %v4611_v26  ;;  %v4554_v6 = vand.u32 2147483648, %v10272_v50 }
 0x74e   :  { %v4617_v29 = vmul.f32 %v4616_v39, %v4311_v15  ;;  %v4559_v35 = vmul.f32 %v6420_v11, %v10296_v8  ;;  %v4552_v47 = vand.u32 2147483647, %v10272_v50  ;;  %v4501_v61 = vmul.f32 %v10511_v27, %v4500_v24  ;;  %v11718_v50 = vld [vmem:[#allocation30_spill] sm:$0xff] }
 0x74f   :  { %v4652_v4 = vmul.f32 %v11498_v49, %v10545_v41  ;;  %v10575_v33 = vadd.f32 %v4602_v60, %v4214_v1  ;;  %v4551_v55 = vsel %vm4550_vm13, %v10460_v7, %v4547_v5  ;;  %v4555_v44 = vor.u32 1.1754944e-38, %v4554_v6  ;;  %v11717_v60 = vld [vmem:[#allocation24_spill] sm:$0xff] }
 0x750   :  { %v4295_v14 = vpop.permute.xlu0 %4294  ;;  %v4560_v1 = vsub.f32 1.0, %v4559_v35  ;;  %vm4553_vm3 = vcmp.eq.f32.partialorder %v4552_v47, 8.507059e+37  ;;  %v4211_v16 = vmul.f32 %v10408_v19, %v11718_v50  ;;  %v4507_v7 = vand.u32 2147483647, %v10280_v31 }
 0x751   :  { %v4312_v13 = vmul.f32 %v4295_v14, %v11714_v42  ;;  %v4668_v54 = vmul.f32 %v4652_v4, %v4652_v4  ;;  %v4662_v58 = vmul.f32 %v11498_v49, %v10575_v33  ;;  %v4556_v3 = vsel %vm4553_vm3, %v4555_v44, %v4551_v55  ;;  %v11719_v42 = vld [vmem:[#allocation23_spill] sm:$0xff] }
 0x752   :  { %v4194_v23 = vpop.permute.xlu1 %4193  ;;  %v4502_v4 = vadd.f32 %v10511_v27, %v4501_v61  ;;  %v4561_v15 = vmul.f32 %v6420_v11, %v4560_v1  ;;  %vm4508_vm4 = vcmp.eq.f32.partialorder %v4507_v7, 8.507059e+37  ;;  %v4510_v45 = vor.u32 1.1754944e-38, %v4509_v34 }
 0x753   :  { %v4632_v10 = vmul.f32 %v4631_v53, %v4312_v13  ;;  %4687 = vadd.xlane.f32.xlu2 %v4668_v54  ;;  %v4215_v0 = vmul.f32 %v4194_v23, %v11716_v17  ;;  %v4678_v30 = vmul.f32 %v4662_v58, %v4662_v58  ;;  %v4569_v31 = vand.u32 2147483648, %v10296_v8 }
 0x754   :  { %v4506_v38 = vsel %vm4505_vm6, %v10511_v27, %v4502_v4  ;;  %v4562_v12 = vadd.f32 %v6420_v11, %v4561_v15  ;;  %v4567_v58 = vand.u32 2147483647, %v10296_v8  ;;  %v11720_v27 = vld [vmem:[#allocation16_spill] sm:$0xff] }
 0x755   :  { %v10584_v2 = vadd.f32 %v4632_v10, %v4216_v63  ;;  %v10586_v57 = vadd.f32 %v4617_v29, %v4215_v0  ;;  %4707 = vadd.xlane.f32.xlu0 %v4678_v30  ;;  %v4511_v53 = vsel %vm4508_vm4, %v4510_v45, %v4506_v38  ;;  %v4208_v39 = vmul.f32 %v10473_v37, %v11720_v27  ;;  %v11721_v63 = vld [vmem:[#allocation18_spill] sm:$0xff]  ;;  %v11722_v8 = vld [vmem:[#allocation28_spill] sm:$0xff] }
 0x756   :  { %v4308_v10 = vmul.f32 %v4275_v51, %v11721_v63  ;;  %v4566_v23 = vsel %vm4565_vm9, %v6420_v11, %v4562_v12  ;;  %v4570_v17 = vor.u32 1.1754944e-38, %v4569_v31  ;;  %vm4568_vm8 = vcmp.eq.f32.partialorder %v4567_v58, 8.507059e+37 }
 0x757   :  { %v4664_v62 = vmul.f32 %v11498_v49, %v10584_v2  ;;  %v4663_v18 = vmul.f32 %v11498_v49, %v10586_v57 }
 0x758   :  { %v4571_v30 = vsel %vm4568_vm8, %v4570_v17, %v4566_v23 }
 0x759   :  { %v4680_v25 = vmul.f32 %v4664_v62, %v4664_v62  ;;  %v4679_v43 = vmul.f32 %v4663_v18, %v4663_v18  ;;  %v4572_v5 = vmul.f32 %v4571_v30, %v4308_v10 }
 0x75a   :  { %v4270_v46 = vpop.permute.xlu1 %4269 }
 0x75b   :  { %4711 = vadd.xlane.f32.xlu2 %v4680_v25  ;;  %v4307_v32 = vmul.f32 %v4270_v46, %v11717_v60  ;;  %4709 = vadd.xlane.f32.xlu1 %v4679_v43 }
 0x75d   :  { %v4557_v20 = vmul.f32 %v4556_v3, %v4307_v32 }
 0x75f   :  { %v10608_v26 = vadd.f32 %v4557_v20, %v4211_v16 }
 0x761   :  { %v4659_v19 = vmul.f32 %v11498_v49, %v10608_v26 }
 0x762   :  { %v4255_v14 = vpop.permute.xlu1 %4254 }
 0x763   :  { %v4304_v13 = vmul.f32 %v4255_v14, %v11719_v42  ;;  %v4675_v54 = vmul.f32 %v4659_v19, %v4659_v19 }
 0x765   :  { %v4512_v52 = vmul.f32 %v4511_v53, %v4304_v13  ;;  %4701 = vadd.xlane.f32.xlu0 %v4675_v54 }
 0x767   :  { %v10620_v29 = vadd.f32 %v4512_v52, %v4208_v39 }
 0x769   :  { %v4656_v0 = vmul.f32 %v11498_v49, %v10620_v29 }
 0x76a   :  { %v4179_v24 = vpop.permute.xlu1 %4178 }
 0x76b   :  { %v4212_v62 = vmul.f32 %v4179_v24, %v11722_v8  ;;  %v4672_v6 = vmul.f32 %v4656_v0, %v4656_v0 }
 0x76d   :  { %v10625_v37 = vadd.f32 %v4572_v5, %v4212_v62  ;;  %4695 = vadd.xlane.f32.xlu0 %v4672_v6 }
 0x76f   :  { %v4660_v35 = vmul.f32 %v11498_v49, %v10625_v37 }
 0x771   :  { %v4676_v11 = vmul.f32 %v4660_v35, %v4660_v35 }
 0x773   :  { %4703 = vadd.xlane.f32.xlu1 %v4676_v11 }
 0x77e   :  { %v4682_v47 = vpop.xlane.xlu2 %4681 }
 0x77f   :  { %v4713_v18 = vadd.f32 1.0, %v4682_v47 }
 0x781   :  { %v4729_v25 = vmax.f32 %v4713_v18, 1e-07 }
 0x783   :  { %6421 = vrsqrt.f32 %v4729_v25  ;;  %vm4752_vm10 = vcmp.eq.f32.partialorder %v4729_v25, inf  ;;  %v4755_v16 = vand.u32 2147483648, %v4729_v25  ;;  %vm4754_vm11 = vcmp.eq.f32.partialorder %v4729_v25, 0.0 }
 0x789   :  { %v6422_v61 = vpop.eup %6421 }
 0x78a   :  { %v4746_v55 = vmul.f32 %v6422_v61, %v4729_v25 }
 0x78c   :  { %v4747_v43 = vmul.f32 %v6422_v61, %v4746_v55 }
 0x78e   :  { %v4748_v44 = vmul.f32 0.5, %v4747_v43  ;;  %v4706_v46 = vpop.xlane.xlu2 %4705 }
 0x78f   :  { %v4725_v1 = vadd.f32 1.0, %v4706_v46 }
 0x790   :  { %v4749_v60 = vsub.f32 1.5, %v4748_v44 }
 0x791   :  { %v4741_v32 = vmax.f32 %v4725_v1, 1e-07 }
 0x792   :  { %v4750_v3 = vmul.f32 %v6422_v61, %v4749_v60 }
 0x793   :  { %6423 = vrsqrt.f32 %v4741_v32  ;;  %vm4896_vm14 = vcmp.eq.f32.partialorder %v4741_v32, inf  ;;  %v4899_v27 = vand.u32 2147483648, %v4741_v32  ;;  %vm4898_vm15 = vcmp.eq.f32.partialorder %v4741_v32, 0.0 }
 0x794   :  { %v4751_v50 = vmul.f32 %v4750_v3, %v4729_v25 }
 0x796   :  { %v4753_v20 = vsel %vm4752_vm10, %v4729_v25, %v4751_v50 }
 0x797   :  { %v4756_v4 = vsel %vm4754_vm11, %v4755_v16, %v4753_v20 }
 0x798   :  { %v10632_v34 = vsel %vm1065_vm0, %v4756_v4, %v10292_v21  ;;  %v4690_v45 = vpop.xlane.xlu0 %4689 }
 0x799   :  { %4953 = vst [vmem:[#allocation7] sm:$0xff] %v10632_v34  ;;  %v4985_v15 = vadd.f32 1.0, %v10632_v34  ;;  %v6424_v38 = vpop.eup %6423  ;;  %v4717_v12 = vadd.f32 1.0, %v4690_v45 }
 0x79a   :  { %v4890_v19 = vmul.f32 %v6424_v38, %v4741_v32 }
 0x79b   :  { %5003 = vperm.xlu0 %5900, %v4985_v15   ;;  %v4733_v13 = vmax.f32 %v4717_v12, 1e-07 }
 0x79c   :  { %v4891_v14 = vmul.f32 %v6424_v38, %v4890_v19 }
 0x79d   :  { %6425 = vrsqrt.f32 %v4733_v13  ;;  %vm4800_vm12 = vcmp.eq.f32.partialorder %v4733_v13, inf  ;;  %v4803_v43 = vand.u32 2147483648, %v4733_v13  ;;  %vm4802_vm13 = vcmp.eq.f32.partialorder %v4733_v13, 0.0 }
 0x79e   :  { %v4892_v42 = vmul.f32 0.5, %v4891_v14  ;;  %v4700_v51 = vpop.xlane.xlu2 %4699 }
 0x79f   :  { %v4722_v31 = vadd.f32 1.0, %v4700_v51 }
 0x7a0   :  { %v4893_v54 = vsub.f32 1.5, %v4892_v42 }
 0x7a1   :  { %v4738_v58 = vmax.f32 %v4722_v31, 1e-07 }
 0x7a2   :  { %v4894_v53 = vmul.f32 %v6424_v38, %v4893_v54 }
 0x7a3   :  { %6427 = vrsqrt.f32 %v4738_v58  ;;  %v6426_v52 = vpop.eup %6425  ;;  %vm4860_vm3 = vcmp.eq.f32.partialorder %v4738_v58, inf  ;;  %v4863_v19 = vand.u32 2147483648, %v4738_v58  ;;  %vm4862_vm2 = vcmp.eq.f32.partialorder %v4738_v58, 0.0 }
 0x7a4   :  { %v4895_v21 = vmul.f32 %v4894_v53, %v4741_v32  ;;  %v4794_v10 = vmul.f32 %v6426_v52, %v4733_v13 }
 0x7a6   :  { %v4897_v39 = vsel %vm4896_vm14, %v4741_v32, %v4895_v21  ;;  %v4694_v17 = vpop.xlane.xlu2 %4693  ;;  %v4698_v24 = vpop.xlane.xlu1 %4697  ;;  %v4795_v5 = vmul.f32 %v6426_v52, %v4794_v10 }
 0x7a7   :  { %v4900_v63 = vsel %vm4898_vm15, %v4899_v27, %v4897_v39  ;;  %v4719_v30 = vadd.f32 1.0, %v4694_v17  ;;  %v4721_v8 = vadd.f32 1.0, %v4698_v24 }
 0x7a8   :  { %v10639_v23 = vsel %vm1065_vm0, %v4900_v63, %v10312_v28  ;;  %v4796_v35 = vmul.f32 0.5, %v4795_v5 }
 0x7a9   :  { %4965 = vst [vmem:[#allocation7 + $0x60] sm:$0xff] %v10639_v23  ;;  %v4997_v0 = vadd.f32 1.0, %v10639_v23  ;;  %v6428_v62 = vpop.eup %6427  ;;  %v4735_v6 = vmax.f32 %v4719_v30, 1e-07  ;;  %v4737_v47 = vmax.f32 %v4721_v8, 1e-07 }
 0x7aa   :  { %v4854_v11 = vmul.f32 %v6428_v62, %v4738_v58  ;;  %v4797_v18 = vsub.f32 1.5, %v4796_v35 }
 0x7ab   :  { %5063 = vperm.xlu0 %5900, %v4997_v0   ;;  %6429 = vrsqrt.f32 %v4735_v6  ;;  %vm4824_vm5 = vcmp.eq.f32.partialorder %v4735_v6, inf  ;;  %v4827_v63 = vand.u32 2147483648, %v4735_v6  ;;  %vm4826_vm6 = vcmp.eq.f32.partialorder %v4735_v6, 0.0 }
 0x7ac   :  { %6431 = vrsqrt.f32 %v4737_v47  ;;  %v4855_v28 = vmul.f32 %v6428_v62, %v4854_v11  ;;  %v4798_v25 = vmul.f32 %v6426_v52, %v4797_v18  ;;  %vm4848_vm4 = vcmp.eq.f32.partialorder %v4737_v47, inf }
 0x7ad   :  { %vm4850_vm1 = vcmp.eq.f32.partialorder %v4737_v47, 0.0 }
 0x7ae   :  { %v4856_v61 = vmul.f32 0.5, %v4855_v28  ;;  %v4799_v55 = vmul.f32 %v4798_v25, %v4733_v13 }
 0x7b0   :  { %v4857_v44 = vsub.f32 1.5, %v4856_v61  ;;  %v4801_v1 = vsel %vm4800_vm12, %v4733_v13, %v4799_v55 }
 0x7b1   :  { %v6430_v46 = vpop.eup %6429  ;;  %v4804_v3 = vsel %vm4802_vm13, %v4803_v43, %v4801_v1 }
 0x7b2   :  { %v6432_v60 = vpop.eup %6431  ;;  %v4818_v32 = vmul.f32 %v6430_v46, %v4735_v6  ;;  %v4858_v50 = vmul.f32 %v6428_v62, %v4857_v44  ;;  %v10646_v20 = vsel %vm1065_vm0, %v4804_v3, %v10346_v9 }
 0x7b3   :  { %v4842_v16 = vmul.f32 %v6432_v60, %v4737_v47  ;;  %v4989_v4 = vadd.f32 1.0, %v10646_v20  ;;  %4957 = vst [vmem:[#allocation7 + $0x20] sm:$0xff] %v10646_v20 }
 0x7b4   :  { %v4859_v15 = vmul.f32 %v4858_v50, %v4738_v58  ;;  %v4819_v38 = vmul.f32 %v6430_v46, %v4818_v32 }
 0x7b5   :  { %v4843_v45 = vmul.f32 %v6432_v60, %v4842_v16  ;;  %5023 = vperm.xlu2 %5899, %v4989_v4  }
 0x7b6   :  { %v4861_v14 = vsel %vm4860_vm3, %v4738_v58, %v4859_v15  ;;  %v4820_v12 = vmul.f32 0.5, %v4819_v38  ;;  %v4692_v42 = vpop.xlane.xlu1 %4691 }
 0x7b7   :  { %v4864_v13 = vsel %vm4862_vm2, %v4863_v19, %v4861_v14  ;;  %v4844_v54 = vmul.f32 0.5, %v4843_v45  ;;  %v4718_v31 = vadd.f32 1.0, %v4692_v42 }
 0x7b8   :  { %v10653_v9 = vsel %vm1065_vm0, %v4864_v13, %v10370_v36  ;;  %v4821_v51 = vsub.f32 1.5, %v4820_v12  ;;  %v4851_v36 = vand.u32 2147483648, %v4737_v47 }
 0x7b9   :  { %4962 = vst [vmem:[#allocation7 + $0x48] sm:$0xff] %v10653_v9  ;;  %v4994_v53 = vadd.f32 1.0, %v10653_v9  ;;  %v4845_v21 = vsub.f32 1.5, %v4844_v54  ;;  %v10657_v52 = vmax.f32 %v4718_v31, 1e-07 }
 0x7ba   :  { %v4822_v27 = vmul.f32 %v6430_v46, %v4821_v51 }
 0x7bb   :  { %5048 = vperm.xlu0 %5900, %v4994_v53   ;;  %v4846_v39 = vmul.f32 %v6432_v60, %v4845_v21  ;;  %6433 = vrsqrt.f32 %v10657_v52  ;;  %vm4812_vm10 = vcmp.eq.f32.partialorder %v10657_v52, inf  ;;  %vm4814_vm14 = vcmp.eq.f32.partialorder %v10657_v52, 0.0 }
 0x7bc   :  { %v4823_v58 = vmul.f32 %v4822_v27, %v4735_v6 }
 0x7bd   :  { %v4847_v10 = vmul.f32 %v4846_v39, %v4737_v47 }
 0x7be   :  { %v4825_v17 = vsel %vm4824_vm5, %v4735_v6, %v4823_v58  ;;  %v4686_v0 = vpop.xlane.xlu1 %4685 }
 0x7bf   :  { %v4828_v30 = vsel %vm4826_vm6, %v4827_v63, %v4825_v17  ;;  %v4849_v24 = vsel %vm4848_vm4, %v4737_v47, %v4847_v10  ;;  %v4715_v5 = vadd.f32 1.0, %v4686_v0 }
 0x7c0   :  { %v10662_v8 = vsel %vm1065_vm0, %v4828_v30, %v10397_v48  ;;  %v4852_v62 = vsel %vm4850_vm1, %v4851_v36, %v4849_v24  ;;  %v4684_v35 = vpop.xlane.xlu0 %4683  ;;  %v4815_v30 = vand.u32 2147483648, %v10657_v52 }
 0x7c1   :  { %4959 = vst [vmem:[#allocation7 + $0x30] sm:$0xff] %v10662_v8  ;;  %v4991_v6 = vadd.f32 1.0, %v10662_v8  ;;  %v10670_v11 = vsel %vm1065_vm0, %v4852_v62, %v10403_v40  ;;  %v4714_v47 = vadd.f32 1.0, %v4684_v35  ;;  %v10674_v48 = vmax.f32 %v4715_v5, 1e-07  ;;  %v6434_v61 = vpop.eup %6433 }
 0x7c2   :  { %4961 = vst [vmem:[#allocation7 + $0x40] sm:$0xff] %v10670_v11  ;;  %v4993_v18 = vadd.f32 1.0, %v10670_v11  ;;  %v4806_v44 = vmul.f32 %v6434_v61, %v10657_v52 }
 0x7c3   :  { %5033 = vperm.xlu0 %5900, %v4991_v6   ;;  %v10676_v28 = vmax.f32 %v4714_v47, 1e-07  ;;  %vm4776_vm13 = vcmp.eq.f32.partialorder %v10674_v48, inf  ;;  %vm4778_vm3 = vcmp.eq.f32.partialorder %v10674_v48, 0.0 }
 0x7c4   :  { %5043 = vperm.xlu1 %5898, %v4993_v18   ;;  %v4807_v16 = vmul.f32 %v6434_v61, %v4806_v44 }
 0x7c5   :  { %6435 = vrsqrt.f32 %v10676_v28  ;;  %vm4764_vm7 = vcmp.eq.f32.partialorder %v10676_v28, inf  ;;  %vm4766_vm9 = vcmp.eq.f32.partialorder %v10676_v28, 0.0  ;;  %v4767_v27 = vand.u32 2147483648, %v10676_v28 }
 0x7c6   :  { %v4688_v25 = vpop.xlane.xlu2 %4687  ;;  %6437 = vrsqrt.f32 %v10674_v48  ;;  %v4808_v45 = vmul.f32 0.5, %v4807_v16 }
 0x7c7   :  { %v4716_v55 = vadd.f32 1.0, %v4688_v25 }
 0x7c8   :  { %v4708_v43 = vpop.xlane.xlu0 %4707  ;;  %v4809_v51 = vsub.f32 1.5, %v4808_v45 }
 0x7c9   :  { %v10680_v40 = vmax.f32 %v4716_v55, 1e-07  ;;  %v4726_v46 = vadd.f32 1.0, %v4708_v43 }
 0x7ca   :  { %v4810_v58 = vmul.f32 %v6434_v61, %v4809_v51 }
 0x7cb   :  { %6439 = vrsqrt.f32 %v10680_v40  ;;  %v6436_v1 = vpop.eup %6435  ;;  %v10684_v60 = vmax.f32 %v4726_v46, 1e-07  ;;  %vm4788_vm8 = vcmp.eq.f32.partialorder %v10680_v40, inf  ;;  %vm4790_vm11 = vcmp.eq.f32.partialorder %v10680_v40, 0.0 }
 0x7cc   :  { %v4758_v32 = vmul.f32 %v6436_v1, %v10676_v28  ;;  %v10687_v3 = vpop.eup %6437  ;;  %v4811_v0 = vmul.f32 %v4810_v58, %v10657_v52 }
 0x7cd   :  { %6441 = vrsqrt.f32 %v10684_v60  ;;  %v4770_v12 = vmul.f32 %v10687_v3, %v10674_v48  ;;  %vm4908_vm15 = vcmp.eq.f32.partialorder %v10684_v60, inf  ;;  %vm4910_vm12 = vcmp.eq.f32.partialorder %v10684_v60, 0.0 }
 0x7ce   :  { %v4712_v50 = vpop.xlane.xlu2 %4711  ;;  %v4710_v15 = vpop.xlane.xlu1 %4709  ;;  %v4759_v38 = vmul.f32 %v6436_v1, %v4758_v32  ;;  %v4813_v6 = vsel %vm4812_vm10, %v10657_v52, %v4811_v0 }
 0x7cf   :  { %v4728_v4 = vadd.f32 1.0, %v4712_v50  ;;  %v4727_v19 = vadd.f32 1.0, %v4710_v15  ;;  %v4771_v17 = vmul.f32 %v10687_v3, %v4770_v12  ;;  %v4816_v61 = vsel %vm4814_vm14, %v4815_v30, %v4813_v6 }
 0x7d0   :  { %v4760_v13 = vmul.f32 0.5, %v4759_v38  ;;  %v4791_v50 = vand.u32 2147483648, %v10680_v40  ;;  %v10727_v16 = vsel %vm1065_vm0, %v4816_v61, %v10462_v56  ;;  %v4911_v12 = vand.u32 2147483648, %v10684_v60 }
 0x7d1   :  { %v6440_v14 = vpop.eup %6439  ;;  %v10692_v42 = vmax.f32 %v4728_v4, 1e-07  ;;  %v10696_v31 = vmax.f32 %v4727_v19, 1e-07  ;;  %v4772_v62 = vmul.f32 0.5, %v4771_v17  ;;  %4958 = vst [vmem:[#allocation7 + $0x28] sm:$0xff] %v10727_v16 }
 0x7d2   :  { %v4782_v54 = vmul.f32 %v6440_v14, %v10680_v40  ;;  %v4761_v53 = vsub.f32 1.5, %v4760_v13 }
 0x7d3   :  { %6443 = vrsqrt.f32 %v10692_v42  ;;  %v6442_v21 = vpop.eup %6441  ;;  %v4773_v43 = vsub.f32 1.5, %v4772_v62  ;;  %vm4932_vm2 = vcmp.eq.f32.partialorder %v10692_v42, inf  ;;  %vm4934_vm5 = vcmp.eq.f32.partialorder %v10692_v42, 0.0 }
 0x7d4   :  { %v4783_v39 = vmul.f32 %v6440_v14, %v4782_v54  ;;  %v4902_v63 = vmul.f32 %v6442_v21, %v10684_v60  ;;  %v4762_v10 = vmul.f32 %v6436_v1, %v4761_v53  ;;  %6445 = vrsqrt.f32 %v10696_v31 }
 0x7d5   :  { %v4774_v56 = vmul.f32 %v10687_v3, %v4773_v43  ;;  %vm4920_vm6 = vcmp.eq.f32.partialorder %v10696_v31, inf  ;;  %vm4922_vm4 = vcmp.eq.f32.partialorder %v10696_v31, 0.0 }
 0x7d6   :  { %v4784_v36 = vmul.f32 0.5, %v4783_v39  ;;  %v4763_v24 = vmul.f32 %v4762_v10, %v10676_v28  ;;  %v4903_v5 = vmul.f32 %v6442_v21, %v4902_v63 }
 0x7d7   :  { %v4775_v53 = vmul.f32 %v4774_v56, %v10674_v48  ;;  %v4923_v56 = vand.u32 2147483648, %v10696_v31 }
 0x7d8   :  { %v4785_v35 = vsub.f32 1.5, %v4784_v36  ;;  %v4702_v18 = vpop.xlane.xlu0 %4701  ;;  %v4765_v25 = vsel %vm4764_vm7, %v10676_v28, %v4763_v24  ;;  %v4904_v55 = vmul.f32 0.5, %v4903_v5 }
 0x7d9   :  { %v6444_v47 = vpop.eup %6443  ;;  %v4723_v46 = vadd.f32 1.0, %v4702_v18  ;;  %v4768_v1 = vsel %vm4766_vm9, %v4767_v27, %v4765_v25  ;;  %v4779_v27 = vand.u32 2147483648, %v10674_v48  ;;  %v4777_v10 = vsel %vm4776_vm13, %v10674_v48, %v4775_v53 }
 0x7da   :  { %v4926_v44 = vmul.f32 %v6444_v47, %v10692_v42  ;;  %v4786_v32 = vmul.f32 %v6440_v14, %v4785_v35  ;;  %v10721_v52 = vsel %vm1065_vm0, %v4768_v1, %v10520_v59  ;;  %v4905_v4 = vsub.f32 1.5, %v4904_v55  ;;  %v6446_v59 = vpop.eup %6445 }
 0x7db   :  { %v10729_v15 = vmax.f32 %v4723_v46, 1e-07  ;;  %v4986_v38 = vadd.f32 1.0, %v10721_v52  ;;  %4954 = vst [vmem:[#allocation7 + $0x8] sm:$0xff] %v10721_v52  ;;  %v4914_v3 = vmul.f32 %v6446_v59, %v10696_v31  ;;  %v4780_v36 = vsel %vm4778_vm3, %v4779_v27, %v4777_v10 }
 0x7dc   :  { %v4787_v28 = vmul.f32 %v4786_v32, %v10680_v40  ;;  %v4906_v19 = vmul.f32 %v6442_v21, %v4905_v4  ;;  %v4927_v45 = vmul.f32 %v6444_v47, %v4926_v44  ;;  %v10772_v24 = vsel %vm1065_vm0, %v4780_v36, %v10488_v22 }
 0x7dd   :  { %6447 = vrsqrt.f32 %v10729_v15  ;;  %5008 = vperm.xlu1 %5898, %v4986_v38   ;;  %v4990_v48 = vadd.f32 1.0, %v10727_v16  ;;  %v4915_v35 = vmul.f32 %v6446_v59, %v4914_v3  ;;  %4955 = vst [vmem:[#allocation7 + $0x10] sm:$0xff] %v10772_v24  ;;  %v4935_v22 = vand.u32 2147483648, %v10692_v42 }
 0x7de   :  { %v4789_v14 = vsel %vm4788_vm8, %v10680_v40, %v4787_v28  ;;  %v4907_v54 = vmul.f32 %v4906_v19, %v10684_v60  ;;  %v4928_v51 = vmul.f32 0.5, %v4927_v45  ;;  %vm4872_vm1 = vcmp.eq.f32.partialorder %v10729_v15, inf }
 0x7df   :  { %v4792_v13 = vsel %vm4790_vm11, %v4791_v50, %v4789_v14  ;;  %v4916_v61 = vmul.f32 0.5, %v4915_v35  ;;  %vm4874_vm7 = vcmp.eq.f32.partialorder %v10729_v15, 0.0 }
 0x7e0   :  { %v10752_v21 = vsel %vm1065_vm0, %v4792_v13, %v10545_v41  ;;  %v4696_v39 = vpop.xlane.xlu0 %4695  ;;  %v4909_v58 = vsel %vm4908_vm15, %v10684_v60, %v4907_v54  ;;  %v4929_v63 = vsub.f32 1.5, %v4928_v51  ;;  %v4875_v13 = vand.u32 2147483648, %v10729_v15 }
 0x7e1   :  { %v4988_v40 = vadd.f32 1.0, %v10752_v21  ;;  %4956 = vst [vmem:[#allocation7 + $0x18] sm:$0xff] %v10752_v21  ;;  %v4720_v17 = vadd.f32 1.0, %v4696_v39  ;;  %v4912_v41 = vsel %vm4910_vm12, %v4911_v12, %v4909_v58  ;;  %v4917_v1 = vsub.f32 1.5, %v4916_v61 }
 0x7e2   :  { %v10767_v0 = vsel %vm1065_vm0, %v4912_v41, %v10575_v33  ;;  %v4930_v30 = vmul.f32 %v6444_v47, %v4929_v63 }
 0x7e3   :  { %5018 = vperm.xlu0 %5900, %v4988_v40   ;;  %v6448_v5 = vpop.eup %6447  ;;  %v10774_v62 = vmax.f32 %v4720_v17, 1e-07  ;;  %v4998_v60 = vadd.f32 1.0, %v10767_v0  ;;  %4966 = vst [vmem:[#allocation7 + $0x68] sm:$0xff] %v10767_v0  ;;  %v4918_v38 = vmul.f32 %v6446_v59, %v4917_v1 }
 0x7e4   :  { %v4866_v6 = vmul.f32 %v6448_v5, %v10729_v15  ;;  %v4931_v33 = vmul.f32 %v4930_v30, %v10692_v42 }
 0x7e5   :  { %6449 = vrsqrt.f32 %v10774_v62  ;;  %5028 = vperm.xlu1 %5898, %v4990_v48   ;;  %5068 = vperm.xlu2 %5899, %v4998_v60   ;;  %vm4836_vm9 = vcmp.eq.f32.partialorder %v10774_v62, inf  ;;  %v4839_v41 = vand.u32 2147483648, %v10774_v62  ;;  %vm4838_vm8 = vcmp.eq.f32.partialorder %v10774_v62, 0.0 }
 0x7e6   :  { %v4704_v47 = vpop.xlane.xlu1 %4703  ;;  %v4933_v18 = vsel %vm4932_vm2, %v10692_v42, %v4931_v33  ;;  %v4867_v25 = vmul.f32 %v6448_v5, %v4866_v6  ;;  %v4987_v42 = vadd.f32 1.0, %v10772_v24 }
 0x7e7   :  { %v4724_v55 = vadd.f32 1.0, %v4704_v47  ;;  %v4936_v43 = vsel %vm4934_vm5, %v4935_v22, %v4933_v18 }
 0x7e8   :  { %v10790_v44 = vsel %vm1065_vm0, %v4936_v43, %v10584_v2  ;;  %v4868_v46 = vmul.f32 0.5, %v4867_v25  ;;  %v4919_v2 = vmul.f32 %v4918_v38, %v10696_v31 }
 0x7e9   :  { %v4740_v32 = vmax.f32 %v4724_v55, 1e-07  ;;  %v5000_v50 = vadd.f32 1.0, %v10790_v44  ;;  %4968 = vst [vmem:[#allocation7 + $0x78] sm:$0xff] %v10790_v44 }
 0x7ea   :  { %v4869_v4 = vsub.f32 1.5, %v4868_v46  ;;  %v4921_v59 = vsel %vm4920_vm6, %v10696_v31, %v4919_v2  ;;  %v4969_v2 = vmul.f32 %v11498_v49, %v10632_v34 }
 0x7eb   :  { %v6450_v28 = vpop.eup %6449  ;;  %6451 = vrsqrt.f32 %v4740_v32  ;;  %5078 = vperm.xlu0 %5900, %v5000_v50   ;;  %v4924_v54 = vsel %vm4922_vm4, %v4923_v56, %v4921_v59  ;;  %vm4884_vm10 = vcmp.eq.f32.partialorder %v4740_v32, inf  ;;  %v4887_v6 = vand.u32 2147483648, %v4740_v32 }
 0x7ec   :  { %v4830_v19 = vmul.f32 %v6450_v28, %v10774_v62  ;;  %v4870_v45 = vmul.f32 %v6448_v5, %v4869_v4  ;;  %v10809_v3 = vsel %vm1065_vm0, %v4924_v54, %v10586_v57  ;;  %vm4886_vm11 = vcmp.eq.f32.partialorder %v4740_v32, 0.0 }
 0x7ed   :  { %5013 = vperm.xlu2 %5899, %v4987_v42   ;;  %4967 = vst [vmem:[#allocation7 + $0x70] sm:$0xff] %v10809_v3  ;;  %v4999_v18 = vadd.f32 1.0, %v10809_v3 }
 0x7ee   :  { %v4871_v14 = vmul.f32 %v4870_v45, %v10729_v15  ;;  %v4831_v12 = vmul.f32 %v6450_v28, %v4830_v19 }
 0x7f0   :  { %v4873_v51 = vsel %vm4872_vm1, %v10729_v15, %v4871_v14  ;;  %v4832_v53 = vmul.f32 0.5, %v4831_v12 }
 0x7f1   :  { %v6452_v27 = vpop.eup %6451  ;;  %v4876_v39 = vsel %vm4874_vm7, %v4875_v13, %v4873_v51 }
 0x7f2   :  { %v4878_v31 = vmul.f32 %v6452_v27, %v4740_v32  ;;  %v10815_v40 = vsel %vm1065_vm0, %v4876_v39, %v10608_v26  ;;  %v4833_v58 = vsub.f32 1.5, %v4832_v53 }
 0x7f3   :  { %v4995_v63 = vadd.f32 1.0, %v10815_v40  ;;  %4963 = vst [vmem:[#allocation7 + $0x50] sm:$0xff] %v10815_v40 }
 0x7f4   :  { %v4834_v15 = vmul.f32 %v6450_v28, %v4833_v58  ;;  %v4879_v10 = vmul.f32 %v6452_v27, %v4878_v31 }
 0x7f5   :  { %5053 = vperm.xlu2 %5899, %v4995_v63  }
 0x7f6   :  { %v4835_v57 = vmul.f32 %v4834_v15, %v10774_v62  ;;  %v4880_v17 = vmul.f32 0.5, %v4879_v10  ;;  %v4981_v10 = vmul.f32 %v11498_v49, %v10639_v23 }
 0x7f8   :  { %v4837_v36 = vsel %vm4836_vm9, %v10774_v62, %v4835_v57  ;;  %v4881_v26 = vsub.f32 1.5, %v4880_v17 }
 0x7f9   :  { %v4840_v30 = vsel %vm4838_vm8, %v4839_v41, %v4837_v36 }
 0x7fa   :  { %v10827_v5 = vsel %vm1065_vm0, %v4840_v30, %v10620_v29  ;;  %v4882_v48 = vmul.f32 %v6452_v27, %v4881_v26 }
 0x7fb   :  { %v4992_v60 = vadd.f32 1.0, %v10827_v5  ;;  %4960 = vst [vmem:[#allocation7 + $0x38] sm:$0xff] %v10827_v5 }
 0x7fc   :  { %v4883_v35 = vmul.f32 %v4882_v48, %v4740_v32 }
 0x7fd   :  { %5038 = vperm.xlu2 %5899, %v4992_v60   ;;  %v4973_v60 = vmul.f32 %v11498_v49, %v10646_v20 }
 0x7fe   :  { %v4885_v33 = vsel %vm4884_vm10, %v4740_v32, %v4883_v35 }
 0x7ff   :  { %v4888_v22 = vsel %vm4886_vm11, %v4887_v6, %v4885_v33 }
 0x800   :  { %v10834_v62 = vsel %vm1065_vm0, %v4888_v22, %v10625_v37 }
 0x801   :  { %4964 = vst [vmem:[#allocation7 + $0x58] sm:$0xff] %v10834_v62  ;;  %v4996_v29 = vadd.f32 1.0, %v10834_v62 }
 0x802   :  { %5733 = dma.vmem_to_hbm [thread:$0]  %s5726_s30, 2048, %s5728_s28, [#allocation4], %s6622_s23, %s6622_s23, %s6623_s24  }
 0x803   :  { %5058 = vperm.xlu1 %5898, %v4996_v29  }
 0x80b   :  { %5073 = vperm.xlu1 %5898, %v4999_v18  }
 0x80d   :  { %v5004_v47 = vpop.permute.xlu0 %5003 }
 0x80e   :  { %6453 = vrcp.f32 %v5004_v47  ;;  %v5092_v37 = vand.u32 2147483648, %v5004_v47  ;;  %vm5086_vm15 = vweird.f32 %v5004_v47  ;;  %v5090_v50 = vand.u32 2147483647, %v5004_v47 }
 0x80f   :  { %v5024_v61 = vpop.permute.xlu2 %5023 }
 0x810   :  { %6455 = vrcp.f32 %v5024_v61  ;;  %v5093_v42 = vor.u32 1.1754944e-38, %v5092_v37  ;;  %vm5091_vm13 = vcmp.eq.f32.partialorder %v5090_v50, 8.507059e+37  ;;  %vm5146_vm5 = vweird.f32 %v5024_v61 }
 0x811   :  { %v5152_v31 = vand.u32 2147483648, %v5024_v61  ;;  %v5150_v58 = vand.u32 2147483647, %v5024_v61  ;;  %v4978_v37 = vmul.f32 %v11498_v49, %v10653_v9 }
 0x813   :  { %v5153_v41 = vor.u32 1.1754944e-38, %v5152_v31  ;;  %vm5151_vm9 = vcmp.eq.f32.partialorder %v5150_v58, 8.507059e+37  ;;  %v4975_v31 = vmul.f32 %v11498_v49, %v10662_v8 }
 0x814   :  { %v6454_v25 = vpop.eup %6453 }
 0x815   :  { %v5082_v55 = vmul.f32 %v6454_v25, %v5004_v47  ;;  %vm5087_vm14 = vweird.f32 %v6454_v25 }
 0x816   :  { %v6456_v1 = vpop.eup %6455  ;;  %vm5088_vm12 = vmor %vm5086_vm15, %vm5087_vm14 }
 0x817   :  { %v5083_v43 = vsub.f32 1.0, %v5082_v55  ;;  %v5142_v4 = vmul.f32 %v6456_v1, %v5024_v61  ;;  %vm5147_vm3 = vweird.f32 %v6456_v1 }
 0x818   :  { %vm10845_vm6 = vmor %vm5146_vm5, %vm5147_vm3 }
 0x819   :  { %v5084_v46 = vmul.f32 %v6454_v25, %v5083_v43  ;;  %v5143_v19 = vsub.f32 1.0, %v5142_v4 }
 0x81b   :  { %v5085_v32 = vadd.f32 %v6454_v25, %v5084_v46  ;;  %v5144_v12 = vmul.f32 %v6456_v1, %v5143_v19 }
 0x81d   :  { %v5064_v38 = vpop.permute.xlu0 %5063  ;;  %v5089_v28 = vsel %vm5088_vm12, %v6454_v25, %v5085_v32  ;;  %v5145_v53 = vadd.f32 %v6456_v1, %v5144_v12 }
 0x81e   :  { %6457 = vrcp.f32 %v5064_v38  ;;  %v5094_v45 = vsel %vm5091_vm13, %v5093_v42, %v5089_v28  ;;  %v5272_v54 = vand.u32 2147483648, %v5064_v38  ;;  %v5270_v39 = vand.u32 2147483647, %v5064_v38 }
 0x81f   :  { %v10841_v14 = vmul.f32 %v5094_v45, %v4969_v2  ;;  %vm5266_vm4 = vweird.f32 %v5064_v38  ;;  %v5149_v17 = vsel %vm10845_vm6, %v6456_v1, %v5145_v53 }
 0x820   :  { %v5273_v15 = vor.u32 1.1754944e-38, %v5272_v54  ;;  %vm5271_vm7 = vcmp.eq.f32.partialorder %v5270_v39, 8.507059e+37  ;;  %v5154_v48 = vsel %vm5151_vm9, %v5153_v41, %v5149_v17 }
 0x821   :  { %v5321_v51 = vmul.f32 %v10841_v14, %v10841_v14  ;;  %v10859_v6 = vmul.f32 %v5154_v48, %v4973_v60 }
 0x823   :  { %v5325_v33 = vmul.f32 %v10859_v6, %v10859_v6 }
 0x824   :  { %v6458_v56 = vpop.eup %6457 }
 0x825   :  { %v5262_v59 = vmul.f32 %v6458_v56, %v5064_v38  ;;  %vm5267_vm2 = vweird.f32 %v6458_v56 }
 0x826   :  { %5337 = vadd.xlane.f32.xlu2 %v5321_v51  ;;  %vm5268_vm1 = vmor %vm5266_vm4, %vm5267_vm2 }
 0x827   :  { %v5263_v13 = vsub.f32 1.0, %v5262_v59 }
 0x829   :  { %v5264_v27 = vmul.f32 %v6458_v56, %v5263_v13 }
 0x82b   :  { %v5265_v63 = vadd.f32 %v6458_v56, %v5264_v27 }
 0x82d   :  { %v5269_v57 = vsel %vm5268_vm1, %v6458_v56, %v5265_v63  ;;  %v5049_v30 = vpop.permute.xlu0 %5048  ;;  %v4977_v63 = vmul.f32 %v11498_v49, %v10670_v11 }
 0x82e   :  { %v5274_v36 = vsel %vm5271_vm7, %v5273_v15, %v5269_v57  ;;  %6459 = vrcp.f32 %v5049_v30  ;;  %v5227_v25 = vand.u32 2147483648, %v5049_v30  ;;  %v5225_v20 = vand.u32 2147483647, %v5049_v30 }
 0x82f   :  { %v10853_v26 = vmul.f32 %v5274_v36, %v4981_v10  ;;  %vm5221_vm10 = vweird.f32 %v5049_v30 }
 0x830   :  { %v5228_v46 = vor.u32 1.1754944e-38, %v5227_v25  ;;  %vm5226_vm14 = vcmp.eq.f32.partialorder %v5225_v20, 8.507059e+37 }
 0x831   :  { %v5333_v35 = vmul.f32 %v10853_v26, %v10853_v26 }
 0x833   :  { %5361 = vadd.xlane.f32.xlu2 %v5333_v35 }
 0x834   :  { %v6460_v23 = vpop.eup %6459 }
 0x835   :  { %v5217_v22 = vmul.f32 %v6460_v23, %v5049_v30  ;;  %v5034_v29 = vpop.permute.xlu0 %5033  ;;  %5345 = vadd.xlane.f32.xlu1 %v5325_v33  ;;  %vm5222_vm8 = vweird.f32 %v6460_v23 }
 0x836   :  { %6461 = vrcp.f32 %v5034_v29  ;;  %v5044_v47 = vpop.permute.xlu1 %5043  ;;  %vm5223_vm11 = vmor %vm5221_vm10, %vm5222_vm8  ;;  %v5182_v19 = vand.u32 2147483648, %v5034_v29  ;;  %v5180_v12 = vand.u32 2147483647, %v5034_v29  ;;  %vm5176_vm13 = vweird.f32 %v5034_v29 }
 0x837   :  { %v5218_v18 = vsub.f32 1.0, %v5217_v22  ;;  %6463 = vrcp.f32 %v5044_v47  ;;  %v5212_v59 = vand.u32 2147483648, %v5044_v47  ;;  %v5210_v54 = vand.u32 2147483647, %v5044_v47 }
 0x838   :  { %v5183_v53 = vor.u32 1.1754944e-38, %v5182_v19  ;;  %vm5206_vm2 = vweird.f32 %v5044_v47  ;;  %vm5181_vm5 = vcmp.eq.f32.partialorder %v5180_v12, 8.507059e+37 }
 0x839   :  { %v5219_v61 = vmul.f32 %v6460_v23, %v5218_v18  ;;  %v5213_v39 = vor.u32 1.1754944e-38, %v5212_v59  ;;  %vm5211_vm4 = vcmp.eq.f32.partialorder %v5210_v54, 8.507059e+37  ;;  %v10911_v18 = vmul.f32 %v11498_v49, %v10772_v24 }
 0x83a   :  { %v10930_v24 = vmul.f32 %v11498_v49, %v10815_v40 }
 0x83b   :  { %v5220_v55 = vadd.f32 %v6460_v23, %v5219_v61 }
 0x83c   :  { %v6462_v43 = vpop.eup %6461 }
 0x83d   :  { %v6464_v1 = vpop.eup %6463  ;;  %v5172_v32 = vmul.f32 %v6462_v43, %v5034_v29  ;;  %v5224_v50 = vsel %vm5223_vm11, %v6460_v23, %v5220_v55  ;;  %vm5177_vm15 = vweird.f32 %v6462_v43  ;;  %v10903_v29 = vmul.f32 %v11498_v49, %v10721_v52 }
 0x83e   :  { %v5202_v4 = vmul.f32 %v6464_v1, %v5044_v47  ;;  %v5229_v38 = vsel %vm5226_vm14, %v5228_v46, %v5224_v50  ;;  %vm5207_vm12 = vweird.f32 %v6464_v1  ;;  %vm5178_vm3 = vmor %vm5176_vm13, %vm5177_vm15  ;;  %v10907_v47 = vmul.f32 %v11498_v49, %v10727_v16 }
 0x83f   :  { %v5173_v28 = vsub.f32 1.0, %v5172_v32  ;;  %v10865_v42 = vmul.f32 %v5229_v38, %v4978_v37  ;;  %v10867_v2 = vpop.permute.xlu2 %5068  ;;  %vm5208_vm6 = vmor %vm5206_vm2, %vm5207_vm12  ;;  %v10926_v16 = vmul.f32 %v11498_v49, %v10752_v21 }
 0x840   :  { %v5203_v45 = vsub.f32 1.0, %v5202_v4 }
 0x841   :  { %v5174_v56 = vmul.f32 %v6462_v43, %v5173_v28  ;;  %v5330_v9 = vmul.f32 %v10865_v42, %v10865_v42 }
 0x842   :  { %v5204_v13 = vmul.f32 %v6464_v1, %v5203_v45 }
 0x843   :  { %v5175_v51 = vadd.f32 %v6462_v43, %v5174_v56  ;;  %5355 = vadd.xlane.f32.xlu2 %v5330_v9 }
 0x844   :  { %v5205_v27 = vadd.f32 %v6464_v1, %v5204_v13 }
 0x845   :  { %v5179_v34 = vsel %vm5178_vm3, %v6462_v43, %v5175_v51 }
 0x846   :  { %v5184_v58 = vsel %vm5181_vm5, %v5183_v53, %v5179_v34  ;;  %v5209_v15 = vsel %vm5208_vm6, %v6464_v1, %v5205_v27 }
 0x847   :  { %v10875_v10 = vmul.f32 %v5184_v58, %v4975_v31  ;;  %v5214_v57 = vsel %vm5211_vm4, %v5213_v39, %v5209_v15  ;;  %v10877_v17 = vpop.permute.xlu2 %5013 }
 0x848   :  { %v10879_v41 = vmul.f32 %v5214_v57, %v4977_v63  ;;  %6465 = vrcp.f32 %v10877_v17  ;;  %v5120_v43 = vand.u32 2147483647, %v10877_v17  ;;  %v5122_v32 = vand.u32 2147483648, %v10877_v17 }
 0x849   :  { %v5327_v36 = vmul.f32 %v10875_v10, %v10875_v10  ;;  %6467 = vrcp.f32 %v10867_v2  ;;  %vm5116_vm11 = vweird.f32 %v10877_v17 }
 0x84a   :  { %v5329_v8 = vmul.f32 %v10879_v41, %v10879_v41 }
 0x84b   :  { %5349 = vadd.xlane.f32.xlu2 %v5327_v36 }
 0x84c   :  { %5353 = vadd.xlane.f32.xlu0 %v5329_v8 }
 0x84e   :  { %v10887_v11 = vpop.eup %6465 }
 0x84f   :  { %v5009_v30 = vpop.permute.xlu1 %5008  ;;  %v10889_v48 = vpop.permute.xlu2 %5053  ;;  %v5112_v60 = vmul.f32 %v10887_v11, %v10877_v17  ;;  %vm5117_vm9 = vweird.f32 %v10887_v11 }
 0x850   :  { %6469 = vrcp.f32 %v5009_v30  ;;  %v10894_v35 = vpop.eup %6467  ;;  %v5105_v46 = vand.u32 2147483647, %v5009_v30  ;;  %v5107_v50 = vand.u32 2147483648, %v5009_v30  ;;  %v5242_v4 = vand.u32 2147483648, %v10889_v48 }
 0x851   :  { %6471 = vrcp.f32 %v10889_v48  ;;  %v5113_v22 = vsub.f32 1.0, %v5112_v60  ;;  %v10917_v61 = vmul.f32 %v10894_v35, %v10867_v2  ;;  %v5240_v40 = vand.u32 2147483647, %v10889_v48 }
 0x852   :  { %vm5101_vm1 = vweird.f32 %v5009_v30  ;;  %vm5236_vm7 = vweird.f32 %v10889_v48  ;;  %vm10946_vm10 = vcmp.eq.f32.partialorder %v5105_v46, 8.507059e+37  ;;  %v5108_v54 = vor.u32 1.1754944e-38, %v5107_v50 }
 0x853   :  { %v5114_v21 = vmul.f32 %v10887_v11, %v5113_v22  ;;  %v5278_v19 = vsub.f32 1.0, %v10917_v61  ;;  %v5243_v9 = vor.u32 1.1754944e-38, %v5242_v4  ;;  %vm10960_vm14 = vcmp.eq.f32.partialorder %v5240_v40, 8.507059e+37 }
 0x855   :  { %v10896_v23 = vpop.permute.xlu0 %5018  ;;  %v10957_v39 = vadd.f32 %v10887_v11, %v5114_v21 }
 0x856   :  { %6473 = vrcp.f32 %v10896_v23  ;;  %v10899_v33 = vpop.eup %6469  ;;  %v5135_v51 = vand.u32 2147483647, %v10896_v23  ;;  %v5137_v58 = vand.u32 2147483648, %v10896_v23  ;;  %vm5131_vm3 = vweird.f32 %v10896_v23 }
 0x857   :  { %v10913_v25 = vpop.eup %6471  ;;  %v5097_v20 = vmul.f32 %v10899_v33, %v5009_v30  ;;  %v10920_v55 = vpop.permute.xlu1 %5028  ;;  %vm5102_vm8 = vweird.f32 %v10899_v33 }
 0x858   :  { %v10922_v52 = vpop.permute.xlu2 %5038  ;;  %v5232_v1 = vmul.f32 %v10913_v25, %v10889_v48  ;;  %6475 = vrcp.f32 %v10920_v55  ;;  %vm10969_vm15 = vmor %vm5101_vm1, %vm5102_vm8  ;;  %vm5237_vm12 = vweird.f32 %v10913_v25  ;;  %v5165_v57 = vand.u32 2147483647, %v10920_v55 }
 0x859   :  { %v5098_v37 = vsub.f32 1.0, %v5097_v20  ;;  %6477 = vrcp.f32 %v10922_v52  ;;  %v5167_v36 = vand.u32 2147483648, %v10920_v55  ;;  %vm10984_vm2 = vcmp.eq.f32.partialorder %v5135_v51, 8.507059e+37  ;;  %vm10992_vm5 = vmor %vm5236_vm7, %vm5237_vm12 }
 0x85a   :  { %v5233_v38 = vsub.f32 1.0, %v5232_v1  ;;  %v5138_v4 = vor.u32 1.1754944e-38, %v5137_v58  ;;  %vm5161_vm6 = vweird.f32 %v10920_v55  ;;  %vm11006_vm7 = vcmp.eq.f32.partialorder %v5165_v57, 8.507059e+37 }
 0x85b   :  { %v5099_v45 = vmul.f32 %v10899_v33, %v5098_v37  ;;  %v5197_v51 = vand.u32 2147483648, %v10922_v52  ;;  %v5195_v31 = vand.u32 2147483647, %v10922_v52 }
 0x85c   :  { %v6474_v28 = vpop.eup %6473  ;;  %v5234_v12 = vmul.f32 %v10913_v25, %v5233_v38 }
 0x85d   :  { %v5127_v59 = vmul.f32 %v6474_v28, %v10896_v23  ;;  %v5100_v13 = vadd.f32 %v10899_v33, %v5099_v45  ;;  %v10954_v53 = vpop.permute.xlu0 %5078  ;;  %vm5132_vm13 = vweird.f32 %v6474_v28 }
 0x85e   :  { %v6476_v27 = vpop.eup %6475  ;;  %6479 = vrcp.f32 %v10954_v53  ;;  %v5235_v60 = vadd.f32 %v10913_v25, %v5234_v12  ;;  %vm10999_vm4 = vmor %vm5131_vm3, %vm5132_vm13  ;;  %v5168_v12 = vor.u32 1.1754944e-38, %v5167_v36  ;;  %v5317_v58 = vand.u32 2147483648, %v10954_v53 }
 0x85f   :  { %v5128_v34 = vsub.f32 1.0, %v5127_v59  ;;  %v5157_v15 = vmul.f32 %v6476_v27, %v10920_v55  ;;  %v10977_v8 = vpop.eup %6477  ;;  %v5104_v30 = vsel %vm10969_vm15, %v10899_v33, %v5100_v13  ;;  %vm5162_vm1 = vweird.f32 %v6476_v27 }
 0x860   :  { %v5187_v1 = vmul.f32 %v10977_v8, %v10922_v52  ;;  %v5109_v23 = vsel %vm10946_vm10, %v5108_v54, %v5104_v30  ;;  %v5239_v59 = vsel %vm10992_vm5, %v10913_v25, %v5235_v60  ;;  %vm5163_vm8 = vmor %vm5161_vm6, %vm5162_vm1  ;;  %vm5192_vm15 = vweird.f32 %v10977_v8 }
 0x861   :  { %v5129_v22 = vmul.f32 %v6474_v28, %v5128_v34  ;;  %v5158_v46 = vsub.f32 1.0, %v5157_v15  ;;  %v11004_v48 = vmul.f32 %v5109_v23, %v10903_v29  ;;  %v5315_v34 = vand.u32 2147483647, %v10954_v53  ;;  %vm11030_vm10 = vmor %vm5116_vm11, %vm5117_vm9 }
 0x862   :  { %v5188_v38 = vsub.f32 1.0, %v5187_v1  ;;  %v5244_v36 = vsel %vm10960_vm14, %v5243_v9, %v5239_v59  ;;  %v5119_v30 = vsel %vm11030_vm10, %v10887_v11, %v10957_v39  ;;  %vm5191_vm11 = vweird.f32 %v10922_v52 }
 0x863   :  { %v5130_v50 = vadd.f32 %v6474_v28, %v5129_v22  ;;  %v5159_v21 = vmul.f32 %v6476_v27, %v5158_v46  ;;  %v11057_v46 = vmul.f32 %v5244_v36, %v10930_v24  ;;  %vm5121_vm14 = vcmp.eq.f32.partialorder %v5120_v43, 8.507059e+37  ;;  %vm11061_vm12 = vmor %vm5191_vm11, %vm5192_vm15 }
 0x864   :  { %v6480_v40 = vpop.eup %6479  ;;  %v5189_v54 = vmul.f32 %v10977_v8, %v5188_v38  ;;  %vm5311_vm13 = vweird.f32 %v10954_v53  ;;  %v5279_v52 = vmul.f32 %v10894_v35, %v5278_v19  ;;  %v5318_v24 = vor.u32 1.1754944e-38, %v5317_v58 }
 0x865   :  { %v5134_v56 = vsel %vm10999_vm4, %v6474_v28, %v5130_v50  ;;  %v5160_v13 = vadd.f32 %v6476_v27, %v5159_v21  ;;  %v5307_v29 = vmul.f32 %v6480_v40, %v10954_v53  ;;  %v5322_v28 = vmul.f32 %v11004_v48, %v11004_v48 }
 0x866   :  { %v5139_v25 = vsel %vm10984_vm2, %v5138_v4, %v5134_v56  ;;  %v5190_v60 = vadd.f32 %v10977_v8, %v5189_v54  ;;  %vm5312_vm9 = vweird.f32 %v6480_v40  ;;  %v5198_v43 = vor.u32 1.1754944e-38, %v5197_v51 }
 0x867   :  { %v5308_v55 = vsub.f32 1.0, %v5307_v29  ;;  %v11035_v15 = vmul.f32 %v5139_v25, %v10926_v16  ;;  %v5164_v57 = vsel %vm5163_vm8, %v6476_v27, %v5160_v13  ;;  %5339 = vadd.xlane.f32.xlu1 %v5322_v28  ;;  %v5123_v27 = vor.u32 1.1754944e-38, %v5122_v32  ;;  %vm5313_vm3 = vmor %vm5311_vm13, %vm5312_vm9 }
 0x868   :  { %v5169_v22 = vsel %vm11006_vm7, %v5168_v12, %v5164_v57  ;;  %v5194_v17 = vsel %vm11061_vm12, %v10977_v8, %v5190_v60  ;;  %vm5316_vm2 = vcmp.eq.f32.partialorder %v5315_v34, 8.507059e+37  ;;  %v4984_v53 = vmul.f32 %v11498_v49, %v10790_v44 }
 0x869   :  { %v5309_v20 = vmul.f32 %v6480_v40, %v5308_v55  ;;  %v5324_v16 = vmul.f32 %v11035_v15, %v11035_v15  ;;  %v11050_v9 = vmul.f32 %v5169_v22, %v10907_v47  ;;  %v5124_v32 = vsel %vm5121_vm14, %v5123_v27, %v5119_v30 }
 0x86a   :  { %vm5196_vm5 = vcmp.eq.f32.partialorder %v5195_v31, 8.507059e+37  ;;  %v5331_v61 = vmul.f32 %v11057_v46, %v11057_v46  ;;  %v11081_v50 = vmul.f32 %v5124_v32, %v10911_v18  ;;  %v5280_v8 = vadd.f32 %v10894_v35, %v5279_v52 }
 0x86b   :  { %v5310_v39 = vadd.f32 %v6480_v40, %v5309_v20  ;;  %5343 = vadd.xlane.f32.xlu2 %v5324_v16  ;;  %v5326_v47 = vmul.f32 %v11050_v9, %v11050_v9  ;;  %v5199_v4 = vsel %vm5196_vm5, %v5198_v43, %v5194_v17  ;;  %vm5282_vm6 = vweird.f32 %v10894_v35 }
 0x86c   :  { %v4976_v44 = vmul.f32 %v11498_v49, %v10827_v5  ;;  %v5287_v23 = vand.u32 2147483648, %v10867_v2  ;;  %vm5281_vm4 = vweird.f32 %v10867_v2  ;;  %v5285_v21 = vand.u32 2147483647, %v10867_v2 }
 0x86d   :  { %5347 = vadd.xlane.f32.xlu0 %v5326_v47  ;;  %v5314_v1 = vsel %vm5313_vm3, %v6480_v40, %v5310_v39  ;;  %vm5283_vm1 = vmor %vm5281_vm4, %vm5282_vm6  ;;  %v5323_v38 = vmul.f32 %v11081_v50, %v11081_v50  ;;  %v4982_v2 = vmul.f32 %v11498_v49, %v10767_v0  ;;  %v4980_v57 = vmul.f32 %v11498_v49, %v10834_v62 }
 0x86e   :  { %v5319_v37 = vsel %vm5316_vm2, %v5318_v24, %v5314_v1  ;;  %v11092_v18 = vmul.f32 %v5199_v4, %v4976_v44  ;;  %v5284_v40 = vsel %vm5283_vm1, %v10894_v35, %v5280_v8  ;;  %v5288_v45 = vor.u32 1.1754944e-38, %v5287_v23 }
 0x86f   :  { %v11078_v19 = vmul.f32 %v5319_v37, %v4984_v53  ;;  %5357 = vadd.xlane.f32.xlu1 %v5331_v61  ;;  %vm5286_vm7 = vcmp.eq.f32.partialorder %v5285_v21, 8.507059e+37  ;;  %v4983_v62 = vmul.f32 %v11498_v49, %v10809_v3 }
 0x870   :  { %v5328_v12 = vmul.f32 %v11092_v18, %v11092_v18  ;;  %v5289_v56 = vsel %vm5286_vm7, %v5288_v45, %v5284_v40 }
 0x871   :  { %v5336_v33 = vmul.f32 %v11078_v19, %v11078_v19  ;;  %v11101_v59 = vmul.f32 %v5289_v56, %v4982_v2 }
 0x873   :  { %5367 = vadd.xlane.f32.xlu2 %v5336_v33  ;;  %v5334_v35 = vmul.f32 %v11101_v59, %v11101_v59 }
 0x875   :  { %v5059_v5 = vpop.permute.xlu1 %5058  ;;  %5341 = vadd.xlane.f32.xlu0 %v5323_v38 }
 0x876   :  { %6481 = vrcp.f32 %v5059_v5  ;;  %v5257_v34 = vand.u32 2147483648, %v5059_v5  ;;  %v5255_v28 = vand.u32 2147483647, %v5059_v5  ;;  %vm5251_vm10 = vweird.f32 %v5059_v5 }
 0x877   :  { %5351 = vadd.xlane.f32.xlu1 %v5328_v12 }
 0x878   :  { %v5258_v0 = vor.u32 1.1754944e-38, %v5257_v34  ;;  %vm5256_vm9 = vcmp.eq.f32.partialorder %v5255_v28, 8.507059e+37 }
 0x87c   :  { %v6482_v13 = vpop.eup %6481 }
 0x87d   :  { %v5247_v54 = vmul.f32 %v6482_v13, %v5059_v5  ;;  %v5074_v51 = vpop.permute.xlu1 %5073  ;;  %vm5252_vm8 = vweird.f32 %v6482_v13 }
 0x87e   :  { %6483 = vrcp.f32 %v5074_v51  ;;  %vm5253_vm15 = vmor %vm5251_vm10, %vm5252_vm8  ;;  %v5302_v20 = vand.u32 2147483648, %v5074_v51  ;;  %v5300_v27 = vand.u32 2147483647, %v5074_v51  ;;  %vm5296_vm14 = vweird.f32 %v5074_v51 }
 0x87f   :  { %v5248_v29 = vsub.f32 1.0, %v5247_v54  ;;  %5363 = vadd.xlane.f32.xlu1 %v5334_v35 }
 0x880   :  { %v5303_v39 = vor.u32 1.1754944e-38, %v5302_v20  ;;  %vm5301_vm13 = vcmp.eq.f32.partialorder %v5300_v27, 8.507059e+37 }
 0x881   :  { %v5249_v58 = vmul.f32 %v6482_v13, %v5248_v29 }
 0x883   :  { %v5250_v25 = vadd.f32 %v6482_v13, %v5249_v58 }
 0x884   :  { %v6484_v63 = vpop.eup %6483 }
 0x885   :  { %v5292_v55 = vmul.f32 %v6484_v63, %v5074_v51  ;;  %v5254_v36 = vsel %vm5253_vm15, %v6482_v13, %v5250_v25  ;;  %vm5297_vm11 = vweird.f32 %v6484_v63 }
 0x886   :  { %v5259_v60 = vsel %vm5256_vm9, %v5258_v0, %v5254_v36  ;;  %vm5298_vm12 = vmor %vm5296_vm14, %vm5297_vm11 }
 0x887   :  { %v5293_v22 = vsub.f32 1.0, %v5292_v55  ;;  %v11107_v30 = vmul.f32 %v5259_v60, %v4980_v57 }
 0x889   :  { %v5294_v16 = vmul.f32 %v6484_v63, %v5293_v22  ;;  %v5332_v31 = vmul.f32 %v11107_v30, %v11107_v30 }
 0x88b   :  { %v5295_v11 = vadd.f32 %v6484_v63, %v5294_v16  ;;  %5359 = vadd.xlane.f32.xlu0 %v5332_v31 }
 0x88d   :  { %v5299_v47 = vsel %vm5298_vm12, %v6484_v63, %v5295_v11 }
 0x88e   :  { %v5304_v52 = vsel %vm5301_vm13, %v5303_v39, %v5299_v47 }
 0x88f   :  { %v11113_v24 = vmul.f32 %v5304_v52, %v4983_v62 }
 0x891   :  { %v5335_v32 = vmul.f32 %v11113_v24, %v11113_v24 }
 0x893   :  { %5365 = vadd.xlane.f32.xlu0 %v5335_v32 }
 0x899   :  { %v5338_v17 = vpop.xlane.xlu2 %5337 }
 0x89a   :  { %v5369_v1 = vsub.f32 1.0, %v5338_v17 }
 0x89c   :  { %v11123_v37 = vmax.f32 %v5369_v1, 1e-15 }
 0x89e   :  { %vm5406_vm15 = vweird.f32 %v11123_v37 }
 0x8a6   :  { %v5362_v49 = vpop.xlane.xlu2 %5361 }
 0x8a7   :  { %v5381_v12 = vsub.f32 1.0, %v5362_v49 }
 0x8a8   :  { %v5346_v23 = vpop.xlane.xlu1 %5345 }
 0x8a9   :  { %v5373_v40 = vsub.f32 1.0, %v5346_v23  ;;  %v11134_v25 = vmax.f32 %v5381_v12, 1e-15  ;;  %v5410_v23 = vand.u32 2147483647, %v11123_v37 }
 0x8ab   :  { %v11128_v54 = vmax.f32 %v5373_v40, 1e-15  ;;  %vm5411_vm11 = vcmp.eq.f32.partialorder %v5410_v23, 8.507059e+37  ;;  %vm5586_vm14 = vweird.f32 %v11134_v25 }
 0x8b6   :  { %v5356_v3 = vpop.xlane.xlu2 %5355 }
 0x8b7   :  { %v5378_v43 = vsub.f32 1.0, %v5356_v3 }
 0x8b9   :  { %v5394_v53 = vmax.f32 %v5378_v43, 1e-15 }
 0x8bb   :  { %6485 = vrcp.f32 %v5394_v53  ;;  %v5547_v2 = vand.u32 2147483648, %v5394_v53  ;;  %vm5541_vm2 = vweird.f32 %v5394_v53  ;;  %v5545_v51 = vand.u32 2147483647, %v5394_v53 }
 0x8bc   :  { %6487 = vrcp.f32 %v11123_v37 }
 0x8bd   :  { %v5548_v63 = vor.u32 1.1754944e-38, %v5547_v2  ;;  %vm5546_vm6 = vcmp.eq.f32.partialorder %v5545_v51, 8.507059e+37 }
 0x8be   :  { %v5350_v21 = vpop.xlane.xlu2 %5349 }
 0x8bf   :  { %v5354_v61 = vpop.xlane.xlu0 %5353  ;;  %v5375_v5 = vsub.f32 1.0, %v5350_v21 }
 0x8c0   :  { %v5377_v4 = vsub.f32 1.0, %v5354_v61 }
 0x8c1   :  { %v6486_v8 = vpop.eup %6485  ;;  %v11130_v29 = vmax.f32 %v5375_v5, 1e-15 }
 0x8c2   :  { %v5393_v44 = vmax.f32 %v5377_v4, 1e-15  ;;  %v5537_v33 = vmul.f32 %v6486_v8, %v5394_v53  ;;  %vm5542_vm3 = vweird.f32 %v6486_v8  ;;  %v11126_v13 = vpop.eup %6487  ;;  %v5412_v4 = vand.u32 2147483648, %v11123_v37 }
 0x8c3   :  { %vm5543_vm5 = vmor %vm5541_vm2, %vm5542_vm3  ;;  %v5402_v28 = vmul.f32 %v11126_v13, %v11123_v37  ;;  %vm5407_vm10 = vweird.f32 %v11126_v13  ;;  %vm5466_vm3 = vweird.f32 %v11128_v54 }
 0x8c4   :  { %v5538_v38 = vsub.f32 1.0, %v5537_v33  ;;  %6489 = vrcp.f32 %v5393_v44  ;;  %v5532_v57 = vand.u32 2147483648, %v5393_v44  ;;  %v5530_v60 = vand.u32 2147483647, %v5393_v44  ;;  %vm5408_vm9 = vmor %vm5406_vm15, %vm5407_vm10 }
 0x8c5   :  { %6491 = vrcp.f32 %v11128_v54  ;;  %v5403_v22 = vsub.f32 1.0, %v5402_v28  ;;  %vm5526_vm1 = vweird.f32 %v5393_v44  ;;  %v5413_v5 = vor.u32 1.1754944e-38, %v5412_v4 }
 0x8c6   :  { %v5539_v45 = vmul.f32 %v6486_v8, %v5538_v38  ;;  %6493 = vrcp.f32 %v11130_v29  ;;  %v5533_v27 = vor.u32 1.1754944e-38, %v5532_v57  ;;  %vm5531_vm8 = vcmp.eq.f32.partialorder %v5530_v60, 8.507059e+37 }
 0x8c7   :  { %6495 = vrcp.f32 %v11134_v25  ;;  %v5404_v62 = vmul.f32 %v11126_v13, %v5403_v22  ;;  %v5590_v28 = vand.u32 2147483647, %v11134_v25  ;;  %v5592_v57 = vand.u32 2147483648, %v11134_v25 }
 0x8c8   :  { %v5540_v56 = vadd.f32 %v6486_v8, %v5539_v45  ;;  %v5472_v60 = vand.u32 2147483648, %v11128_v54 }
 0x8c9   :  { %v5405_v61 = vadd.f32 %v11126_v13, %v5404_v62  ;;  %v5593_v4 = vor.u32 1.1754944e-38, %v5592_v57 }
 0x8ca   :  { %v6490_v35 = vpop.eup %6489  ;;  %v5544_v34 = vsel %vm5543_vm5, %v6486_v8, %v5540_v56 }
 0x8cb   :  { %v5522_v58 = vmul.f32 %v6490_v35, %v5393_v44  ;;  %v5549_v55 = vsel %vm5546_vm6, %v5548_v63, %v5544_v34  ;;  %vm5527_vm4 = vweird.f32 %v6490_v35  ;;  %v11139_v31 = vpop.eup %6491  ;;  %v5409_v40 = vsel %vm5408_vm9, %v11126_v13, %v5405_v61 }
 0x8cc   :  { %v5550_v20 = vmul.f32 2.0, %v5549_v55  ;;  %vm5528_vm7 = vmor %vm5526_vm1, %vm5527_vm4  ;;  %v11141_v39 = vpop.eup %6493  ;;  %v5462_v3 = vmul.f32 %v11139_v31, %v11128_v54  ;;  %vm5467_vm12 = vweird.f32 %v11139_v31  ;;  %vm5496_vm6 = vweird.f32 %v11130_v29 }
 0x8cd   :  { %v5523_v0 = vsub.f32 1.0, %v5522_v58  ;;  %v11145_v49 = vpop.eup %6495  ;;  %v5492_v43 = vmul.f32 %v11141_v39, %v11130_v29  ;;  %vm5497_vm13 = vweird.f32 %v11141_v39  ;;  %vm11188_vm5 = vmor %vm5466_vm3, %vm5467_vm12 }
 0x8ce   :  { %v5786_v52 = vadd.f32 -1.0, %v5550_v20  ;;  %v5666_v32 = vmul.f32 %v5550_v20, %v10865_v42  ;;  %v5582_v42 = vmul.f32 %v11145_v49, %v11134_v25  ;;  %vm5587_vm2 = vweird.f32 %v11145_v49  ;;  %vm11200_vm4 = vmor %vm5496_vm6, %vm5497_vm13 }
 0x8cf   :  { %v5524_v36 = vmul.f32 %v6490_v35, %v5523_v0  ;;  %v5493_v21 = vsub.f32 1.0, %v5492_v43  ;;  %vm11211_vm1 = vmor %vm5586_vm14, %vm5587_vm2 }
 0x8d0   :  { %v5682_v8 = vsel %vm1065_vm0, %v5786_v52, %v5666_v32  ;;  %v5583_v12 = vsub.f32 1.0, %v5582_v42  ;;  %v5500_v52 = vand.u32 2147483647, %v11130_v29 }
 0x8d1   :  { %v5525_v16 = vadd.f32 %v6490_v35, %v5524_v36  ;;  %v5494_v37 = vmul.f32 %v11141_v39, %v5493_v21 }
 0x8d2   :  { %v5584_v13 = vmul.f32 %v11145_v49, %v5583_v12  ;;  %vm5501_vm10 = vcmp.eq.f32.partialorder %v5500_v52, 8.507059e+37 }
 0x8d3   :  { %v5529_v11 = vsel %vm5528_vm7, %v6490_v35, %v5525_v16  ;;  %v5414_v35 = vsel %vm5411_vm11, %v5413_v5, %v5409_v40  ;;  %v5495_v22 = vadd.f32 %v11141_v39, %v5494_v37  ;;  %v5470_v16 = vand.u32 2147483647, %v11128_v54 }
 0x8d4   :  { %v5534_v47 = vsel %vm5531_vm8, %v5533_v27, %v5529_v11  ;;  %v5415_v55 = vmul.f32 2.0, %v5414_v35  ;;  %v5502_v27 = vand.u32 2147483648, %v11130_v29  ;;  %v5585_v62 = vadd.f32 %v11145_v49, %v5584_v13 }
 0x8d5   :  { %v5535_v17 = vmul.f32 2.0, %v5534_v47  ;;  %v5499_v29 = vsel %vm11200_vm4, %v11141_v39, %v5495_v22  ;;  %vm11215_vm7 = vcmp.eq.f32.partialorder %v5590_v28, 8.507059e+37  ;;  %vm5471_vm8 = vcmp.eq.f32.partialorder %v5470_v16, 8.507059e+37 }
 0x8d6   :  { %v5657_v54 = vmul.f32 %v5415_v55, %v10841_v14  ;;  %v5503_v42 = vor.u32 1.1754944e-38, %v5502_v27  ;;  %v5589_v39 = vsel %vm11211_vm1, %v11145_v49, %v5585_v62 }
 0x8d7   :  { %v5785_v53 = vadd.f32 -1.0, %v5535_v17  ;;  %v5665_v1 = vmul.f32 %v5535_v17, %v10879_v41  ;;  %v5463_v41 = vsub.f32 1.0, %v5462_v3  ;;  %v5777_v17 = vadd.f32 -1.0, %v5415_v55 }
 0x8d9   :  { %v5681_v44 = vsel %vm1065_vm0, %v5785_v53, %v5665_v1  ;;  %v5464_v56 = vmul.f32 %v11139_v31, %v5463_v41  ;;  %v5473_v53 = vor.u32 1.1754944e-38, %v5472_v60  ;;  %v11226_v41 = vsel %vm1065_vm0, %v5777_v17, %v5657_v54 }
 0x8da   :  { %v5816_v33 = vpack.c.bf16 %v5682_v8, %v5681_v44  ;;  %v5340_v38 = vpop.xlane.xlu1 %5339 }
 0x8db   :  { %v5370_v45 = vsub.f32 1.0, %v5340_v38  ;;  %v5465_v36 = vadd.f32 %v11139_v31, %v5464_v56 }
 0x8dc   :  { %5836 = vst [vmem:[#allocation8 + $0x20] sm:$0xff] %v5816_v33   ;;  %v5504_v33 = vsel %vm5501_vm10, %v5503_v42, %v5499_v29 }
 0x8dd   :  { %v11165_v2 = vmax.f32 %v5370_v45, 1e-15  ;;  %v5469_v3 = vsel %vm11188_vm5, %v11139_v31, %v5465_v36 }
 0x8de   :  { %v5344_v51 = vpop.xlane.xlu2 %5343  ;;  %v5474_v44 = vsel %vm5471_vm8, %v5473_v53, %v5469_v3 }
 0x8df   :  { %v5372_v34 = vsub.f32 1.0, %v5344_v51  ;;  %6497 = vrcp.f32 %v11165_v2  ;;  %v5427_v21 = vand.u32 2147483648, %v11165_v2  ;;  %v5425_v5 = vand.u32 2147483647, %v11165_v2 }
 0x8e0   :  { %v5348_v58 = vpop.xlane.xlu0 %5347  ;;  %v5594_v51 = vsel %vm11215_vm7, %v5593_v4, %v5589_v39  ;;  %v5475_v35 = vmul.f32 2.0, %v5474_v44  ;;  %vm5421_vm9 = vweird.f32 %v11165_v2 }
 0x8e1   :  { %v11172_v63 = vmax.f32 %v5372_v34, 1e-15  ;;  %v5374_v0 = vsub.f32 1.0, %v5348_v58  ;;  %v5428_v55 = vor.u32 1.1754944e-38, %v5427_v21  ;;  %vm5426_vm14 = vcmp.eq.f32.partialorder %v5425_v5, 8.507059e+37 }
 0x8e2   :  { %v5358_v20 = vpop.xlane.xlu1 %5357  ;;  %v11248_v17 = vmul.f32 2.0, %v5594_v51  ;;  %v5661_v3 = vmul.f32 %v5475_v35, %v10859_v6 }
 0x8e3   :  { %6499 = vrcp.f32 %v11172_v63  ;;  %v11184_v11 = vmax.f32 %v5374_v0, 1e-15  ;;  %v5379_v14 = vsub.f32 1.0, %v5358_v20  ;;  %v5505_v0 = vmul.f32 2.0, %v5504_v33 }
 0x8e4   :  { %v5455_v42 = vand.u32 2147483647, %v11172_v63  ;;  %v5457_v39 = vand.u32 2147483648, %v11172_v63  ;;  %vm5451_vm6 = vweird.f32 %v11172_v63 }
 0x8e5   :  { %v6498_v32 = vpop.eup %6497  ;;  %6501 = vrcp.f32 %v11184_v11  ;;  %v11232_v49 = vmax.f32 %v5379_v14, 1e-15  ;;  %v5485_v16 = vand.u32 2147483647, %v11184_v11  ;;  %v5487_v47 = vand.u32 2147483648, %v11184_v11 }
 0x8e6   :  { %v5417_v1 = vmul.f32 %v6498_v32, %v11165_v2  ;;  %v5368_v23 = vpop.xlane.xlu2 %5367  ;;  %vm5422_vm15 = vweird.f32 %v6498_v32  ;;  %v5783_v43 = vadd.f32 -1.0, %v5505_v0  ;;  %vm5481_vm13 = vweird.f32 %v11184_v11 }
 0x8e7   :  { %v5384_v37 = vsub.f32 1.0, %v5368_v23  ;;  %vm5423_vm11 = vmor %vm5421_vm9, %vm5422_vm15  ;;  %6503 = vrcp.f32 %v11232_v49  ;;  %vm5486_vm2 = vcmp.eq.f32.partialorder %v5485_v16, 8.507059e+37  ;;  %v5488_v4 = vor.u32 1.1754944e-38, %v5487_v47 }
 0x8e8   :  { %v5418_v25 = vsub.f32 1.0, %v5417_v1  ;;  %v5342_v40 = vpop.xlane.xlu0 %5341  ;;  %v5663_v1 = vmul.f32 %v5505_v0, %v10875_v10  ;;  %v11268_v23 = vadd.f32 -1.0, %v11248_v17  ;;  %vm5456_vm1 = vcmp.eq.f32.partialorder %v5455_v42, 8.507059e+37 }
 0x8e9   :  { %v11219_v8 = vpop.eup %6499  ;;  %v5371_v28 = vsub.f32 1.0, %v5342_v40  ;;  %v11242_v27 = vmax.f32 %v5384_v37, 1e-15 }
 0x8ea   :  { %v5447_v38 = vmul.f32 %v11219_v8, %v11172_v63  ;;  %v5419_v45 = vmul.f32 %v6498_v32, %v5418_v25  ;;  %v5352_v12 = vpop.xlane.xlu1 %5351  ;;  %vm5452_vm5 = vweird.f32 %v11219_v8 }
 0x8eb   :  { %v6502_v56 = vpop.eup %6501  ;;  %v5376_v34 = vsub.f32 1.0, %v5352_v12  ;;  %v11246_v52 = vmax.f32 %v5371_v28, 1e-15  ;;  %vm11279_vm4 = vmor %vm5451_vm6, %vm5452_vm5 }
 0x8ec   :  { %v5420_v58 = vadd.f32 %v6498_v32, %v5419_v45  ;;  %v5477_v13 = vmul.f32 %v6502_v56, %v11184_v11  ;;  %v5448_v57 = vsub.f32 1.0, %v5447_v38  ;;  %vm5482_vm12 = vweird.f32 %v6502_v56 }
 0x8ed   :  { %v11238_v36 = vmax.f32 %v5376_v34, 1e-15  ;;  %v11256_v31 = vpop.eup %6503  ;;  %vm5483_vm3 = vmor %vm5481_vm13, %vm5482_vm12  ;;  %v11277_v38 = vsel %vm1065_vm0, %v5783_v43, %v5663_v1  ;;  %v5458_v34 = vor.u32 1.1754944e-38, %v5457_v39  ;;  %v5440_v47 = vand.u32 2147483647, %v11246_v52 }
 0x8ee   :  { %v5424_v60 = vsel %vm5423_vm11, %v6498_v32, %v5420_v58  ;;  %v5478_v22 = vsub.f32 1.0, %v5477_v13  ;;  %v5781_v32 = vadd.f32 -1.0, %v5475_v35  ;;  %v5449_v54 = vmul.f32 %v11219_v8, %v5448_v57 }
 0x8ef   :  { %v5429_v20 = vsel %vm5426_vm14, %v5428_v55, %v5424_v60  ;;  %6505 = vrcp.f32 %v11238_v36  ;;  %v5515_v5 = vand.u32 2147483647, %v11238_v36  ;;  %v5517_v35 = vand.u32 2147483648, %v11238_v36 }
 0x8f0   :  { %v5430_v2 = vmul.f32 2.0, %v5429_v20  ;;  %v5479_v62 = vmul.f32 %v6502_v56, %v5478_v22  ;;  %6507 = vrcp.f32 %v11242_v27  ;;  %v5450_v10 = vadd.f32 %v11219_v8, %v5449_v54 }
 0x8f1   :  { %6509 = vrcp.f32 %v11246_v52  ;;  %v5677_v21 = vsel %vm1065_vm0, %v5781_v32, %v5661_v3  ;;  %vm5511_vm8 = vweird.f32 %v11238_v36  ;;  %vm5516_vm15 = vcmp.eq.f32.partialorder %v5515_v5, 8.507059e+37 }
 0x8f2   :  { %v5778_v53 = vadd.f32 -1.0, %v5430_v2  ;;  %v5658_v29 = vmul.f32 %v5430_v2, %v11004_v48  ;;  %v5480_v14 = vadd.f32 %v6502_v56, %v5479_v62  ;;  %v5454_v63 = vsel %vm11279_vm4, %v11219_v8, %v5450_v10  ;;  %v5364_v13 = vpop.xlane.xlu1 %5363 }
 0x8f3   :  { %v5459_v8 = vsel %vm5456_vm1, %v5458_v34, %v5454_v63  ;;  %v5518_v22 = vor.u32 1.1754944e-38, %v5517_v35  ;;  %v5382_v16 = vsub.f32 1.0, %v5364_v13  ;;  %vm5436_vm11 = vweird.f32 %v11246_v52 }
 0x8f4   :  { %v5674_v61 = vsel %vm1065_vm0, %v5778_v53, %v5658_v29  ;;  %v5484_v11 = vsel %vm5483_vm3, %v6502_v56, %v5480_v14  ;;  %v5560_v29 = vand.u32 2147483647, %v11232_v49  ;;  %vm5441_vm12 = vcmp.eq.f32.partialorder %v5440_v47, 8.507059e+37 }
 0x8f5   :  { %v6506_v6 = vpop.eup %6505  ;;  %v5796_v48 = vpack.c.bf16 %v5674_v61, %v11226_v41  ;;  %v5489_v44 = vsel %vm5486_vm2, %v5488_v4, %v5484_v11  ;;  %v5552_v41 = vmul.f32 %v11256_v31, %v11232_v49  ;;  %v11299_v43 = vmax.f32 %v5382_v16, 1e-15 }
 0x8f6   :  { %v5507_v25 = vmul.f32 %v6506_v6, %v11238_v36  ;;  %v5490_v33 = vmul.f32 2.0, %v5489_v44  ;;  %v11284_v12 = vpop.eup %6507  ;;  %vm5512_vm7 = vweird.f32 %v6506_v6  ;;  %v5442_v36 = vand.u32 2147483648, %v11246_v52 }
 0x8f7   :  { %5797 = vst [vmem:[#allocation8] sm:$0xff] %v5796_v48   ;;  %v6510_v37 = vpop.eup %6509  ;;  %v5553_v28 = vsub.f32 1.0, %v5552_v41  ;;  %vm5513_vm10 = vmor %vm5511_vm8, %vm5512_vm7  ;;  %v5460_v61 = vmul.f32 2.0, %v5459_v8  ;;  %6511 = vrcp.f32 %v11299_v43  ;;  %v5562_v11 = vand.u32 2147483648, %v11232_v49 }
 0x8f8   :  { %v5508_v45 = vsub.f32 1.0, %v5507_v25  ;;  %v5782_v56 = vadd.f32 -1.0, %v5490_v33  ;;  %v5662_v51 = vmul.f32 %v5490_v33, %v11050_v9  ;;  %v5432_v55 = vmul.f32 %v6510_v37, %v11246_v52 }
 0x8f9   :  { %v5627_v9 = vmul.f32 %v11284_v12, %v11242_v27  ;;  %vm5437_vm9 = vweird.f32 %v6510_v37  ;;  %v5554_v53 = vmul.f32 %v11256_v31, %v5553_v28  ;;  %v5443_v10 = vor.u32 1.1754944e-38, %v5442_v36 }
 0x8fa   :  { %v5509_v58 = vmul.f32 %v6506_v6, %v5508_v45  ;;  %v5678_v0 = vsel %vm1065_vm0, %v5782_v56, %v5662_v51  ;;  %v5433_v20 = vsub.f32 1.0, %v5432_v55  ;;  %vm5438_vm14 = vmor %vm5436_vm11, %vm5437_vm9  ;;  %vm5557_vm13 = vweird.f32 %v11256_v31 }
 0x8fb   :  { %v5806_v57 = vpack.c.bf16 %v5678_v0, %v5677_v21  ;;  %v5628_v42 = vsub.f32 1.0, %v5627_v9  ;;  %v5555_v44 = vadd.f32 %v11256_v31, %v5554_v53  ;;  %v5780_v41 = vadd.f32 -1.0, %v5460_v61 }
 0x8fc   :  { %v5510_v60 = vadd.f32 %v6506_v6, %v5509_v58  ;;  %v5434_v3 = vmul.f32 %v6510_v37, %v5433_v20  ;;  %v11318_v45 = vmul.f32 %v11248_v17, %v10853_v26  ;;  %vm5556_vm3 = vweird.f32 %v11232_v49 }
 0x8fd   :  { %5834 = vst [vmem:[#allocation8 + $0x10] sm:$0xff] %v5806_v57   ;;  %vm11321_vm2 = vcmp.eq.f32.partialorder %v5560_v29, 8.507059e+37  ;;  %v6512_v56 = vpop.eup %6511  ;;  %vm11325_vm5 = vmor %vm5556_vm3, %vm5557_vm13  ;;  %v5637_v28 = vand.u32 2147483648, %v11242_v27  ;;  %vm5632_vm6 = vweird.f32 %v11284_v12  ;;  %v5607_v9 = vand.u32 2147483648, %v11299_v43 }
 0x8fe   :  { %v5360_v2 = vpop.xlane.xlu0 %5359  ;;  %v5514_v62 = vsel %vm5513_vm10, %v6506_v6, %v5510_v60  ;;  %v5435_v4 = vadd.f32 %v6510_v37, %v5434_v3  ;;  %v5559_v49 = vsel %vm11325_vm5, %v11256_v31, %v5555_v44  ;;  %v5597_v34 = vmul.f32 %v6512_v56, %v11299_v43 }
 0x8ff   :  { %v5380_v32 = vsub.f32 1.0, %v5360_v2  ;;  %v5519_v54 = vsel %vm5516_vm15, %v5518_v22, %v5514_v62  ;;  %vm5602_vm4 = vweird.f32 %v6512_v56  ;;  %v5605_v20 = vand.u32 2147483647, %v11299_v43 }
 0x900   :  { %v5520_v1 = vmul.f32 2.0, %v5519_v54  ;;  %v5439_v39 = vsel %vm5438_vm14, %v6510_v37, %v5435_v4  ;;  %v5635_v37 = vand.u32 2147483647, %v11242_v27  ;;  %v5598_v31 = vsub.f32 1.0, %v5597_v34 }
 0x901   :  { %v11303_v14 = vmax.f32 %v5380_v32, 1e-15  ;;  %v5444_v25 = vsel %vm5441_vm12, %v5443_v10, %v5439_v39  ;;  %vm5631_vm1 = vweird.f32 %v11242_v27  ;;  %vm5601_vm15 = vweird.f32 %v11299_v43 }
 0x902   :  { %v5784_v6 = vadd.f32 -1.0, %v5520_v1  ;;  %v5664_v48 = vmul.f32 %v5520_v1, %v11092_v18  ;;  %v5660_v18 = vmul.f32 %v5460_v61, %v11035_v15  ;;  %v5445_v21 = vmul.f32 2.0, %v5444_v25  ;;  %vm11356_vm8 = vmor %vm5631_vm1, %vm5632_vm6 }
 0x903   :  { %6513 = vrcp.f32 %v11303_v14  ;;  %v5563_v15 = vor.u32 1.1754944e-38, %v5562_v11  ;;  %v5599_v22 = vmul.f32 %v6512_v56, %v5598_v31  ;;  %v5577_v16 = vand.u32 2147483648, %v11303_v14  ;;  %vm5603_vm9 = vmor %vm5601_vm15, %vm5602_vm4 }
 0x904   :  { %v5680_v52 = vsel %vm1065_vm0, %v5784_v6, %v5664_v48  ;;  %v5779_v35 = vadd.f32 -1.0, %v5445_v21  ;;  %v5659_v26 = vmul.f32 %v5445_v21, %v11081_v50  ;;  %v5676_v13 = vsel %vm1065_vm0, %v5780_v41, %v5660_v18 }
 0x905   :  { %v5811_v33 = vpack.c.bf16 %v5680_v52, %v11277_v38  ;;  %v5629_v38 = vmul.f32 %v11284_v12, %v5628_v42  ;;  %v5564_v8 = vsel %vm11321_vm2, %v5563_v15, %v5559_v49  ;;  %v5575_v62 = vand.u32 2147483647, %v11303_v14 }
 0x906   :  { %v5366_v40 = vpop.xlane.xlu0 %5365  ;;  %v5675_v0 = vsel %vm1065_vm0, %v5779_v35, %v5659_v26  ;;  %v5565_v47 = vmul.f32 2.0, %v5564_v8  ;;  %vm11360_vm10 = vcmp.eq.f32.partialorder %v5635_v37, 8.507059e+37  ;;  %v5600_v54 = vadd.f32 %v6512_v56, %v5599_v22 }
 0x907   :  { %v5383_v63 = vsub.f32 1.0, %v5366_v40  ;;  %5835 = vst [vmem:[#allocation8 + $0x18] sm:$0xff] %v5811_v33   ;;  %v5801_v55 = vpack.c.bf16 %v5676_v13, %v5675_v0  ;;  %v5630_v57 = vadd.f32 %v11284_v12, %v5629_v38  ;;  %v5638_v3 = vor.u32 1.1754944e-38, %v5637_v28 }
 0x908   :  { %v5608_v27 = vor.u32 1.1754944e-38, %v5607_v9  ;;  %vm5571_vm11 = vweird.f32 %v11303_v14  ;;  %v5604_v61 = vsel %vm5603_vm9, %v6512_v56, %v5600_v54  ;;  %vm5606_vm14 = vcmp.eq.f32.partialorder %v5605_v20, 8.507059e+37 }
 0x909   :  { %v6514_v17 = vpop.eup %6513  ;;  %v11336_v58 = vmax.f32 %v5383_v63, 1e-15  ;;  %5833 = vst [vmem:[#allocation8 + $0x8] sm:$0xff] %v5801_v55   ;;  %v5634_v1 = vsel %vm11356_vm8, %v11284_v12, %v5630_v57  ;;  %v5578_v4 = vor.u32 1.1754944e-38, %v5577_v16  ;;  %vm5576_vm13 = vcmp.eq.f32.partialorder %v5575_v62, 8.507059e+37 }
 0x90a   :  { %v5567_v50 = vmul.f32 %v6514_v17, %v11303_v14  ;;  %vm5572_vm7 = vweird.f32 %v6514_v17  ;;  %v5609_v6 = vsel %vm5606_vm14, %v5608_v27, %v5604_v61  ;;  %v5787_v10 = vadd.f32 -1.0, %v5565_v47 }
 0x90b   :  { %6515 = vrcp.f32 %v11336_v58  ;;  %vm5573_vm12 = vmor %vm5571_vm11, %vm5572_vm7  ;;  %v5667_v11 = vmul.f32 %v5565_v47, %v11057_v46  ;;  %v5610_v42 = vmul.f32 2.0, %v5609_v6  ;;  %v5639_v39 = vsel %vm11360_vm10, %v5638_v3, %v5634_v1 }
 0x90c   :  { %v5568_v60 = vsub.f32 1.0, %v5567_v50  ;;  %v5620_v41 = vand.u32 2147483647, %v11336_v58  ;;  %v5622_v18 = vand.u32 2147483648, %v11336_v58  ;;  %v5685_v46 = vsel %vm1065_vm0, %v11268_v23, %v11318_v45 }
 0x90d   :  { %v5790_v52 = vadd.f32 -1.0, %v5610_v42  ;;  %v5670_v25 = vmul.f32 %v5610_v42, %v11101_v59  ;;  %v5683_v5 = vsel %vm1065_vm0, %v5787_v10, %v5667_v11  ;;  %v5640_v63 = vmul.f32 2.0, %v5639_v39 }
 0x90e   :  { %v5569_v2 = vmul.f32 %v6514_v17, %v5568_v60  ;;  %vm5616_vm2 = vweird.f32 %v11336_v58  ;;  %v5623_v38 = vor.u32 1.1754944e-38, %v5622_v18  ;;  %vm5621_vm6 = vcmp.eq.f32.partialorder %v5620_v41, 8.507059e+37 }
 0x90f   :  { %v5686_v59 = vsel %vm1065_vm0, %v5790_v52, %v5670_v25  ;;  %v5792_v45 = vadd.f32 -1.0, %v5640_v63  ;;  %v5672_v26 = vmul.f32 %v5640_v63, %v11078_v19 }
 0x910   :  { %v5570_v53 = vadd.f32 %v6514_v17, %v5569_v2  ;;  %v5826_v56 = vpack.c.bf16 %v5686_v59, %v5685_v46 }
 0x911   :  { %v6516_v29 = vpop.eup %6515  ;;  %v5688_v34 = vsel %vm1065_vm0, %v5792_v45, %v5672_v26 }
 0x912   :  { %v5574_v48 = vsel %vm5573_vm12, %v6514_v17, %v5570_v53  ;;  %v5612_v43 = vmul.f32 %v6516_v29, %v11336_v58  ;;  %vm5617_vm3 = vweird.f32 %v6516_v29  ;;  %5838 = vst [vmem:[#allocation8 + $0x30] sm:$0xff] %v5826_v56  }
 0x913   :  { %v5579_v14 = vsel %vm5576_vm13, %v5578_v4, %v5574_v48  ;;  %vm5618_vm5 = vmor %vm5616_vm2, %vm5617_vm3 }
 0x914   :  { %v5580_v44 = vmul.f32 2.0, %v5579_v14  ;;  %v5613_v12 = vsub.f32 1.0, %v5612_v43 }
 0x916   :  { %v5788_v33 = vadd.f32 -1.0, %v5580_v44  ;;  %v5668_v21 = vmul.f32 %v5580_v44, %v11107_v30  ;;  %v5614_v40 = vmul.f32 %v6516_v29, %v5613_v12 }
 0x918   :  { %v5684_v51 = vsel %vm1065_vm0, %v5788_v33, %v5668_v21  ;;  %v5615_v15 = vadd.f32 %v6516_v29, %v5614_v40 }
 0x919   :  { %v5821_v30 = vpack.c.bf16 %v5684_v51, %v5683_v5 }
 0x91a   :  { %v5619_v35 = vsel %vm5618_vm5, %v6516_v29, %v5615_v15 }
 0x91b   :  { %5837 = vst [vmem:[#allocation8 + $0x28] sm:$0xff] %v5821_v30   ;;  %v5624_v23 = vsel %vm5621_vm6, %v5623_v38, %v5619_v35 }
 0x91c   :  { %v5625_v17 = vmul.f32 2.0, %v5624_v23 }
 0x91e   :  { %v5791_v49 = vadd.f32 -1.0, %v5625_v17  ;;  %v5671_v37 = vmul.f32 %v5625_v17, %v11113_v24 }
 0x920   :  { %v5687_v58 = vsel %vm1065_vm0, %v5791_v49, %v5671_v37 }
 0x921   :  { %v5831_v13 = vpack.c.bf16 %v5688_v34, %v5687_v58 }
 0x923   :  { %5839 = vst [vmem:[#allocation8 + $0x38] sm:$0xff] %v5831_v13  }
 0x924   :  { %5746 = dma.vmem_to_hbm [thread:$0]  %s5739_s5, 1024, %s5741_s8, [#allocation9], %s6629_s9, %s6629_s9, %s6630_s10  }
 0x925   :  { %6617 = dma.done.wait [#allocation4], 2048  }
 0x926   :  { %6618 = vsyncadd [#allocation4], 4294965248 }
 0x927   :  { %6619 = dma.done.wait [#allocation9], 1024  }
 0x928   :  { %6620 = vsyncadd [#allocation9], 4294966272 }
 0x929   :  { %5755 = vsyncpa [#allocation3], 1 }
 0x92a   :  { %5756 = vsyncpa [#allocation6], 1 }
 0x92b   :  { %5757 = vsyncpa [#allocation4], 1 }
 0x92c   :  { %5758 = vsyncpa [#allocation9], 1 }

</bundles_post_ra>
